<compile_context>
chip_gen: v6e
topology: v6e:2x2x1
jax: 0.10.0
libtpu: 0.0.40
codegen_flags: <defaults>
</compile_context>

<pallas_src>
import functools

import jax
import jax.numpy as jnp
from jax import lax
from jax.experimental import pallas as pl
from jax.experimental.pallas import tpu as pltpu

_VMEM_LIMIT = 48 * 1024 * 1024   # below v7x physical (64 MiB); can be raised on v5e/v6e
_NEG_BIG = -1e30


def _round_up(x, m):
    return ((x + m - 1) // m) * m


def _apply_activation(x, activation):
    if activation == "elu":
        # clamp the exp argument so the unselected branch cannot overflow
        return jnp.where(x > 0, x, jnp.exp(jnp.minimum(x, 0.0)) - 1.0)
    if activation == "relu":
        return jnp.maximum(x, 0.0)
    if activation is None:
        return x
    raise ValueError(f"unsupported activation {activation}")


# --------------------- Pallas kernel: matmul + bias + act ------------------ #

def _mm_bias_act_kernel(x_ref, w_ref, b_ref, o_ref, *, activation):
    acc = jnp.dot(x_ref[...], w_ref[...], preferred_element_type=jnp.float32)
    acc = _apply_activation(acc + b_ref[...], activation)
    o_ref[...] = acc.astype(o_ref.dtype)


def _pick_tile_m(m):
    if m >= 1024:
        return 512
    if m >= 512:
        return 256
    if m >= 64:
        # split into >=2 grid steps so both v7x TensorCores get work
        return _round_up((m + 1) // 2, 8)
    return _round_up(max(m, 1), 8)


def matmul_bias_act(x, w, b, activation, out_dtype=jnp.bfloat16):
    """y = act(x @ w + b).  x:[M,K], w:[K,N], b:[N] -> [M,N] out_dtype.

    bf16 MXU operands, f32 accumulate + bias + activation epilogue.  K and N are
    zero-padded to multiples of 128 (lane-dense MXU work / unmasked stores); M is
    tiled into a bounded, megacore-parallel grid.
    """
    M, K = x.shape
    K2, N = w.shape
    assert K == K2
    Kp = _round_up(K, 128)
    Np = _round_up(N, 128)
    tm = _pick_tile_m(M)
    Mp = _round_up(M, tm)

    xp = jnp.pad(x.astype(jnp.bfloat16), ((0, Mp - M), (0, Kp - K)))
    wp = jnp.pad(w.astype(jnp.bfloat16), ((0, Kp - K), (0, Np - N)))
    bp = jnp.pad(b.astype(jnp.float32), (0, Np - N)).reshape(1, Np)

    out = pl.pallas_call(
        functools.partial(_mm_bias_act_kernel, activation=activation),
        out_shape=jax.ShapeDtypeStruct((Mp, Np), out_dtype),
        grid_spec=pltpu.PrefetchScalarGridSpec(
            num_scalar_prefetch=0,
            grid=(Mp // tm,),
            in_specs=[
                pl.BlockSpec((tm, Kp), lambda i: (i, 0)),
                pl.BlockSpec((Kp, Np), lambda i: (0, 0)),
                pl.BlockSpec((1, Np), lambda i: (0, 0)),
            ],
            out_specs=pl.BlockSpec((tm, Np), lambda i: (i, 0)),
        ),
        compiler_params=pltpu.CompilerParams(
            dimension_semantics=("parallel",),
            vmem_limit_bytes=_VMEM_LIMIT),
    )(xp, wp, bp)
    return out[:M, :N]


# -------------- Pallas kernel: fused stride-1 3x3 conv pair ---------------- #

def _fused_conv_pair_kernel(x_ref, w1_ref, b1_ref, w2_ref, b2_ref, o_ref,
                            pad_ref, xmat_ref, *, H, W, C, act1, act2):
    """Two chained ReflectionPad(1)+Conv3x3(stride=1)+act layers, activation kept in VMEM."""
    h = x_ref[0].astype(jnp.float32)                              # (H*W, C)
    for w_ref, b_ref, act in ((w1_ref, b1_ref, act1), (w2_ref, b2_ref, act2)):
        # reflection pad (PyTorch ReflectionPad2d(1)) into the VMEM scratch
        for y in range(H):
            pad_ref[y + 1:y + 2, 1:W + 1, :] = h[y * W:(y + 1) * W, :].reshape(1, W, C)
        pad_ref[0:1, 1:W + 1, :] = h[W:2 * W, :].reshape(1, W, C)
        pad_ref[H + 1:H + 2, 1:W + 1, :] = h[(H - 2) * W:(H - 1) * W, :].reshape(1, W, C)
        pad_ref[:, 0:1, :] = pad_ref[:, 2:3, :]
        pad_ref[:, W + 1:W + 2, :] = pad_ref[:, W - 1:W, :]
        # in-VMEM im2col (bf16) -> one MXU matmul for the whole feature map
        for ky in range(3):
            for kx in range(3):
                c0 = (ky * 3 + kx) * C
                for y in range(H):
                    piece = pad_ref[y + ky:y + ky + 1, kx:kx + W, :]
                    xmat_ref[y * W:(y + 1) * W, c0:c0 + C] = (
                        piece.reshape(W, C).astype(xmat_ref.dtype))
        acc = jnp.dot(xmat_ref[...], w_ref[...], preferred_element_type=jnp.float32)
        h = _apply_activation(acc + b_ref[...], act)
    o_ref[0] = h.astype(o_ref.dtype)


def conv_pair(x, w1, b1, act1, w2, b2, act2):
    """Two stride-1 3x3 reflection-pad convs fused into one pallas_call when possible."""
    B, H, W, C = x.shape
    fuse_ok = (w1.shape == (C, C, 3, 3) and w2.shape == (C, C, 3, 3)
               and C % 128 == 0 and H >= 2 and W >= 2 and H * W <= 1024)
    if not fuse_ok:
        # TODO(synk): generalize the fused path to mixed channel counts / large maps.
        h = conv_block(x, w1, b1, 1, 1, act1)
        return conv_block(h, w2, b2, 1, 1, act2)

    def wmat(w):
        return jnp.transpose(w, (2, 3, 1, 0)).reshape(9 * C, C).astype(jnp.bfloat16)

    out = pl.pallas_call(
        functools.partial(_fused_conv_pair_kernel, H=H, W=W, C=C,
                          act1=act1, act2=act2),
        out_shape=jax.ShapeDtypeStruct((B, H * W, C), jnp.bfloat16),
        grid_spec=pltpu.PrefetchScalarGridSpec(
            num_scalar_prefetch=0,
            grid=(B,),
            in_specs=[
                pl.BlockSpec((1, H * W, C), lambda b: (b, 0, 0)),
                pl.BlockSpec((9 * C, C), lambda b: (0, 0)),
                pl.BlockSpec((1, C), lambda b: (0, 0)),
                pl.BlockSpec((9 * C, C), lambda b: (0, 0)),
                pl.BlockSpec((1, C), lambda b: (0, 0)),
            ],
            out_specs=pl.BlockSpec((1, H * W, C), lambda b: (b, 0, 0)),
            scratch_shapes=[pltpu.VMEM((H + 2, W + 2, C), jnp.float32),
                            pltpu.VMEM((H * W, 9 * C), jnp.bfloat16)],
        ),
        compiler_params=pltpu.CompilerParams(
            dimension_semantics=("parallel",),
            vmem_limit_bytes=_VMEM_LIMIT),
    )(x.reshape(B, H * W, C).astype(jnp.bfloat16),
      wmat(w1), b1.astype(jnp.float32).reshape(1, C),
      wmat(w2), b2.astype(jnp.float32).reshape(1, C))
    return out.reshape(B, H, W, C)


# ------------- Pallas kernel: contextual attention (flash-style) ----------- #

def _ctx_attn_kernel(ufg_ref, fbgn_ref, mask_ref, out_ref, m_sc, l_sc, acc_sc,
                     *, lambda_value, nf_valid, tnf):
    nt = pl.program_id(2)

    @pl.when(nt == 0)
    def _():
        m_sc[...] = jnp.full(m_sc.shape, _NEG_BIG, jnp.float32)
        l_sc[...] = jnp.zeros(l_sc.shape, jnp.float32)
        acc_sc[...] = jnp.zeros(acc_sc.shape, jnp.float32)

    ufg = ufg_ref[0]                                              # (tl, Kp)  bf16
    fbg_n = fbgn_ref[0]                                           # (tnf, Kp) bf16
    msk = mask_ref[0]                                             # (1, tnf)  f32

    # scores_{l,p} = <fg patch l, normalized bg patch p>; rhs contracted on its minor
    # dim so only one copy of the bg filters is streamed per step.
    scores = lax.dot_general(ufg, fbg_n, (((1,), (1,)), ((), ())),
                             preferred_element_type=jnp.float32)  # (tl, tnf)
    logits = scores * (msk * lambda_value)
    # exclude NF *padding* lanes from the softmax; real masked positions keep logit 0
    # (mask stays purely multiplicative, matching the torch module).
    nf_idx = nt * tnf + lax.broadcasted_iota(jnp.int32, (1, tnf), 1)
    logits = jnp.where(nf_idx < nf_valid, logits, _NEG_BIG)

    # online softmax over the NF axis (bounded VMEM even for large NF)
    m_new = jnp.maximum(m_sc[...], jnp.max(logits, axis=-1, keepdims=True))
    alpha = jnp.exp(m_sc[...] - m_new)
    p = jnp.exp(logits - m_new)
    l_sc[...] = alpha * l_sc[...] + jnp.sum(p, axis=-1, keepdims=True)
    # post-softmax mask multiplies the numerator only (torch semantics)
    pm = (p * msk).astype(fbg_n.dtype)
    acc_sc[...] = alpha * acc_sc[...] + jnp.dot(pm, fbg_n,
                                                preferred_element_type=jnp.float32)
    m_sc[...] = m_new

    @pl.when(nt == pl.num_programs(2) - 1)
    def _():
        out = acc_sc[...] * pl.reciprocal(l_sc[...], approx=True)
        out_ref[0] = out.astype(out_ref.dtype)


def contextual_attention_core(ufg, fbg_n, mask_p, lambda_value):
    """ufg:[B,L,K] bf16, fbg_n:[B,NF,K] bf16 (normalized), mask_p:[B,1,NF] -> [B,L,K] bf16."""
    B, L, K = ufg.shape
    _, NF, _ = fbg_n.shape
    Kp = _round_up(K, 128)
    tl = min(256, _round_up(L, 8))
    Lp = _round_up(L, tl)
    tnf = min(512, _round_up(NF, 128))
    NFp = _round_up(NF, tnf)

    ufg_p = jnp.pad(ufg.astype(jnp.bfloat16), ((0, 0), (0, Lp - L), (0, Kp - K)))
    fbg_p = jnp.pad(fbg_n.astype(jnp.bfloat16), ((0, 0), (0, NFp - NF), (0, Kp - K)))
    mask_pp = jnp.pad(mask_p.astype(jnp.float32), ((0, 0), (0, 0), (0, NFp - NF)))

    out = pl.pallas_call(
        functools.partial(_ctx_attn_kernel, lambda_value=lambda_value,
                          nf_valid=NF, tnf=tnf),
        out_shape=jax.ShapeDtypeStruct((B, Lp, Kp), jnp.bfloat16),
        grid_spec=pltpu.PrefetchScalarGridSpec(
            num_scalar_prefetch=0,
            grid=(B, Lp // tl, NFp // tnf),
            in_specs=[
                pl.BlockSpec((1, tl, Kp), lambda b, lt, nt: (b, lt, 0)),
                pl.BlockSpec((1, tnf, Kp), lambda b, lt, nt: (b, nt, 0)),
                pl.BlockSpec((1, 1, tnf), lambda b, lt, nt: (b, 0, nt)),
            ],
            out_specs=pl.BlockSpec((1, tl, Kp), lambda b, lt, nt: (b, lt, 0)),
            scratch_shapes=[pltpu.VMEM((tl, 1), jnp.float32),
                            pltpu.VMEM((tl, 1), jnp.float32),
                            pltpu.VMEM((tl, Kp), jnp.float32)],
        ),
        compiler_params=pltpu.CompilerParams(
            dimension_semantics=("parallel", "parallel", "arbitrary"),
            vmem_limit_bytes=_VMEM_LIMIT),
    )(ufg_p, fbg_p, mask_pp)
    return out[:, :L, :K]


# ------------------------------- JAX glue ---------------------------------- #

def _unfold3x3_nhwc(x):
    """x:[B,H,W,C] -> [B,H*W,9*C]; zero-padded 3x3 patches in (ky,kx,c) order."""
    B, H, W, C = x.shape
    xp = jnp.pad(x, ((0, 0), (1, 1), (1, 1), (0, 0)))
    cols = [xp[:, ky:ky + H, kx:kx + W, :] for ky in range(3) for kx in range(3)]
    return jnp.concatenate(cols, axis=-1).reshape(B, H * W, 9 * C)


def _extract_mask_patches(mask_nchw):
    """torch extract_mask: mean over zero-padded 3x3 neighborhood (and channels) != 0."""
    B, C, H, W = mask_nchw.shape
    m = jnp.transpose(mask_nchw, (0, 2, 3, 1)).astype(jnp.float32)
    mp = jnp.pad(m, ((0, 0), (1, 1), (1, 1), (0, 0)))
    s = sum(mp[:, ky:ky + H, kx:kx + W, :] for ky in range(3) for kx in range(3))
    s = jnp.sum(s, axis=-1)
    return (s != 0).astype(jnp.float32).reshape(B, 1, H * W)


def _fold3x3(P, B, H, W, C):
    """col2im: overlap-add 3x3 patches, crop 1 (== conv_transpose2d, padding=1)."""
    Pimg = P.reshape(B, H, W, 3, 3, C)
    Ppad = jnp.pad(Pimg, ((0, 0), (1, 1), (1, 1), (0, 0), (0, 0), (0, 0)))
    out = jnp.zeros((B, H, W, C), jnp.float32)
    for ky in range(3):
        for kx in range(3):
            out = out + Ppad[:, 2 - ky:2 - ky + H, 2 - kx:2 - kx + W, ky, kx, :].astype(jnp.float32)
    return out


def conv_block(x, w, b, stride, pad, activation):
    """ReflectionPad2d(pad) + Conv2d(stride) + activation on NHWC bf16 activations.

    im2col is emitted directly in (B, ho, wo, k*k*Cin) order (lane-dim concat, bf16)
    and fed to the Pallas matmul kernel.
    """
    B, H, W, Cin = x.shape
    Cout, _, k, _ = w.shape
    xp = jnp.pad(x.astype(jnp.bfloat16), ((0, 0), (pad, pad), (pad, pad), (0, 0)),
                 mode="reflect")
    h_out = (H + 2 * pad - k) // stride + 1
    w_out = (W + 2 * pad - k) // stride + 1
    cols = [xp[:, ky:ky + stride * (h_out - 1) + 1:stride,
                  kx:kx + stride * (w_out - 1) + 1:stride, :]
            for ky in range(k) for kx in range(k)]
    x_mat = jnp.concatenate(cols, axis=-1).reshape(B * h_out * w_out, k * k * Cin)
    w_mat = jnp.transpose(w, (2, 3, 1, 0)).reshape(k * k * Cin, Cout)
    y = matmul_bias_act(x_mat, w_mat, b, activation)              # Pallas hot path
    return y.reshape(B, h_out, w_out, Cout)


def contextual_attention(foreground, background, mask, lambda_value=10.0):
    """foreground/background NHWC feature maps (bf16), mask NCHW at the feature resolution."""
    B, H, W, C = foreground.shape
    NF = H * W
    mask_p = _extract_mask_patches(mask)                          # (B, 1, NF)
    # Exact background-filter normalization (torch: max(||.||_2, 1e-4)), computed via a
    # 3x3 box-sum of per-pixel squared norms so the 9x unfold itself stays bf16.
    bg32 = background.astype(jnp.float32)
    sq = jnp.sum(bg32 * bg32, axis=-1)                            # (B, H, W)
    sqp = jnp.pad(sq, ((0, 0), (1, 1), (1, 1)))
    ssq = sum(sqp[:, ky:ky + H, kx:kx + W] for ky in range(3) for kx in range(3))
    inv_norm = (1.0 / jnp.maximum(jnp.sqrt(ssq), 1e-4)).reshape(B, NF, 1)
    fbg = _unfold3x3_nhwc(background.astype(jnp.bfloat16))        # (B, NF, 9C) bf16
    fbg_n = (fbg.astype(jnp.float32) * inv_norm).astype(jnp.bfloat16)
    ufg = _unfold3x3_nhwc(foreground.astype(jnp.bfloat16))        # (B, L, 9C) bf16
    P = contextual_attention_core(ufg, fbg_n, mask_p, lambda_value)   # (B, L, 9C) bf16
    return _fold3x3(P, B, H, W, C).astype(jnp.bfloat16)           # (B, H, W, C) bf16


# ------------------------------- Network ----------------------------------- #

_CONV_CFG = [
    # (name, Cout, Cin, k, stride, pad, activation)
    ("c1", 32, 3, 5, 1, 2, "elu"),
    ("c2", 32, 32, 3, 2, 1, "elu"),
    ("c3", 64, 32, 3, 1, 1, "elu"),
    ("c4", 128, 64, 3, 2, 1, "elu"),
    ("c5", 128, 128, 3, 1, 1, "elu"),
    ("c6", 128, 128, 3, 1, 1, "relu"),
    ("r1", 128, 128, 3, 1, 1, "elu"),
    ("r2", 128, 128, 3, 1, 1, "elu"),
]


def init_params(key):
    params = {}
    for name, cout, cin, k, _, _, _ in _CONV_CFG:
        key, kw, kb = jax.random.split(key, 3)
        fan_in = cin * k * k
        params[name + "_w"] = (jax.random.normal(kw, (cout, cin, k, k), jnp.float32)
                               / jnp.sqrt(jnp.float32(fan_in)))
        params[name + "_b"] = 0.01 * jax.random.normal(kb, (cout,), jnp.float32)
    return params


def attentive_encoder_decoder(params, x, mask, context_softmax_scale=10.0):
    # host-facing NCHW f32 -> internal NHWC bf16 once at the boundary
    h = jnp.transpose(x, (0, 2, 3, 1)).astype(jnp.bfloat16)
    # contracting path (mixed channel counts / strides): per-layer Pallas matmul
    for name, _, _, _, stride, pad, act in _CONV_CFG[:4]:
        h = conv_block(h, params[name + "_w"], params[name + "_b"], stride, pad, act)
    # fused stride-1 128->128 pair c5+c6 (activation held in VMEM, im2col in-kernel)
    h = conv_pair(h, params["c5_w"], params["c5_b"], "elu",
                  params["c6_w"], params["c6_b"], "relu")
    # contextual attention (fg == bg == h)
    h = contextual_attention(h, h, mask, lambda_value=context_softmax_scale)
    # fused refine pair r1+r2
    h = conv_pair(h, params["r1_w"], params["r1_b"], "elu",
                  params["r2_w"], params["r2_b"], "elu")
    return jnp.transpose(h, (0, 3, 1, 2)).astype(jnp.float32)     # back to NCHW f32


if __name__ == "__main__":
    key = jax.random.PRNGKey(0)
    kp, kx, km = jax.random.split(key, 3)

    params = init_params(kp)
    # input image NCHW; mask at the attention feature resolution (H/4, W/4), as required
    # by the torch module's broadcasting in the softmax step.
    x = jax.random.normal(kx, (2, 3, 16, 16), jnp.float32)
    mask = (jax.random.uniform(km, (2, 1, 4, 4)) > 0.5).astype(jnp.float32)

    fwd = jax.jit(attentive_encoder_decoder)
    out = fwd(params, x, mask)
    jax.block_until_ready(out)
    assert out.shape == (2, 128, 4, 4), out.shape
    assert bool(jnp.all(jnp.isfinite(out)))
    print("KERNEL_OK")
</pallas_src>

<mosaic_0001>
module attributes {stable_mosaic.version = 11 : i64} {
  func.func @_mm_bias_act_kernel(%arg0: i32, %arg1: memref<256x128xbf16, #tpu.memory_space<vmem>>, %arg2: memref<128x128xbf16, #tpu.memory_space<vmem>>, %arg3: memref<1x128xf32, #tpu.memory_space<vmem>>, %arg4: memref<256x128xbf16, #tpu.memory_space<vmem>>) attributes {dimension_semantics = [#tpu.dimension_semantics<parallel>], iteration_bounds = array<i64: 2>, scalar_prefetch = 0 : i64, scratch_operands = 0 : i64, tpu.core_type = #tpu.core_type<tc>, window_params = [{transform_indices = @transform_0, window_bounds = array<i64: 256, 128>}, {pipeline_mode = #tpu.pipeline_mode<synchronous>, transform_indices = @transform_1, window_bounds = array<i64: 128, 128>}, {pipeline_mode = #tpu.pipeline_mode<synchronous>, transform_indices = @transform_2, window_bounds = array<i64: 1, 128>}, {transform_indices = @transform_3, window_bounds = array<i64: 256, 128>}]} {
    %c0 = arith.constant 0 : index
    %c0_0 = arith.constant 0 : index
    %0 = vector.load %arg1[%c0, %c0_0] : memref<256x128xbf16, #tpu.memory_space<vmem>>, vector<256x128xbf16>
    %c0_1 = arith.constant 0 : index
    %c0_2 = arith.constant 0 : index
    %1 = vector.load %arg2[%c0_1, %c0_2] : memref<128x128xbf16, #tpu.memory_space<vmem>>, vector<128x128xbf16>
    %cst = arith.constant dense<0.000000e+00> : vector<256x128xf32>
    %2 = tpu.matmul %0, %1, %cst {dimension_numbers = #tpu.dot_dimension_numbers<[1], [0], [0], [1], [0, 0, 1, 1], [], []>} : vector<256x128xbf16>, vector<128x128xbf16>, vector<256x128xf32> -> vector<256x128xf32>
    %c0_3 = arith.constant 0 : index
    %c0_4 = arith.constant 0 : index
    %3 = vector.load %arg3[%c0_3, %c0_4] : memref<1x128xf32, #tpu.memory_space<vmem>>, vector<1x128xf32>
    %4 = vector.broadcast %3 : vector<1x128xf32> to vector<256x128xf32>
    %5 = arith.addf %2, %4 : vector<256x128xf32>
    %cst_5 = arith.constant 0.000000e+00 : f32
    %6 = vector.broadcast %cst_5 : f32 to vector<256x128xf32>
    %7 = arith.cmpf ogt, %5, %6 : vector<256x128xf32>
    %cst_6 = arith.constant 0.000000e+00 : f32
    %8 = vector.broadcast %cst_6 : f32 to vector<256x128xf32>
    %9 = arith.minimumf %5, %8 : vector<256x128xf32>
    %10 = math.exp %9 : vector<256x128xf32>
    %cst_7 = arith.constant 1.000000e+00 : f32
    %11 = vector.broadcast %cst_7 : f32 to vector<256x128xf32>
    %12 = arith.subf %10, %11 : vector<256x128xf32>
    %13 = arith.select %7, %5, %12 : vector<256x128xi1>, vector<256x128xf32>
    %14 = arith.truncf %13 : vector<256x128xf32> to vector<256x128xbf16>
    %c0_8 = arith.constant 0 : index
    %c0_9 = arith.constant 0 : index
    %15 = vector.load %arg4[%c0_8, %c0_9] : memref<256x128xbf16, #tpu.memory_space<vmem>>, vector<256x128xbf16>
    tpu.vector_store %arg4[%c0_8, %c0_9], %14 {strides = array<i32>} : memref<256x128xbf16, #tpu.memory_space<vmem>>, vector<256x128xbf16>,
    return
  }
  func.func @transform_0(%arg0: i32) -> (i32, i32) {
    %c0_i32 = arith.constant 0 : i32
    %c0_i32_0 = arith.constant 0 : i32
    return %arg0, %c0_i32 : i32, i32
  }
  func.func @transform_1(%arg0: i32) -> (i32, i32) {
    %c0_i32 = arith.constant 0 : i32
    %c0_i32_0 = arith.constant 0 : i32
    %c0_i32_1 = arith.constant 0 : i32
    return %c0_i32, %c0_i32_0 : i32, i32
  }
  func.func @transform_2(%arg0: i32) -> (i32, i32) {
    %c0_i32 = arith.constant 0 : i32
    %c0_i32_0 = arith.constant 0 : i32
    %c0_i32_1 = arith.constant 0 : i32
    return %c0_i32, %c0_i32_0 : i32, i32
  }
  func.func @transform_3(%arg0: i32) -> (i32, i32) {
    %c0_i32 = arith.constant 0 : i32
    %c0_i32_0 = arith.constant 0 : i32
    return %arg0, %c0_i32 : i32, i32
  }
}

module attributes {stable_mosaic.version = 11 : i64} {
  func.func @_mm_bias_act_kernel(%arg0: i32, %arg1: memref<64x384xbf16, #tpu.memory_space<vmem>>, %arg2: memref<384x128xbf16, #tpu.memory_space<vmem>>, %arg3: memref<1x128xf32, #tpu.memory_space<vmem>>, %arg4: memref<64x128xbf16, #tpu.memory_space<vmem>>) attributes {dimension_semantics = [#tpu.dimension_semantics<parallel>], iteration_bounds = array<i64: 2>, scalar_prefetch = 0 : i64, scratch_operands = 0 : i64, tpu.core_type = #tpu.core_type<tc>, window_params = [{transform_indices = @transform_0, window_bounds = array<i64: 64, 384>}, {pipeline_mode = #tpu.pipeline_mode<synchronous>, transform_indices = @transform_1, window_bounds = array<i64: 384, 128>}, {pipeline_mode = #tpu.pipeline_mode<synchronous>, transform_indices = @transform_2, window_bounds = array<i64: 1, 128>}, {transform_indices = @transform_3, window_bounds = array<i64: 64, 128>}]} {
    %c0 = arith.constant 0 : index
    %c0_0 = arith.constant 0 : index
    %0 = vector.load %arg1[%c0, %c0_0] : memref<64x384xbf16, #tpu.memory_space<vmem>>, vector<64x384xbf16>
    %c0_1 = arith.constant 0 : index
    %c0_2 = arith.constant 0 : index
    %1 = vector.load %arg2[%c0_1, %c0_2] : memref<384x128xbf16, #tpu.memory_space<vmem>>, vector<384x128xbf16>
    %cst = arith.constant dense<0.000000e+00> : vector<64x128xf32>
    %2 = tpu.matmul %0, %1, %cst {dimension_numbers = #tpu.dot_dimension_numbers<[1], [0], [0], [1], [0, 0, 1, 1], [], []>} : vector<64x384xbf16>, vector<384x128xbf16>, vector<64x128xf32> -> vector<64x128xf32>
    %c0_3 = arith.constant 0 : index
    %c0_4 = arith.constant 0 : index
    %3 = vector.load %arg3[%c0_3, %c0_4] : memref<1x128xf32, #tpu.memory_space<vmem>>, vector<1x128xf32>
    %4 = vector.broadcast %3 : vector<1x128xf32> to vector<64x128xf32>
    %5 = arith.addf %2, %4 : vector<64x128xf32>
    %cst_5 = arith.constant 0.000000e+00 : f32
    %6 = vector.broadcast %cst_5 : f32 to vector<64x128xf32>
    %7 = arith.cmpf ogt, %5, %6 : vector<64x128xf32>
    %cst_6 = arith.constant 0.000000e+00 : f32
    %8 = vector.broadcast %cst_6 : f32 to vector<64x128xf32>
    %9 = arith.minimumf %5, %8 : vector<64x128xf32>
    %10 = math.exp %9 : vector<64x128xf32>
    %cst_7 = arith.constant 1.000000e+00 : f32
    %11 = vector.broadcast %cst_7 : f32 to vector<64x128xf32>
    %12 = arith.subf %10, %11 : vector<64x128xf32>
    %13 = arith.select %7, %5, %12 : vector<64x128xi1>, vector<64x128xf32>
    %14 = arith.truncf %13 : vector<64x128xf32> to vector<64x128xbf16>
    %c0_8 = arith.constant 0 : index
    %c0_9 = arith.constant 0 : index
    %15 = vector.load %arg4[%c0_8, %c0_9] : memref<64x128xbf16, #tpu.memory_space<vmem>>, vector<64x128xbf16>
    tpu.vector_store %arg4[%c0_8, %c0_9], %14 {strides = array<i32>} : memref<64x128xbf16, #tpu.memory_space<vmem>>, vector<64x128xbf16>,
    return
  }
  func.func @transform_0(%arg0: i32) -> (i32, i32) {
    %c0_i32 = arith.constant 0 : i32
    %c0_i32_0 = arith.constant 0 : i32
    return %arg0, %c0_i32 : i32, i32
  }
  func.func @transform_1(%arg0: i32) -> (i32, i32) {
    %c0_i32 = arith.constant 0 : i32
    %c0_i32_0 = arith.constant 0 : i32
    %c0_i32_1 = arith.constant 0 : i32
    return %c0_i32, %c0_i32_0 : i32, i32
  }
  func.func @transform_2(%arg0: i32) -> (i32, i32) {
    %c0_i32 = arith.constant 0 : i32
    %c0_i32_0 = arith.constant 0 : i32
    %c0_i32_1 = arith.constant 0 : i32
    return %c0_i32, %c0_i32_0 : i32, i32
  }
  func.func @transform_3(%arg0: i32) -> (i32, i32) {
    %c0_i32 = arith.constant 0 : i32
    %c0_i32_0 = arith.constant 0 : i32
    return %arg0, %c0_i32 : i32, i32
  }
}

module attributes {stable_mosaic.version = 11 : i64} {
  func.func @_mm_bias_act_kernel(%arg0: i32, %arg1: memref<32x640xbf16, #tpu.memory_space<vmem>>, %arg2: memref<640x128xbf16, #tpu.memory_space<vmem>>, %arg3: memref<1x128xf32, #tpu.memory_space<vmem>>, %arg4: memref<32x128xbf16, #tpu.memory_space<vmem>>) attributes {dimension_semantics = [#tpu.dimension_semantics<parallel>], iteration_bounds = array<i64: 1>, scalar_prefetch = 0 : i64, scratch_operands = 0 : i64, tpu.core_type = #tpu.core_type<tc>, window_params = [{transform_indices = @transform_0, window_bounds = array<i64: 32, 640>}, {pipeline_mode = #tpu.pipeline_mode<synchronous>, transform_indices = @transform_1, window_bounds = array<i64: 640, 128>}, {pipeline_mode = #tpu.pipeline_mode<synchronous>, transform_indices = @transform_2, window_bounds = array<i64: 1, 128>}, {transform_indices = @transform_3, window_bounds = array<i64: 32, 128>}]} {
    %c0 = arith.constant 0 : index
    %c0_0 = arith.constant 0 : index
    %0 = vector.load %arg1[%c0, %c0_0] : memref<32x640xbf16, #tpu.memory_space<vmem>>, vector<32x640xbf16>
    %c0_1 = arith.constant 0 : index
    %c0_2 = arith.constant 0 : index
    %1 = vector.load %arg2[%c0_1, %c0_2] : memref<640x128xbf16, #tpu.memory_space<vmem>>, vector<640x128xbf16>
    %cst = arith.constant dense<0.000000e+00> : vector<32x128xf32>
    %2 = tpu.matmul %0, %1, %cst {dimension_numbers = #tpu.dot_dimension_numbers<[1], [0], [0], [1], [0, 0, 1, 1], [], []>} : vector<32x640xbf16>, vector<640x128xbf16>, vector<32x128xf32> -> vector<32x128xf32>
    %c0_3 = arith.constant 0 : index
    %c0_4 = arith.constant 0 : index
    %3 = vector.load %arg3[%c0_3, %c0_4] : memref<1x128xf32, #tpu.memory_space<vmem>>, vector<1x128xf32>
    %4 = vector.broadcast %3 : vector<1x128xf32> to vector<32x128xf32>
    %5 = arith.addf %2, %4 : vector<32x128xf32>
    %cst_5 = arith.constant 0.000000e+00 : f32
    %6 = vector.broadcast %cst_5 : f32 to vector<32x128xf32>
    %7 = arith.cmpf ogt, %5, %6 : vector<32x128xf32>
    %cst_6 = arith.constant 0.000000e+00 : f32
    %8 = vector.broadcast %cst_6 : f32 to vector<32x128xf32>
    %9 = arith.minimumf %5, %8 : vector<32x128xf32>
    %10 = math.exp %9 : vector<32x128xf32>
    %cst_7 = arith.constant 1.000000e+00 : f32
    %11 = vector.broadcast %cst_7 : f32 to vector<32x128xf32>
    %12 = arith.subf %10, %11 : vector<32x128xf32>
    %13 = arith.select %7, %5, %12 : vector<32x128xi1>, vector<32x128xf32>
    %14 = arith.truncf %13 : vector<32x128xf32> to vector<32x128xbf16>
    %c0_8 = arith.constant 0 : index
    %c0_9 = arith.constant 0 : index
    %15 = vector.load %arg4[%c0_8, %c0_9] : memref<32x128xbf16, #tpu.memory_space<vmem>>, vector<32x128xbf16>
    tpu.vector_store %arg4[%c0_8, %c0_9], %14 {strides = array<i32>} : memref<32x128xbf16, #tpu.memory_space<vmem>>, vector<32x128xbf16>,
    return
  }
  func.func @transform_0(%arg0: i32) -> (i32, i32) {
    %c0_i32 = arith.constant 0 : i32
    %c0_i32_0 = arith.constant 0 : i32
    return %arg0, %c0_i32 : i32, i32
  }
  func.func @transform_1(%arg0: i32) -> (i32, i32) {
    %c0_i32 = arith.constant 0 : i32
    %c0_i32_0 = arith.constant 0 : i32
    %c0_i32_1 = arith.constant 0 : i32
    return %c0_i32, %c0_i32_0 : i32, i32
  }
  func.func @transform_2(%arg0: i32) -> (i32, i32) {
    %c0_i32 = arith.constant 0 : i32
    %c0_i32_0 = arith.constant 0 : i32
    %c0_i32_1 = arith.constant 0 : i32
    return %c0_i32, %c0_i32_0 : i32, i32
  }
  func.func @transform_3(%arg0: i32) -> (i32, i32) {
    %c0_i32 = arith.constant 0 : i32
    %c0_i32_0 = arith.constant 0 : i32
    return %arg0, %c0_i32 : i32, i32
  }
}

module attributes {stable_mosaic.version = 11 : i64} {
  func.func @_fused_conv_pair_kernel(%arg0: i32, %arg1: memref<1x16x128xbf16, #tpu.memory_space<vmem>>, %arg2: memref<1152x128xbf16, #tpu.memory_space<vmem>>, %arg3: memref<1x128xf32, #tpu.memory_space<vmem>>, %arg4: memref<1152x128xbf16, #tpu.memory_space<vmem>>, %arg5: memref<1x128xf32, #tpu.memory_space<vmem>>, %arg6: memref<1x16x128xbf16, #tpu.memory_space<vmem>>, %arg7: memref<6x6x128xf32, #tpu.memory_space<vmem>>, %arg8: memref<16x1152xbf16, #tpu.memory_space<vmem>>) attributes {dimension_semantics = [#tpu.dimension_semantics<parallel>], iteration_bounds = array<i64: 2>, scalar_prefetch = 0 : i64, scratch_operands = 2 : i64, tpu.core_type = #tpu.core_type<tc>, window_params = [{transform_indices = @transform_0, window_bounds = array<i64: 1, 16, 128>}, {pipeline_mode = #tpu.pipeline_mode<synchronous>, transform_indices = @transform_1, window_bounds = array<i64: 1152, 128>}, {pipeline_mode = #tpu.pipeline_mode<synchronous>, transform_indices = @transform_2, window_bounds = array<i64: 1, 128>}, {pipeline_mode = #tpu.pipeline_mode<synchronous>, transform_indices = @transform_3, window_bounds = array<i64: 1152, 128>}, {pipeline_mode = #tpu.pipeline_mode<synchronous>, transform_indices = @transform_4, window_bounds = array<i64: 1, 128>}, {transform_indices = @transform_5, window_bounds = array<i64: 1, 16, 128>}]} {
    %c0 = arith.constant 0 : index
    %c0_0 = arith.constant 0 : index
    %c0_1 = arith.constant 0 : index
    %0 = vector.load %arg1[%c0, %c0_0, %c0_1] : memref<1x16x128xbf16, #tpu.memory_space<vmem>>, vector<1x16x128xbf16>
    %1 = vector.shape_cast %0 : vector<1x16x128xbf16> to vector<16x128xbf16>
    %2 = arith.extf %1 : vector<16x128xbf16> to vector<16x128xf32>
    %3 = vector.extract_strided_slice %2 {offsets = [0, 0], sizes = [4, 128], strides = [1, 1]} : vector<16x128xf32> to vector<4x128xf32>
    %4 = vector.shape_cast %3 : vector<4x128xf32> to vector<1x4x128xf32>
    %c1 = arith.constant 1 : index
    %c1_2 = arith.constant 1 : index
    %c0_3 = arith.constant 0 : index
    %5 = vector.load %arg7[%c1, %c1_2, %c0_3] : memref<6x6x128xf32, #tpu.memory_space<vmem>>, vector<1x4x128xf32>
    tpu.vector_store %arg7[%c1, %c1_2, %c0_3], %4 {strides = array<i32>} : memref<6x6x128xf32, #tpu.memory_space<vmem>>, vector<1x4x128xf32>,
    %6 = vector.extract_strided_slice %2 {offsets = [4, 0], sizes = [4, 128], strides = [1, 1]} : vector<16x128xf32> to vector<4x128xf32>
    %7 = vector.shape_cast %6 : vector<4x128xf32> to vector<1x4x128xf32>
    %c2 = arith.constant 2 : index
    %c1_4 = arith.constant 1 : index
    %c0_5 = arith.constant 0 : index
    %8 = vector.load %arg7[%c2, %c1_4, %c0_5] : memref<6x6x128xf32, #tpu.memory_space<vmem>>, vector<1x4x128xf32>
    tpu.vector_store %arg7[%c2, %c1_4, %c0_5], %7 {strides = array<i32>} : memref<6x6x128xf32, #tpu.memory_space<vmem>>, vector<1x4x128xf32>,
    %9 = vector.extract_strided_slice %2 {offsets = [8, 0], sizes = [4, 128], strides = [1, 1]} : vector<16x128xf32> to vector<4x128xf32>
    %10 = vector.shape_cast %9 : vector<4x128xf32> to vector<1x4x128xf32>
    %c3 = arith.constant 3 : index
    %c1_6 = arith.constant 1 : index
    %c0_7 = arith.constant 0 : index
    %11 = vector.load %arg7[%c3, %c1_6, %c0_7] : memref<6x6x128xf32, #tpu.memory_space<vmem>>, vector<1x4x128xf32>
    tpu.vector_store %arg7[%c3, %c1_6, %c0_7], %10 {strides = array<i32>} : memref<6x6x128xf32, #tpu.memory_space<vmem>>, vector<1x4x128xf32>,
    %12 = vector.extract_strided_slice %2 {offsets = [12, 0], sizes = [4, 128], strides = [1, 1]} : vector<16x128xf32> to vector<4x128xf32>
    %13 = vector.shape_cast %12 : vector<4x128xf32> to vector<1x4x128xf32>
    %c4 = arith.constant 4 : index
    %c1_8 = arith.constant 1 : index
    %c0_9 = arith.constant 0 : index
    %14 = vector.load %arg7[%c4, %c1_8, %c0_9] : memref<6x6x128xf32, #tpu.memory_space<vmem>>, vector<1x4x128xf32>
    tpu.vector_store %arg7[%c4, %c1_8, %c0_9], %13 {strides = array<i32>} : memref<6x6x128xf32, #tpu.memory_space<vmem>>, vector<1x4x128xf32>,
    %15 = vector.extract_strided_slice %2 {offsets = [4, 0], sizes = [4, 128], strides = [1, 1]} : vector<16x128xf32> to vector<4x128xf32>
    %16 = vector.shape_cast %15 : vector<4x128xf32> to vector<1x4x128xf32>
    %c0_10 = arith.constant 0 : index
    %c1_11 = arith.constant 1 : index
    %c0_12 = arith.constant 0 : index
    %17 = vector.load %arg7[%c0_10, %c1_11, %c0_12] : memref<6x6x128xf32, #tpu.memory_space<vmem>>, vector<1x4x128xf32>
    tpu.vector_store %arg7[%c0_10, %c1_11, %c0_12], %16 {strides = array<i32>} : memref<6x6x128xf32, #tpu.memory_space<vmem>>, vector<1x4x128xf32>,
    %18 = vector.extract_strided_slice %2 {offsets = [8, 0], sizes = [4, 128], strides = [1, 1]} : vector<16x128xf32> to vector<4x128xf32>
    %19 = vector.shape_cast %18 : vector<4x128xf32> to vector<1x4x128xf32>
    %c5 = arith.constant 5 : index
    %c1_13 = arith.constant 1 : index
    %c0_14 = arith.constant 0 : index
    %20 = vector.load %arg7[%c5, %c1_13, %c0_14] : memref<6x6x128xf32, #tpu.memory_space<vmem>>, vector<1x4x128xf32>
    tpu.vector_store %arg7[%c5, %c1_13, %c0_14], %19 {strides = array<i32>} : memref<6x6x128xf32, #tpu.memory_space<vmem>>, vector<1x4x128xf32>,
    %c0_15 = arith.constant 0 : index
    %c2_16 = arith.constant 2 : index
    %c0_17 = arith.constant 0 : index
    %21 = vector.load %arg7[%c0_15, %c2_16, %c0_17] : memref<6x6x128xf32, #tpu.memory_space<vmem>>, vector<6x1x128xf32>
    %c0_18 = arith.constant 0 : index
    %c0_19 = arith.constant 0 : index
    %c0_20 = arith.constant 0 : index
    %22 = vector.load %arg7[%c0_18, %c0_19, %c0_20] : memref<6x6x128xf32, #tpu.memory_space<vmem>>, vector<6x1x128xf32>
    tpu.vector_store %arg7[%c0_18, %c0_19, %c0_20], %21 {strides = array<i32>} : memref<6x6x128xf32, #tpu.memory_space<vmem>>, vector<6x1x128xf32>,
    %c0_21 = arith.constant 0 : index
    %c3_22 = arith.constant 3 : index
    %c0_23 = arith.constant 0 : index
    %23 = vector.load %arg7[%c0_21, %c3_22, %c0_23] : memref<6x6x128xf32, #tpu.memory_space<vmem>>, vector<6x1x128xf32>
    %c0_24 = arith.constant 0 : index
    %c5_25 = arith.constant 5 : index
    %c0_26 = arith.constant 0 : index
    %24 = vector.load %arg7[%c0_24, %c5_25, %c0_26] : memref<6x6x128xf32, #tpu.memory_space<vmem>>, vector<6x1x128xf32>
    tpu.vector_store %arg7[%c0_24, %c5_25, %c0_26], %23 {strides = array<i32>} : memref<6x6x128xf32, #tpu.memory_space<vmem>>, vector<6x1x128xf32>,
    %c0_27 = arith.constant 0 : index
    %c0_28 = arith.constant 0 : index
    %c0_29 = arith.constant 0 : index
    %25 = vector.load %arg7[%c0_27, %c0_28, %c0_29] : memref<6x6x128xf32, #tpu.memory_space<vmem>>, vector<1x4x128xf32>
    %26 = vector.shape_cast %25 : vector<1x4x128xf32> to vector<4x128xf32>
    %27 = arith.truncf %26 : vector<4x128xf32> to vector<4x128xbf16>
    %c0_30 = arith.constant 0 : index
    %c0_31 = arith.constant 0 : index
    %28 = vector.load %arg8[%c0_30, %c0_31] : memref<16x1152xbf16, #tpu.memory_space<vmem>>, vector<4x128xbf16>
    tpu.vector_store %arg8[%c0_30, %c0_31], %27 {strides = array<i32>} : memref<16x1152xbf16, #tpu.memory_space<vmem>>, vector<4x128xbf16>,
    %c1_32 = arith.constant 1 : index
    %c0_33 = arith.constant 0 : index
    %c0_34 = arith.constant 0 : index
    %29 = vector.load %arg7[%c1_32, %c0_33, %c0_34] : memref<6x6x128xf32, #tpu.memory_space<vmem>>, vector<1x4x128xf32>
    %30 = vector.shape_cast %29 : vector<1x4x128xf32> to vector<4x128xf32>
    %31 = arith.truncf %30 : vector<4x128xf32> to vector<4x128xbf16>
    %c4_35 = arith.constant 4 : index
    %c0_36 = arith.constant 0 : index
    %32 = vector.load %arg8[%c4_35, %c0_36] : memref<16x1152xbf16, #tpu.memory_space<vmem>>, vector<4x128xbf16>
    tpu.vector_store %arg8[%c4_35, %c0_36], %31 {strides = array<i32>} : memref<16x1152xbf16, #tpu.memory_space<vmem>>, vector<4x128xbf16>,
    %c2_37 = arith.constant 2 : index
    %c0_38 = arith.constant 0 : index
    %c0_39 = arith.constant 0 : index
    %33 = vector.load %arg7[%c2_37, %c0_38, %c0_39] : memref<6x6x128xf32, #tpu.memory_space<vmem>>, vector<1x4x128xf32>
    %34 = vector.shape_cast %33 : vector<1x4x128xf32> to vector<4x128xf32>
    %35 = arith.truncf %34 : vector<4x128xf32> to vector<4x128xbf16>
    %c8 = arith.constant 8 : index
    %c0_40 = arith.constant 0 : index
    %36 = vector.load %arg8[%c8, %c0_40] : memref<16x1152xbf16, #tpu.memory_space<vmem>>, vector<4x128xbf16>
    tpu.vector_store %arg8[%c8, %c0_40], %35 {strides = array<i32>} : memref<16x1152xbf16, #tpu.memory_space<vmem>>, vector<4x128xbf16>,
    %c3_41 = arith.constant 3 : index
    %c0_42 = arith.constant 0 : index
    %c0_43 = arith.constant 0 : index
    %37 = vector.load %arg7[%c3_41, %c0_42, %c0_43] : memref<6x6x128xf32, #tpu.memory_space<vmem>>, vector<1x4x128xf32>
    %38 = vector.shape_cast %37 : vector<1x4x128xf32> to vector<4x128xf32>
    %39 = arith.truncf %38 : vector<4x128xf32> to vector<4x128xbf16>
    %c12 = arith.constant 12 : index
    %c0_44 = arith.constant 0 : index
    %40 = vector.load %arg8[%c12, %c0_44] : memref<16x1152xbf16, #tpu.memory_space<vmem>>, vector<4x128xbf16>
    tpu.vector_store %arg8[%c12, %c0_44], %39 {strides = array<i32>} : memref<16x1152xbf16, #tpu.memory_space<vmem>>, vector<4x128xbf16>,
    %c0_45 = arith.constant 0 : index
    %c1_46 = arith.constant 1 : index
    %c0_47 = arith.constant 0 : index
    %41 = vector.load %arg7[%c0_45, %c1_46, %c0_47] : memref<6x6x128xf32, #tpu.memory_space<vmem>>, vector<1x4x128xf32>
    %42 = vector.shape_cast %41 : vector<1x4x128xf32> to vector<4x128xf32>
    %43 = arith.truncf %42 : vector<4x128xf32> to vector<4x128xbf16>
    %c0_48 = arith.constant 0 : index
    %c128 = arith.constant 128 : index
    %44 = vector.load %arg8[%c0_48, %c128] : memref<16x1152xbf16, #tpu.memory_space<vmem>>, vector<4x128xbf16>
    tpu.vector_store %arg8[%c0_48, %c128], %43 {strides = array<i32>} : memref<16x1152xbf16, #tpu.memory_space<vmem>>, vector<4x128xbf16>,
    %c1_49 = arith.constant 1 : index
    %c1_50 = arith.constant 1 : index
    %c0_51 = arith.constant 0 : index
    %45 = vector.load %arg7[%c1_49, %c1_50, %c0_51] : memref<6x6x128xf32, #tpu.memory_space<vmem>>, vector<1x4x128xf32>
    %46 = vector.shape_cast %45 : vector<1x4x128xf32> to vector<4x128xf32>
    %47 = arith.truncf %46 : vector<4x128xf32> to vector<4x128xbf16>
    %c4_52 = arith.constant 4 : index
    %c128_53 = arith.constant 128 : index
    %48 = vector.load %arg8[%c4_52, %c128_53] : memref<16x1152xbf16, #tpu.memory_space<vmem>>, vector<4x128xbf16>
    tpu.vector_store %arg8[%c4_52, %c128_53], %47 {strides = array<i32>} : memref<16x1152xbf16, #tpu.memory_space<vmem>>, vector<4x128xbf16>,
    %c2_54 = arith.constant 2 : index
    %c1_55 = arith.constant 1 : index
    %c0_56 = arith.constant 0 : index
    %49 = vector.load %arg7[%c2_54, %c1_55, %c0_56] : memref<6x6x128xf32, #tpu.memory_space<vmem>>, vector<1x4x128xf32>
    %50 = vector.shape_cast %49 : vector<1x4x128xf32> to vector<4x128xf32>
    %51 = arith.truncf %50 : vector<4x128xf32> to vector<4x128xbf16>
    %c8_57 = arith.constant 8 : index
    %c128_58 = arith.constant 128 : index
    %52 = vector.load %arg8[%c8_57, %c128_58] : memref<16x1152xbf16, #tpu.memory_space<vmem>>, vector<4x128xbf16>
    tpu.vector_store %arg8[%c8_57, %c128_58], %51 {strides = array<i32>} : memref<16x1152xbf16, #tpu.memory_space<vmem>>, vector<4x128xbf16>,
    %c3_59 = arith.constant 3 : index
    %c1_60 = arith.constant 1 : index
    %c0_61 = arith.constant 0 : index
    %53 = vector.load %arg7[%c3_59, %c1_60, %c0_61] : memref<6x6x128xf32, #tpu.memory_space<vmem>>, vector<1x4x128xf32>
    %54 = vector.shape_cast %53 : vector<1x4x128xf32> to vector<4x128xf32>
    %55 = arith.truncf %54 : vector<4x128xf32> to vector<4x128xbf16>
    %c12_62 = arith.constant 12 : index
    %c128_63 = arith.constant 128 : index
    %56 = vector.load %arg8[%c12_62, %c128_63] : memref<16x1152xbf16, #tpu.memory_space<vmem>>, vector<4x128xbf16>
    tpu.vector_store %arg8[%c12_62, %c128_63], %55 {strides = array<i32>} : memref<16x1152xbf16, #tpu.memory_space<vmem>>, vector<4x128xbf16>,
    %c0_64 = arith.constant 0 : index
    %c2_65 = arith.constant 2 : index
    %c0_66 = arith.constant 0 : index
    %57 = vector.load %arg7[%c0_64, %c2_65, %c0_66] : memref<6x6x128xf32, #tpu.memory_space<vmem>>, vector<1x4x128xf32>
    %58 = vector.shape_cast %57 : vector<1x4x128xf32> to vector<4x128xf32>
    %59 = arith.truncf %58 : vector<4x128xf32> to vector<4x128xbf16>
    %c0_67 = arith.constant 0 : index
    %c256 = arith.constant 256 : index
    %60 = vector.load %arg8[%c0_67, %c256] : memref<16x1152xbf16, #tpu.memory_space<vmem>>, vector<4x128xbf16>
    tpu.vector_store %arg8[%c0_67, %c256], %59 {strides = array<i32>} : memref<16x1152xbf16, #tpu.memory_space<vmem>>, vector<4x128xbf16>,
    %c1_68 = arith.constant 1 : index
    %c2_69 = arith.constant 2 : index
    %c0_70 = arith.constant 0 : index
    %61 = vector.load %arg7[%c1_68, %c2_69, %c0_70] : memref<6x6x128xf32, #tpu.memory_space<vmem>>, vector<1x4x128xf32>
    %62 = vector.shape_cast %61 : vector<1x4x128xf32> to vector<4x128xf32>
    %63 = arith.truncf %62 : vector<4x128xf32> to vector<4x128xbf16>
    %c4_71 = arith.constant 4 : index
    %c256_72 = arith.constant 256 : index
    %64 = vector.load %arg8[%c4_71, %c256_72] : memref<16x1152xbf16, #tpu.memory_space<vmem>>, vector<4x128xbf16>
    tpu.vector_store %arg8[%c4_71, %c256_72], %63 {strides = array<i32>} : memref<16x1152xbf16, #tpu.memory_space<vmem>>, vector<4x128xbf16>,
    %c2_73 = arith.constant 2 : index
    %c2_74 = arith.constant 2 : index
    %c0_75 = arith.constant 0 : index
    %65 = vector.load %arg7[%c2_73, %c2_74, %c0_75] : memref<6x6x128xf32, #tpu.memory_space<vmem>>, vector<1x4x128xf32>
    %66 = vector.shape_cast %65 : vector<1x4x128xf32> to vector<4x128xf32>
    %67 = arith.truncf %66 : vector<4x128xf32> to vector<4x128xbf16>
    %c8_76 = arith.constant 8 : index
    %c256_77 = arith.constant 256 : index
    %68 = vector.load %arg8[%c8_76, %c256_77] : memref<16x1152xbf16, #tpu.memory_space<vmem>>, vector<4x128xbf16>
    tpu.vector_store %arg8[%c8_76, %c256_77], %67 {strides = array<i32>} : memref<16x1152xbf16, #tpu.memory_space<vmem>>, vector<4x128xbf16>,
    %c3_78 = arith.constant 3 : index
    %c2_79 = arith.constant 2 : index
    %c0_80 = arith.constant 0 : index
    %69 = vector.load %arg7[%c3_78, %c2_79, %c0_80] : memref<6x6x128xf32, #tpu.memory_space<vmem>>, vector<1x4x128xf32>
    %70 = vector.shape_cast %69 : vector<1x4x128xf32> to vector<4x128xf32>
    %71 = arith.truncf %70 : vector<4x128xf32> to vector<4x128xbf16>
    %c12_81 = arith.constant 12 : index
    %c256_82 = arith.constant 256 : index
    %72 = vector.load %arg8[%c12_81, %c256_82] : memref<16x1152xbf16, #tpu.memory_space<vmem>>, vector<4x128xbf16>
    tpu.vector_store %arg8[%c12_81, %c256_82], %71 {strides = array<i32>} : memref<16x1152xbf16, #tpu.memory_space<vmem>>, vector<4x128xbf16>,
    %c1_83 = arith.constant 1 : index
    %c0_84 = arith.constant 0 : index
    %c0_85 = arith.constant 0 : index
    %73 = vector.load %arg7[%c1_83, %c0_84, %c0_85] : memref<6x6x128xf32, #tpu.memory_space<vmem>>, vector<1x4x128xf32>
    %74 = vector.shape_cast %73 : vector<1x4x128xf32> to vector<4x128xf32>
    %75 = arith.truncf %74 : vector<4x128xf32> to vector<4x128xbf16>
    %c0_86 = arith.constant 0 : index
    %c384 = arith.constant 384 : index
    %76 = vector.load %arg8[%c0_86, %c384] : memref<16x1152xbf16, #tpu.memory_space<vmem>>, vector<4x128xbf16>
    tpu.vector_store %arg8[%c0_86, %c384], %75 {strides = array<i32>} : memref<16x1152xbf16, #tpu.memory_space<vmem>>, vector<4x128xbf16>,
    %c2_87 = arith.constant 2 : index
    %c0_88 = arith.constant 0 : index
    %c0_89 = arith.constant 0 : index
    %77 = vector.load %arg7[%c2_87, %c0_88, %c0_89] : memref<6x6x128xf32, #tpu.memory_space<vmem>>, vector<1x4x128xf32>
    %78 = vector.shape_cast %77 : vector<1x4x128xf32> to vector<4x128xf32>
    %79 = arith.truncf %78 : vector<4x128xf32> to vector<4x128xbf16>
    %c4_90 = arith.constant 4 : index
    %c384_91 = arith.constant 384 : index
    %80 = vector.load %arg8[%c4_90, %c384_91] : memref<16x1152xbf16, #tpu.memory_space<vmem>>, vector<4x128xbf16>
    tpu.vector_store %arg8[%c4_90, %c384_91], %79 {strides = array<i32>} : memref<16x1152xbf16, #tpu.memory_space<vmem>>, vector<4x128xbf16>,
    %c3_92 = arith.constant 3 : index
    %c0_93 = arith.constant 0 : index
    %c0_94 = arith.constant 0 : index
    %81 = vector.load %arg7[%c3_92, %c0_93, %c0_94] : memref<6x6x128xf32, #tpu.memory_space<vmem>>, vector<1x4x128xf32>
    %82 = vector.shape_cast %81 : vector<1x4x128xf32> to vector<4x128xf32>
    %83 = arith.truncf %82 : vector<4x128xf32> to vector<4x128xbf16>
    %c8_95 = arith.constant 8 : index
    %c384_96 = arith.constant 384 : index
    %84 = vector.load %arg8[%c8_95, %c384_96] : memref<16x1152xbf16, #tpu.memory_space<vmem>>, vector<4x128xbf16>
    tpu.vector_store %arg8[%c8_95, %c384_96], %83 {strides = array<i32>} : memref<16x1152xbf16, #tpu.memory_space<vmem>>, vector<4x128xbf16>,
    %c4_97 = arith.constant 4 : index
    %c0_98 = arith.constant 0 : index
    %c0_99 = arith.constant 0 : index
    %85 = vector.load %arg7[%c4_97, %c0_98, %c0_99] : memref<6x6x128xf32, #tpu.memory_space<vmem>>, vector<1x4x128xf32>
    %86 = vector.shape_cast %85 : vector<1x4x128xf32> to vector<4x128xf32>
    %87 = arith.truncf %86 : vector<4x128xf32> to vector<4x128xbf16>
    %c12_100 = arith.constant 12 : index
    %c384_101 = arith.constant 384 : index
    %88 = vector.load %arg8[%c12_100, %c384_101] : memref<16x1152xbf16, #tpu.memory_space<vmem>>, vector<4x128xbf16>
    tpu.vector_store %arg8[%c12_100, %c384_101], %87 {strides = array<i32>} : memref<16x1152xbf16, #tpu.memory_space<vmem>>, vector<4x128xbf16>,
    %c1_102 = arith.constant 1 : index
    %c1_103 = arith.constant 1 : index
    %c0_104 = arith.constant 0 : index
    %89 = vector.load %arg7[%c1_102, %c1_103, %c0_104] : memref<6x6x128xf32, #tpu.memory_space<vmem>>, vector<1x4x128xf32>
    %90 = vector.shape_cast %89 : vector<1x4x128xf32> to vector<4x128xf32>
    %91 = arith.truncf %90 : vector<4x128xf32> to vector<4x128xbf16>
    %c0_105 = arith.constant 0 : index
    %c512 = arith.constant 512 : index
    %92 = vector.load %arg8[%c0_105, %c512] : memref<16x1152xbf16, #tpu.memory_space<vmem>>, vector<4x128xbf16>
    tpu.vector_store %arg8[%c0_105, %c512], %91 {strides = array<i32>} : memref<16x1152xbf16, #tpu.memory_space<vmem>>, vector<4x128xbf16>,
    %c2_106 = arith.constant 2 : index
    %c1_107 = arith.constant 1 : index
    %c0_108 = arith.constant 0 : index
    %93 = vector.load %arg7[%c2_106, %c1_107, %c0_108] : memref<6x6x128xf32, #tpu.memory_space<vmem>>, vector<1x4x128xf32>
    %94 = vector.shape_cast %93 : vector<1x4x128xf32> to vector<4x128xf32>
    %95 = arith.truncf %94 : vector<4x128xf32> to vector<4x128xbf16>
    %c4_109 = arith.constant 4 : index
    %c512_110 = arith.constant 512 : index
    %96 = vector.load %arg8[%c4_109, %c512_110] : memref<16x1152xbf16, #tpu.memory_space<vmem>>, vector<4x128xbf16>
    tpu.vector_store %arg8[%c4_109, %c512_110], %95 {strides = array<i32>} : memref<16x1152xbf16, #tpu.memory_space<vmem>>, vector<4x128xbf16>,
    %c3_111 = arith.constant 3 : index
    %c1_112 = arith.constant 1 : index
    %c0_113 = arith.constant 0 : index
    %97 = vector.load %arg7[%c3_111, %c1_112, %c0_113] : memref<6x6x128xf32, #tpu.memory_space<vmem>>, vector<1x4x128xf32>
    %98 = vector.shape_cast %97 : vector<1x4x128xf32> to vector<4x128xf32>
    %99 = arith.truncf %98 : vector<4x128xf32> to vector<4x128xbf16>
    %c8_114 = arith.constant 8 : index
    %c512_115 = arith.constant 512 : index
    %100 = vector.load %arg8[%c8_114, %c512_115] : memref<16x1152xbf16, #tpu.memory_space<vmem>>, vector<4x128xbf16>
    tpu.vector_store %arg8[%c8_114, %c512_115], %99 {strides = array<i32>} : memref<16x1152xbf16, #tpu.memory_space<vmem>>, vector<4x128xbf16>,
    %c4_116 = arith.constant 4 : index
    %c1_117 = arith.constant 1 : index
    %c0_118 = arith.constant 0 : index
    %101 = vector.load %arg7[%c4_116, %c1_117, %c0_118] : memref<6x6x128xf32, #tpu.memory_space<vmem>>, vector<1x4x128xf32>
    %102 = vector.shape_cast %101 : vector<1x4x128xf32> to vector<4x128xf32>
    %103 = arith.truncf %102 : vector<4x128xf32> to vector<4x128xbf16>
    %c12_119 = arith.constant 12 : index
    %c512_120 = arith.constant 512 : index
    %104 = vector.load %arg8[%c12_119, %c512_120] : memref<16x1152xbf16, #tpu.memory_space<vmem>>, vector<4x128xbf16>
    tpu.vector_store %arg8[%c12_119, %c512_120], %103 {strides = array<i32>} : memref<16x1152xbf16, #tpu.memory_space<vmem>>, vector<4x128xbf16>,
    %c1_121 = arith.constant 1 : index
    %c2_122 = arith.constant 2 : index
    %c0_123 = arith.constant 0 : index
    %105 = vector.load %arg7[%c1_121, %c2_122, %c0_123] : memref<6x6x128xf32, #tpu.memory_space<vmem>>, vector<1x4x128xf32>
    %106 = vector.shape_cast %105 : vector<1x4x128xf32> to vector<4x128xf32>
    %107 = arith.truncf %106 : vector<4x128xf32> to vector<4x128xbf16>
    %c0_124 = arith.constant 0 : index
    %c640 = arith.constant 640 : index
    %108 = vector.load %arg8[%c0_124, %c640] : memref<16x1152xbf16, #tpu.memory_space<vmem>>, vector<4x128xbf16>
    tpu.vector_store %arg8[%c0_124, %c640], %107 {strides = array<i32>} : memref<16x1152xbf16, #tpu.memory_space<vmem>>, vector<4x128xbf16>,
    %c2_125 = arith.constant 2 : index
    %c2_126 = arith.constant 2 : index
    %c0_127 = arith.constant 0 : index
    %109 = vector.load %arg7[%c2_125, %c2_126, %c0_127] : memref<6x6x128xf32, #tpu.memory_space<vmem>>, vector<1x4x128xf32>
    %110 = vector.shape_cast %109 : vector<1x4x128xf32> to vector<4x128xf32>
    %111 = arith.truncf %110 : vector<4x128xf32> to vector<4x128xbf16>
    %c4_128 = arith.constant 4 : index
    %c640_129 = arith.constant 640 : index
    %112 = vector.load %arg8[%c4_128, %c640_129] : memref<16x1152xbf16, #tpu.memory_space<vmem>>, vector<4x128xbf16>
    tpu.vector_store %arg8[%c4_128, %c640_129], %111 {strides = array<i32>} : memref<16x1152xbf16, #tpu.memory_space<vmem>>, vector<4x128xbf16>,
    %c3_130 = arith.constant 3 : index
    %c2_131 = arith.constant 2 : index
    %c0_132 = arith.constant 0 : index
    %113 = vector.load %arg7[%c3_130, %c2_131, %c0_132] : memref<6x6x128xf32, #tpu.memory_space<vmem>>, vector<1x4x128xf32>
    %114 = vector.shape_cast %113 : vector<1x4x128xf32> to vector<4x128xf32>
    %115 = arith.truncf %114 : vector<4x128xf32> to vector<4x128xbf16>
    %c8_133 = arith.constant 8 : index
    %c640_134 = arith.constant 640 : index
    %116 = vector.load %arg8[%c8_133, %c640_134] : memref<16x1152xbf16, #tpu.memory_space<vmem>>, vector<4x128xbf16>
    tpu.vector_store %arg8[%c8_133, %c640_134], %115 {strides = array<i32>} : memref<16x1152xbf16, #tpu.memory_space<vmem>>, vector<4x128xbf16>,
    %c4_135 = arith.constant 4 : index
    %c2_136 = arith.constant 2 : index
    %c0_137 = arith.constant 0 : index
    %117 = vector.load %arg7[%c4_135, %c2_136, %c0_137] : memref<6x6x128xf32, #tpu.memory_space<vmem>>, vector<1x4x128xf32>
    %118 = vector.shape_cast %117 : vector<1x4x128xf32> to vector<4x128xf32>
    %119 = arith.truncf %118 : vector<4x128xf32> to vector<4x128xbf16>
    %c12_138 = arith.constant 12 : index
    %c640_139 = arith.constant 640 : index
    %120 = vector.load %arg8[%c12_138, %c640_139] : memref<16x1152xbf16, #tpu.memory_space<vmem>>, vector<4x128xbf16>
    tpu.vector_store %arg8[%c12_138, %c640_139], %119 {strides = array<i32>} : memref<16x1152xbf16, #tpu.memory_space<vmem>>, vector<4x128xbf16>,
    %c2_140 = arith.constant 2 : index
    %c0_141 = arith.constant 0 : index
    %c0_142 = arith.constant 0 : index
    %121 = vector.load %arg7[%c2_140, %c0_141, %c0_142] : memref<6x6x128xf32, #tpu.memory_space<vmem>>, vector<1x4x128xf32>
    %122 = vector.shape_cast %121 : vector<1x4x128xf32> to vector<4x128xf32>
    %123 = arith.truncf %122 : vector<4x128xf32> to vector<4x128xbf16>
    %c0_143 = arith.constant 0 : index
    %c768 = arith.constant 768 : index
    %124 = vector.load %arg8[%c0_143, %c768] : memref<16x1152xbf16, #tpu.memory_space<vmem>>, vector<4x128xbf16>
    tpu.vector_store %arg8[%c0_143, %c768], %123 {strides = array<i32>} : memref<16x1152xbf16, #tpu.memory_space<vmem>>, vector<4x128xbf16>,
    %c3_144 = arith.constant 3 : index
    %c0_145 = arith.constant 0 : index
    %c0_146 = arith.constant 0 : index
    %125 = vector.load %arg7[%c3_144, %c0_145, %c0_146] : memref<6x6x128xf32, #tpu.memory_space<vmem>>, vector<1x4x128xf32>
    %126 = vector.shape_cast %125 : vector<1x4x128xf32> to vector<4x128xf32>
    %127 = arith.truncf %126 : vector<4x128xf32> to vector<4x128xbf16>
    %c4_147 = arith.constant 4 : index
    %c768_148 = arith.constant 768 : index
    %128 = vector.load %arg8[%c4_147, %c768_148] : memref<16x1152xbf16, #tpu.memory_space<vmem>>, vector<4x128xbf16>
    tpu.vector_store %arg8[%c4_147, %c768_148], %127 {strides = array<i32>} : memref<16x1152xbf16, #tpu.memory_space<vmem>>, vector<4x128xbf16>,
    %c4_149 = arith.constant 4 : index
    %c0_150 = arith.constant 0 : index
    %c0_151 = arith.constant 0 : index
    %129 = vector.load %arg7[%c4_149, %c0_150, %c0_151] : memref<6x6x128xf32, #tpu.memory_space<vmem>>, vector<1x4x128xf32>
    %130 = vector.shape_cast %129 : vector<1x4x128xf32> to vector<4x128xf32>
    %131 = arith.truncf %130 : vector<4x128xf32> to vector<4x128xbf16>
    %c8_152 = arith.constant 8 : index
    %c768_153 = arith.constant 768 : index
    %132 = vector.load %arg8[%c8_152, %c768_153] : memref<16x1152xbf16, #tpu.memory_space<vmem>>, vector<4x128xbf16>
    tpu.vector_store %arg8[%c8_152, %c768_153], %131 {strides = array<i32>} : memref<16x1152xbf16, #tpu.memory_space<vmem>>, vector<4x128xbf16>,
    %c5_154 = arith.constant 5 : index
    %c0_155 = arith.constant 0 : index
    %c0_156 = arith.constant 0 : index
    %133 = vector.load %arg7[%c5_154, %c0_155, %c0_156] : memref<6x6x128xf32, #tpu.memory_space<vmem>>, vector<1x4x128xf32>
    %134 = vector.shape_cast %133 : vector<1x4x128xf32> to vector<4x128xf32>
    %135 = arith.truncf %134 : vector<4x128xf32> to vector<4x128xbf16>
    %c12_157 = arith.constant 12 : index
    %c768_158 = arith.constant 768 : index
    %136 = vector.load %arg8[%c12_157, %c768_158] : memref<16x1152xbf16, #tpu.memory_space<vmem>>, vector<4x128xbf16>
    tpu.vector_store %arg8[%c12_157, %c768_158], %135 {strides = array<i32>} : memref<16x1152xbf16, #tpu.memory_space<vmem>>, vector<4x128xbf16>,
    %c2_159 = arith.constant 2 : index
    %c1_160 = arith.constant 1 : index
    %c0_161 = arith.constant 0 : index
    %137 = vector.load %arg7[%c2_159, %c1_160, %c0_161] : memref<6x6x128xf32, #tpu.memory_space<vmem>>, vector<1x4x128xf32>
    %138 = vector.shape_cast %137 : vector<1x4x128xf32> to vector<4x128xf32>
    %139 = arith.truncf %138 : vector<4x128xf32> to vector<4x128xbf16>
    %c0_162 = arith.constant 0 : index
    %c896 = arith.constant 896 : index
    %140 = vector.load %arg8[%c0_162, %c896] : memref<16x1152xbf16, #tpu.memory_space<vmem>>, vector<4x128xbf16>
    tpu.vector_store %arg8[%c0_162, %c896], %139 {strides = array<i32>} : memref<16x1152xbf16, #tpu.memory_space<vmem>>, vector<4x128xbf16>,
    %c3_163 = arith.constant 3 : index
    %c1_164 = arith.constant 1 : index
    %c0_165 = arith.constant 0 : index
    %141 = vector.load %arg7[%c3_163, %c1_164, %c0_165] : memref<6x6x128xf32, #tpu.memory_space<vmem>>, vector<1x4x128xf32>
    %142 = vector.shape_cast %141 : vector<1x4x128xf32> to vector<4x128xf32>
    %143 = arith.truncf %142 : vector<4x128xf32> to vector<4x128xbf16>
    %c4_166 = arith.constant 4 : index
    %c896_167 = arith.constant 896 : index
    %144 = vector.load %arg8[%c4_166, %c896_167] : memref<16x1152xbf16, #tpu.memory_space<vmem>>, vector<4x128xbf16>
    tpu.vector_store %arg8[%c4_166, %c896_167], %143 {strides = array<i32>} : memref<16x1152xbf16, #tpu.memory_space<vmem>>, vector<4x128xbf16>,
    %c4_168 = arith.constant 4 : index
    %c1_169 = arith.constant 1 : index
    %c0_170 = arith.constant 0 : index
    %145 = vector.load %arg7[%c4_168, %c1_169, %c0_170] : memref<6x6x128xf32, #tpu.memory_space<vmem>>, vector<1x4x128xf32>
    %146 = vector.shape_cast %145 : vector<1x4x128xf32> to vector<4x128xf32>
    %147 = arith.truncf %146 : vector<4x128xf32> to vector<4x128xbf16>
    %c8_171 = arith.constant 8 : index
    %c896_172 = arith.constant 896 : index
    %148 = vector.load %arg8[%c8_171, %c896_172] : memref<16x1152xbf16, #tpu.memory_space<vmem>>, vector<4x128xbf16>
    tpu.vector_store %arg8[%c8_171, %c896_172], %147 {strides = array<i32>} : memref<16x1152xbf16, #tpu.memory_space<vmem>>, vector<4x128xbf16>,
    %c5_173 = arith.constant 5 : index
    %c1_174 = arith.constant 1 : index
    %c0_175 = arith.constant 0 : index
    %149 = vector.load %arg7[%c5_173, %c1_174, %c0_175] : memref<6x6x128xf32, #tpu.memory_space<vmem>>, vector<1x4x128xf32>
    %150 = vector.shape_cast %149 : vector<1x4x128xf32> to vector<4x128xf32>
    %151 = arith.truncf %150 : vector<4x128xf32> to vector<4x128xbf16>
    %c12_176 = arith.constant 12 : index
    %c896_177 = arith.constant 896 : index
    %152 = vector.load %arg8[%c12_176, %c896_177] : memref<16x1152xbf16, #tpu.memory_space<vmem>>, vector<4x128xbf16>
    tpu.vector_store %arg8[%c12_176, %c896_177], %151 {strides = array<i32>} : memref<16x1152xbf16, #tpu.memory_space<vmem>>, vector<4x128xbf16>,
    %c2_178 = arith.constant 2 : index
    %c2_179 = arith.constant 2 : index
    %c0_180 = arith.constant 0 : index
    %153 = vector.load %arg7[%c2_178, %c2_179, %c0_180] : memref<6x6x128xf32, #tpu.memory_space<vmem>>, vector<1x4x128xf32>
    %154 = vector.shape_cast %153 : vector<1x4x128xf32> to vector<4x128xf32>
    %155 = arith.truncf %154 : vector<4x128xf32> to vector<4x128xbf16>
    %c0_181 = arith.constant 0 : index
    %c1024 = arith.constant 1024 : index
    %156 = vector.load %arg8[%c0_181, %c1024] : memref<16x1152xbf16, #tpu.memory_space<vmem>>, vector<4x128xbf16>
    tpu.vector_store %arg8[%c0_181, %c1024], %155 {strides = array<i32>} : memref<16x1152xbf16, #tpu.memory_space<vmem>>, vector<4x128xbf16>,
    %c3_182 = arith.constant 3 : index
    %c2_183 = arith.constant 2 : index
    %c0_184 = arith.constant 0 : index
    %157 = vector.load %arg7[%c3_182, %c2_183, %c0_184] : memref<6x6x128xf32, #tpu.memory_space<vmem>>, vector<1x4x128xf32>
    %158 = vector.shape_cast %157 : vector<1x4x128xf32> to vector<4x128xf32>
    %159 = arith.truncf %158 : vector<4x128xf32> to vector<4x128xbf16>
    %c4_185 = arith.constant 4 : index
    %c1024_186 = arith.constant 1024 : index
    %160 = vector.load %arg8[%c4_185, %c1024_186] : memref<16x1152xbf16, #tpu.memory_space<vmem>>, vector<4x128xbf16>
    tpu.vector_store %arg8[%c4_185, %c1024_186], %159 {strides = array<i32>} : memref<16x1152xbf16, #tpu.memory_space<vmem>>, vector<4x128xbf16>,
    %c4_187 = arith.constant 4 : index
    %c2_188 = arith.constant 2 : index
    %c0_189 = arith.constant 0 : index
    %161 = vector.load %arg7[%c4_187, %c2_188, %c0_189] : memref<6x6x128xf32, #tpu.memory_space<vmem>>, vector<1x4x128xf32>
    %162 = vector.shape_cast %161 : vector<1x4x128xf32> to vector<4x128xf32>
    %163 = arith.truncf %162 : vector<4x128xf32> to vector<4x128xbf16>
    %c8_190 = arith.constant 8 : index
    %c1024_191 = arith.constant 1024 : index
    %164 = vector.load %arg8[%c8_190, %c1024_191] : memref<16x1152xbf16, #tpu.memory_space<vmem>>, vector<4x128xbf16>
    tpu.vector_store %arg8[%c8_190, %c1024_191], %163 {strides = array<i32>} : memref<16x1152xbf16, #tpu.memory_space<vmem>>, vector<4x128xbf16>,
    %c5_192 = arith.constant 5 : index
    %c2_193 = arith.constant 2 : index
    %c0_194 = arith.constant 0 : index
    %165 = vector.load %arg7[%c5_192, %c2_193, %c0_194] : memref<6x6x128xf32, #tpu.memory_space<vmem>>, vector<1x4x128xf32>
    %166 = vector.shape_cast %165 : vector<1x4x128xf32> to vector<4x128xf32>
    %167 = arith.truncf %166 : vector<4x128xf32> to vector<4x128xbf16>
    %c12_195 = arith.constant 12 : index
    %c1024_196 = arith.constant 1024 : index
    %168 = vector.load %arg8[%c12_195, %c1024_196] : memref<16x1152xbf16, #tpu.memory_space<vmem>>, vector<4x128xbf16>
    tpu.vector_store %arg8[%c12_195, %c1024_196], %167 {strides = array<i32>} : memref<16x1152xbf16, #tpu.memory_space<vmem>>, vector<4x128xbf16>,
    %c0_197 = arith.constant 0 : index
    %c0_198 = arith.constant 0 : index
    %169 = vector.load %arg8[%c0_197, %c0_198] : memref<16x1152xbf16, #tpu.memory_space<vmem>>, vector<16x1152xbf16>
    %c0_199 = arith.constant 0 : index
    %c0_200 = arith.constant 0 : index
    %170 = vector.load %arg2[%c0_199, %c0_200] : memref<1152x128xbf16, #tpu.memory_space<vmem>>, vector<1152x128xbf16>
    %cst = arith.constant dense<0.000000e+00> : vector<16x128xf32>
    %171 = tpu.matmul %169, %170, %cst {dimension_numbers = #tpu.dot_dimension_numbers<[1], [0], [0], [1], [0, 0, 1, 1], [], []>} : vector<16x1152xbf16>, vector<1152x128xbf16>, vector<16x128xf32> -> vector<16x128xf32>
    %c0_201 = arith.constant 0 : index
    %c0_202 = arith.constant 0 : index
    %172 = vector.load %arg3[%c0_201, %c0_202] : memref<1x128xf32, #tpu.memory_space<vmem>>, vector<1x128xf32>
    %173 = vector.broadcast %172 : vector<1x128xf32> to vector<16x128xf32>
    %174 = arith.addf %171, %173 : vector<16x128xf32>
    %cst_203 = arith.constant 0.000000e+00 : f32
    %175 = vector.broadcast %cst_203 : f32 to vector<16x128xf32>
    %176 = arith.cmpf ogt, %174, %175 : vector<16x128xf32>
    %cst_204 = arith.constant 0.000000e+00 : f32
    %177 = vector.broadcast %cst_204 : f32 to vector<16x128xf32>
    %178 = arith.minimumf %174, %177 : vector<16x128xf32>
    %179 = math.exp %178 : vector<16x128xf32>
    %cst_205 = arith.constant 1.000000e+00 : f32
    %180 = vector.broadcast %cst_205 : f32 to vector<16x128xf32>
    %181 = arith.subf %179, %180 : vector<16x128xf32>
    %182 = arith.select %176, %174, %181 : vector<16x128xi1>, vector<16x128xf32>
    %183 = vector.extract_strided_slice %182 {offsets = [0, 0], sizes = [4, 128], strides = [1, 1]} : vector<16x128xf32> to vector<4x128xf32>
    %184 = vector.shape_cast %183 : vector<4x128xf32> to vector<1x4x128xf32>
    %c1_206 = arith.constant 1 : index
    %c1_207 = arith.constant 1 : index
    %c0_208 = arith.constant 0 : index
    %185 = vector.load %arg7[%c1_206, %c1_207, %c0_208] : memref<6x6x128xf32, #tpu.memory_space<vmem>>, vector<1x4x128xf32>
    tpu.vector_store %arg7[%c1_206, %c1_207, %c0_208], %184 {strides = array<i32>} : memref<6x6x128xf32, #tpu.memory_space<vmem>>, vector<1x4x128xf32>,
    %186 = vector.extract_strided_slice %182 {offsets = [4, 0], sizes = [4, 128], strides = [1, 1]} : vector<16x128xf32> to vector<4x128xf32>
    %187 = vector.shape_cast %186 : vector<4x128xf32> to vector<1x4x128xf32>
    %c2_209 = arith.constant 2 : index
    %c1_210 = arith.constant 1 : index
    %c0_211 = arith.constant 0 : index
    %188 = vector.load %arg7[%c2_209, %c1_210, %c0_211] : memref<6x6x128xf32, #tpu.memory_space<vmem>>, vector<1x4x128xf32>
    tpu.vector_store %arg7[%c2_209, %c1_210, %c0_211], %187 {strides = array<i32>} : memref<6x6x128xf32, #tpu.memory_space<vmem>>, vector<1x4x128xf32>,
    %189 = vector.extract_strided_slice %182 {offsets = [8, 0], sizes = [4, 128], strides = [1, 1]} : vector<16x128xf32> to vector<4x128xf32>
    %190 = vector.shape_cast %189 : vector<4x128xf32> to vector<1x4x128xf32>
    %c3_212 = arith.constant 3 : index
    %c1_213 = arith.constant 1 : index
    %c0_214 = arith.constant 0 : index
    %191 = vector.load %arg7[%c3_212, %c1_213, %c0_214] : memref<6x6x128xf32, #tpu.memory_space<vmem>>, vector<1x4x128xf32>
    tpu.vector_store %arg7[%c3_212, %c1_213, %c0_214], %190 {strides = array<i32>} : memref<6x6x128xf32, #tpu.memory_space<vmem>>, vector<1x4x128xf32>,
    %192 = vector.extract_strided_slice %182 {offsets = [12, 0], sizes = [4, 128], strides = [1, 1]} : vector<16x128xf32> to vector<4x128xf32>
    %193 = vector.shape_cast %192 : vector<4x128xf32> to vector<1x4x128xf32>
    %c4_215 = arith.constant 4 : index
    %c1_216 = arith.constant 1 : index
    %c0_217 = arith.constant 0 : index
    %194 = vector.load %arg7[%c4_215, %c1_216, %c0_217] : memref<6x6x128xf32, #tpu.memory_space<vmem>>, vector<1x4x128xf32>
    tpu.vector_store %arg7[%c4_215, %c1_216, %c0_217], %193 {strides = array<i32>} : memref<6x6x128xf32, #tpu.memory_space<vmem>>, vector<1x4x128xf32>,
    %195 = vector.extract_strided_slice %182 {offsets = [4, 0], sizes = [4, 128], strides = [1, 1]} : vector<16x128xf32> to vector<4x128xf32>
    %196 = vector.shape_cast %195 : vector<4x128xf32> to vector<1x4x128xf32>
    %c0_218 = arith.constant 0 : index
    %c1_219 = arith.constant 1 : index
    %c0_220 = arith.constant 0 : index
    %197 = vector.load %arg7[%c0_218, %c1_219, %c0_220] : memref<6x6x128xf32, #tpu.memory_space<vmem>>, vector<1x4x128xf32>
    tpu.vector_store %arg7[%c0_218, %c1_219, %c0_220], %196 {strides = array<i32>} : memref<6x6x128xf32, #tpu.memory_space<vmem>>, vector<1x4x128xf32>,
    %198 = vector.extract_strided_slice %182 {offsets = [8, 0], sizes = [4, 128], strides = [1, 1]} : vector<16x128xf32> to vector<4x128xf32>
    %199 = vector.shape_cast %198 : vector<4x128xf32> to vector<1x4x128xf32>
    %c5_221 = arith.constant 5 : index
    %c1_222 = arith.constant 1 : index
    %c0_223 = arith.constant 0 : index
    %200 = vector.load %arg7[%c5_221, %c1_222, %c0_223] : memref<6x6x128xf32, #tpu.memory_space<vmem>>, vector<1x4x128xf32>
    tpu.vector_store %arg7[%c5_221, %c1_222, %c0_223], %199 {strides = array<i32>} : memref<6x6x128xf32, #tpu.memory_space<vmem>>, vector<1x4x128xf32>,
    %c0_224 = arith.constant 0 : index
    %c2_225 = arith.constant 2 : index
    %c0_226 = arith.constant 0 : index
    %201 = vector.load %arg7[%c0_224, %c2_225, %c0_226] : memref<6x6x128xf32, #tpu.memory_space<vmem>>, vector<6x1x128xf32>
    %c0_227 = arith.constant 0 : index
    %c0_228 = arith.constant 0 : index
    %c0_229 = arith.constant 0 : index
    %202 = vector.load %arg7[%c0_227, %c0_228, %c0_229] : memref<6x6x128xf32, #tpu.memory_space<vmem>>, vector<6x1x128xf32>
    tpu.vector_store %arg7[%c0_227, %c0_228, %c0_229], %201 {strides = array<i32>} : memref<6x6x128xf32, #tpu.memory_space<vmem>>, vector<6x1x128xf32>,
    %c0_230 = arith.constant 0 : index
    %c3_231 = arith.constant 3 : index
    %c0_232 = arith.constant 0 : index
    %203 = vector.load %arg7[%c0_230, %c3_231, %c0_232] : memref<6x6x128xf32, #tpu.memory_space<vmem>>, vector<6x1x128xf32>
    %c0_233 = arith.constant 0 : index
    %c5_234 = arith.constant 5 : index
    %c0_235 = arith.constant 0 : index
    %204 = vector.load %arg7[%c0_233, %c5_234, %c0_235] : memref<6x6x128xf32, #tpu.memory_space<vmem>>, vector<6x1x128xf32>
    tpu.vector_store %arg7[%c0_233, %c5_234, %c0_235], %203 {strides = array<i32>} : memref<6x6x128xf32, #tpu.memory_space<vmem>>, vector<6x1x128xf32>,
    %c0_236 = arith.constant 0 : index
    %c0_237 = arith.constant 0 : index
    %c0_238 = arith.constant 0 : index
    %205 = vector.load %arg7[%c0_236, %c0_237, %c0_238] : memref<6x6x128xf32, #tpu.memory_space<vmem>>, vector<1x4x128xf32>
    %206 = vector.shape_cast %205 : vector<1x4x128xf32> to vector<4x128xf32>
    %207 = arith.truncf %206 : vector<4x128xf32> to vector<4x128xbf16>
    %c0_239 = arith.constant 0 : index
    %c0_240 = arith.constant 0 : index
    %208 = vector.load %arg8[%c0_239, %c0_240] : memref<16x1152xbf16, #tpu.memory_space<vmem>>, vector<4x128xbf16>
    tpu.vector_store %arg8[%c0_239, %c0_240], %207 {strides = array<i32>} : memref<16x1152xbf16, #tpu.memory_space<vmem>>, vector<4x128xbf16>,
    %c1_241 = arith.constant 1 : index
    %c0_242 = arith.constant 0 : index
    %c0_243 = arith.constant 0 : index
    %209 = vector.load %arg7[%c1_241, %c0_242, %c0_243] : memref<6x6x128xf32, #tpu.memory_space<vmem>>, vector<1x4x128xf32>
    %210 = vector.shape_cast %209 : vector<1x4x128xf32> to vector<4x128xf32>
    %211 = arith.truncf %210 : vector<4x128xf32> to vector<4x128xbf16>
    %c4_244 = arith.constant 4 : index
    %c0_245 = arith.constant 0 : index
    %212 = vector.load %arg8[%c4_244, %c0_245] : memref<16x1152xbf16, #tpu.memory_space<vmem>>, vector<4x128xbf16>
    tpu.vector_store %arg8[%c4_244, %c0_245], %211 {strides = array<i32>} : memref<16x1152xbf16, #tpu.memory_space<vmem>>, vector<4x128xbf16>,
    %c2_246 = arith.constant 2 : index
    %c0_247 = arith.constant 0 : index
    %c0_248 = arith.constant 0 : index
    %213 = vector.load %arg7[%c2_246, %c0_247, %c0_248] : memref<6x6x128xf32, #tpu.memory_space<vmem>>, vector<1x4x128xf32>
    %214 = vector.shape_cast %213 : vector<1x4x128xf32> to vector<4x128xf32>
    %215 = arith.truncf %214 : vector<4x128xf32> to vector<4x128xbf16>
    %c8_249 = arith.constant 8 : index
    %c0_250 = arith.constant 0 : index
    %216 = vector.load %arg8[%c8_249, %c0_250] : memref<16x1152xbf16, #tpu.memory_space<vmem>>, vector<4x128xbf16>
    tpu.vector_store %arg8[%c8_249, %c0_250], %215 {strides = array<i32>} : memref<16x1152xbf16, #tpu.memory_space<vmem>>, vector<4x128xbf16>,
    %c3_251 = arith.constant 3 : index
    %c0_252 = arith.constant 0 : index
    %c0_253 = arith.constant 0 : index
    %217 = vector.load %arg7[%c3_251, %c0_252, %c0_253] : memref<6x6x128xf32, #tpu.memory_space<vmem>>, vector<1x4x128xf32>
    %218 = vector.shape_cast %217 : vector<1x4x128xf32> to vector<4x128xf32>
    %219 = arith.truncf %218 : vector<4x128xf32> to vector<4x128xbf16>
    %c12_254 = arith.constant 12 : index
    %c0_255 = arith.constant 0 : index
    %220 = vector.load %arg8[%c12_254, %c0_255] : memref<16x1152xbf16, #tpu.memory_space<vmem>>, vector<4x128xbf16>
    tpu.vector_store %arg8[%c12_254, %c0_255], %219 {strides = array<i32>} : memref<16x1152xbf16, #tpu.memory_space<vmem>>, vector<4x128xbf16>,
    %c0_256 = arith.constant 0 : index
    %c1_257 = arith.constant 1 : index
    %c0_258 = arith.constant 0 : index
    %221 = vector.load %arg7[%c0_256, %c1_257, %c0_258] : memref<6x6x128xf32, #tpu.memory_space<vmem>>, vector<1x4x128xf32>
    %222 = vector.shape_cast %221 : vector<1x4x128xf32> to vector<4x128xf32>
    %223 = arith.truncf %222 : vector<4x128xf32> to vector<4x128xbf16>
    %c0_259 = arith.constant 0 : index
    %c128_260 = arith.constant 128 : index
    %224 = vector.load %arg8[%c0_259, %c128_260] : memref<16x1152xbf16, #tpu.memory_space<vmem>>, vector<4x128xbf16>
    tpu.vector_store %arg8[%c0_259, %c128_260], %223 {strides = array<i32>} : memref<16x1152xbf16, #tpu.memory_space<vmem>>, vector<4x128xbf16>,
    %c1_261 = arith.constant 1 : index
    %c1_262 = arith.constant 1 : index
    %c0_263 = arith.constant 0 : index
    %225 = vector.load %arg7[%c1_261, %c1_262, %c0_263] : memref<6x6x128xf32, #tpu.memory_space<vmem>>, vector<1x4x128xf32>
    %226 = vector.shape_cast %225 : vector<1x4x128xf32> to vector<4x128xf32>
    %227 = arith.truncf %226 : vector<4x128xf32> to vector<4x128xbf16>
    %c4_264 = arith.constant 4 : index
    %c128_265 = arith.constant 128 : index
    %228 = vector.load %arg8[%c4_264, %c128_265] : memref<16x1152xbf16, #tpu.memory_space<vmem>>, vector<4x128xbf16>
    tpu.vector_store %arg8[%c4_264, %c128_265], %227 {strides = array<i32>} : memref<16x1152xbf16, #tpu.memory_space<vmem>>, vector<4x128xbf16>,
    %c2_266 = arith.constant 2 : index
    %c1_267 = arith.constant 1 : index
    %c0_268 = arith.constant 0 : index
    %229 = vector.load %arg7[%c2_266, %c1_267, %c0_268] : memref<6x6x128xf32, #tpu.memory_space<vmem>>, vector<1x4x128xf32>
    %230 = vector.shape_cast %229 : vector<1x4x128xf32> to vector<4x128xf32>
    %231 = arith.truncf %230 : vector<4x128xf32> to vector<4x128xbf16>
    %c8_269 = arith.constant 8 : index
    %c128_270 = arith.constant 128 : index
    %232 = vector.load %arg8[%c8_269, %c128_270] : memref<16x1152xbf16, #tpu.memory_space<vmem>>, vector<4x128xbf16>
    tpu.vector_store %arg8[%c8_269, %c128_270], %231 {strides = array<i32>} : memref<16x1152xbf16, #tpu.memory_space<vmem>>, vector<4x128xbf16>,
    %c3_271 = arith.constant 3 : index
    %c1_272 = arith.constant 1 : index
    %c0_273 = arith.constant 0 : index
    %233 = vector.load %arg7[%c3_271, %c1_272, %c0_273] : memref<6x6x128xf32, #tpu.memory_space<vmem>>, vector<1x4x128xf32>
    %234 = vector.shape_cast %233 : vector<1x4x128xf32> to vector<4x128xf32>
    %235 = arith.truncf %234 : vector<4x128xf32> to vector<4x128xbf16>
    %c12_274 = arith.constant 12 : index
    %c128_275 = arith.constant 128 : index
    %236 = vector.load %arg8[%c12_274, %c128_275] : memref<16x1152xbf16, #tpu.memory_space<vmem>>, vector<4x128xbf16>
    tpu.vector_store %arg8[%c12_274, %c128_275], %235 {strides = array<i32>} : memref<16x1152xbf16, #tpu.memory_space<vmem>>, vector<4x128xbf16>,
    %c0_276 = arith.constant 0 : index
    %c2_277 = arith.constant 2 : index
    %c0_278 = arith.constant 0 : index
    %237 = vector.load %arg7[%c0_276, %c2_277, %c0_278] : memref<6x6x128xf32, #tpu.memory_space<vmem>>, vector<1x4x128xf32>
    %238 = vector.shape_cast %237 : vector<1x4x128xf32> to vector<4x128xf32>
    %239 = arith.truncf %238 : vector<4x128xf32> to vector<4x128xbf16>
    %c0_279 = arith.constant 0 : index
    %c256_280 = arith.constant 256 : index
    %240 = vector.load %arg8[%c0_279, %c256_280] : memref<16x1152xbf16, #tpu.memory_space<vmem>>, vector<4x128xbf16>
    tpu.vector_store %arg8[%c0_279, %c256_280], %239 {strides = array<i32>} : memref<16x1152xbf16, #tpu.memory_space<vmem>>, vector<4x128xbf16>,
    %c1_281 = arith.constant 1 : index
    %c2_282 = arith.constant 2 : index
    %c0_283 = arith.constant 0 : index
    %241 = vector.load %arg7[%c1_281, %c2_282, %c0_283] : memref<6x6x128xf32, #tpu.memory_space<vmem>>, vector<1x4x128xf32>
    %242 = vector.shape_cast %241 : vector<1x4x128xf32> to vector<4x128xf32>
    %243 = arith.truncf %242 : vector<4x128xf32> to vector<4x128xbf16>
    %c4_284 = arith.constant 4 : index
    %c256_285 = arith.constant 256 : index
    %244 = vector.load %arg8[%c4_284, %c256_285] : memref<16x1152xbf16, #tpu.memory_space<vmem>>, vector<4x128xbf16>
    tpu.vector_store %arg8[%c4_284, %c256_285], %243 {strides = array<i32>} : memref<16x1152xbf16, #tpu.memory_space<vmem>>, vector<4x128xbf16>,
    %c2_286 = arith.constant 2 : index
    %c2_287 = arith.constant 2 : index
    %c0_288 = arith.constant 0 : index
    %245 = vector.load %arg7[%c2_286, %c2_287, %c0_288] : memref<6x6x128xf32, #tpu.memory_space<vmem>>, vector<1x4x128xf32>
    %246 = vector.shape_cast %245 : vector<1x4x128xf32> to vector<4x128xf32>
    %247 = arith.truncf %246 : vector<4x128xf32> to vector<4x128xbf16>
    %c8_289 = arith.constant 8 : index
    %c256_290 = arith.constant 256 : index
    %248 = vector.load %arg8[%c8_289, %c256_290] : memref<16x1152xbf16, #tpu.memory_space<vmem>>, vector<4x128xbf16>
    tpu.vector_store %arg8[%c8_289, %c256_290], %247 {strides = array<i32>} : memref<16x1152xbf16, #tpu.memory_space<vmem>>, vector<4x128xbf16>,
    %c3_291 = arith.constant 3 : index
    %c2_292 = arith.constant 2 : index
    %c0_293 = arith.constant 0 : index
    %249 = vector.load %arg7[%c3_291, %c2_292, %c0_293] : memref<6x6x128xf32, #tpu.memory_space<vmem>>, vector<1x4x128xf32>
    %250 = vector.shape_cast %249 : vector<1x4x128xf32> to vector<4x128xf32>
    %251 = arith.truncf %250 : vector<4x128xf32> to vector<4x128xbf16>
    %c12_294 = arith.constant 12 : index
    %c256_295 = arith.constant 256 : index
    %252 = vector.load %arg8[%c12_294, %c256_295] : memref<16x1152xbf16, #tpu.memory_space<vmem>>, vector<4x128xbf16>
    tpu.vector_store %arg8[%c12_294, %c256_295], %251 {strides = array<i32>} : memref<16x1152xbf16, #tpu.memory_space<vmem>>, vector<4x128xbf16>,
    %c1_296 = arith.constant 1 : index
    %c0_297 = arith.constant 0 : index
    %c0_298 = arith.constant 0 : index
    %253 = vector.load %arg7[%c1_296, %c0_297, %c0_298] : memref<6x6x128xf32, #tpu.memory_space<vmem>>, vector<1x4x128xf32>
    %254 = vector.shape_cast %253 : vector<1x4x128xf32> to vector<4x128xf32>
    %255 = arith.truncf %254 : vector<4x128xf32> to vector<4x128xbf16>
    %c0_299 = arith.constant 0 : index
    %c384_300 = arith.constant 384 : index
    %256 = vector.load %arg8[%c0_299, %c384_300] : memref<16x1152xbf16, #tpu.memory_space<vmem>>, vector<4x128xbf16>
    tpu.vector_store %arg8[%c0_299, %c384_300], %255 {strides = array<i32>} : memref<16x1152xbf16, #tpu.memory_space<vmem>>, vector<4x128xbf16>,
    %c2_301 = arith.constant 2 : index
    %c0_302 = arith.constant 0 : index
    %c0_303 = arith.constant 0 : index
    %257 = vector.load %arg7[%c2_301, %c0_302, %c0_303] : memref<6x6x128xf32, #tpu.memory_space<vmem>>, vector<1x4x128xf32>
    %258 = vector.shape_cast %257 : vector<1x4x128xf32> to vector<4x128xf32>
    %259 = arith.truncf %258 : vector<4x128xf32> to vector<4x128xbf16>
    %c4_304 = arith.constant 4 : index
    %c384_305 = arith.constant 384 : index
    %260 = vector.load %arg8[%c4_304, %c384_305] : memref<16x1152xbf16, #tpu.memory_space<vmem>>, vector<4x128xbf16>
    tpu.vector_store %arg8[%c4_304, %c384_305], %259 {strides = array<i32>} : memref<16x1152xbf16, #tpu.memory_space<vmem>>, vector<4x128xbf16>,
    %c3_306 = arith.constant 3 : index
    %c0_307 = arith.constant 0 : index
    %c0_308 = arith.constant 0 : index
    %261 = vector.load %arg7[%c3_306, %c0_307, %c0_308] : memref<6x6x128xf32, #tpu.memory_space<vmem>>, vector<1x4x128xf32>
    %262 = vector.shape_cast %261 : vector<1x4x128xf32> to vector<4x128xf32>
    %263 = arith.truncf %262 : vector<4x128xf32> to vector<4x128xbf16>
    %c8_309 = arith.constant 8 : index
    %c384_310 = arith.constant 384 : index
    %264 = vector.load %arg8[%c8_309, %c384_310] : memref<16x1152xbf16, #tpu.memory_space<vmem>>, vector<4x128xbf16>
    tpu.vector_store %arg8[%c8_309, %c384_310], %263 {strides = array<i32>} : memref<16x1152xbf16, #tpu.memory_space<vmem>>, vector<4x128xbf16>,
    %c4_311 = arith.constant 4 : index
    %c0_312 = arith.constant 0 : index
    %c0_313 = arith.constant 0 : index
    %265 = vector.load %arg7[%c4_311, %c0_312, %c0_313] : memref<6x6x128xf32, #tpu.memory_space<vmem>>, vector<1x4x128xf32>
    %266 = vector.shape_cast %265 : vector<1x4x128xf32> to vector<4x128xf32>
    %267 = arith.truncf %266 : vector<4x128xf32> to vector<4x128xbf16>
    %c12_314 = arith.constant 12 : index
    %c384_315 = arith.constant 384 : index
    %268 = vector.load %arg8[%c12_314, %c384_315] : memref<16x1152xbf16, #tpu.memory_space<vmem>>, vector<4x128xbf16>
    tpu.vector_store %arg8[%c12_314, %c384_315], %267 {strides = array<i32>} : memref<16x1152xbf16, #tpu.memory_space<vmem>>, vector<4x128xbf16>,
    %c1_316 = arith.constant 1 : index
    %c1_317 = arith.constant 1 : index
    %c0_318 = arith.constant 0 : index
    %269 = vector.load %arg7[%c1_316, %c1_317, %c0_318] : memref<6x6x128xf32, #tpu.memory_space<vmem>>, vector<1x4x128xf32>
    %270 = vector.shape_cast %269 : vector<1x4x128xf32> to vector<4x128xf32>
    %271 = arith.truncf %270 : vector<4x128xf32> to vector<4x128xbf16>
    %c0_319 = arith.constant 0 : index
    %c512_320 = arith.constant 512 : index
    %272 = vector.load %arg8[%c0_319, %c512_320] : memref<16x1152xbf16, #tpu.memory_space<vmem>>, vector<4x128xbf16>
    tpu.vector_store %arg8[%c0_319, %c512_320], %271 {strides = array<i32>} : memref<16x1152xbf16, #tpu.memory_space<vmem>>, vector<4x128xbf16>,
    %c2_321 = arith.constant 2 : index
    %c1_322 = arith.constant 1 : index
    %c0_323 = arith.constant 0 : index
    %273 = vector.load %arg7[%c2_321, %c1_322, %c0_323] : memref<6x6x128xf32, #tpu.memory_space<vmem>>, vector<1x4x128xf32>
    %274 = vector.shape_cast %273 : vector<1x4x128xf32> to vector<4x128xf32>
    %275 = arith.truncf %274 : vector<4x128xf32> to vector<4x128xbf16>
    %c4_324 = arith.constant 4 : index
    %c512_325 = arith.constant 512 : index
    %276 = vector.load %arg8[%c4_324, %c512_325] : memref<16x1152xbf16, #tpu.memory_space<vmem>>, vector<4x128xbf16>
    tpu.vector_store %arg8[%c4_324, %c512_325], %275 {strides = array<i32>} : memref<16x1152xbf16, #tpu.memory_space<vmem>>, vector<4x128xbf16>,
    %c3_326 = arith.constant 3 : index
    %c1_327 = arith.constant 1 : index
    %c0_328 = arith.constant 0 : index
    %277 = vector.load %arg7[%c3_326, %c1_327, %c0_328] : memref<6x6x128xf32, #tpu.memory_space<vmem>>, vector<1x4x128xf32>
    %278 = vector.shape_cast %277 : vector<1x4x128xf32> to vector<4x128xf32>
    %279 = arith.truncf %278 : vector<4x128xf32> to vector<4x128xbf16>
    %c8_329 = arith.constant 8 : index
    %c512_330 = arith.constant 512 : index
    %280 = vector.load %arg8[%c8_329, %c512_330] : memref<16x1152xbf16, #tpu.memory_space<vmem>>, vector<4x128xbf16>
    tpu.vector_store %arg8[%c8_329, %c512_330], %279 {strides = array<i32>} : memref<16x1152xbf16, #tpu.memory_space<vmem>>, vector<4x128xbf16>,
    %c4_331 = arith.constant 4 : index
    %c1_332 = arith.constant 1 : index
    %c0_333 = arith.constant 0 : index
    %281 = vector.load %arg7[%c4_331, %c1_332, %c0_333] : memref<6x6x128xf32, #tpu.memory_space<vmem>>, vector<1x4x128xf32>
    %282 = vector.shape_cast %281 : vector<1x4x128xf32> to vector<4x128xf32>
    %283 = arith.truncf %282 : vector<4x128xf32> to vector<4x128xbf16>
    %c12_334 = arith.constant 12 : index
    %c512_335 = arith.constant 512 : index
    %284 = vector.load %arg8[%c12_334, %c512_335] : memref<16x1152xbf16, #tpu.memory_space<vmem>>, vector<4x128xbf16>
    tpu.vector_store %arg8[%c12_334, %c512_335], %283 {strides = array<i32>} : memref<16x1152xbf16, #tpu.memory_space<vmem>>, vector<4x128xbf16>,
    %c1_336 = arith.constant 1 : index
    %c2_337 = arith.constant 2 : index
    %c0_338 = arith.constant 0 : index
    %285 = vector.load %arg7[%c1_336, %c2_337, %c0_338] : memref<6x6x128xf32, #tpu.memory_space<vmem>>, vector<1x4x128xf32>
    %286 = vector.shape_cast %285 : vector<1x4x128xf32> to vector<4x128xf32>
    %287 = arith.truncf %286 : vector<4x128xf32> to vector<4x128xbf16>
    %c0_339 = arith.constant 0 : index
    %c640_340 = arith.constant 640 : index
    %288 = vector.load %arg8[%c0_339, %c640_340] : memref<16x1152xbf16, #tpu.memory_space<vmem>>, vector<4x128xbf16>
    tpu.vector_store %arg8[%c0_339, %c640_340], %287 {strides = array<i32>} : memref<16x1152xbf16, #tpu.memory_space<vmem>>, vector<4x128xbf16>,
    %c2_341 = arith.constant 2 : index
    %c2_342 = arith.constant 2 : index
    %c0_343 = arith.constant 0 : index
    %289 = vector.load %arg7[%c2_341, %c2_342, %c0_343] : memref<6x6x128xf32, #tpu.memory_space<vmem>>, vector<1x4x128xf32>
    %290 = vector.shape_cast %289 : vector<1x4x128xf32> to vector<4x128xf32>
    %291 = arith.truncf %290 : vector<4x128xf32> to vector<4x128xbf16>
    %c4_344 = arith.constant 4 : index
    %c640_345 = arith.constant 640 : index
    %292 = vector.load %arg8[%c4_344, %c640_345] : memref<16x1152xbf16, #tpu.memory_space<vmem>>, vector<4x128xbf16>
    tpu.vector_store %arg8[%c4_344, %c640_345], %291 {strides = array<i32>} : memref<16x1152xbf16, #tpu.memory_space<vmem>>, vector<4x128xbf16>,
    %c3_346 = arith.constant 3 : index
    %c2_347 = arith.constant 2 : index
    %c0_348 = arith.constant 0 : index
    %293 = vector.load %arg7[%c3_346, %c2_347, %c0_348] : memref<6x6x128xf32, #tpu.memory_space<vmem>>, vector<1x4x128xf32>
    %294 = vector.shape_cast %293 : vector<1x4x128xf32> to vector<4x128xf32>
    %295 = arith.truncf %294 : vector<4x128xf32> to vector<4x128xbf16>
    %c8_349 = arith.constant 8 : index
    %c640_350 = arith.constant 640 : index
    %296 = vector.load %arg8[%c8_349, %c640_350] : memref<16x1152xbf16, #tpu.memory_space<vmem>>, vector<4x128xbf16>
    tpu.vector_store %arg8[%c8_349, %c640_350], %295 {strides = array<i32>} : memref<16x1152xbf16, #tpu.memory_space<vmem>>, vector<4x128xbf16>,
    %c4_351 = arith.constant 4 : index
    %c2_352 = arith.constant 2 : index
    %c0_353 = arith.constant 0 : index
    %297 = vector.load %arg7[%c4_351, %c2_352, %c0_353] : memref<6x6x128xf32, #tpu.memory_space<vmem>>, vector<1x4x128xf32>
    %298 = vector.shape_cast %297 : vector<1x4x128xf32> to vector<4x128xf32>
    %299 = arith.truncf %298 : vector<4x128xf32> to vector<4x128xbf16>
    %c12_354 = arith.constant 12 : index
    %c640_355 = arith.constant 640 : index
    %300 = vector.load %arg8[%c12_354, %c640_355] : memref<16x1152xbf16, #tpu.memory_space<vmem>>, vector<4x128xbf16>
    tpu.vector_store %arg8[%c12_354, %c640_355], %299 {strides = array<i32>} : memref<16x1152xbf16, #tpu.memory_space<vmem>>, vector<4x128xbf16>,
    %c2_356 = arith.constant 2 : index
    %c0_357 = arith.constant 0 : index
    %c0_358 = arith.constant 0 : index
    %301 = vector.load %arg7[%c2_356, %c0_357, %c0_358] : memref<6x6x128xf32, #tpu.memory_space<vmem>>, vector<1x4x128xf32>
    %302 = vector.shape_cast %301 : vector<1x4x128xf32> to vector<4x128xf32>
    %303 = arith.truncf %302 : vector<4x128xf32> to vector<4x128xbf16>
    %c0_359 = arith.constant 0 : index
    %c768_360 = arith.constant 768 : index
    %304 = vector.load %arg8[%c0_359, %c768_360] : memref<16x1152xbf16, #tpu.memory_space<vmem>>, vector<4x128xbf16>
    tpu.vector_store %arg8[%c0_359, %c768_360], %303 {strides = array<i32>} : memref<16x1152xbf16, #tpu.memory_space<vmem>>, vector<4x128xbf16>,
    %c3_361 = arith.constant 3 : index
    %c0_362 = arith.constant 0 : index
    %c0_363 = arith.constant 0 : index
    %305 = vector.load %arg7[%c3_361, %c0_362, %c0_363] : memref<6x6x128xf32, #tpu.memory_space<vmem>>, vector<1x4x128xf32>
    %306 = vector.shape_cast %305 : vector<1x4x128xf32> to vector<4x128xf32>
    %307 = arith.truncf %306 : vector<4x128xf32> to vector<4x128xbf16>
    %c4_364 = arith.constant 4 : index
    %c768_365 = arith.constant 768 : index
    %308 = vector.load %arg8[%c4_364, %c768_365] : memref<16x1152xbf16, #tpu.memory_space<vmem>>, vector<4x128xbf16>
    tpu.vector_store %arg8[%c4_364, %c768_365], %307 {strides = array<i32>} : memref<16x1152xbf16, #tpu.memory_space<vmem>>, vector<4x128xbf16>,
    %c4_366 = arith.constant 4 : index
    %c0_367 = arith.constant 0 : index
    %c0_368 = arith.constant 0 : index
    %309 = vector.load %arg7[%c4_366, %c0_367, %c0_368] : memref<6x6x128xf32, #tpu.memory_space<vmem>>, vector<1x4x128xf32>
    %310 = vector.shape_cast %309 : vector<1x4x128xf32> to vector<4x128xf32>
    %311 = arith.truncf %310 : vector<4x128xf32> to vector<4x128xbf16>
    %c8_369 = arith.constant 8 : index
    %c768_370 = arith.constant 768 : index
    %312 = vector.load %arg8[%c8_369, %c768_370] : memref<16x1152xbf16, #tpu.memory_space<vmem>>, vector<4x128xbf16>
    tpu.vector_store %arg8[%c8_369, %c768_370], %311 {strides = array<i32>} : memref<16x1152xbf16, #tpu.memory_space<vmem>>, vector<4x128xbf16>,
    %c5_371 = arith.constant 5 : index
    %c0_372 = arith.constant 0 : index
    %c0_373 = arith.constant 0 : index
    %313 = vector.load %arg7[%c5_371, %c0_372, %c0_373] : memref<6x6x128xf32, #tpu.memory_space<vmem>>, vector<1x4x128xf32>
    %314 = vector.shape_cast %313 : vector<1x4x128xf32> to vector<4x128xf32>
    %315 = arith.truncf %314 : vector<4x128xf32> to vector<4x128xbf16>
    %c12_374 = arith.constant 12 : index
    %c768_375 = arith.constant 768 : index
    %316 = vector.load %arg8[%c12_374, %c768_375] : memref<16x1152xbf16, #tpu.memory_space<vmem>>, vector<4x128xbf16>
    tpu.vector_store %arg8[%c12_374, %c768_375], %315 {strides = array<i32>} : memref<16x1152xbf16, #tpu.memory_space<vmem>>, vector<4x128xbf16>,
    %c2_376 = arith.constant 2 : index
    %c1_377 = arith.constant 1 : index
    %c0_378 = arith.constant 0 : index
    %317 = vector.load %arg7[%c2_376, %c1_377, %c0_378] : memref<6x6x128xf32, #tpu.memory_space<vmem>>, vector<1x4x128xf32>
    %318 = vector.shape_cast %317 : vector<1x4x128xf32> to vector<4x128xf32>
    %319 = arith.truncf %318 : vector<4x128xf32> to vector<4x128xbf16>
    %c0_379 = arith.constant 0 : index
    %c896_380 = arith.constant 896 : index
    %320 = vector.load %arg8[%c0_379, %c896_380] : memref<16x1152xbf16, #tpu.memory_space<vmem>>, vector<4x128xbf16>
    tpu.vector_store %arg8[%c0_379, %c896_380], %319 {strides = array<i32>} : memref<16x1152xbf16, #tpu.memory_space<vmem>>, vector<4x128xbf16>,
    %c3_381 = arith.constant 3 : index
    %c1_382 = arith.constant 1 : index
    %c0_383 = arith.constant 0 : index
    %321 = vector.load %arg7[%c3_381, %c1_382, %c0_383] : memref<6x6x128xf32, #tpu.memory_space<vmem>>, vector<1x4x128xf32>
    %322 = vector.shape_cast %321 : vector<1x4x128xf32> to vector<4x128xf32>
    %323 = arith.truncf %322 : vector<4x128xf32> to vector<4x128xbf16>
    %c4_384 = arith.constant 4 : index
    %c896_385 = arith.constant 896 : index
    %324 = vector.load %arg8[%c4_384, %c896_385] : memref<16x1152xbf16, #tpu.memory_space<vmem>>, vector<4x128xbf16>
    tpu.vector_store %arg8[%c4_384, %c896_385], %323 {strides = array<i32>} : memref<16x1152xbf16, #tpu.memory_space<vmem>>, vector<4x128xbf16>,
    %c4_386 = arith.constant 4 : index
    %c1_387 = arith.constant 1 : index
    %c0_388 = arith.constant 0 : index
    %325 = vector.load %arg7[%c4_386, %c1_387, %c0_388] : memref<6x6x128xf32, #tpu.memory_space<vmem>>, vector<1x4x128xf32>
    %326 = vector.shape_cast %325 : vector<1x4x128xf32> to vector<4x128xf32>
    %327 = arith.truncf %326 : vector<4x128xf32> to vector<4x128xbf16>
    %c8_389 = arith.constant 8 : index
    %c896_390 = arith.constant 896 : index
    %328 = vector.load %arg8[%c8_389, %c896_390] : memref<16x1152xbf16, #tpu.memory_space<vmem>>, vector<4x128xbf16>
    tpu.vector_store %arg8[%c8_389, %c896_390], %327 {strides = array<i32>} : memref<16x1152xbf16, #tpu.memory_space<vmem>>, vector<4x128xbf16>,
    %c5_391 = arith.constant 5 : index
    %c1_392 = arith.constant 1 : index
    %c0_393 = arith.constant 0 : index
    %329 = vector.load %arg7[%c5_391, %c1_392, %c0_393] : memref<6x6x128xf32, #tpu.memory_space<vmem>>, vector<1x4x128xf32>
    %330 = vector.shape_cast %329 : vector<1x4x128xf32> to vector<4x128xf32>
    %331 = arith.truncf %330 : vector<4x128xf32> to vector<4x128xbf16>
    %c12_394 = arith.constant 12 : index
    %c896_395 = arith.constant 896 : index
    %332 = vector.load %arg8[%c12_394, %c896_395] : memref<16x1152xbf16, #tpu.memory_space<vmem>>, vector<4x128xbf16>
    tpu.vector_store %arg8[%c12_394, %c896_395], %331 {strides = array<i32>} : memref<16x1152xbf16, #tpu.memory_space<vmem>>, vector<4x128xbf16>,
    %c2_396 = arith.constant 2 : index
    %c2_397 = arith.constant 2 : index
    %c0_398 = arith.constant 0 : index
    %333 = vector.load %arg7[%c2_396, %c2_397, %c0_398] : memref<6x6x128xf32, #tpu.memory_space<vmem>>, vector<1x4x128xf32>
    %334 = vector.shape_cast %333 : vector<1x4x128xf32> to vector<4x128xf32>
    %335 = arith.truncf %334 : vector<4x128xf32> to vector<4x128xbf16>
    %c0_399 = arith.constant 0 : index
    %c1024_400 = arith.constant 1024 : index
    %336 = vector.load %arg8[%c0_399, %c1024_400] : memref<16x1152xbf16, #tpu.memory_space<vmem>>, vector<4x128xbf16>
    tpu.vector_store %arg8[%c0_399, %c1024_400], %335 {strides = array<i32>} : memref<16x1152xbf16, #tpu.memory_space<vmem>>, vector<4x128xbf16>,
    %c3_401 = arith.constant 3 : index
    %c2_402 = arith.constant 2 : index
    %c0_403 = arith.constant 0 : index
    %337 = vector.load %arg7[%c3_401, %c2_402, %c0_403] : memref<6x6x128xf32, #tpu.memory_space<vmem>>, vector<1x4x128xf32>
    %338 = vector.shape_cast %337 : vector<1x4x128xf32> to vector<4x128xf32>
    %339 = arith.truncf %338 : vector<4x128xf32> to vector<4x128xbf16>
    %c4_404 = arith.constant 4 : index
    %c1024_405 = arith.constant 1024 : index
    %340 = vector.load %arg8[%c4_404, %c1024_405] : memref<16x1152xbf16, #tpu.memory_space<vmem>>, vector<4x128xbf16>
    tpu.vector_store %arg8[%c4_404, %c1024_405], %339 {strides = array<i32>} : memref<16x1152xbf16, #tpu.memory_space<vmem>>, vector<4x128xbf16>,
    %c4_406 = arith.constant 4 : index
    %c2_407 = arith.constant 2 : index
    %c0_408 = arith.constant 0 : index
    %341 = vector.load %arg7[%c4_406, %c2_407, %c0_408] : memref<6x6x128xf32, #tpu.memory_space<vmem>>, vector<1x4x128xf32>
    %342 = vector.shape_cast %341 : vector<1x4x128xf32> to vector<4x128xf32>
    %343 = arith.truncf %342 : vector<4x128xf32> to vector<4x128xbf16>
    %c8_409 = arith.constant 8 : index
    %c1024_410 = arith.constant 1024 : index
    %344 = vector.load %arg8[%c8_409, %c1024_410] : memref<16x1152xbf16, #tpu.memory_space<vmem>>, vector<4x128xbf16>
    tpu.vector_store %arg8[%c8_409, %c1024_410], %343 {strides = array<i32>} : memref<16x1152xbf16, #tpu.memory_space<vmem>>, vector<4x128xbf16>,
    %c5_411 = arith.constant 5 : index
    %c2_412 = arith.constant 2 : index
    %c0_413 = arith.constant 0 : index
    %345 = vector.load %arg7[%c5_411, %c2_412, %c0_413] : memref<6x6x128xf32, #tpu.memory_space<vmem>>, vector<1x4x128xf32>
    %346 = vector.shape_cast %345 : vector<1x4x128xf32> to vector<4x128xf32>
    %347 = arith.truncf %346 : vector<4x128xf32> to vector<4x128xbf16>
    %c12_414 = arith.constant 12 : index
    %c1024_415 = arith.constant 1024 : index
    %348 = vector.load %arg8[%c12_414, %c1024_415] : memref<16x1152xbf16, #tpu.memory_space<vmem>>, vector<4x128xbf16>
    tpu.vector_store %arg8[%c12_414, %c1024_415], %347 {strides = array<i32>} : memref<16x1152xbf16, #tpu.memory_space<vmem>>, vector<4x128xbf16>,
    %c0_416 = arith.constant 0 : index
    %c0_417 = arith.constant 0 : index
    %349 = vector.load %arg8[%c0_416, %c0_417] : memref<16x1152xbf16, #tpu.memory_space<vmem>>, vector<16x1152xbf16>
    %c0_418 = arith.constant 0 : index
    %c0_419 = arith.constant 0 : index
    %350 = vector.load %arg4[%c0_418, %c0_419] : memref<1152x128xbf16, #tpu.memory_space<vmem>>, vector<1152x128xbf16>
    %cst_420 = arith.constant dense<0.000000e+00> : vector<16x128xf32>
    %351 = tpu.matmul %349, %350, %cst_420 {dimension_numbers = #tpu.dot_dimension_numbers<[1], [0], [0], [1], [0, 0, 1, 1], [], []>} : vector<16x1152xbf16>, vector<1152x128xbf16>, vector<16x128xf32> -> vector<16x128xf32>
    %c0_421 = arith.constant 0 : index
    %c0_422 = arith.constant 0 : index
    %352 = vector.load %arg5[%c0_421, %c0_422] : memref<1x128xf32, #tpu.memory_space<vmem>>, vector<1x128xf32>
    %353 = vector.broadcast %352 : vector<1x128xf32> to vector<16x128xf32>
    %354 = arith.addf %351, %353 : vector<16x128xf32>
    %cst_423 = arith.constant 0.000000e+00 : f32
    %355 = vector.broadcast %cst_423 : f32 to vector<16x128xf32>
    %356 = arith.maximumf %354, %355 : vector<16x128xf32>
    %357 = arith.truncf %356 : vector<16x128xf32> to vector<16x128xbf16>
    %c0_424 = arith.constant 0 : index
    %c0_425 = arith.constant 0 : index
    %c0_426 = arith.constant 0 : index
    %358 = vector.load %arg6[%c0_424, %c0_425, %c0_426] : memref<1x16x128xbf16, #tpu.memory_space<vmem>>, vector<1x16x128xbf16>
    %359 = vector.shape_cast %358 : vector<1x16x128xbf16> to vector<16x128xbf16>
    %360 = vector.shape_cast %357 : vector<16x128xbf16> to vector<1x16x128xbf16>
    tpu.vector_store %arg6[%c0_424, %c0_425, %c0_426], %360 {strides = array<i32>} : memref<1x16x128xbf16, #tpu.memory_space<vmem>>, vector<1x16x128xbf16>,
    return
  }
  func.func @transform_0(%arg0: i32) -> (i32, i32, i32) {
    %c0_i32 = arith.constant 0 : i32
    %c0_i32_0 = arith.constant 0 : i32
    %c0_i32_1 = arith.constant 0 : i32
    return %arg0, %c0_i32, %c0_i32_0 : i32, i32, i32
  }
  func.func @transform_1(%arg0: i32) -> (i32, i32) {
    %c0_i32 = arith.constant 0 : i32
    %c0_i32_0 = arith.constant 0 : i32
    %c0_i32_1 = arith.constant 0 : i32
    return %c0_i32, %c0_i32_0 : i32, i32
  }
  func.func @transform_2(%arg0: i32) -> (i32, i32) {
    %c0_i32 = arith.constant 0 : i32
    %c0_i32_0 = arith.constant 0 : i32
    %c0_i32_1 = arith.constant 0 : i32
    return %c0_i32, %c0_i32_0 : i32, i32
  }
  func.func @transform_3(%arg0: i32) -> (i32, i32) {
    %c0_i32 = arith.constant 0 : i32
    %c0_i32_0 = arith.constant 0 : i32
    %c0_i32_1 = arith.constant 0 : i32
    return %c0_i32, %c0_i32_0 : i32, i32
  }
  func.func @transform_4(%arg0: i32) -> (i32, i32) {
    %c0_i32 = arith.constant 0 : i32
    %c0_i32_0 = arith.constant 0 : i32
    %c0_i32_1 = arith.constant 0 : i32
    return %c0_i32, %c0_i32_0 : i32, i32
  }
  func.func @transform_5(%arg0: i32) -> (i32, i32, i32) {
    %c0_i32 = arith.constant 0 : i32
    %c0_i32_0 = arith.constant 0 : i32
    %c0_i32_1 = arith.constant 0 : i32
    return %arg0, %c0_i32, %c0_i32_0 : i32, i32, i32
  }
}

module attributes {stable_mosaic.version = 11 : i64} {
  func.func @_ctx_attn_kernel(%arg0: i32, %arg1: i32, %arg2: i32, %arg3: memref<1x16x1152xbf16, #tpu.memory_space<vmem>>, %arg4: memref<1x128x1152xbf16, #tpu.memory_space<vmem>>, %arg5: memref<1x1x128xf32, #tpu.memory_space<vmem>>, %arg6: memref<1x16x1152xbf16, #tpu.memory_space<vmem>>, %arg7: memref<16x1xf32, #tpu.memory_space<vmem>>, %arg8: memref<16x1xf32, #tpu.memory_space<vmem>>, %arg9: memref<16x1152xf32, #tpu.memory_space<vmem>>) attributes {dimension_semantics = [#tpu.dimension_semantics<parallel>, #tpu.dimension_semantics<parallel>, #tpu.dimension_semantics<arbitrary>], iteration_bounds = array<i64: 2, 1, 1>, scalar_prefetch = 0 : i64, scratch_operands = 3 : i64, tpu.core_type = #tpu.core_type<tc>, window_params = [{transform_indices = @transform_0, window_bounds = array<i64: 1, 16, 1152>}, {transform_indices = @transform_1, window_bounds = array<i64: 1, 128, 1152>}, {transform_indices = @transform_2, window_bounds = array<i64: 1, 1, 128>}, {transform_indices = @transform_3, window_bounds = array<i64: 1, 16, 1152>}]} {
    %c0_i32 = arith.constant 0 : i32
    %0 = arith.cmpi eq, %arg2, %c0_i32 : i32
    %1 = arith.extui %0 : i1 to i32
    %c0_i32_0 = arith.constant 0 : i32
    %2 = arith.cmpi ne, %1, %c0_i32_0 : i32
    scf.if %2 {
      %cst_30 = arith.constant -1.000000e+30 : f32
      %53 = vector.broadcast %cst_30 : f32 to vector<16x1xf32>
      %c0_31 = arith.constant 0 : index
      %c0_32 = arith.constant 0 : index
      %54 = vector.load %arg7[%c0_31, %c0_32] : memref<16x1xf32, #tpu.memory_space<vmem>>, vector<16x1xf32>
      tpu.vector_store %arg7[%c0_31, %c0_32], %53 {strides = array<i32>} : memref<16x1xf32, #tpu.memory_space<vmem>>, vector<16x1xf32>,
      %cst_33 = arith.constant 0.000000e+00 : f32
      %55 = vector.broadcast %cst_33 : f32 to vector<16x1xf32>
      %c0_34 = arith.constant 0 : index
      %c0_35 = arith.constant 0 : index
      %56 = vector.load %arg8[%c0_34, %c0_35] : memref<16x1xf32, #tpu.memory_space<vmem>>, vector<16x1xf32>
      tpu.vector_store %arg8[%c0_34, %c0_35], %55 {strides = array<i32>} : memref<16x1xf32, #tpu.memory_space<vmem>>, vector<16x1xf32>,
      %cst_36 = arith.constant 0.000000e+00 : f32
      %57 = vector.broadcast %cst_36 : f32 to vector<16x1152xf32>
      %c0_37 = arith.constant 0 : index
      %c0_38 = arith.constant 0 : index
      %58 = vector.load %arg9[%c0_37, %c0_38] : memref<16x1152xf32, #tpu.memory_space<vmem>>, vector<16x1152xf32>
      tpu.vector_store %arg9[%c0_37, %c0_38], %57 {strides = array<i32>} : memref<16x1152xf32, #tpu.memory_space<vmem>>, vector<16x1152xf32>,
    } else {
    }
    %c0 = arith.constant 0 : index
    %c0_1 = arith.constant 0 : index
    %c0_2 = arith.constant 0 : index
    %3 = vector.load %arg3[%c0, %c0_1, %c0_2] : memref<1x16x1152xbf16, #tpu.memory_space<vmem>>, vector<1x16x1152xbf16>
    %4 = vector.shape_cast %3 : vector<1x16x1152xbf16> to vector<16x1152xbf16>
    %c0_3 = arith.constant 0 : index
    %c0_4 = arith.constant 0 : index
    %c0_5 = arith.constant 0 : index
    %5 = vector.load %arg4[%c0_3, %c0_4, %c0_5] : memref<1x128x1152xbf16, #tpu.memory_space<vmem>>, vector<1x128x1152xbf16>
    %6 = vector.shape_cast %5 : vector<1x128x1152xbf16> to vector<128x1152xbf16>
    %c0_6 = arith.constant 0 : index
    %c0_7 = arith.constant 0 : index
    %c0_8 = arith.constant 0 : index
    %7 = vector.load %arg5[%c0_6, %c0_7, %c0_8] : memref<1x1x128xf32, #tpu.memory_space<vmem>>, vector<1x1x128xf32>
    %8 = vector.shape_cast %7 : vector<1x1x128xf32> to vector<1x128xf32>
    %cst = arith.constant dense<0.000000e+00> : vector<16x128xf32>
    %9 = tpu.matmul %4, %6, %cst {dimension_numbers = #tpu.dot_dimension_numbers<[1], [1], [0], [0], [0, 0, 1, 0], [], []>} : vector<16x1152xbf16>, vector<128x1152xbf16>, vector<16x128xf32> -> vector<16x128xf32>
    %cst_9 = arith.constant 1.000000e+01 : f32
    %10 = vector.broadcast %cst_9 : f32 to vector<1x128xf32>
    %11 = arith.mulf %8, %10 : vector<1x128xf32>
    %12 = vector.broadcast %11 : vector<1x128xf32> to vector<16x128xf32>
    %13 = arith.mulf %9, %12 : vector<16x128xf32>
    %c128_i32 = arith.constant 128 : i32
    %14 = arith.muli %arg2, %c128_i32 : i32
    %15 = tpu.iota {dimensions = array<i32: 1>} : vector<1x128xi32>
    %16 = vector.broadcast %14 : i32 to vector<1x128xi32>
    %17 = arith.addi %16, %15 : vector<1x128xi32>
    %c16_i32 = arith.constant 16 : i32
    %18 = vector.broadcast %c16_i32 : i32 to vector<1x128xi32>
    %19 = arith.cmpi slt, %17, %18 : vector<1x128xi32>
    %cst_10 = arith.constant -1.000000e+30 : f32
    %20 = vector.shape_cast %19 : vector<1x128xi1> to vector<1x128xi1>
    %21 = vector.broadcast %20 : vector<1x128xi1> to vector<16x128xi1>
    %22 = vector.broadcast %cst_10 : f32 to vector<16x128xf32>
    %23 = arith.select %21, %13, %22 : vector<16x128xi1>, vector<16x128xf32>
    %c0_11 = arith.constant 0 : index
    %c0_12 = arith.constant 0 : index
    %24 = vector.load %arg7[%c0_11, %c0_12] : memref<16x1xf32, #tpu.memory_space<vmem>>, vector<16x1xf32>
    %cst_13 = arith.constant dense<0xFF800000> : vector<16xf32>
    %25 = vector.multi_reduction <maximumf>, %23, %cst_13 [1] : vector<16x128xf32> to vector<16xf32>
    %26 = vector.shape_cast %25 : vector<16xf32> to vector<16x1xf32>
    %27 = arith.maximumf %24, %26 : vector<16x1xf32>
    %c0_14 = arith.constant 0 : index
    %c0_15 = arith.constant 0 : index
    %28 = vector.load %arg7[%c0_14, %c0_15] : memref<16x1xf32, #tpu.memory_space<vmem>>, vector<16x1xf32>
    %29 = arith.subf %28, %27 : vector<16x1xf32>
    %30 = math.exp %29 : vector<16x1xf32>
    %31 = vector.broadcast %27 : vector<16x1xf32> to vector<16x128xf32>
    %32 = arith.subf %23, %31 : vector<16x128xf32>
    %33 = math.exp %32 : vector<16x128xf32>
    %c0_16 = arith.constant 0 : index
    %c0_17 = arith.constant 0 : index
    %34 = vector.load %arg8[%c0_16, %c0_17] : memref<16x1xf32, #tpu.memory_space<vmem>>, vector<16x1xf32>
    %35 = arith.mulf %30, %34 : vector<16x1xf32>
    %cst_18 = arith.constant dense<0.000000e+00> : vector<16xf32>
    %36 = vector.multi_reduction <add>, %33, %cst_18 [1] : vector<16x128xf32> to vector<16xf32>
    %37 = vector.shape_cast %36 : vector<16xf32> to vector<16x1xf32>
    %38 = arith.addf %35, %37 : vector<16x1xf32>
    %c0_19 = arith.constant 0 : index
    %c0_20 = arith.constant 0 : index
    %39 = vector.load %arg8[%c0_19, %c0_20] : memref<16x1xf32, #tpu.memory_space<vmem>>, vector<16x1xf32>
    tpu.vector_store %arg8[%c0_19, %c0_20], %38 {strides = array<i32>} : memref<16x1xf32, #tpu.memory_space<vmem>>, vector<16x1xf32>,
    %40 = vector.broadcast %8 : vector<1x128xf32> to vector<16x128xf32>
    %41 = arith.mulf %33, %40 : vector<16x128xf32>
    %42 = arith.truncf %41 : vector<16x128xf32> to vector<16x128xbf16>
    %c0_21 = arith.constant 0 : index
    %c0_22 = arith.constant 0 : index
    %43 = vector.load %arg9[%c0_21, %c0_22] : memref<16x1152xf32, #tpu.memory_space<vmem>>, vector<16x1152xf32>
    %44 = vector.broadcast %30 : vector<16x1xf32> to vector<16x1152xf32>
    %45 = arith.mulf %44, %43 : vector<16x1152xf32>
    %cst_23 = arith.constant dense<0.000000e+00> : vector<16x1152xf32>
    %46 = tpu.matmul %42, %6, %cst_23 {dimension_numbers = #tpu.dot_dimension_numbers<[1], [0], [0], [1], [0, 0, 1, 1], [], []>} : vector<16x128xbf16>, vector<128x1152xbf16>, vector<16x1152xf32> -> vector<16x1152xf32>
    %47 = arith.addf %45, %46 : vector<16x1152xf32>
    %c0_24 = arith.constant 0 : index
    %c0_25 = arith.constant 0 : index
    %48 = vector.load %arg9[%c0_24, %c0_25] : memref<16x1152xf32, #tpu.memory_space<vmem>>, vector<16x1152xf32>
    tpu.vector_store %arg9[%c0_24, %c0_25], %47 {strides = array<i32>} : memref<16x1152xf32, #tpu.memory_space<vmem>>, vector<16x1152xf32>,
    %c0_26 = arith.constant 0 : index
    %c0_27 = arith.constant 0 : index
    %49 = vector.load %arg7[%c0_26, %c0_27] : memref<16x1xf32, #tpu.memory_space<vmem>>, vector<16x1xf32>
    tpu.vector_store %arg7[%c0_26, %c0_27], %27 {strides = array<i32>} : memref<16x1xf32, #tpu.memory_space<vmem>>, vector<16x1xf32>,
    %c0_i32_28 = arith.constant 0 : i32
    %50 = arith.cmpi eq, %arg2, %c0_i32_28 : i32
    %51 = arith.extui %50 : i1 to i32
    %c0_i32_29 = arith.constant 0 : i32
    %52 = arith.cmpi ne, %51, %c0_i32_29 : i32
    scf.if %52 {
      %c0_30 = arith.constant 0 : index
      %c0_31 = arith.constant 0 : index
      %53 = vector.load %arg9[%c0_30, %c0_31] : memref<16x1152xf32, #tpu.memory_space<vmem>>, vector<16x1152xf32>
      %c0_32 = arith.constant 0 : index
      %c0_33 = arith.constant 0 : index
      %54 = vector.load %arg8[%c0_32, %c0_33] : memref<16x1xf32, #tpu.memory_space<vmem>>, vector<16x1xf32>
      %55 = tpu.reciprocal %54 {approx = true} : vector<16x1xf32> -> vector<16x1xf32>
      %56 = vector.broadcast %55 : vector<16x1xf32> to vector<16x1152xf32>
      %57 = arith.mulf %53, %56 : vector<16x1152xf32>
      %58 = arith.truncf %57 : vector<16x1152xf32> to vector<16x1152xbf16>
      %c0_34 = arith.constant 0 : index
      %c0_35 = arith.constant 0 : index
      %c0_36 = arith.constant 0 : index
      %59 = vector.load %arg6[%c0_34, %c0_35, %c0_36] : memref<1x16x1152xbf16, #tpu.memory_space<vmem>>, vector<1x16x1152xbf16>
      %60 = vector.shape_cast %59 : vector<1x16x1152xbf16> to vector<16x1152xbf16>
      %61 = vector.shape_cast %58 : vector<16x1152xbf16> to vector<1x16x1152xbf16>
      tpu.vector_store %arg6[%c0_34, %c0_35, %c0_36], %61 {strides = array<i32>} : memref<1x16x1152xbf16, #tpu.memory_space<vmem>>, vector<1x16x1152xbf16>,
    } else {
    }
    return
  }
  func.func @transform_0(%arg0: i32, %arg1: i32, %arg2: i32) -> (i32, i32, i32) {
    %c0_i32 = arith.constant 0 : i32
    %c0_i32_0 = arith.constant 0 : i32
    return %arg0, %arg1, %c0_i32 : i32, i32, i32
  }
  func.func @transform_1(%arg0: i32, %arg1: i32, %arg2: i32) -> (i32, i32, i32) {
    %c0_i32 = arith.constant 0 : i32
    %c0_i32_0 = arith.constant 0 : i32
    return %arg0, %arg2, %c0_i32 : i32, i32, i32
  }
  func.func @transform_2(%arg0: i32, %arg1: i32, %arg2: i32) -> (i32, i32, i32) {
    %c0_i32 = arith.constant 0 : i32
    %c0_i32_0 = arith.constant 0 : i32
    return %arg0, %c0_i32, %arg2 : i32, i32, i32
  }
  func.func @transform_3(%arg0: i32, %arg1: i32, %arg2: i32) -> (i32, i32, i32) {
    %c0_i32 = arith.constant 0 : i32
    %c0_i32_0 = arith.constant 0 : i32
    return %arg0, %arg1, %c0_i32 : i32, i32, i32
  }
}

module attributes {stable_mosaic.version = 11 : i64} {
  func.func @_fused_conv_pair_kernel(%arg0: i32, %arg1: memref<1x16x128xbf16, #tpu.memory_space<vmem>>, %arg2: memref<1152x128xbf16, #tpu.memory_space<vmem>>, %arg3: memref<1x128xf32, #tpu.memory_space<vmem>>, %arg4: memref<1152x128xbf16, #tpu.memory_space<vmem>>, %arg5: memref<1x128xf32, #tpu.memory_space<vmem>>, %arg6: memref<1x16x128xbf16, #tpu.memory_space<vmem>>, %arg7: memref<6x6x128xf32, #tpu.memory_space<vmem>>, %arg8: memref<16x1152xbf16, #tpu.memory_space<vmem>>) attributes {dimension_semantics = [#tpu.dimension_semantics<parallel>], iteration_bounds = array<i64: 2>, scalar_prefetch = 0 : i64, scratch_operands = 2 : i64, tpu.core_type = #tpu.core_type<tc>, window_params = [{transform_indices = @transform_0, window_bounds = array<i64: 1, 16, 128>}, {pipeline_mode = #tpu.pipeline_mode<synchronous>, transform_indices = @transform_1, window_bounds = array<i64: 1152, 128>}, {pipeline_mode = #tpu.pipeline_mode<synchronous>, transform_indices = @transform_2, window_bounds = array<i64: 1, 128>}, {pipeline_mode = #tpu.pipeline_mode<synchronous>, transform_indices = @transform_3, window_bounds = array<i64: 1152, 128>}, {pipeline_mode = #tpu.pipeline_mode<synchronous>, transform_indices = @transform_4, window_bounds = array<i64: 1, 128>}, {transform_indices = @transform_5, window_bounds = array<i64: 1, 16, 128>}]} {
    %c0 = arith.constant 0 : index
    %c0_0 = arith.constant 0 : index
    %c0_1 = arith.constant 0 : index
    %0 = vector.load %arg1[%c0, %c0_0, %c0_1] : memref<1x16x128xbf16, #tpu.memory_space<vmem>>, vector<1x16x128xbf16>
    %1 = vector.shape_cast %0 : vector<1x16x128xbf16> to vector<16x128xbf16>
    %2 = arith.extf %1 : vector<16x128xbf16> to vector<16x128xf32>
    %3 = vector.extract_strided_slice %2 {offsets = [0, 0], sizes = [4, 128], strides = [1, 1]} : vector<16x128xf32> to vector<4x128xf32>
    %4 = vector.shape_cast %3 : vector<4x128xf32> to vector<1x4x128xf32>
    %c1 = arith.constant 1 : index
    %c1_2 = arith.constant 1 : index
    %c0_3 = arith.constant 0 : index
    %5 = vector.load %arg7[%c1, %c1_2, %c0_3] : memref<6x6x128xf32, #tpu.memory_space<vmem>>, vector<1x4x128xf32>
    tpu.vector_store %arg7[%c1, %c1_2, %c0_3], %4 {strides = array<i32>} : memref<6x6x128xf32, #tpu.memory_space<vmem>>, vector<1x4x128xf32>,
    %6 = vector.extract_strided_slice %2 {offsets = [4, 0], sizes = [4, 128], strides = [1, 1]} : vector<16x128xf32> to vector<4x128xf32>
    %7 = vector.shape_cast %6 : vector<4x128xf32> to vector<1x4x128xf32>
    %c2 = arith.constant 2 : index
    %c1_4 = arith.constant 1 : index
    %c0_5 = arith.constant 0 : index
    %8 = vector.load %arg7[%c2, %c1_4, %c0_5] : memref<6x6x128xf32, #tpu.memory_space<vmem>>, vector<1x4x128xf32>
    tpu.vector_store %arg7[%c2, %c1_4, %c0_5], %7 {strides = array<i32>} : memref<6x6x128xf32, #tpu.memory_space<vmem>>, vector<1x4x128xf32>,
    %9 = vector.extract_strided_slice %2 {offsets = [8, 0], sizes = [4, 128], strides = [1, 1]} : vector<16x128xf32> to vector<4x128xf32>
    %10 = vector.shape_cast %9 : vector<4x128xf32> to vector<1x4x128xf32>
    %c3 = arith.constant 3 : index
    %c1_6 = arith.constant 1 : index
    %c0_7 = arith.constant 0 : index
    %11 = vector.load %arg7[%c3, %c1_6, %c0_7] : memref<6x6x128xf32, #tpu.memory_space<vmem>>, vector<1x4x128xf32>
    tpu.vector_store %arg7[%c3, %c1_6, %c0_7], %10 {strides = array<i32>} : memref<6x6x128xf32, #tpu.memory_space<vmem>>, vector<1x4x128xf32>,
    %12 = vector.extract_strided_slice %2 {offsets = [12, 0], sizes = [4, 128], strides = [1, 1]} : vector<16x128xf32> to vector<4x128xf32>
    %13 = vector.shape_cast %12 : vector<4x128xf32> to vector<1x4x128xf32>
    %c4 = arith.constant 4 : index
    %c1_8 = arith.constant 1 : index
    %c0_9 = arith.constant 0 : index
    %14 = vector.load %arg7[%c4, %c1_8, %c0_9] : memref<6x6x128xf32, #tpu.memory_space<vmem>>, vector<1x4x128xf32>
    tpu.vector_store %arg7[%c4, %c1_8, %c0_9], %13 {strides = array<i32>} : memref<6x6x128xf32, #tpu.memory_space<vmem>>, vector<1x4x128xf32>,
    %15 = vector.extract_strided_slice %2 {offsets = [4, 0], sizes = [4, 128], strides = [1, 1]} : vector<16x128xf32> to vector<4x128xf32>
    %16 = vector.shape_cast %15 : vector<4x128xf32> to vector<1x4x128xf32>
    %c0_10 = arith.constant 0 : index
    %c1_11 = arith.constant 1 : index
    %c0_12 = arith.constant 0 : index
    %17 = vector.load %arg7[%c0_10, %c1_11, %c0_12] : memref<6x6x128xf32, #tpu.memory_space<vmem>>, vector<1x4x128xf32>
    tpu.vector_store %arg7[%c0_10, %c1_11, %c0_12], %16 {strides = array<i32>} : memref<6x6x128xf32, #tpu.memory_space<vmem>>, vector<1x4x128xf32>,
    %18 = vector.extract_strided_slice %2 {offsets = [8, 0], sizes = [4, 128], strides = [1, 1]} : vector<16x128xf32> to vector<4x128xf32>
    %19 = vector.shape_cast %18 : vector<4x128xf32> to vector<1x4x128xf32>
    %c5 = arith.constant 5 : index
    %c1_13 = arith.constant 1 : index
    %c0_14 = arith.constant 0 : index
    %20 = vector.load %arg7[%c5, %c1_13, %c0_14] : memref<6x6x128xf32, #tpu.memory_space<vmem>>, vector<1x4x128xf32>
    tpu.vector_store %arg7[%c5, %c1_13, %c0_14], %19 {strides = array<i32>} : memref<6x6x128xf32, #tpu.memory_space<vmem>>, vector<1x4x128xf32>,
    %c0_15 = arith.constant 0 : index
    %c2_16 = arith.constant 2 : index
    %c0_17 = arith.constant 0 : index
    %21 = vector.load %arg7[%c0_15, %c2_16, %c0_17] : memref<6x6x128xf32, #tpu.memory_space<vmem>>, vector<6x1x128xf32>
    %c0_18 = arith.constant 0 : index
    %c0_19 = arith.constant 0 : index
    %c0_20 = arith.constant 0 : index
    %22 = vector.load %arg7[%c0_18, %c0_19, %c0_20] : memref<6x6x128xf32, #tpu.memory_space<vmem>>, vector<6x1x128xf32>
    tpu.vector_store %arg7[%c0_18, %c0_19, %c0_20], %21 {strides = array<i32>} : memref<6x6x128xf32, #tpu.memory_space<vmem>>, vector<6x1x128xf32>,
    %c0_21 = arith.constant 0 : index
    %c3_22 = arith.constant 3 : index
    %c0_23 = arith.constant 0 : index
    %23 = vector.load %arg7[%c0_21, %c3_22, %c0_23] : memref<6x6x128xf32, #tpu.memory_space<vmem>>, vector<6x1x128xf32>
    %c0_24 = arith.constant 0 : index
    %c5_25 = arith.constant 5 : index
    %c0_26 = arith.constant 0 : index
    %24 = vector.load %arg7[%c0_24, %c5_25, %c0_26] : memref<6x6x128xf32, #tpu.memory_space<vmem>>, vector<6x1x128xf32>
    tpu.vector_store %arg7[%c0_24, %c5_25, %c0_26], %23 {strides = array<i32>} : memref<6x6x128xf32, #tpu.memory_space<vmem>>, vector<6x1x128xf32>,
    %c0_27 = arith.constant 0 : index
    %c0_28 = arith.constant 0 : index
    %c0_29 = arith.constant 0 : index
    %25 = vector.load %arg7[%c0_27, %c0_28, %c0_29] : memref<6x6x128xf32, #tpu.memory_space<vmem>>, vector<1x4x128xf32>
    %26 = vector.shape_cast %25 : vector<1x4x128xf32> to vector<4x128xf32>
    %27 = arith.truncf %26 : vector<4x128xf32> to vector<4x128xbf16>
    %c0_30 = arith.constant 0 : index
    %c0_31 = arith.constant 0 : index
    %28 = vector.load %arg8[%c0_30, %c0_31] : memref<16x1152xbf16, #tpu.memory_space<vmem>>, vector<4x128xbf16>
    tpu.vector_store %arg8[%c0_30, %c0_31], %27 {strides = array<i32>} : memref<16x1152xbf16, #tpu.memory_space<vmem>>, vector<4x128xbf16>,
    %c1_32 = arith.constant 1 : index
    %c0_33 = arith.constant 0 : index
    %c0_34 = arith.constant 0 : index
    %29 = vector.load %arg7[%c1_32, %c0_33, %c0_34] : memref<6x6x128xf32, #tpu.memory_space<vmem>>, vector<1x4x128xf32>
    %30 = vector.shape_cast %29 : vector<1x4x128xf32> to vector<4x128xf32>
    %31 = arith.truncf %30 : vector<4x128xf32> to vector<4x128xbf16>
    %c4_35 = arith.constant 4 : index
    %c0_36 = arith.constant 0 : index
    %32 = vector.load %arg8[%c4_35, %c0_36] : memref<16x1152xbf16, #tpu.memory_space<vmem>>, vector<4x128xbf16>
    tpu.vector_store %arg8[%c4_35, %c0_36], %31 {strides = array<i32>} : memref<16x1152xbf16, #tpu.memory_space<vmem>>, vector<4x128xbf16>,
    %c2_37 = arith.constant 2 : index
    %c0_38 = arith.constant 0 : index
    %c0_39 = arith.constant 0 : index
    %33 = vector.load %arg7[%c2_37, %c0_38, %c0_39] : memref<6x6x128xf32, #tpu.memory_space<vmem>>, vector<1x4x128xf32>
    %34 = vector.shape_cast %33 : vector<1x4x128xf32> to vector<4x128xf32>
    %35 = arith.truncf %34 : vector<4x128xf32> to vector<4x128xbf16>
    %c8 = arith.constant 8 : index
    %c0_40 = arith.constant 0 : index
    %36 = vector.load %arg8[%c8, %c0_40] : memref<16x1152xbf16, #tpu.memory_space<vmem>>, vector<4x128xbf16>
    tpu.vector_store %arg8[%c8, %c0_40], %35 {strides = array<i32>} : memref<16x1152xbf16, #tpu.memory_space<vmem>>, vector<4x128xbf16>,
    %c3_41 = arith.constant 3 : index
    %c0_42 = arith.constant 0 : index
    %c0_43 = arith.constant 0 : index
    %37 = vector.load %arg7[%c3_41, %c0_42, %c0_43] : memref<6x6x128xf32, #tpu.memory_space<vmem>>, vector<1x4x128xf32>
    %38 = vector.shape_cast %37 : vector<1x4x128xf32> to vector<4x128xf32>
    %39 = arith.truncf %38 : vector<4x128xf32> to vector<4x128xbf16>
    %c12 = arith.constant 12 : index
    %c0_44 = arith.constant 0 : index
    %40 = vector.load %arg8[%c12, %c0_44] : memref<16x1152xbf16, #tpu.memory_space<vmem>>, vector<4x128xbf16>
    tpu.vector_store %arg8[%c12, %c0_44], %39 {strides = array<i32>} : memref<16x1152xbf16, #tpu.memory_space<vmem>>, vector<4x128xbf16>,
    %c0_45 = arith.constant 0 : index
    %c1_46 = arith.constant 1 : index
    %c0_47 = arith.constant 0 : index
    %41 = vector.load %arg7[%c0_45, %c1_46, %c0_47] : memref<6x6x128xf32, #tpu.memory_space<vmem>>, vector<1x4x128xf32>
    %42 = vector.shape_cast %41 : vector<1x4x128xf32> to vector<4x128xf32>
    %43 = arith.truncf %42 : vector<4x128xf32> to vector<4x128xbf16>
    %c0_48 = arith.constant 0 : index
    %c128 = arith.constant 128 : index
    %44 = vector.load %arg8[%c0_48, %c128] : memref<16x1152xbf16, #tpu.memory_space<vmem>>, vector<4x128xbf16>
    tpu.vector_store %arg8[%c0_48, %c128], %43 {strides = array<i32>} : memref<16x1152xbf16, #tpu.memory_space<vmem>>, vector<4x128xbf16>,
    %c1_49 = arith.constant 1 : index
    %c1_50 = arith.constant 1 : index
    %c0_51 = arith.constant 0 : index
    %45 = vector.load %arg7[%c1_49, %c1_50, %c0_51] : memref<6x6x128xf32, #tpu.memory_space<vmem>>, vector<1x4x128xf32>
    %46 = vector.shape_cast %45 : vector<1x4x128xf32> to vector<4x128xf32>
    %47 = arith.truncf %46 : vector<4x128xf32> to vector<4x128xbf16>
    %c4_52 = arith.constant 4 : index
    %c128_53 = arith.constant 128 : index
    %48 = vector.load %arg8[%c4_52, %c128_53] : memref<16x1152xbf16, #tpu.memory_space<vmem>>, vector<4x128xbf16>
    tpu.vector_store %arg8[%c4_52, %c128_53], %47 {strides = array<i32>} : memref<16x1152xbf16, #tpu.memory_space<vmem>>, vector<4x128xbf16>,
    %c2_54 = arith.constant 2 : index
    %c1_55 = arith.constant 1 : index
    %c0_56 = arith.constant 0 : index
    %49 = vector.load %arg7[%c2_54, %c1_55, %c0_56] : memref<6x6x128xf32, #tpu.memory_space<vmem>>, vector<1x4x128xf32>
    %50 = vector.shape_cast %49 : vector<1x4x128xf32> to vector<4x128xf32>
    %51 = arith.truncf %50 : vector<4x128xf32> to vector<4x128xbf16>
    %c8_57 = arith.constant 8 : index
    %c128_58 = arith.constant 128 : index
    %52 = vector.load %arg8[%c8_57, %c128_58] : memref<16x1152xbf16, #tpu.memory_space<vmem>>, vector<4x128xbf16>
    tpu.vector_store %arg8[%c8_57, %c128_58], %51 {strides = array<i32>} : memref<16x1152xbf16, #tpu.memory_space<vmem>>, vector<4x128xbf16>,
    %c3_59 = arith.constant 3 : index
    %c1_60 = arith.constant 1 : index
    %c0_61 = arith.constant 0 : index
    %53 = vector.load %arg7[%c3_59, %c1_60, %c0_61] : memref<6x6x128xf32, #tpu.memory_space<vmem>>, vector<1x4x128xf32>
    %54 = vector.shape_cast %53 : vector<1x4x128xf32> to vector<4x128xf32>
    %55 = arith.truncf %54 : vector<4x128xf32> to vector<4x128xbf16>
    %c12_62 = arith.constant 12 : index
    %c128_63 = arith.constant 128 : index
    %56 = vector.load %arg8[%c12_62, %c128_63] : memref<16x1152xbf16, #tpu.memory_space<vmem>>, vector<4x128xbf16>
    tpu.vector_store %arg8[%c12_62, %c128_63], %55 {strides = array<i32>} : memref<16x1152xbf16, #tpu.memory_space<vmem>>, vector<4x128xbf16>,
    %c0_64 = arith.constant 0 : index
    %c2_65 = arith.constant 2 : index
    %c0_66 = arith.constant 0 : index
    %57 = vector.load %arg7[%c0_64, %c2_65, %c0_66] : memref<6x6x128xf32, #tpu.memory_space<vmem>>, vector<1x4x128xf32>
    %58 = vector.shape_cast %57 : vector<1x4x128xf32> to vector<4x128xf32>
    %59 = arith.truncf %58 : vector<4x128xf32> to vector<4x128xbf16>
    %c0_67 = arith.constant 0 : index
    %c256 = arith.constant 256 : index
    %60 = vector.load %arg8[%c0_67, %c256] : memref<16x1152xbf16, #tpu.memory_space<vmem>>, vector<4x128xbf16>
    tpu.vector_store %arg8[%c0_67, %c256], %59 {strides = array<i32>} : memref<16x1152xbf16, #tpu.memory_space<vmem>>, vector<4x128xbf16>,
    %c1_68 = arith.constant 1 : index
    %c2_69 = arith.constant 2 : index
    %c0_70 = arith.constant 0 : index
    %61 = vector.load %arg7[%c1_68, %c2_69, %c0_70] : memref<6x6x128xf32, #tpu.memory_space<vmem>>, vector<1x4x128xf32>
    %62 = vector.shape_cast %61 : vector<1x4x128xf32> to vector<4x128xf32>
    %63 = arith.truncf %62 : vector<4x128xf32> to vector<4x128xbf16>
    %c4_71 = arith.constant 4 : index
    %c256_72 = arith.constant 256 : index
    %64 = vector.load %arg8[%c4_71, %c256_72] : memref<16x1152xbf16, #tpu.memory_space<vmem>>, vector<4x128xbf16>
    tpu.vector_store %arg8[%c4_71, %c256_72], %63 {strides = array<i32>} : memref<16x1152xbf16, #tpu.memory_space<vmem>>, vector<4x128xbf16>,
    %c2_73 = arith.constant 2 : index
    %c2_74 = arith.constant 2 : index
    %c0_75 = arith.constant 0 : index
    %65 = vector.load %arg7[%c2_73, %c2_74, %c0_75] : memref<6x6x128xf32, #tpu.memory_space<vmem>>, vector<1x4x128xf32>
    %66 = vector.shape_cast %65 : vector<1x4x128xf32> to vector<4x128xf32>
    %67 = arith.truncf %66 : vector<4x128xf32> to vector<4x128xbf16>
    %c8_76 = arith.constant 8 : index
    %c256_77 = arith.constant 256 : index
    %68 = vector.load %arg8[%c8_76, %c256_77] : memref<16x1152xbf16, #tpu.memory_space<vmem>>, vector<4x128xbf16>
    tpu.vector_store %arg8[%c8_76, %c256_77], %67 {strides = array<i32>} : memref<16x1152xbf16, #tpu.memory_space<vmem>>, vector<4x128xbf16>,
    %c3_78 = arith.constant 3 : index
    %c2_79 = arith.constant 2 : index
    %c0_80 = arith.constant 0 : index
    %69 = vector.load %arg7[%c3_78, %c2_79, %c0_80] : memref<6x6x128xf32, #tpu.memory_space<vmem>>, vector<1x4x128xf32>
    %70 = vector.shape_cast %69 : vector<1x4x128xf32> to vector<4x128xf32>
    %71 = arith.truncf %70 : vector<4x128xf32> to vector<4x128xbf16>
    %c12_81 = arith.constant 12 : index
    %c256_82 = arith.constant 256 : index
    %72 = vector.load %arg8[%c12_81, %c256_82] : memref<16x1152xbf16, #tpu.memory_space<vmem>>, vector<4x128xbf16>
    tpu.vector_store %arg8[%c12_81, %c256_82], %71 {strides = array<i32>} : memref<16x1152xbf16, #tpu.memory_space<vmem>>, vector<4x128xbf16>,
    %c1_83 = arith.constant 1 : index
    %c0_84 = arith.constant 0 : index
    %c0_85 = arith.constant 0 : index
    %73 = vector.load %arg7[%c1_83, %c0_84, %c0_85] : memref<6x6x128xf32, #tpu.memory_space<vmem>>, vector<1x4x128xf32>
    %74 = vector.shape_cast %73 : vector<1x4x128xf32> to vector<4x128xf32>
    %75 = arith.truncf %74 : vector<4x128xf32> to vector<4x128xbf16>
    %c0_86 = arith.constant 0 : index
    %c384 = arith.constant 384 : index
    %76 = vector.load %arg8[%c0_86, %c384] : memref<16x1152xbf16, #tpu.memory_space<vmem>>, vector<4x128xbf16>
    tpu.vector_store %arg8[%c0_86, %c384], %75 {strides = array<i32>} : memref<16x1152xbf16, #tpu.memory_space<vmem>>, vector<4x128xbf16>,
    %c2_87 = arith.constant 2 : index
    %c0_88 = arith.constant 0 : index
    %c0_89 = arith.constant 0 : index
    %77 = vector.load %arg7[%c2_87, %c0_88, %c0_89] : memref<6x6x128xf32, #tpu.memory_space<vmem>>, vector<1x4x128xf32>
    %78 = vector.shape_cast %77 : vector<1x4x128xf32> to vector<4x128xf32>
    %79 = arith.truncf %78 : vector<4x128xf32> to vector<4x128xbf16>
    %c4_90 = arith.constant 4 : index
    %c384_91 = arith.constant 384 : index
    %80 = vector.load %arg8[%c4_90, %c384_91] : memref<16x1152xbf16, #tpu.memory_space<vmem>>, vector<4x128xbf16>
    tpu.vector_store %arg8[%c4_90, %c384_91], %79 {strides = array<i32>} : memref<16x1152xbf16, #tpu.memory_space<vmem>>, vector<4x128xbf16>,
    %c3_92 = arith.constant 3 : index
    %c0_93 = arith.constant 0 : index
    %c0_94 = arith.constant 0 : index
    %81 = vector.load %arg7[%c3_92, %c0_93, %c0_94] : memref<6x6x128xf32, #tpu.memory_space<vmem>>, vector<1x4x128xf32>
    %82 = vector.shape_cast %81 : vector<1x4x128xf32> to vector<4x128xf32>
    %83 = arith.truncf %82 : vector<4x128xf32> to vector<4x128xbf16>
    %c8_95 = arith.constant 8 : index
    %c384_96 = arith.constant 384 : index
    %84 = vector.load %arg8[%c8_95, %c384_96] : memref<16x1152xbf16, #tpu.memory_space<vmem>>, vector<4x128xbf16>
    tpu.vector_store %arg8[%c8_95, %c384_96], %83 {strides = array<i32>} : memref<16x1152xbf16, #tpu.memory_space<vmem>>, vector<4x128xbf16>,
    %c4_97 = arith.constant 4 : index
    %c0_98 = arith.constant 0 : index
    %c0_99 = arith.constant 0 : index
    %85 = vector.load %arg7[%c4_97, %c0_98, %c0_99] : memref<6x6x128xf32, #tpu.memory_space<vmem>>, vector<1x4x128xf32>
    %86 = vector.shape_cast %85 : vector<1x4x128xf32> to vector<4x128xf32>
    %87 = arith.truncf %86 : vector<4x128xf32> to vector<4x128xbf16>
    %c12_100 = arith.constant 12 : index
    %c384_101 = arith.constant 384 : index
    %88 = vector.load %arg8[%c12_100, %c384_101] : memref<16x1152xbf16, #tpu.memory_space<vmem>>, vector<4x128xbf16>
    tpu.vector_store %arg8[%c12_100, %c384_101], %87 {strides = array<i32>} : memref<16x1152xbf16, #tpu.memory_space<vmem>>, vector<4x128xbf16>,
    %c1_102 = arith.constant 1 : index
    %c1_103 = arith.constant 1 : index
    %c0_104 = arith.constant 0 : index
    %89 = vector.load %arg7[%c1_102, %c1_103, %c0_104] : memref<6x6x128xf32, #tpu.memory_space<vmem>>, vector<1x4x128xf32>
    %90 = vector.shape_cast %89 : vector<1x4x128xf32> to vector<4x128xf32>
    %91 = arith.truncf %90 : vector<4x128xf32> to vector<4x128xbf16>
    %c0_105 = arith.constant 0 : index
    %c512 = arith.constant 512 : index
    %92 = vector.load %arg8[%c0_105, %c512] : memref<16x1152xbf16, #tpu.memory_space<vmem>>, vector<4x128xbf16>
    tpu.vector_store %arg8[%c0_105, %c512], %91 {strides = array<i32>} : memref<16x1152xbf16, #tpu.memory_space<vmem>>, vector<4x128xbf16>,
    %c2_106 = arith.constant 2 : index
    %c1_107 = arith.constant 1 : index
    %c0_108 = arith.constant 0 : index
    %93 = vector.load %arg7[%c2_106, %c1_107, %c0_108] : memref<6x6x128xf32, #tpu.memory_space<vmem>>, vector<1x4x128xf32>
    %94 = vector.shape_cast %93 : vector<1x4x128xf32> to vector<4x128xf32>
    %95 = arith.truncf %94 : vector<4x128xf32> to vector<4x128xbf16>
    %c4_109 = arith.constant 4 : index
    %c512_110 = arith.constant 512 : index
    %96 = vector.load %arg8[%c4_109, %c512_110] : memref<16x1152xbf16, #tpu.memory_space<vmem>>, vector<4x128xbf16>
    tpu.vector_store %arg8[%c4_109, %c512_110], %95 {strides = array<i32>} : memref<16x1152xbf16, #tpu.memory_space<vmem>>, vector<4x128xbf16>,
    %c3_111 = arith.constant 3 : index
    %c1_112 = arith.constant 1 : index
    %c0_113 = arith.constant 0 : index
    %97 = vector.load %arg7[%c3_111, %c1_112, %c0_113] : memref<6x6x128xf32, #tpu.memory_space<vmem>>, vector<1x4x128xf32>
    %98 = vector.shape_cast %97 : vector<1x4x128xf32> to vector<4x128xf32>
    %99 = arith.truncf %98 : vector<4x128xf32> to vector<4x128xbf16>
    %c8_114 = arith.constant 8 : index
    %c512_115 = arith.constant 512 : index
    %100 = vector.load %arg8[%c8_114, %c512_115] : memref<16x1152xbf16, #tpu.memory_space<vmem>>, vector<4x128xbf16>
    tpu.vector_store %arg8[%c8_114, %c512_115], %99 {strides = array<i32>} : memref<16x1152xbf16, #tpu.memory_space<vmem>>, vector<4x128xbf16>,
    %c4_116 = arith.constant 4 : index
    %c1_117 = arith.constant 1 : index
    %c0_118 = arith.constant 0 : index
    %101 = vector.load %arg7[%c4_116, %c1_117, %c0_118] : memref<6x6x128xf32, #tpu.memory_space<vmem>>, vector<1x4x128xf32>
    %102 = vector.shape_cast %101 : vector<1x4x128xf32> to vector<4x128xf32>
    %103 = arith.truncf %102 : vector<4x128xf32> to vector<4x128xbf16>
    %c12_119 = arith.constant 12 : index
    %c512_120 = arith.constant 512 : index
    %104 = vector.load %arg8[%c12_119, %c512_120] : memref<16x1152xbf16, #tpu.memory_space<vmem>>, vector<4x128xbf16>
    tpu.vector_store %arg8[%c12_119, %c512_120], %103 {strides = array<i32>} : memref<16x1152xbf16, #tpu.memory_space<vmem>>, vector<4x128xbf16>,
    %c1_121 = arith.constant 1 : index
    %c2_122 = arith.constant 2 : index
    %c0_123 = arith.constant 0 : index
    %105 = vector.load %arg7[%c1_121, %c2_122, %c0_123] : memref<6x6x128xf32, #tpu.memory_space<vmem>>, vector<1x4x128xf32>
    %106 = vector.shape_cast %105 : vector<1x4x128xf32> to vector<4x128xf32>
    %107 = arith.truncf %106 : vector<4x128xf32> to vector<4x128xbf16>
    %c0_124 = arith.constant 0 : index
    %c640 = arith.constant 640 : index
    %108 = vector.load %arg8[%c0_124, %c640] : memref<16x1152xbf16, #tpu.memory_space<vmem>>, vector<4x128xbf16>
    tpu.vector_store %arg8[%c0_124, %c640], %107 {strides = array<i32>} : memref<16x1152xbf16, #tpu.memory_space<vmem>>, vector<4x128xbf16>,
    %c2_125 = arith.constant 2 : index
    %c2_126 = arith.constant 2 : index
    %c0_127 = arith.constant 0 : index
    %109 = vector.load %arg7[%c2_125, %c2_126, %c0_127] : memref<6x6x128xf32, #tpu.memory_space<vmem>>, vector<1x4x128xf32>
    %110 = vector.shape_cast %109 : vector<1x4x128xf32> to vector<4x128xf32>
    %111 = arith.truncf %110 : vector<4x128xf32> to vector<4x128xbf16>
    %c4_128 = arith.constant 4 : index
    %c640_129 = arith.constant 640 : index
    %112 = vector.load %arg8[%c4_128, %c640_129] : memref<16x1152xbf16, #tpu.memory_space<vmem>>, vector<4x128xbf16>
    tpu.vector_store %arg8[%c4_128, %c640_129], %111 {strides = array<i32>} : memref<16x1152xbf16, #tpu.memory_space<vmem>>, vector<4x128xbf16>,
    %c3_130 = arith.constant 3 : index
    %c2_131 = arith.constant 2 : index
    %c0_132 = arith.constant 0 : index
    %113 = vector.load %arg7[%c3_130, %c2_131, %c0_132] : memref<6x6x128xf32, #tpu.memory_space<vmem>>, vector<1x4x128xf32>
    %114 = vector.shape_cast %113 : vector<1x4x128xf32> to vector<4x128xf32>
    %115 = arith.truncf %114 : vector<4x128xf32> to vector<4x128xbf16>
    %c8_133 = arith.constant 8 : index
    %c640_134 = arith.constant 640 : index
    %116 = vector.load %arg8[%c8_133, %c640_134] : memref<16x1152xbf16, #tpu.memory_space<vmem>>, vector<4x128xbf16>
    tpu.vector_store %arg8[%c8_133, %c640_134], %115 {strides = array<i32>} : memref<16x1152xbf16, #tpu.memory_space<vmem>>, vector<4x128xbf16>,
    %c4_135 = arith.constant 4 : index
    %c2_136 = arith.constant 2 : index
    %c0_137 = arith.constant 0 : index
    %117 = vector.load %arg7[%c4_135, %c2_136, %c0_137] : memref<6x6x128xf32, #tpu.memory_space<vmem>>, vector<1x4x128xf32>
    %118 = vector.shape_cast %117 : vector<1x4x128xf32> to vector<4x128xf32>
    %119 = arith.truncf %118 : vector<4x128xf32> to vector<4x128xbf16>
    %c12_138 = arith.constant 12 : index
    %c640_139 = arith.constant 640 : index
    %120 = vector.load %arg8[%c12_138, %c640_139] : memref<16x1152xbf16, #tpu.memory_space<vmem>>, vector<4x128xbf16>
    tpu.vector_store %arg8[%c12_138, %c640_139], %119 {strides = array<i32>} : memref<16x1152xbf16, #tpu.memory_space<vmem>>, vector<4x128xbf16>,
    %c2_140 = arith.constant 2 : index
    %c0_141 = arith.constant 0 : index
    %c0_142 = arith.constant 0 : index
    %121 = vector.load %arg7[%c2_140, %c0_141, %c0_142] : memref<6x6x128xf32, #tpu.memory_space<vmem>>, vector<1x4x128xf32>
    %122 = vector.shape_cast %121 : vector<1x4x128xf32> to vector<4x128xf32>
    %123 = arith.truncf %122 : vector<4x128xf32> to vector<4x128xbf16>
    %c0_143 = arith.constant 0 : index
    %c768 = arith.constant 768 : index
    %124 = vector.load %arg8[%c0_143, %c768] : memref<16x1152xbf16, #tpu.memory_space<vmem>>, vector<4x128xbf16>
    tpu.vector_store %arg8[%c0_143, %c768], %123 {strides = array<i32>} : memref<16x1152xbf16, #tpu.memory_space<vmem>>, vector<4x128xbf16>,
    %c3_144 = arith.constant 3 : index
    %c0_145 = arith.constant 0 : index
    %c0_146 = arith.constant 0 : index
    %125 = vector.load %arg7[%c3_144, %c0_145, %c0_146] : memref<6x6x128xf32, #tpu.memory_space<vmem>>, vector<1x4x128xf32>
    %126 = vector.shape_cast %125 : vector<1x4x128xf32> to vector<4x128xf32>
    %127 = arith.truncf %126 : vector<4x128xf32> to vector<4x128xbf16>
    %c4_147 = arith.constant 4 : index
    %c768_148 = arith.constant 768 : index
    %128 = vector.load %arg8[%c4_147, %c768_148] : memref<16x1152xbf16, #tpu.memory_space<vmem>>, vector<4x128xbf16>
    tpu.vector_store %arg8[%c4_147, %c768_148], %127 {strides = array<i32>} : memref<16x1152xbf16, #tpu.memory_space<vmem>>, vector<4x128xbf16>,
    %c4_149 = arith.constant 4 : index
    %c0_150 = arith.constant 0 : index
    %c0_151 = arith.constant 0 : index
    %129 = vector.load %arg7[%c4_149, %c0_150, %c0_151] : memref<6x6x128xf32, #tpu.memory_space<vmem>>, vector<1x4x128xf32>
    %130 = vector.shape_cast %129 : vector<1x4x128xf32> to vector<4x128xf32>
    %131 = arith.truncf %130 : vector<4x128xf32> to vector<4x128xbf16>
    %c8_152 = arith.constant 8 : index
    %c768_153 = arith.constant 768 : index
    %132 = vector.load %arg8[%c8_152, %c768_153] : memref<16x1152xbf16, #tpu.memory_space<vmem>>, vector<4x128xbf16>
    tpu.vector_store %arg8[%c8_152, %c768_153], %131 {strides = array<i32>} : memref<16x1152xbf16, #tpu.memory_space<vmem>>, vector<4x128xbf16>,
    %c5_154 = arith.constant 5 : index
    %c0_155 = arith.constant 0 : index
    %c0_156 = arith.constant 0 : index
    %133 = vector.load %arg7[%c5_154, %c0_155, %c0_156] : memref<6x6x128xf32, #tpu.memory_space<vmem>>, vector<1x4x128xf32>
    %134 = vector.shape_cast %133 : vector<1x4x128xf32> to vector<4x128xf32>
    %135 = arith.truncf %134 : vector<4x128xf32> to vector<4x128xbf16>
    %c12_157 = arith.constant 12 : index
    %c768_158 = arith.constant 768 : index
    %136 = vector.load %arg8[%c12_157, %c768_158] : memref<16x1152xbf16, #tpu.memory_space<vmem>>, vector<4x128xbf16>
    tpu.vector_store %arg8[%c12_157, %c768_158], %135 {strides = array<i32>} : memref<16x1152xbf16, #tpu.memory_space<vmem>>, vector<4x128xbf16>,
    %c2_159 = arith.constant 2 : index
    %c1_160 = arith.constant 1 : index
    %c0_161 = arith.constant 0 : index
    %137 = vector.load %arg7[%c2_159, %c1_160, %c0_161] : memref<6x6x128xf32, #tpu.memory_space<vmem>>, vector<1x4x128xf32>
    %138 = vector.shape_cast %137 : vector<1x4x128xf32> to vector<4x128xf32>
    %139 = arith.truncf %138 : vector<4x128xf32> to vector<4x128xbf16>
    %c0_162 = arith.constant 0 : index
    %c896 = arith.constant 896 : index
    %140 = vector.load %arg8[%c0_162, %c896] : memref<16x1152xbf16, #tpu.memory_space<vmem>>, vector<4x128xbf16>
    tpu.vector_store %arg8[%c0_162, %c896], %139 {strides = array<i32>} : memref<16x1152xbf16, #tpu.memory_space<vmem>>, vector<4x128xbf16>,
    %c3_163 = arith.constant 3 : index
    %c1_164 = arith.constant 1 : index
    %c0_165 = arith.constant 0 : index
    %141 = vector.load %arg7[%c3_163, %c1_164, %c0_165] : memref<6x6x128xf32, #tpu.memory_space<vmem>>, vector<1x4x128xf32>
    %142 = vector.shape_cast %141 : vector<1x4x128xf32> to vector<4x128xf32>
    %143 = arith.truncf %142 : vector<4x128xf32> to vector<4x128xbf16>
    %c4_166 = arith.constant 4 : index
    %c896_167 = arith.constant 896 : index
    %144 = vector.load %arg8[%c4_166, %c896_167] : memref<16x1152xbf16, #tpu.memory_space<vmem>>, vector<4x128xbf16>
    tpu.vector_store %arg8[%c4_166, %c896_167], %143 {strides = array<i32>} : memref<16x1152xbf16, #tpu.memory_space<vmem>>, vector<4x128xbf16>,
    %c4_168 = arith.constant 4 : index
    %c1_169 = arith.constant 1 : index
    %c0_170 = arith.constant 0 : index
    %145 = vector.load %arg7[%c4_168, %c1_169, %c0_170] : memref<6x6x128xf32, #tpu.memory_space<vmem>>, vector<1x4x128xf32>
    %146 = vector.shape_cast %145 : vector<1x4x128xf32> to vector<4x128xf32>
    %147 = arith.truncf %146 : vector<4x128xf32> to vector<4x128xbf16>
    %c8_171 = arith.constant 8 : index
    %c896_172 = arith.constant 896 : index
    %148 = vector.load %arg8[%c8_171, %c896_172] : memref<16x1152xbf16, #tpu.memory_space<vmem>>, vector<4x128xbf16>
    tpu.vector_store %arg8[%c8_171, %c896_172], %147 {strides = array<i32>} : memref<16x1152xbf16, #tpu.memory_space<vmem>>, vector<4x128xbf16>,
    %c5_173 = arith.constant 5 : index
    %c1_174 = arith.constant 1 : index
    %c0_175 = arith.constant 0 : index
    %149 = vector.load %arg7[%c5_173, %c1_174, %c0_175] : memref<6x6x128xf32, #tpu.memory_space<vmem>>, vector<1x4x128xf32>
    %150 = vector.shape_cast %149 : vector<1x4x128xf32> to vector<4x128xf32>
    %151 = arith.truncf %150 : vector<4x128xf32> to vector<4x128xbf16>
    %c12_176 = arith.constant 12 : index
    %c896_177 = arith.constant 896 : index
    %152 = vector.load %arg8[%c12_176, %c896_177] : memref<16x1152xbf16, #tpu.memory_space<vmem>>, vector<4x128xbf16>
    tpu.vector_store %arg8[%c12_176, %c896_177], %151 {strides = array<i32>} : memref<16x1152xbf16, #tpu.memory_space<vmem>>, vector<4x128xbf16>,
    %c2_178 = arith.constant 2 : index
    %c2_179 = arith.constant 2 : index
    %c0_180 = arith.constant 0 : index
    %153 = vector.load %arg7[%c2_178, %c2_179, %c0_180] : memref<6x6x128xf32, #tpu.memory_space<vmem>>, vector<1x4x128xf32>
    %154 = vector.shape_cast %153 : vector<1x4x128xf32> to vector<4x128xf32>
    %155 = arith.truncf %154 : vector<4x128xf32> to vector<4x128xbf16>
    %c0_181 = arith.constant 0 : index
    %c1024 = arith.constant 1024 : index
    %156 = vector.load %arg8[%c0_181, %c1024] : memref<16x1152xbf16, #tpu.memory_space<vmem>>, vector<4x128xbf16>
    tpu.vector_store %arg8[%c0_181, %c1024], %155 {strides = array<i32>} : memref<16x1152xbf16, #tpu.memory_space<vmem>>, vector<4x128xbf16>,
    %c3_182 = arith.constant 3 : index
    %c2_183 = arith.constant 2 : index
    %c0_184 = arith.constant 0 : index
    %157 = vector.load %arg7[%c3_182, %c2_183, %c0_184] : memref<6x6x128xf32, #tpu.memory_space<vmem>>, vector<1x4x128xf32>
    %158 = vector.shape_cast %157 : vector<1x4x128xf32> to vector<4x128xf32>
    %159 = arith.truncf %158 : vector<4x128xf32> to vector<4x128xbf16>
    %c4_185 = arith.constant 4 : index
    %c1024_186 = arith.constant 1024 : index
    %160 = vector.load %arg8[%c4_185, %c1024_186] : memref<16x1152xbf16, #tpu.memory_space<vmem>>, vector<4x128xbf16>
    tpu.vector_store %arg8[%c4_185, %c1024_186], %159 {strides = array<i32>} : memref<16x1152xbf16, #tpu.memory_space<vmem>>, vector<4x128xbf16>,
    %c4_187 = arith.constant 4 : index
    %c2_188 = arith.constant 2 : index
    %c0_189 = arith.constant 0 : index
    %161 = vector.load %arg7[%c4_187, %c2_188, %c0_189] : memref<6x6x128xf32, #tpu.memory_space<vmem>>, vector<1x4x128xf32>
    %162 = vector.shape_cast %161 : vector<1x4x128xf32> to vector<4x128xf32>
    %163 = arith.truncf %162 : vector<4x128xf32> to vector<4x128xbf16>
    %c8_190 = arith.constant 8 : index
    %c1024_191 = arith.constant 1024 : index
    %164 = vector.load %arg8[%c8_190, %c1024_191] : memref<16x1152xbf16, #tpu.memory_space<vmem>>, vector<4x128xbf16>
    tpu.vector_store %arg8[%c8_190, %c1024_191], %163 {strides = array<i32>} : memref<16x1152xbf16, #tpu.memory_space<vmem>>, vector<4x128xbf16>,
    %c5_192 = arith.constant 5 : index
    %c2_193 = arith.constant 2 : index
    %c0_194 = arith.constant 0 : index
    %165 = vector.load %arg7[%c5_192, %c2_193, %c0_194] : memref<6x6x128xf32, #tpu.memory_space<vmem>>, vector<1x4x128xf32>
    %166 = vector.shape_cast %165 : vector<1x4x128xf32> to vector<4x128xf32>
    %167 = arith.truncf %166 : vector<4x128xf32> to vector<4x128xbf16>
    %c12_195 = arith.constant 12 : index
    %c1024_196 = arith.constant 1024 : index
    %168 = vector.load %arg8[%c12_195, %c1024_196] : memref<16x1152xbf16, #tpu.memory_space<vmem>>, vector<4x128xbf16>
    tpu.vector_store %arg8[%c12_195, %c1024_196], %167 {strides = array<i32>} : memref<16x1152xbf16, #tpu.memory_space<vmem>>, vector<4x128xbf16>,
    %c0_197 = arith.constant 0 : index
    %c0_198 = arith.constant 0 : index
    %169 = vector.load %arg8[%c0_197, %c0_198] : memref<16x1152xbf16, #tpu.memory_space<vmem>>, vector<16x1152xbf16>
    %c0_199 = arith.constant 0 : index
    %c0_200 = arith.constant 0 : index
    %170 = vector.load %arg2[%c0_199, %c0_200] : memref<1152x128xbf16, #tpu.memory_space<vmem>>, vector<1152x128xbf16>
    %cst = arith.constant dense<0.000000e+00> : vector<16x128xf32>
    %171 = tpu.matmul %169, %170, %cst {dimension_numbers = #tpu.dot_dimension_numbers<[1], [0], [0], [1], [0, 0, 1, 1], [], []>} : vector<16x1152xbf16>, vector<1152x128xbf16>, vector<16x128xf32> -> vector<16x128xf32>
    %c0_201 = arith.constant 0 : index
    %c0_202 = arith.constant 0 : index
    %172 = vector.load %arg3[%c0_201, %c0_202] : memref<1x128xf32, #tpu.memory_space<vmem>>, vector<1x128xf32>
    %173 = vector.broadcast %172 : vector<1x128xf32> to vector<16x128xf32>
    %174 = arith.addf %171, %173 : vector<16x128xf32>
    %cst_203 = arith.constant 0.000000e+00 : f32
    %175 = vector.broadcast %cst_203 : f32 to vector<16x128xf32>
    %176 = arith.cmpf ogt, %174, %175 : vector<16x128xf32>
    %cst_204 = arith.constant 0.000000e+00 : f32
    %177 = vector.broadcast %cst_204 : f32 to vector<16x128xf32>
    %178 = arith.minimumf %174, %177 : vector<16x128xf32>
    %179 = math.exp %178 : vector<16x128xf32>
    %cst_205 = arith.constant 1.000000e+00 : f32
    %180 = vector.broadcast %cst_205 : f32 to vector<16x128xf32>
    %181 = arith.subf %179, %180 : vector<16x128xf32>
    %182 = arith.select %176, %174, %181 : vector<16x128xi1>, vector<16x128xf32>
    %183 = vector.extract_strided_slice %182 {offsets = [0, 0], sizes = [4, 128], strides = [1, 1]} : vector<16x128xf32> to vector<4x128xf32>
    %184 = vector.shape_cast %183 : vector<4x128xf32> to vector<1x4x128xf32>
    %c1_206 = arith.constant 1 : index
    %c1_207 = arith.constant 1 : index
    %c0_208 = arith.constant 0 : index
    %185 = vector.load %arg7[%c1_206, %c1_207, %c0_208] : memref<6x6x128xf32, #tpu.memory_space<vmem>>, vector<1x4x128xf32>
    tpu.vector_store %arg7[%c1_206, %c1_207, %c0_208], %184 {strides = array<i32>} : memref<6x6x128xf32, #tpu.memory_space<vmem>>, vector<1x4x128xf32>,
    %186 = vector.extract_strided_slice %182 {offsets = [4, 0], sizes = [4, 128], strides = [1, 1]} : vector<16x128xf32> to vector<4x128xf32>
    %187 = vector.shape_cast %186 : vector<4x128xf32> to vector<1x4x128xf32>
    %c2_209 = arith.constant 2 : index
    %c1_210 = arith.constant 1 : index
    %c0_211 = arith.constant 0 : index
    %188 = vector.load %arg7[%c2_209, %c1_210, %c0_211] : memref<6x6x128xf32, #tpu.memory_space<vmem>>, vector<1x4x128xf32>
    tpu.vector_store %arg7[%c2_209, %c1_210, %c0_211], %187 {strides = array<i32>} : memref<6x6x128xf32, #tpu.memory_space<vmem>>, vector<1x4x128xf32>,
    %189 = vector.extract_strided_slice %182 {offsets = [8, 0], sizes = [4, 128], strides = [1, 1]} : vector<16x128xf32> to vector<4x128xf32>
    %190 = vector.shape_cast %189 : vector<4x128xf32> to vector<1x4x128xf32>
    %c3_212 = arith.constant 3 : index
    %c1_213 = arith.constant 1 : index
    %c0_214 = arith.constant 0 : index
    %191 = vector.load %arg7[%c3_212, %c1_213, %c0_214] : memref<6x6x128xf32, #tpu.memory_space<vmem>>, vector<1x4x128xf32>
    tpu.vector_store %arg7[%c3_212, %c1_213, %c0_214], %190 {strides = array<i32>} : memref<6x6x128xf32, #tpu.memory_space<vmem>>, vector<1x4x128xf32>,
    %192 = vector.extract_strided_slice %182 {offsets = [12, 0], sizes = [4, 128], strides = [1, 1]} : vector<16x128xf32> to vector<4x128xf32>
    %193 = vector.shape_cast %192 : vector<4x128xf32> to vector<1x4x128xf32>
    %c4_215 = arith.constant 4 : index
    %c1_216 = arith.constant 1 : index
    %c0_217 = arith.constant 0 : index
    %194 = vector.load %arg7[%c4_215, %c1_216, %c0_217] : memref<6x6x128xf32, #tpu.memory_space<vmem>>, vector<1x4x128xf32>
    tpu.vector_store %arg7[%c4_215, %c1_216, %c0_217], %193 {strides = array<i32>} : memref<6x6x128xf32, #tpu.memory_space<vmem>>, vector<1x4x128xf32>,
    %195 = vector.extract_strided_slice %182 {offsets = [4, 0], sizes = [4, 128], strides = [1, 1]} : vector<16x128xf32> to vector<4x128xf32>
    %196 = vector.shape_cast %195 : vector<4x128xf32> to vector<1x4x128xf32>
    %c0_218 = arith.constant 0 : index
    %c1_219 = arith.constant 1 : index
    %c0_220 = arith.constant 0 : index
    %197 = vector.load %arg7[%c0_218, %c1_219, %c0_220] : memref<6x6x128xf32, #tpu.memory_space<vmem>>, vector<1x4x128xf32>
    tpu.vector_store %arg7[%c0_218, %c1_219, %c0_220], %196 {strides = array<i32>} : memref<6x6x128xf32, #tpu.memory_space<vmem>>, vector<1x4x128xf32>,
    %198 = vector.extract_strided_slice %182 {offsets = [8, 0], sizes = [4, 128], strides = [1, 1]} : vector<16x128xf32> to vector<4x128xf32>
    %199 = vector.shape_cast %198 : vector<4x128xf32> to vector<1x4x128xf32>
    %c5_221 = arith.constant 5 : index
    %c1_222 = arith.constant 1 : index
    %c0_223 = arith.constant 0 : index
    %200 = vector.load %arg7[%c5_221, %c1_222, %c0_223] : memref<6x6x128xf32, #tpu.memory_space<vmem>>, vector<1x4x128xf32>
    tpu.vector_store %arg7[%c5_221, %c1_222, %c0_223], %199 {strides = array<i32>} : memref<6x6x128xf32, #tpu.memory_space<vmem>>, vector<1x4x128xf32>,
    %c0_224 = arith.constant 0 : index
    %c2_225 = arith.constant 2 : index
    %c0_226 = arith.constant 0 : index
    %201 = vector.load %arg7[%c0_224, %c2_225, %c0_226] : memref<6x6x128xf32, #tpu.memory_space<vmem>>, vector<6x1x128xf32>
    %c0_227 = arith.constant 0 : index
    %c0_228 = arith.constant 0 : index
    %c0_229 = arith.constant 0 : index
    %202 = vector.load %arg7[%c0_227, %c0_228, %c0_229] : memref<6x6x128xf32, #tpu.memory_space<vmem>>, vector<6x1x128xf32>
    tpu.vector_store %arg7[%c0_227, %c0_228, %c0_229], %201 {strides = array<i32>} : memref<6x6x128xf32, #tpu.memory_space<vmem>>, vector<6x1x128xf32>,
    %c0_230 = arith.constant 0 : index
    %c3_231 = arith.constant 3 : index
    %c0_232 = arith.constant 0 : index
    %203 = vector.load %arg7[%c0_230, %c3_231, %c0_232] : memref<6x6x128xf32, #tpu.memory_space<vmem>>, vector<6x1x128xf32>
    %c0_233 = arith.constant 0 : index
    %c5_234 = arith.constant 5 : index
    %c0_235 = arith.constant 0 : index
    %204 = vector.load %arg7[%c0_233, %c5_234, %c0_235] : memref<6x6x128xf32, #tpu.memory_space<vmem>>, vector<6x1x128xf32>
    tpu.vector_store %arg7[%c0_233, %c5_234, %c0_235], %203 {strides = array<i32>} : memref<6x6x128xf32, #tpu.memory_space<vmem>>, vector<6x1x128xf32>,
    %c0_236 = arith.constant 0 : index
    %c0_237 = arith.constant 0 : index
    %c0_238 = arith.constant 0 : index
    %205 = vector.load %arg7[%c0_236, %c0_237, %c0_238] : memref<6x6x128xf32, #tpu.memory_space<vmem>>, vector<1x4x128xf32>
    %206 = vector.shape_cast %205 : vector<1x4x128xf32> to vector<4x128xf32>
    %207 = arith.truncf %206 : vector<4x128xf32> to vector<4x128xbf16>
    %c0_239 = arith.constant 0 : index
    %c0_240 = arith.constant 0 : index
    %208 = vector.load %arg8[%c0_239, %c0_240] : memref<16x1152xbf16, #tpu.memory_space<vmem>>, vector<4x128xbf16>
    tpu.vector_store %arg8[%c0_239, %c0_240], %207 {strides = array<i32>} : memref<16x1152xbf16, #tpu.memory_space<vmem>>, vector<4x128xbf16>,
    %c1_241 = arith.constant 1 : index
    %c0_242 = arith.constant 0 : index
    %c0_243 = arith.constant 0 : index
    %209 = vector.load %arg7[%c1_241, %c0_242, %c0_243] : memref<6x6x128xf32, #tpu.memory_space<vmem>>, vector<1x4x128xf32>
    %210 = vector.shape_cast %209 : vector<1x4x128xf32> to vector<4x128xf32>
    %211 = arith.truncf %210 : vector<4x128xf32> to vector<4x128xbf16>
    %c4_244 = arith.constant 4 : index
    %c0_245 = arith.constant 0 : index
    %212 = vector.load %arg8[%c4_244, %c0_245] : memref<16x1152xbf16, #tpu.memory_space<vmem>>, vector<4x128xbf16>
    tpu.vector_store %arg8[%c4_244, %c0_245], %211 {strides = array<i32>} : memref<16x1152xbf16, #tpu.memory_space<vmem>>, vector<4x128xbf16>,
    %c2_246 = arith.constant 2 : index
    %c0_247 = arith.constant 0 : index
    %c0_248 = arith.constant 0 : index
    %213 = vector.load %arg7[%c2_246, %c0_247, %c0_248] : memref<6x6x128xf32, #tpu.memory_space<vmem>>, vector<1x4x128xf32>
    %214 = vector.shape_cast %213 : vector<1x4x128xf32> to vector<4x128xf32>
    %215 = arith.truncf %214 : vector<4x128xf32> to vector<4x128xbf16>
    %c8_249 = arith.constant 8 : index
    %c0_250 = arith.constant 0 : index
    %216 = vector.load %arg8[%c8_249, %c0_250] : memref<16x1152xbf16, #tpu.memory_space<vmem>>, vector<4x128xbf16>
    tpu.vector_store %arg8[%c8_249, %c0_250], %215 {strides = array<i32>} : memref<16x1152xbf16, #tpu.memory_space<vmem>>, vector<4x128xbf16>,
    %c3_251 = arith.constant 3 : index
    %c0_252 = arith.constant 0 : index
    %c0_253 = arith.constant 0 : index
    %217 = vector.load %arg7[%c3_251, %c0_252, %c0_253] : memref<6x6x128xf32, #tpu.memory_space<vmem>>, vector<1x4x128xf32>
    %218 = vector.shape_cast %217 : vector<1x4x128xf32> to vector<4x128xf32>
    %219 = arith.truncf %218 : vector<4x128xf32> to vector<4x128xbf16>
    %c12_254 = arith.constant 12 : index
    %c0_255 = arith.constant 0 : index
    %220 = vector.load %arg8[%c12_254, %c0_255] : memref<16x1152xbf16, #tpu.memory_space<vmem>>, vector<4x128xbf16>
    tpu.vector_store %arg8[%c12_254, %c0_255], %219 {strides = array<i32>} : memref<16x1152xbf16, #tpu.memory_space<vmem>>, vector<4x128xbf16>,
    %c0_256 = arith.constant 0 : index
    %c1_257 = arith.constant 1 : index
    %c0_258 = arith.constant 0 : index
    %221 = vector.load %arg7[%c0_256, %c1_257, %c0_258] : memref<6x6x128xf32, #tpu.memory_space<vmem>>, vector<1x4x128xf32>
    %222 = vector.shape_cast %221 : vector<1x4x128xf32> to vector<4x128xf32>
    %223 = arith.truncf %222 : vector<4x128xf32> to vector<4x128xbf16>
    %c0_259 = arith.constant 0 : index
    %c128_260 = arith.constant 128 : index
    %224 = vector.load %arg8[%c0_259, %c128_260] : memref<16x1152xbf16, #tpu.memory_space<vmem>>, vector<4x128xbf16>
    tpu.vector_store %arg8[%c0_259, %c128_260], %223 {strides = array<i32>} : memref<16x1152xbf16, #tpu.memory_space<vmem>>, vector<4x128xbf16>,
    %c1_261 = arith.constant 1 : index
    %c1_262 = arith.constant 1 : index
    %c0_263 = arith.constant 0 : index
    %225 = vector.load %arg7[%c1_261, %c1_262, %c0_263] : memref<6x6x128xf32, #tpu.memory_space<vmem>>, vector<1x4x128xf32>
    %226 = vector.shape_cast %225 : vector<1x4x128xf32> to vector<4x128xf32>
    %227 = arith.truncf %226 : vector<4x128xf32> to vector<4x128xbf16>
    %c4_264 = arith.constant 4 : index
    %c128_265 = arith.constant 128 : index
    %228 = vector.load %arg8[%c4_264, %c128_265] : memref<16x1152xbf16, #tpu.memory_space<vmem>>, vector<4x128xbf16>
    tpu.vector_store %arg8[%c4_264, %c128_265], %227 {strides = array<i32>} : memref<16x1152xbf16, #tpu.memory_space<vmem>>, vector<4x128xbf16>,
    %c2_266 = arith.constant 2 : index
    %c1_267 = arith.constant 1 : index
    %c0_268 = arith.constant 0 : index
    %229 = vector.load %arg7[%c2_266, %c1_267, %c0_268] : memref<6x6x128xf32, #tpu.memory_space<vmem>>, vector<1x4x128xf32>
    %230 = vector.shape_cast %229 : vector<1x4x128xf32> to vector<4x128xf32>
    %231 = arith.truncf %230 : vector<4x128xf32> to vector<4x128xbf16>
    %c8_269 = arith.constant 8 : index
    %c128_270 = arith.constant 128 : index
    %232 = vector.load %arg8[%c8_269, %c128_270] : memref<16x1152xbf16, #tpu.memory_space<vmem>>, vector<4x128xbf16>
    tpu.vector_store %arg8[%c8_269, %c128_270], %231 {strides = array<i32>} : memref<16x1152xbf16, #tpu.memory_space<vmem>>, vector<4x128xbf16>,
    %c3_271 = arith.constant 3 : index
    %c1_272 = arith.constant 1 : index
    %c0_273 = arith.constant 0 : index
    %233 = vector.load %arg7[%c3_271, %c1_272, %c0_273] : memref<6x6x128xf32, #tpu.memory_space<vmem>>, vector<1x4x128xf32>
    %234 = vector.shape_cast %233 : vector<1x4x128xf32> to vector<4x128xf32>
    %235 = arith.truncf %234 : vector<4x128xf32> to vector<4x128xbf16>
    %c12_274 = arith.constant 12 : index
    %c128_275 = arith.constant 128 : index
    %236 = vector.load %arg8[%c12_274, %c128_275] : memref<16x1152xbf16, #tpu.memory_space<vmem>>, vector<4x128xbf16>
    tpu.vector_store %arg8[%c12_274, %c128_275], %235 {strides = array<i32>} : memref<16x1152xbf16, #tpu.memory_space<vmem>>, vector<4x128xbf16>,
    %c0_276 = arith.constant 0 : index
    %c2_277 = arith.constant 2 : index
    %c0_278 = arith.constant 0 : index
    %237 = vector.load %arg7[%c0_276, %c2_277, %c0_278] : memref<6x6x128xf32, #tpu.memory_space<vmem>>, vector<1x4x128xf32>
    %238 = vector.shape_cast %237 : vector<1x4x128xf32> to vector<4x128xf32>
    %239 = arith.truncf %238 : vector<4x128xf32> to vector<4x128xbf16>
    %c0_279 = arith.constant 0 : index
    %c256_280 = arith.constant 256 : index
    %240 = vector.load %arg8[%c0_279, %c256_280] : memref<16x1152xbf16, #tpu.memory_space<vmem>>, vector<4x128xbf16>
    tpu.vector_store %arg8[%c0_279, %c256_280], %239 {strides = array<i32>} : memref<16x1152xbf16, #tpu.memory_space<vmem>>, vector<4x128xbf16>,
    %c1_281 = arith.constant 1 : index
    %c2_282 = arith.constant 2 : index
    %c0_283 = arith.constant 0 : index
    %241 = vector.load %arg7[%c1_281, %c2_282, %c0_283] : memref<6x6x128xf32, #tpu.memory_space<vmem>>, vector<1x4x128xf32>
    %242 = vector.shape_cast %241 : vector<1x4x128xf32> to vector<4x128xf32>
    %243 = arith.truncf %242 : vector<4x128xf32> to vector<4x128xbf16>
    %c4_284 = arith.constant 4 : index
    %c256_285 = arith.constant 256 : index
    %244 = vector.load %arg8[%c4_284, %c256_285] : memref<16x1152xbf16, #tpu.memory_space<vmem>>, vector<4x128xbf16>
    tpu.vector_store %arg8[%c4_284, %c256_285], %243 {strides = array<i32>} : memref<16x1152xbf16, #tpu.memory_space<vmem>>, vector<4x128xbf16>,
    %c2_286 = arith.constant 2 : index
    %c2_287 = arith.constant 2 : index
    %c0_288 = arith.constant 0 : index
    %245 = vector.load %arg7[%c2_286, %c2_287, %c0_288] : memref<6x6x128xf32, #tpu.memory_space<vmem>>, vector<1x4x128xf32>
    %246 = vector.shape_cast %245 : vector<1x4x128xf32> to vector<4x128xf32>
    %247 = arith.truncf %246 : vector<4x128xf32> to vector<4x128xbf16>
    %c8_289 = arith.constant 8 : index
    %c256_290 = arith.constant 256 : index
    %248 = vector.load %arg8[%c8_289, %c256_290] : memref<16x1152xbf16, #tpu.memory_space<vmem>>, vector<4x128xbf16>
    tpu.vector_store %arg8[%c8_289, %c256_290], %247 {strides = array<i32>} : memref<16x1152xbf16, #tpu.memory_space<vmem>>, vector<4x128xbf16>,
    %c3_291 = arith.constant 3 : index
    %c2_292 = arith.constant 2 : index
    %c0_293 = arith.constant 0 : index
    %249 = vector.load %arg7[%c3_291, %c2_292, %c0_293] : memref<6x6x128xf32, #tpu.memory_space<vmem>>, vector<1x4x128xf32>
    %250 = vector.shape_cast %249 : vector<1x4x128xf32> to vector<4x128xf32>
    %251 = arith.truncf %250 : vector<4x128xf32> to vector<4x128xbf16>
    %c12_294 = arith.constant 12 : index
    %c256_295 = arith.constant 256 : index
    %252 = vector.load %arg8[%c12_294, %c256_295] : memref<16x1152xbf16, #tpu.memory_space<vmem>>, vector<4x128xbf16>
    tpu.vector_store %arg8[%c12_294, %c256_295], %251 {strides = array<i32>} : memref<16x1152xbf16, #tpu.memory_space<vmem>>, vector<4x128xbf16>,
    %c1_296 = arith.constant 1 : index
    %c0_297 = arith.constant 0 : index
    %c0_298 = arith.constant 0 : index
    %253 = vector.load %arg7[%c1_296, %c0_297, %c0_298] : memref<6x6x128xf32, #tpu.memory_space<vmem>>, vector<1x4x128xf32>
    %254 = vector.shape_cast %253 : vector<1x4x128xf32> to vector<4x128xf32>
    %255 = arith.truncf %254 : vector<4x128xf32> to vector<4x128xbf16>
    %c0_299 = arith.constant 0 : index
    %c384_300 = arith.constant 384 : index
    %256 = vector.load %arg8[%c0_299, %c384_300] : memref<16x1152xbf16, #tpu.memory_space<vmem>>, vector<4x128xbf16>
    tpu.vector_store %arg8[%c0_299, %c384_300], %255 {strides = array<i32>} : memref<16x1152xbf16, #tpu.memory_space<vmem>>, vector<4x128xbf16>,
    %c2_301 = arith.constant 2 : index
    %c0_302 = arith.constant 0 : index
    %c0_303 = arith.constant 0 : index
    %257 = vector.load %arg7[%c2_301, %c0_302, %c0_303] : memref<6x6x128xf32, #tpu.memory_space<vmem>>, vector<1x4x128xf32>
    %258 = vector.shape_cast %257 : vector<1x4x128xf32> to vector<4x128xf32>
    %259 = arith.truncf %258 : vector<4x128xf32> to vector<4x128xbf16>
    %c4_304 = arith.constant 4 : index
    %c384_305 = arith.constant 384 : index
    %260 = vector.load %arg8[%c4_304, %c384_305] : memref<16x1152xbf16, #tpu.memory_space<vmem>>, vector<4x128xbf16>
    tpu.vector_store %arg8[%c4_304, %c384_305], %259 {strides = array<i32>} : memref<16x1152xbf16, #tpu.memory_space<vmem>>, vector<4x128xbf16>,
    %c3_306 = arith.constant 3 : index
    %c0_307 = arith.constant 0 : index
    %c0_308 = arith.constant 0 : index
    %261 = vector.load %arg7[%c3_306, %c0_307, %c0_308] : memref<6x6x128xf32, #tpu.memory_space<vmem>>, vector<1x4x128xf32>
    %262 = vector.shape_cast %261 : vector<1x4x128xf32> to vector<4x128xf32>
    %263 = arith.truncf %262 : vector<4x128xf32> to vector<4x128xbf16>
    %c8_309 = arith.constant 8 : index
    %c384_310 = arith.constant 384 : index
    %264 = vector.load %arg8[%c8_309, %c384_310] : memref<16x1152xbf16, #tpu.memory_space<vmem>>, vector<4x128xbf16>
    tpu.vector_store %arg8[%c8_309, %c384_310], %263 {strides = array<i32>} : memref<16x1152xbf16, #tpu.memory_space<vmem>>, vector<4x128xbf16>,
    %c4_311 = arith.constant 4 : index
    %c0_312 = arith.constant 0 : index
    %c0_313 = arith.constant 0 : index
    %265 = vector.load %arg7[%c4_311, %c0_312, %c0_313] : memref<6x6x128xf32, #tpu.memory_space<vmem>>, vector<1x4x128xf32>
    %266 = vector.shape_cast %265 : vector<1x4x128xf32> to vector<4x128xf32>
    %267 = arith.truncf %266 : vector<4x128xf32> to vector<4x128xbf16>
    %c12_314 = arith.constant 12 : index
    %c384_315 = arith.constant 384 : index
    %268 = vector.load %arg8[%c12_314, %c384_315] : memref<16x1152xbf16, #tpu.memory_space<vmem>>, vector<4x128xbf16>
    tpu.vector_store %arg8[%c12_314, %c384_315], %267 {strides = array<i32>} : memref<16x1152xbf16, #tpu.memory_space<vmem>>, vector<4x128xbf16>,
    %c1_316 = arith.constant 1 : index
    %c1_317 = arith.constant 1 : index
    %c0_318 = arith.constant 0 : index
    %269 = vector.load %arg7[%c1_316, %c1_317, %c0_318] : memref<6x6x128xf32, #tpu.memory_space<vmem>>, vector<1x4x128xf32>
    %270 = vector.shape_cast %269 : vector<1x4x128xf32> to vector<4x128xf32>
    %271 = arith.truncf %270 : vector<4x128xf32> to vector<4x128xbf16>
    %c0_319 = arith.constant 0 : index
    %c512_320 = arith.constant 512 : index
    %272 = vector.load %arg8[%c0_319, %c512_320] : memref<16x1152xbf16, #tpu.memory_space<vmem>>, vector<4x128xbf16>
    tpu.vector_store %arg8[%c0_319, %c512_320], %271 {strides = array<i32>} : memref<16x1152xbf16, #tpu.memory_space<vmem>>, vector<4x128xbf16>,
    %c2_321 = arith.constant 2 : index
    %c1_322 = arith.constant 1 : index
    %c0_323 = arith.constant 0 : index
    %273 = vector.load %arg7[%c2_321, %c1_322, %c0_323] : memref<6x6x128xf32, #tpu.memory_space<vmem>>, vector<1x4x128xf32>
    %274 = vector.shape_cast %273 : vector<1x4x128xf32> to vector<4x128xf32>
    %275 = arith.truncf %274 : vector<4x128xf32> to vector<4x128xbf16>
    %c4_324 = arith.constant 4 : index
    %c512_325 = arith.constant 512 : index
    %276 = vector.load %arg8[%c4_324, %c512_325] : memref<16x1152xbf16, #tpu.memory_space<vmem>>, vector<4x128xbf16>
    tpu.vector_store %arg8[%c4_324, %c512_325], %275 {strides = array<i32>} : memref<16x1152xbf16, #tpu.memory_space<vmem>>, vector<4x128xbf16>,
    %c3_326 = arith.constant 3 : index
    %c1_327 = arith.constant 1 : index
    %c0_328 = arith.constant 0 : index
    %277 = vector.load %arg7[%c3_326, %c1_327, %c0_328] : memref<6x6x128xf32, #tpu.memory_space<vmem>>, vector<1x4x128xf32>
    %278 = vector.shape_cast %277 : vector<1x4x128xf32> to vector<4x128xf32>
    %279 = arith.truncf %278 : vector<4x128xf32> to vector<4x128xbf16>
    %c8_329 = arith.constant 8 : index
    %c512_330 = arith.constant 512 : index
    %280 = vector.load %arg8[%c8_329, %c512_330] : memref<16x1152xbf16, #tpu.memory_space<vmem>>, vector<4x128xbf16>
    tpu.vector_store %arg8[%c8_329, %c512_330], %279 {strides = array<i32>} : memref<16x1152xbf16, #tpu.memory_space<vmem>>, vector<4x128xbf16>,
    %c4_331 = arith.constant 4 : index
    %c1_332 = arith.constant 1 : index
    %c0_333 = arith.constant 0 : index
    %281 = vector.load %arg7[%c4_331, %c1_332, %c0_333] : memref<6x6x128xf32, #tpu.memory_space<vmem>>, vector<1x4x128xf32>
    %282 = vector.shape_cast %281 : vector<1x4x128xf32> to vector<4x128xf32>
    %283 = arith.truncf %282 : vector<4x128xf32> to vector<4x128xbf16>
    %c12_334 = arith.constant 12 : index
    %c512_335 = arith.constant 512 : index
    %284 = vector.load %arg8[%c12_334, %c512_335] : memref<16x1152xbf16, #tpu.memory_space<vmem>>, vector<4x128xbf16>
    tpu.vector_store %arg8[%c12_334, %c512_335], %283 {strides = array<i32>} : memref<16x1152xbf16, #tpu.memory_space<vmem>>, vector<4x128xbf16>,
    %c1_336 = arith.constant 1 : index
    %c2_337 = arith.constant 2 : index
    %c0_338 = arith.constant 0 : index
    %285 = vector.load %arg7[%c1_336, %c2_337, %c0_338] : memref<6x6x128xf32, #tpu.memory_space<vmem>>, vector<1x4x128xf32>
    %286 = vector.shape_cast %285 : vector<1x4x128xf32> to vector<4x128xf32>
    %287 = arith.truncf %286 : vector<4x128xf32> to vector<4x128xbf16>
    %c0_339 = arith.constant 0 : index
    %c640_340 = arith.constant 640 : index
    %288 = vector.load %arg8[%c0_339, %c640_340] : memref<16x1152xbf16, #tpu.memory_space<vmem>>, vector<4x128xbf16>
    tpu.vector_store %arg8[%c0_339, %c640_340], %287 {strides = array<i32>} : memref<16x1152xbf16, #tpu.memory_space<vmem>>, vector<4x128xbf16>,
    %c2_341 = arith.constant 2 : index
    %c2_342 = arith.constant 2 : index
    %c0_343 = arith.constant 0 : index
    %289 = vector.load %arg7[%c2_341, %c2_342, %c0_343] : memref<6x6x128xf32, #tpu.memory_space<vmem>>, vector<1x4x128xf32>
    %290 = vector.shape_cast %289 : vector<1x4x128xf32> to vector<4x128xf32>
    %291 = arith.truncf %290 : vector<4x128xf32> to vector<4x128xbf16>
    %c4_344 = arith.constant 4 : index
    %c640_345 = arith.constant 640 : index
    %292 = vector.load %arg8[%c4_344, %c640_345] : memref<16x1152xbf16, #tpu.memory_space<vmem>>, vector<4x128xbf16>
    tpu.vector_store %arg8[%c4_344, %c640_345], %291 {strides = array<i32>} : memref<16x1152xbf16, #tpu.memory_space<vmem>>, vector<4x128xbf16>,
    %c3_346 = arith.constant 3 : index
    %c2_347 = arith.constant 2 : index
    %c0_348 = arith.constant 0 : index
    %293 = vector.load %arg7[%c3_346, %c2_347, %c0_348] : memref<6x6x128xf32, #tpu.memory_space<vmem>>, vector<1x4x128xf32>
    %294 = vector.shape_cast %293 : vector<1x4x128xf32> to vector<4x128xf32>
    %295 = arith.truncf %294 : vector<4x128xf32> to vector<4x128xbf16>
    %c8_349 = arith.constant 8 : index
    %c640_350 = arith.constant 640 : index
    %296 = vector.load %arg8[%c8_349, %c640_350] : memref<16x1152xbf16, #tpu.memory_space<vmem>>, vector<4x128xbf16>
    tpu.vector_store %arg8[%c8_349, %c640_350], %295 {strides = array<i32>} : memref<16x1152xbf16, #tpu.memory_space<vmem>>, vector<4x128xbf16>,
    %c4_351 = arith.constant 4 : index
    %c2_352 = arith.constant 2 : index
    %c0_353 = arith.constant 0 : index
    %297 = vector.load %arg7[%c4_351, %c2_352, %c0_353] : memref<6x6x128xf32, #tpu.memory_space<vmem>>, vector<1x4x128xf32>
    %298 = vector.shape_cast %297 : vector<1x4x128xf32> to vector<4x128xf32>
    %299 = arith.truncf %298 : vector<4x128xf32> to vector<4x128xbf16>
    %c12_354 = arith.constant 12 : index
    %c640_355 = arith.constant 640 : index
    %300 = vector.load %arg8[%c12_354, %c640_355] : memref<16x1152xbf16, #tpu.memory_space<vmem>>, vector<4x128xbf16>
    tpu.vector_store %arg8[%c12_354, %c640_355], %299 {strides = array<i32>} : memref<16x1152xbf16, #tpu.memory_space<vmem>>, vector<4x128xbf16>,
    %c2_356 = arith.constant 2 : index
    %c0_357 = arith.constant 0 : index
    %c0_358 = arith.constant 0 : index
    %301 = vector.load %arg7[%c2_356, %c0_357, %c0_358] : memref<6x6x128xf32, #tpu.memory_space<vmem>>, vector<1x4x128xf32>
    %302 = vector.shape_cast %301 : vector<1x4x128xf32> to vector<4x128xf32>
    %303 = arith.truncf %302 : vector<4x128xf32> to vector<4x128xbf16>
    %c0_359 = arith.constant 0 : index
    %c768_360 = arith.constant 768 : index
    %304 = vector.load %arg8[%c0_359, %c768_360] : memref<16x1152xbf16, #tpu.memory_space<vmem>>, vector<4x128xbf16>
    tpu.vector_store %arg8[%c0_359, %c768_360], %303 {strides = array<i32>} : memref<16x1152xbf16, #tpu.memory_space<vmem>>, vector<4x128xbf16>,
    %c3_361 = arith.constant 3 : index
    %c0_362 = arith.constant 0 : index
    %c0_363 = arith.constant 0 : index
    %305 = vector.load %arg7[%c3_361, %c0_362, %c0_363] : memref<6x6x128xf32, #tpu.memory_space<vmem>>, vector<1x4x128xf32>
    %306 = vector.shape_cast %305 : vector<1x4x128xf32> to vector<4x128xf32>
    %307 = arith.truncf %306 : vector<4x128xf32> to vector<4x128xbf16>
    %c4_364 = arith.constant 4 : index
    %c768_365 = arith.constant 768 : index
    %308 = vector.load %arg8[%c4_364, %c768_365] : memref<16x1152xbf16, #tpu.memory_space<vmem>>, vector<4x128xbf16>
    tpu.vector_store %arg8[%c4_364, %c768_365], %307 {strides = array<i32>} : memref<16x1152xbf16, #tpu.memory_space<vmem>>, vector<4x128xbf16>,
    %c4_366 = arith.constant 4 : index
    %c0_367 = arith.constant 0 : index
    %c0_368 = arith.constant 0 : index
    %309 = vector.load %arg7[%c4_366, %c0_367, %c0_368] : memref<6x6x128xf32, #tpu.memory_space<vmem>>, vector<1x4x128xf32>
    %310 = vector.shape_cast %309 : vector<1x4x128xf32> to vector<4x128xf32>
    %311 = arith.truncf %310 : vector<4x128xf32> to vector<4x128xbf16>
    %c8_369 = arith.constant 8 : index
    %c768_370 = arith.constant 768 : index
    %312 = vector.load %arg8[%c8_369, %c768_370] : memref<16x1152xbf16, #tpu.memory_space<vmem>>, vector<4x128xbf16>
    tpu.vector_store %arg8[%c8_369, %c768_370], %311 {strides = array<i32>} : memref<16x1152xbf16, #tpu.memory_space<vmem>>, vector<4x128xbf16>,
    %c5_371 = arith.constant 5 : index
    %c0_372 = arith.constant 0 : index
    %c0_373 = arith.constant 0 : index
    %313 = vector.load %arg7[%c5_371, %c0_372, %c0_373] : memref<6x6x128xf32, #tpu.memory_space<vmem>>, vector<1x4x128xf32>
    %314 = vector.shape_cast %313 : vector<1x4x128xf32> to vector<4x128xf32>
    %315 = arith.truncf %314 : vector<4x128xf32> to vector<4x128xbf16>
    %c12_374 = arith.constant 12 : index
    %c768_375 = arith.constant 768 : index
    %316 = vector.load %arg8[%c12_374, %c768_375] : memref<16x1152xbf16, #tpu.memory_space<vmem>>, vector<4x128xbf16>
    tpu.vector_store %arg8[%c12_374, %c768_375], %315 {strides = array<i32>} : memref<16x1152xbf16, #tpu.memory_space<vmem>>, vector<4x128xbf16>,
    %c2_376 = arith.constant 2 : index
    %c1_377 = arith.constant 1 : index
    %c0_378 = arith.constant 0 : index
    %317 = vector.load %arg7[%c2_376, %c1_377, %c0_378] : memref<6x6x128xf32, #tpu.memory_space<vmem>>, vector<1x4x128xf32>
    %318 = vector.shape_cast %317 : vector<1x4x128xf32> to vector<4x128xf32>
    %319 = arith.truncf %318 : vector<4x128xf32> to vector<4x128xbf16>
    %c0_379 = arith.constant 0 : index
    %c896_380 = arith.constant 896 : index
    %320 = vector.load %arg8[%c0_379, %c896_380] : memref<16x1152xbf16, #tpu.memory_space<vmem>>, vector<4x128xbf16>
    tpu.vector_store %arg8[%c0_379, %c896_380], %319 {strides = array<i32>} : memref<16x1152xbf16, #tpu.memory_space<vmem>>, vector<4x128xbf16>,
    %c3_381 = arith.constant 3 : index
    %c1_382 = arith.constant 1 : index
    %c0_383 = arith.constant 0 : index
    %321 = vector.load %arg7[%c3_381, %c1_382, %c0_383] : memref<6x6x128xf32, #tpu.memory_space<vmem>>, vector<1x4x128xf32>
    %322 = vector.shape_cast %321 : vector<1x4x128xf32> to vector<4x128xf32>
    %323 = arith.truncf %322 : vector<4x128xf32> to vector<4x128xbf16>
    %c4_384 = arith.constant 4 : index
    %c896_385 = arith.constant 896 : index
    %324 = vector.load %arg8[%c4_384, %c896_385] : memref<16x1152xbf16, #tpu.memory_space<vmem>>, vector<4x128xbf16>
    tpu.vector_store %arg8[%c4_384, %c896_385], %323 {strides = array<i32>} : memref<16x1152xbf16, #tpu.memory_space<vmem>>, vector<4x128xbf16>,
    %c4_386 = arith.constant 4 : index
    %c1_387 = arith.constant 1 : index
    %c0_388 = arith.constant 0 : index
    %325 = vector.load %arg7[%c4_386, %c1_387, %c0_388] : memref<6x6x128xf32, #tpu.memory_space<vmem>>, vector<1x4x128xf32>
    %326 = vector.shape_cast %325 : vector<1x4x128xf32> to vector<4x128xf32>
    %327 = arith.truncf %326 : vector<4x128xf32> to vector<4x128xbf16>
    %c8_389 = arith.constant 8 : index
    %c896_390 = arith.constant 896 : index
    %328 = vector.load %arg8[%c8_389, %c896_390] : memref<16x1152xbf16, #tpu.memory_space<vmem>>, vector<4x128xbf16>
    tpu.vector_store %arg8[%c8_389, %c896_390], %327 {strides = array<i32>} : memref<16x1152xbf16, #tpu.memory_space<vmem>>, vector<4x128xbf16>,
    %c5_391 = arith.constant 5 : index
    %c1_392 = arith.constant 1 : index
    %c0_393 = arith.constant 0 : index
    %329 = vector.load %arg7[%c5_391, %c1_392, %c0_393] : memref<6x6x128xf32, #tpu.memory_space<vmem>>, vector<1x4x128xf32>
    %330 = vector.shape_cast %329 : vector<1x4x128xf32> to vector<4x128xf32>
    %331 = arith.truncf %330 : vector<4x128xf32> to vector<4x128xbf16>
    %c12_394 = arith.constant 12 : index
    %c896_395 = arith.constant 896 : index
    %332 = vector.load %arg8[%c12_394, %c896_395] : memref<16x1152xbf16, #tpu.memory_space<vmem>>, vector<4x128xbf16>
    tpu.vector_store %arg8[%c12_394, %c896_395], %331 {strides = array<i32>} : memref<16x1152xbf16, #tpu.memory_space<vmem>>, vector<4x128xbf16>,
    %c2_396 = arith.constant 2 : index
    %c2_397 = arith.constant 2 : index
    %c0_398 = arith.constant 0 : index
    %333 = vector.load %arg7[%c2_396, %c2_397, %c0_398] : memref<6x6x128xf32, #tpu.memory_space<vmem>>, vector<1x4x128xf32>
    %334 = vector.shape_cast %333 : vector<1x4x128xf32> to vector<4x128xf32>
    %335 = arith.truncf %334 : vector<4x128xf32> to vector<4x128xbf16>
    %c0_399 = arith.constant 0 : index
    %c1024_400 = arith.constant 1024 : index
    %336 = vector.load %arg8[%c0_399, %c1024_400] : memref<16x1152xbf16, #tpu.memory_space<vmem>>, vector<4x128xbf16>
    tpu.vector_store %arg8[%c0_399, %c1024_400], %335 {strides = array<i32>} : memref<16x1152xbf16, #tpu.memory_space<vmem>>, vector<4x128xbf16>,
    %c3_401 = arith.constant 3 : index
    %c2_402 = arith.constant 2 : index
    %c0_403 = arith.constant 0 : index
    %337 = vector.load %arg7[%c3_401, %c2_402, %c0_403] : memref<6x6x128xf32, #tpu.memory_space<vmem>>, vector<1x4x128xf32>
    %338 = vector.shape_cast %337 : vector<1x4x128xf32> to vector<4x128xf32>
    %339 = arith.truncf %338 : vector<4x128xf32> to vector<4x128xbf16>
    %c4_404 = arith.constant 4 : index
    %c1024_405 = arith.constant 1024 : index
    %340 = vector.load %arg8[%c4_404, %c1024_405] : memref<16x1152xbf16, #tpu.memory_space<vmem>>, vector<4x128xbf16>
    tpu.vector_store %arg8[%c4_404, %c1024_405], %339 {strides = array<i32>} : memref<16x1152xbf16, #tpu.memory_space<vmem>>, vector<4x128xbf16>,
    %c4_406 = arith.constant 4 : index
    %c2_407 = arith.constant 2 : index
    %c0_408 = arith.constant 0 : index
    %341 = vector.load %arg7[%c4_406, %c2_407, %c0_408] : memref<6x6x128xf32, #tpu.memory_space<vmem>>, vector<1x4x128xf32>
    %342 = vector.shape_cast %341 : vector<1x4x128xf32> to vector<4x128xf32>
    %343 = arith.truncf %342 : vector<4x128xf32> to vector<4x128xbf16>
    %c8_409 = arith.constant 8 : index
    %c1024_410 = arith.constant 1024 : index
    %344 = vector.load %arg8[%c8_409, %c1024_410] : memref<16x1152xbf16, #tpu.memory_space<vmem>>, vector<4x128xbf16>
    tpu.vector_store %arg8[%c8_409, %c1024_410], %343 {strides = array<i32>} : memref<16x1152xbf16, #tpu.memory_space<vmem>>, vector<4x128xbf16>,
    %c5_411 = arith.constant 5 : index
    %c2_412 = arith.constant 2 : index
    %c0_413 = arith.constant 0 : index
    %345 = vector.load %arg7[%c5_411, %c2_412, %c0_413] : memref<6x6x128xf32, #tpu.memory_space<vmem>>, vector<1x4x128xf32>
    %346 = vector.shape_cast %345 : vector<1x4x128xf32> to vector<4x128xf32>
    %347 = arith.truncf %346 : vector<4x128xf32> to vector<4x128xbf16>
    %c12_414 = arith.constant 12 : index
    %c1024_415 = arith.constant 1024 : index
    %348 = vector.load %arg8[%c12_414, %c1024_415] : memref<16x1152xbf16, #tpu.memory_space<vmem>>, vector<4x128xbf16>
    tpu.vector_store %arg8[%c12_414, %c1024_415], %347 {strides = array<i32>} : memref<16x1152xbf16, #tpu.memory_space<vmem>>, vector<4x128xbf16>,
    %c0_416 = arith.constant 0 : index
    %c0_417 = arith.constant 0 : index
    %349 = vector.load %arg8[%c0_416, %c0_417] : memref<16x1152xbf16, #tpu.memory_space<vmem>>, vector<16x1152xbf16>
    %c0_418 = arith.constant 0 : index
    %c0_419 = arith.constant 0 : index
    %350 = vector.load %arg4[%c0_418, %c0_419] : memref<1152x128xbf16, #tpu.memory_space<vmem>>, vector<1152x128xbf16>
    %cst_420 = arith.constant dense<0.000000e+00> : vector<16x128xf32>
    %351 = tpu.matmul %349, %350, %cst_420 {dimension_numbers = #tpu.dot_dimension_numbers<[1], [0], [0], [1], [0, 0, 1, 1], [], []>} : vector<16x1152xbf16>, vector<1152x128xbf16>, vector<16x128xf32> -> vector<16x128xf32>
    %c0_421 = arith.constant 0 : index
    %c0_422 = arith.constant 0 : index
    %352 = vector.load %arg5[%c0_421, %c0_422] : memref<1x128xf32, #tpu.memory_space<vmem>>, vector<1x128xf32>
    %353 = vector.broadcast %352 : vector<1x128xf32> to vector<16x128xf32>
    %354 = arith.addf %351, %353 : vector<16x128xf32>
    %cst_423 = arith.constant 0.000000e+00 : f32
    %355 = vector.broadcast %cst_423 : f32 to vector<16x128xf32>
    %356 = arith.cmpf ogt, %354, %355 : vector<16x128xf32>
    %cst_424 = arith.constant 0.000000e+00 : f32
    %357 = vector.broadcast %cst_424 : f32 to vector<16x128xf32>
    %358 = arith.minimumf %354, %357 : vector<16x128xf32>
    %359 = math.exp %358 : vector<16x128xf32>
    %cst_425 = arith.constant 1.000000e+00 : f32
    %360 = vector.broadcast %cst_425 : f32 to vector<16x128xf32>
    %361 = arith.subf %359, %360 : vector<16x128xf32>
    %362 = arith.select %356, %354, %361 : vector<16x128xi1>, vector<16x128xf32>
    %363 = arith.truncf %362 : vector<16x128xf32> to vector<16x128xbf16>
    %c0_426 = arith.constant 0 : index
    %c0_427 = arith.constant 0 : index
    %c0_428 = arith.constant 0 : index
    %364 = vector.load %arg6[%c0_426, %c0_427, %c0_428] : memref<1x16x128xbf16, #tpu.memory_space<vmem>>, vector<1x16x128xbf16>
    %365 = vector.shape_cast %364 : vector<1x16x128xbf16> to vector<16x128xbf16>
    %366 = vector.shape_cast %363 : vector<16x128xbf16> to vector<1x16x128xbf16>
    tpu.vector_store %arg6[%c0_426, %c0_427, %c0_428], %366 {strides = array<i32>} : memref<1x16x128xbf16, #tpu.memory_space<vmem>>, vector<1x16x128xbf16>,
    return
  }
  func.func @transform_0(%arg0: i32) -> (i32, i32, i32) {
    %c0_i32 = arith.constant 0 : i32
    %c0_i32_0 = arith.constant 0 : i32
    %c0_i32_1 = arith.constant 0 : i32
    return %arg0, %c0_i32, %c0_i32_0 : i32, i32, i32
  }
  func.func @transform_1(%arg0: i32) -> (i32, i32) {
    %c0_i32 = arith.constant 0 : i32
    %c0_i32_0 = arith.constant 0 : i32
    %c0_i32_1 = arith.constant 0 : i32
    return %c0_i32, %c0_i32_0 : i32, i32
  }
  func.func @transform_2(%arg0: i32) -> (i32, i32) {
    %c0_i32 = arith.constant 0 : i32
    %c0_i32_0 = arith.constant 0 : i32
    %c0_i32_1 = arith.constant 0 : i32
    return %c0_i32, %c0_i32_0 : i32, i32
  }
  func.func @transform_3(%arg0: i32) -> (i32, i32) {
    %c0_i32 = arith.constant 0 : i32
    %c0_i32_0 = arith.constant 0 : i32
    %c0_i32_1 = arith.constant 0 : i32
    return %c0_i32, %c0_i32_0 : i32, i32
  }
  func.func @transform_4(%arg0: i32) -> (i32, i32) {
    %c0_i32 = arith.constant 0 : i32
    %c0_i32_0 = arith.constant 0 : i32
    %c0_i32_1 = arith.constant 0 : i32
    return %c0_i32, %c0_i32_0 : i32, i32
  }
  func.func @transform_5(%arg0: i32) -> (i32, i32, i32) {
    %c0_i32 = arith.constant 0 : i32
    %c0_i32_0 = arith.constant 0 : i32
    %c0_i32_1 = arith.constant 0 : i32
    return %arg0, %c0_i32, %c0_i32_0 : i32, i32, i32
  }
}

</mosaic_0001>

<bundles_post_ra>
// kernel: attentive_encoder_decoder.7
= control target key start
LH: loop header
LB: loop body
LE: loop exit
PB: predicated region body
PF: predicated region fallthrough
CT: control target
= control target key end

     0   :  { %s1382_s12 = smov 0   ;;  %s1697_s0 = inlined_call_operand.vmem [shape: bf16[512,128], index: 0, kind: input, shape index: {}]   ;;  %s1698_s1 = inlined_call_operand.vmem [shape: bf16[128,128], index: 1, kind: input, shape index: {}]   ;;  %s1699_s2 = inlined_call_operand.vmem [shape: f32[1,128], index: 2, kind: input, shape index: {}]   ;;  %s1700_s3 = inlined_call_operand.vmem [shape: bf16[512,128], index: 3, kind: output, shape index: {}]  }
   0x1 LB: > { %s943_s13 = sadd.s32 4294967295, %s1360_s12   ;;  %p947_p0 = scmp.ge.s32.totalorder %s1360_s12, 1  ;;  %s1360_s12 = sphi %s1382_s12, %s13_s12  }
   0x2   : > { %p138_p1 = scmp.lt.s32.totalorder %s1360_s12, 3 }
   0x4   : > { %p139_p2 = pnand %p947_p0, %p138_p1 }
   0x5   : > { %s948_s16 = sshll.u32 (!%p139_p2), %s943_s13, 5 }
   0x6   : > { %142 = sbr.rel (%p139_p2) target bundleno = 310 (0x136), region = 32  ;;  %p163_p3 = scmp.lt.s32.totalorder (!%p139_p2), %s948_s16, 63 }
   0xb   : > { %v1266_v0 = vld [vmem:[%s1698_s1 + $0x38] sm:$0xff]   ;;  %v1267_v1 = vld [vmem:[%s1698_s1 + $0x30] sm:$0xff]   ;;  %s1702_s16 = smov (!%p163_p3, %s948_s16), 63  ;;  %v1268_v2 = vld [vmem:[%s1698_s1 + $0x28] sm:$0xff]  }
   0xc   : > { %1194 = vmatprep.subr.bf16.mxu0 %v1266_v0  ;;  %1242 = vmatprep.subr.bf16.mxu1 %v1266_v0  ;;  %s949_s21 = sshll.u32 %s1702_s16, 2  ;;  %v1269_v3 = vld [vmem:[%s1698_s1 + $0x20] sm:$0xff]   ;;  %v1270_v6 = vld [vmem:[%s1698_s1 + $0x18] sm:$0xff]   ;;  %v1271_v7 = vld [vmem:[%s1698_s1 + $0x10] sm:$0xff]  }
   0xd   : > { %1195 = vmatpush3.bf16.msra.mxu0 %v1266_v0  ;;  %1250 = vmatpush3.bf16.msra.mxu1 %v1266_v0  ;;  %s1407_s24 = scalar_lea.vmem %s1697_s0, %s949_s21  ;;  %v1272_v8 = vld [vmem:[%s1698_s1 + $0x8] sm:$0xff]   ;;  %v1273_v9 = vld [vmem:[%s1698_s1] sm:$0xff]   ;;  %s1544_s13 = scalar_lea.vmem %s1700_s3, %s949_s21 }
   0xe   : > { %1196 = vmatprep.subr.bf16.mxu0 %v1267_v1  ;;  %1243 = vmatprep.subr.bf16.mxu1 %v1267_v1  ;;  %v1274_v4 = vld [vmem:[%s1407_s24] sm:$0xff]   ;;  %v1276_v10 = vld [vmem:[%s1407_s24 + $0x8] sm:$0xff]   ;;  %v1278_v12 = vld [vmem:[%s1407_s24 + $0x10] sm:$0xff]  }
   0xf   : > { %v1275_v5 = vld [vmem:[%s1407_s24 + $0x40] sm:$0xff]   ;;  %1210 = vmatprep.mubr.bf16.mxu0 %v1274_v4  ;;  %v1277_v11 = vld [vmem:[%s1407_s24 + $0x48] sm:$0xff]   ;;  %v1279_v13 = vld [vmem:[%s1407_s24 + $0x50] sm:$0xff]  }
  0x10   : > { %1226 = vmatprep.mubr.bf16.mxu1 %v1275_v5  ;;  %v1280_v14 = vld [vmem:[%s1407_s24 + $0x18] sm:$0xff]   ;;  %v1282_v16 = vld [vmem:[%s1407_s24 + $0x20] sm:$0xff]   ;;  %v1284_v18 = vld [vmem:[%s1407_s24 + $0x28] sm:$0xff]  }
  0x11   : > { %1197 = vmatpush3.bf16.msra.mxu0 %v1267_v1  ;;  %1251 = vmatpush3.bf16.msra.mxu1 %v1267_v1  ;;  %v1281_v15 = vld [vmem:[%s1407_s24 + $0x58] sm:$0xff]   ;;  %v1283_v17 = vld [vmem:[%s1407_s24 + $0x60] sm:$0xff]   ;;  %v1285_v19 = vld [vmem:[%s1407_s24 + $0x68] sm:$0xff]  }
  0x12   : > { %1198 = vmatprep.subr.bf16.mxu0 %v1268_v2  ;;  %1244 = vmatprep.subr.bf16.mxu1 %v1268_v2  ;;  %v1286_v20 = vld [vmem:[%s1407_s24 + $0x30] sm:$0xff]   ;;  %v1288_v22 = vld [vmem:[%s1407_s24 + $0x38] sm:$0xff]   ;;  %v1443_v24 = vld [vmem:[%s1699_s2] ss:$0 sm:$0xff] }
  0x13   : > { %v1287_v21 = vld [vmem:[%s1407_s24 + $0x70] sm:$0xff]   ;;  %v1289_v23 = vld [vmem:[%s1407_s24 + $0x78] sm:$0xff]  }
  0x15   : > { %1199 = vmatpush3.bf16.msra.mxu0 %v1268_v2  ;;  %1252 = vmatpush3.bf16.msra.mxu1 %v1268_v2 }
  0x16   : > { %1200 = vmatprep.subr.bf16.mxu0 %v1269_v3  ;;  %1245 = vmatprep.subr.bf16.mxu1 %v1269_v3 }
  0x19   : > { %1201 = vmatpush3.bf16.msra.mxu0 %v1269_v3  ;;  %1253 = vmatpush3.bf16.msra.mxu1 %v1269_v3 }
  0x1a   : > { %1202 = vmatprep.subr.bf16.mxu0 %v1270_v6  ;;  %1246 = vmatprep.subr.bf16.mxu1 %v1270_v6 }
  0x1d   : > { %1203 = vmatpush3.bf16.msra.mxu0 %v1270_v6  ;;  %1254 = vmatpush3.bf16.msra.mxu1 %v1270_v6 }
  0x1e   : > { %1204 = vmatprep.subr.bf16.mxu0 %v1271_v7  ;;  %1247 = vmatprep.subr.bf16.mxu1 %v1271_v7 }
  0x21   : > { %1205 = vmatpush3.bf16.msra.mxu0 %v1271_v7  ;;  %1255 = vmatpush3.bf16.msra.mxu1 %v1271_v7 }
  0x22   : > { %1206 = vmatprep.subr.bf16.mxu0 %v1272_v8  ;;  %1248 = vmatprep.subr.bf16.mxu1 %v1272_v8 }
  0x25   : > { %1207 = vmatpush3.bf16.msra.mxu0 %v1272_v8  ;;  %1256 = vmatpush3.bf16.msra.mxu1 %v1272_v8 }
  0x26   : > { %1208 = vmatprep.subr.bf16.mxu0 %v1273_v9  ;;  %1249 = vmatprep.subr.bf16.mxu1 %v1273_v9 }
  0x29   : > { %1209 = vmatpush3.bf16.msra.mxu0 %v1273_v9  ;;  %1257 = vmatpush3.bf16.msra.mxu1 %v1273_v9 }
  0x2c   : > { %1211 = vmatmul.mubr.bf16.vlgmr.msra.gmra.mxu0 %v1276_v10  ;;  %1227 = vmatmul.mubr.bf16.vlgmr.msra.gmra.mxu1 %v1277_v11 }
  0x2d   : > { %1214 = vmatprep.mubr.bf16.mxu0 %v1278_v12  ;;  %1230 = vmatprep.mubr.bf16.mxu1 %v1279_v13 }
  0x34   : > { %1215 = vmatmul.mubr.bf16.gmra.mxu0 %v1280_v14  ;;  %1231 = vmatmul.mubr.bf16.gmra.mxu1 %v1281_v15 }
  0x35   : > { %1218 = vmatprep.mubr.bf16.mxu0 %v1282_v16  ;;  %1234 = vmatprep.mubr.bf16.mxu1 %v1283_v17 }
  0x3c   : > { %1219 = vmatmul.mubr.bf16.gmra.mxu0 %v1284_v18  ;;  %1235 = vmatmul.mubr.bf16.gmra.mxu1 %v1285_v19 }
  0x3d   : > { %1222 = vmatprep.mubr.bf16.mxu0 %v1286_v20  ;;  %1238 = vmatprep.mubr.bf16.mxu1 %v1287_v21 }
  0x44   : > { %1223 = vmatmul.mubr.bf16.gmra.mxu0 %v1288_v22  ;;  %1239 = vmatmul.mubr.bf16.gmra.mxu1 %v1289_v23 }
  0xec   : > { %v1212_v25 = vpop.f32.mrf.mxu0  ;;  %v1228_v26 = vpop.f32.mrf.mxu1 }
  0xed   : > { %v1446_v27 = vadd.f32 %v1212_v25, %v1443_v24  ;;  %v1449_v28 = vadd.f32 %v1228_v26, %v1443_v24 }
  0xee   : > { %v408_v29 = vpop.f32.mrf.mxu0  ;;  %v472_v30 = vpop.f32.mrf.mxu1 }
  0xef   : > { %v569_v31 = vmin.f32 %v1446_v27, 0.0  ;;  %v585_v32 = vmin.f32 %v1449_v28, 0.0  ;;  %v1454_v33 = vadd.f32 %v1443_v24, %v408_v29  ;;  %v1457_v34 = vadd.f32 %v1443_v24, %v472_v30 }
  0xf0   : > { %v1213_v35 = vpop.f32.mrf.mxu0  ;;  %v1229_v36 = vpop.f32.mrf.mxu1  ;;  %vm537_vm0 = vcmp.gt.f32.partialorder %v1446_v27, 0.0  ;;  %vm553_vm1 = vcmp.gt.f32.partialorder %v1449_v28, 0.0 }
  0xf1   : > { %v603_v37 = vmul.f32 1.442695, %v569_v31  ;;  %v635_v38 = vmul.f32 1.442695, %v585_v32  ;;  %v1460_v39 = vadd.f32 %v1213_v35, %v1443_v24  ;;  %v1463_v40 = vadd.f32 %v1229_v36, %v1443_v24 }
  0xf2   : > { %v567_v41 = vmin.f32 %v1454_v33, 0.0  ;;  %v583_v42 = vmin.f32 %v1457_v34, 0.0  ;;  %v411_v43 = vpop.f32.mrf.mxu0  ;;  %v475_v44 = vpop.f32.mrf.mxu1  ;;  %vm535_vm2 = vcmp.gt.f32.partialorder %v1454_v33, 0.0  ;;  %vm551_vm3 = vcmp.gt.f32.partialorder %v1457_v34, 0.0 }
  0xf3   : > { %1290 = vpow2.f32 %v603_v37  ;;  %v570_v45 = vmin.f32 %v1460_v39, 0.0  ;;  %v586_v48 = vmin.f32 %v1463_v40, 0.0  ;;  %v1470_v52 = vadd.f32 %v1443_v24, %v411_v43 }
  0xf4   : > { %1292 = vpow2.f32 %v635_v38  ;;  %v599_v46 = vmul.f32 1.442695, %v567_v41  ;;  %v631_v47 = vmul.f32 1.442695, %v583_v42  ;;  %v1216_v49 = vpop.f32.mrf.mxu0  ;;  %v1232_v50 = vpop.f32.mrf.mxu1  ;;  %v1473_v53 = vadd.f32 %v1443_v24, %v475_v44 }
  0xf5   : > { %v605_v51 = vmul.f32 1.442695, %v570_v45  ;;  %v1476_v54 = vadd.f32 %v1216_v49, %v1443_v24  ;;  %v637_v55 = vmul.f32 1.442695, %v586_v48  ;;  %v1479_v56 = vadd.f32 %v1232_v50, %v1443_v24 }
  0xf6   : > { %1294 = vpow2.f32 %v599_v46  ;;  %v424_v57 = vpop.f32.mrf.mxu0  ;;  %v488_v58 = vpop.f32.mrf.mxu1  ;;  %v568_v59 = vmin.f32 %v1470_v52, 0.0  ;;  %v584_v60 = vmin.f32 %v1473_v53, 0.0  ;;  %vm538_vm4 = vcmp.gt.f32.partialorder %v1460_v39, 0.0 }
  0xf7   : > { %1296 = vpow2.f32 %v631_v47  ;;  %v573_v61 = vmin.f32 %v1476_v54, 0.0  ;;  %v589_v1 = vmin.f32 %v1479_v56, 0.0  ;;  %v1486_v4 = vadd.f32 %v1443_v24, %v424_v57 }
  0xf8   : > { %1298 = vpow2.f32 %v605_v51  ;;  %v1217_v62 = vpop.f32.mrf.mxu0  ;;  %v1233_v63 = vpop.f32.mrf.mxu1  ;;  %v601_v0 = vmul.f32 1.442695, %v568_v59  ;;  %v633_v2 = vmul.f32 1.442695, %v584_v60  ;;  %v1489_v5 = vadd.f32 %v1443_v24, %v488_v58 }
  0xf9   : > { %1300 = vpow2.f32 %v637_v55  ;;  %v611_v3 = vmul.f32 1.442695, %v573_v61  ;;  %v643_v8 = vmul.f32 1.442695, %v589_v1  ;;  %v1492_v9 = vadd.f32 %v1217_v62, %v1443_v24 }
  0xfa   : > { %v427_v6 = vpop.f32.mrf.mxu0  ;;  %v491_v7 = vpop.f32.mrf.mxu1  ;;  %1302 = vpow2.f32 %v601_v0  ;;  %v1495_v10 = vadd.f32 %v1233_v63, %v1443_v24  ;;  %v571_v11 = vmin.f32 %v1486_v4, 0.0  ;;  %v587_v12 = vmin.f32 %v1489_v5, 0.0 }
  0xfb   : > { %1304 = vpow2.f32 %v633_v2  ;;  %v574_v13 = vmin.f32 %v1492_v9, 0.0  ;;  %v1503_v20 = vadd.f32 %v1443_v24, %v427_v6  ;;  %v1506_v21 = vadd.f32 %v1443_v24, %v491_v7 }
  0xfc   : > { %1306 = vpow2.f32 %v611_v3  ;;  %v1220_v14 = vpop.f32.mrf.mxu0  ;;  %v607_v15 = vmul.f32 1.442695, %v571_v11  ;;  %v590_v16 = vmin.f32 %v1495_v10, 0.0  ;;  %v1236_v17 = vpop.f32.mrf.mxu1  ;;  %v639_v18 = vmul.f32 1.442695, %v587_v12 }
  0xfd   : > { %1308 = vpow2.f32 %v643_v8  ;;  %v613_v19 = vmul.f32 1.442695, %v574_v13  ;;  %v1510_v25 = vadd.f32 %v1220_v14, %v1443_v24  ;;  %v572_v29 = vmin.f32 %v1503_v20, 0.0 }
  0xfe   : > { %1310 = vpow2.f32 %v607_v15  ;;  %v645_v23 = vmul.f32 1.442695, %v590_v16  ;;  %v1515_v30 = vadd.f32 %v1236_v17, %v1443_v24  ;;  %v588_v32 = vmin.f32 %v1506_v21, 0.0  ;;  %v440_v35 = vpop.f32.mrf.mxu0  ;;  %v504_v47 = vpop.f32.mrf.mxu1 }
  0xff   : > { %1312 = vpow2.f32 %v639_v18  ;;  %v609_v38 = vmul.f32 1.442695, %v572_v29  ;;  %vm554_vm5 = vcmp.gt.f32.partialorder %v1463_v40, 0.0  ;;  %v577_v44 = vmin.f32 %v1510_v25, 0.0 }
 0x100   : > { %v1291_v22 = vpop.eup %1290  ;;  %1314 = vpow2.f32 %v613_v19  ;;  %v641_v43 = vmul.f32 1.442695, %v588_v32  ;;  %vm536_vm6 = vcmp.gt.f32.partialorder %v1470_v52, 0.0  ;;  %vm552_vm7 = vcmp.gt.f32.partialorder %v1473_v53, 0.0  ;;  %v1221_v51 = vpop.f32.mrf.mxu0 }
 0x101   : > { %v1293_v26 = vpop.eup %1292  ;;  %v979_v31 = vadd.f32 -1.0, %v1291_v22  ;;  %1316 = vpow2.f32 %v645_v23  ;;  %v593_v46 = vmin.f32 %v1515_v30, 0.0  ;;  %vm541_vm8 = vcmp.gt.f32.partialorder %v1476_v54, 0.0  ;;  %v1237_v11 = vpop.f32.mrf.mxu1 }
 0x102   : > { %v995_v37 = vadd.f32 -1.0, %v1293_v26  ;;  %1318 = vpow2.f32 %v609_v38  ;;  %vm557_vm9 = vcmp.gt.f32.partialorder %v1479_v56, 0.0  ;;  %v1534_v59 = vadd.f32 %v1443_v24, %v440_v35  ;;  %v443_v12 = vpop.f32.mrf.mxu0 }
 0x103   : > { %v1295_v36 = vpop.eup %1294  ;;  %v697_v49 = vsel %vm537_vm0, %v1446_v27, %v979_v31  ;;  %1320 = vpow2.f32 %v641_v43  ;;  %v619_v61 = vmul.f32 1.442695, %v577_v44  ;;  %v1550_v62 = vadd.f32 %v1443_v24, %v504_v47  ;;  %v507_v29 = vpop.f32.mrf.mxu1 }
 0x104   : > { %v1297_v41 = vpop.eup %1296  ;;  %v977_v42 = vadd.f32 -1.0, %v1295_v36  ;;  %v713_v55 = vsel %vm553_vm1, %v1449_v28, %v995_v37  ;;  %vm542_vm10 = vcmp.gt.f32.partialorder %v1492_v9, 0.0  ;;  %v651_v2 = vmul.f32 1.442695, %v593_v46  ;;  %v1224_v31 = vpop.f32.mrf.mxu0 }
 0x105   : > { %v1299_v45 = vpop.eup %1298  ;;  %v993_v57 = vadd.f32 -1.0, %v1297_v41  ;;  %v1558_v8 = vadd.f32 %v1221_v51, %v1443_v24  ;;  %vm539_vm11 = vcmp.gt.f32.partialorder %v1486_v4, 0.0  ;;  %v591_v16 = vmin.f32 %v1550_v62, 0.0 }
 0x106   : > { %v1301_v48 = vpop.eup %1300  ;;  %v980_v50 = vadd.f32 -1.0, %v1299_v45  ;;  %v695_v27 = vsel %vm535_vm2, %v1454_v33, %v977_v42  ;;  %vm555_vm12 = vcmp.gt.f32.partialorder %v1489_v5, 0.0  ;;  %vm558_vm13 = vcmp.gt.f32.partialorder %v1495_v10, 0.0  ;;  %v456_v51 = vpop.f32.mrf.mxu0 }
 0x107   : > { %v996_v58 = vadd.f32 -1.0, %v1301_v48  ;;  %v1303_v60 = vpop.eup %1302  ;;  %1322 = vpow2.f32 %v619_v61  ;;  %vm540_vm14 = vcmp.gt.f32.partialorder %v1503_v20, 0.0  ;;  %vm556_vm15 = vcmp.gt.f32.partialorder %v1506_v21, 0.0 }
 0x108   : > { %v698_v28 = vsel %vm538_vm4, %v1460_v39, %v980_v50  ;;  %v1305_v63 = vpop.eup %1304  ;;  %v978_v1 = vadd.f32 -1.0, %v1303_v60  ;;  %v575_v39 = vmin.f32 %v1534_v59, 0.0  ;;  %1324 = vpow2.f32 %v651_v2  ;;  %v1240_v50 = vpop.f32.mrf.mxu1 }
 0x109   : > { %v1083_v0 = vpack.c.bf16 %v698_v28, %v697_v49  ;;  %v714_v33 = vsel %vm554_vm5, %v1463_v40, %v996_v58  ;;  %v1307_v3 = vpop.eup %1306  ;;  %v994_v7 = vadd.f32 -1.0, %v1305_v63  ;;  %v711_v40 = vsel %vm551_vm3, %v1457_v34, %v993_v57 }
 0x10a   : > { %v1123_v6 = vpack.c.bf16 %v714_v33, %v713_v55  ;;  %v1309_v13 = vpop.eup %1308  ;;  %v696_v14 = vsel %vm536_vm6, %v1470_v52, %v978_v1  ;;  %v983_v15 = vadd.f32 -1.0, %v1307_v3  ;;  %v615_v22 = vmul.f32 1.442695, %v575_v39  ;;  %v520_v3 = vpop.f32.mrf.mxu1 }
 0x10b   : > { %1155 = vst [vmem:[%s1544_s13 + $0x8] sm:$0xff] %v1083_v0   ;;  %v1078_v17 = vpack.c.bf16 %v696_v14, %v695_v27  ;;  %v712_v18 = vsel %vm552_vm7, %v1473_v53, %v994_v7  ;;  %v999_v19 = vadd.f32 -1.0, %v1309_v13  ;;  %v1311_v34 = vpop.eup %1310  ;;  %v647_v52 = vmul.f32 1.442695, %v591_v16 }
 0x10c   : > { %1163 = vst [vmem:[%s1544_s13 + $0x48] sm:$0xff] %v1123_v6   ;;  %v1118_v23 = vpack.c.bf16 %v712_v18, %v711_v40  ;;  %v1313_v26 = vpop.eup %1312  ;;  %v578_v53 = vmin.f32 %v1558_v8, 0.0  ;;  %v701_v35 = vsel %vm541_vm8, %v1476_v54, %v983_v15  ;;  %v1587_v37 = vadd.f32 %v1237_v11, %v1443_v24  ;;  %v1241_v15 = vpop.f32.mrf.mxu1 }
 0x10d   : > { %1079 = vst [vmem:[%s1544_s13] sm:$0xff] %v1078_v17   ;;  %v1315_v32 = vpop.eup %1314  ;;  %v717_v36 = vsel %vm557_vm9, %v1479_v56, %v999_v19  ;;  %v1590_v38 = vadd.f32 %v1443_v24, %v443_v12  ;;  %v981_v42 = vadd.f32 -1.0, %v1311_v34  ;;  %1326 = vpow2.f32 %v615_v22 }
 0x10e   : > { %1162 = vst [vmem:[%s1544_s13 + $0x40] sm:$0xff] %v1118_v23   ;;  %v1317_v41 = vpop.eup %1316  ;;  %v984_v43 = vadd.f32 -1.0, %v1315_v32  ;;  %v621_v44 = vmul.f32 1.442695, %v578_v53  ;;  %1328 = vpow2.f32 %v647_v52  ;;  %v594_v46 = vmin.f32 %v1587_v37, 0.0 }
 0x10f   : > { %v1000_v45 = vadd.f32 -1.0, %v1317_v41  ;;  %v1594_v54 = vadd.f32 %v1443_v24, %v507_v29  ;;  %v1319_v47 = vpop.eup %1318  ;;  %v997_v56 = vadd.f32 -1.0, %v1313_v26  ;;  %v576_v49 = vmin.f32 %v1590_v38, 0.0 }
 0x110   : > { %v702_v48 = vsel %vm542_vm10, %v1492_v9, %v984_v43  ;;  %1330 = vpow2.f32 %v621_v44  ;;  %v1321_v55 = vpop.eup %1320  ;;  %v982_v60 = vadd.f32 -1.0, %v1319_v47  ;;  %v653_v27 = vmul.f32 1.442695, %v594_v46 }
 0x111   : > { %v1093_v57 = vpack.c.bf16 %v702_v48, %v701_v35  ;;  %v718_v58 = vsel %vm558_vm13, %v1495_v10, %v1000_v45  ;;  %v699_v28 = vsel %vm539_vm11, %v1486_v4, %v981_v42  ;;  %v998_v9 = vadd.f32 -1.0, %v1321_v55 }
 0x112   : > { %v1133_v61 = vpack.c.bf16 %v718_v58, %v717_v36  ;;  %v617_v63 = vmul.f32 1.442695, %v576_v49  ;;  %v700_v0 = vsel %vm540_vm14, %v1503_v20, %v982_v60  ;;  %1332 = vpow2.f32 %v653_v27  ;;  %v1225_v20 = vpop.f32.mrf.mxu0  ;;  %v523_v36 = vpop.f32.mrf.mxu1 }
 0x113   : > { %1157 = vst [vmem:[%s1544_s13 + $0x18] sm:$0xff] %v1093_v57   ;;  %v592_v33 = vmin.f32 %v1594_v54, 0.0  ;;  %v1612_v10 = vadd.f32 %v1224_v31, %v1443_v24  ;;  %v715_v4 = vsel %vm555_vm12, %v1489_v5, %v997_v56  ;;  %v1088_v1 = vpack.c.bf16 %v700_v0, %v699_v28 }
 0x114   : > { %1165 = vst [vmem:[%s1544_s13 + $0x58] sm:$0xff] %v1133_v61   ;;  %v716_v2 = vsel %vm556_vm15, %v1506_v21, %v998_v9  ;;  %1334 = vpow2.f32 %v617_v63  ;;  %v1624_v11 = vadd.f32 %v1240_v50, %v1443_v24  ;;  %v1627_v12 = vadd.f32 %v1443_v24, %v456_v51  ;;  %v1323_v13 = vpop.eup %1322  ;;  %v459_v19 = vpop.f32.mrf.mxu0 }
 0x115   : > { %v1128_v6 = vpack.c.bf16 %v716_v2, %v715_v4  ;;  %v649_v7 = vmul.f32 1.442695, %v592_v33  ;;  %1156 = vst [vmem:[%s1544_s13 + $0x10] sm:$0xff] %v1088_v1   ;;  %v581_v39 = vmin.f32 %v1612_v10, 0.0  ;;  %v1631_v5 = vadd.f32 %v1443_v24, %v520_v3  ;;  %v1325_v16 = vpop.eup %1324 }
 0x116   : > { %v1634_v21 = vadd.f32 %v1225_v20, %v1443_v24  ;;  %v597_v14 = vmin.f32 %v1624_v11, 0.0  ;;  %v579_v17 = vmin.f32 %v1627_v12, 0.0  ;;  %v987_v52 = vadd.f32 -1.0, %v1323_v13 }
 0x117   : > { %1164 = vst [vmem:[%s1544_s13 + $0x50] sm:$0xff] %v1128_v6   ;;  %1336 = vpow2.f32 %v649_v7  ;;  %v627_v40 = vmul.f32 1.442695, %v581_v39  ;;  %v595_v18 = vmin.f32 %v1631_v5, 0.0  ;;  %v1641_v53 = vadd.f32 %v1241_v15, %v1443_v24 }
 0x118   : > { %v659_v22 = vmul.f32 1.442695, %v597_v14  ;;  %v582_v34 = vmin.f32 %v1634_v21, 0.0  ;;  %v623_v26 = vmul.f32 1.442695, %v579_v17  ;;  %vm545_vm0 = vcmp.gt.f32.partialorder %v1510_v25, 0.0 }
 0x119   : > { %1338 = vpow2.f32 %v627_v40  ;;  %v655_v31 = vmul.f32 1.442695, %v595_v18  ;;  %v1645_v35 = vadd.f32 %v1443_v24, %v459_v19  ;;  %vm561_vm1 = vcmp.gt.f32.partialorder %v1515_v30, 0.0 }
 0x11a   : > { %v1327_v23 = vpop.eup %1326  ;;  %v629_v32 = vmul.f32 1.442695, %v582_v34  ;;  %vm546_vm2 = vcmp.gt.f32.partialorder %v1558_v8, 0.0  ;;  %1340 = vpow2.f32 %v659_v22  ;;  %v598_v42 = vmin.f32 %v1641_v53, 0.0 }
 0x11b   : > { %v1329_v29 = vpop.eup %1328  ;;  %v1003_v43 = vadd.f32 -1.0, %v1325_v16  ;;  %1342 = vpow2.f32 %v623_v26  ;;  %v580_v45 = vmin.f32 %v1645_v35, 0.0  ;;  %v705_v46 = vsel %vm545_vm0, %v1510_v25, %v987_v52 }
 0x11c   : > { %1344 = vpow2.f32 %v629_v32  ;;  %v661_v47 = vmul.f32 1.442695, %v598_v42  ;;  %v1653_v56 = vadd.f32 %v1443_v24, %v523_v36  ;;  %v985_v49 = vadd.f32 -1.0, %v1327_v23 }
 0x11d   : > { %v1331_v41 = vpop.eup %1330  ;;  %1346 = vpow2.f32 %v655_v31  ;;  %v625_v51 = vmul.f32 1.442695, %v580_v45  ;;  %vm543_vm3 = vcmp.gt.f32.partialorder %v1534_v59, 0.0  ;;  %vm562_vm4 = vcmp.gt.f32.partialorder %v1587_v37, 0.0 }
 0x11e   : > { %v988_v44 = vadd.f32 -1.0, %v1331_v41  ;;  %1348 = vpow2.f32 %v661_v47  ;;  %v596_v24 = vmin.f32 %v1653_v56, 0.0  ;;  %v721_v60 = vsel %vm561_vm1, %v1515_v30, %v1003_v43 }
 0x11f   : > { %v1333_v48 = vpop.eup %1332  ;;  %1350 = vpow2.f32 %v625_v51  ;;  %vm544_vm5 = vcmp.gt.f32.partialorder %v1590_v38, 0.0  ;;  %v703_v61 = vsel %vm543_vm3, %v1534_v59, %v985_v49  ;;  %vm559_vm6 = vcmp.gt.f32.partialorder %v1550_v62, 0.0 }
 0x120   : > { %v706_v50 = vsel %vm546_vm2, %v1558_v8, %v988_v44  ;;  %v1004_v58 = vadd.f32 -1.0, %v1333_v48  ;;  %v1001_v8 = vadd.f32 -1.0, %v1329_v29  ;;  %v657_v0 = vmul.f32 1.442695, %v596_v24 }
 0x121   : > { %v1335_v55 = vpop.eup %1334  ;;  %v1103_v57 = vpack.c.bf16 %v706_v50, %v705_v46  ;;  %vm560_vm7 = vcmp.gt.f32.partialorder %v1594_v54, 0.0  ;;  %vm549_vm8 = vcmp.gt.f32.partialorder %v1612_v10, 0.0  ;;  %vm550_vm9 = vcmp.gt.f32.partialorder %v1634_v21, 0.0 }
 0x122   : > { %v986_v25 = vadd.f32 -1.0, %v1335_v55  ;;  %v722_v27 = vsel %vm562_vm4, %v1587_v37, %v1004_v58  ;;  %1352 = vpow2.f32 %v657_v0  ;;  %v719_v30 = vsel %vm559_vm6, %v1550_v62, %v1001_v8 }
 0x123   : > { %1159 = vst [vmem:[%s1544_s13 + $0x28] sm:$0xff] %v1103_v57   ;;  %v1143_v9 = vpack.c.bf16 %v722_v27, %v721_v60  ;;  %vm565_vm10 = vcmp.gt.f32.partialorder %v1624_v11, 0.0  ;;  %vm566_vm11 = vcmp.gt.f32.partialorder %v1641_v53, 0.0  ;;  %vm547_vm12 = vcmp.gt.f32.partialorder %v1627_v12, 0.0 }
 0x124   : > { %v1337_v28 = vpop.eup %1336  ;;  %v704_v63 = vsel %vm544_vm5, %v1590_v38, %v986_v25  ;;  %vm548_vm13 = vcmp.gt.f32.partialorder %v1645_v35, 0.0  ;;  %vm563_vm14 = vcmp.gt.f32.partialorder %v1631_v5, 0.0  ;;  %vm564_vm15 = vcmp.gt.f32.partialorder %v1653_v56, 0.0 }
 0x125   : > { %v1098_v33 = vpack.c.bf16 %v704_v63, %v703_v61  ;;  %v1002_v4 = vadd.f32 -1.0, %v1337_v28  ;;  %1167 = vst [vmem:[%s1544_s13 + $0x68] sm:$0xff] %v1143_v9  }
 0x126   : > { %v1339_v1 = vpop.eup %1338 }
 0x127   : > { %1158 = vst [vmem:[%s1544_s13 + $0x20] sm:$0xff] %v1098_v33   ;;  %v720_v37 = vsel %vm560_vm7, %v1594_v54, %v1002_v4  ;;  %v1341_v2 = vpop.eup %1340  ;;  %v991_v38 = vadd.f32 -1.0, %v1339_v1 }
 0x128   : > { %v1138_v59 = vpack.c.bf16 %v720_v37, %v719_v30  ;;  %v1343_v3 = vpop.eup %1342  ;;  %v1007_v7 = vadd.f32 -1.0, %v1341_v2 }
 0x129   : > { %v1345_v20 = vpop.eup %1344  ;;  %v989_v40 = vadd.f32 -1.0, %v1343_v3  ;;  %v709_v54 = vsel %vm549_vm8, %v1612_v10, %v991_v38 }
 0x12a   : > { %1166 = vst [vmem:[%s1544_s13 + $0x60] sm:$0xff] %v1138_v59   ;;  %v1347_v6 = vpop.eup %1346  ;;  %v992_v39 = vadd.f32 -1.0, %v1345_v20  ;;  %v725_v18 = vsel %vm565_vm10, %v1624_v11, %v1007_v7 }
 0x12b   : > { %v1349_v13 = vpop.eup %1348  ;;  %v707_v10 = vsel %vm547_vm12, %v1627_v12, %v989_v40 }
 0x12c   : > { %v1351_v62 = vpop.eup %1350  ;;  %v710_v14 = vsel %vm550_vm9, %v1634_v21, %v992_v39  ;;  %v1008_v15 = vadd.f32 -1.0, %v1349_v13  ;;  %v1005_v21 = vadd.f32 -1.0, %v1347_v6 }
 0x12d   : > { %v1113_v16 = vpack.c.bf16 %v710_v14, %v709_v54  ;;  %v990_v17 = vadd.f32 -1.0, %v1351_v62 }
 0x12e   : > { %v726_v19 = vsel %vm566_vm11, %v1641_v53, %v1008_v15  ;;  %v723_v11 = vsel %vm563_vm14, %v1631_v5, %v1005_v21 }
 0x12f   : > { %1161 = vst [vmem:[%s1544_s13 + $0x38] sm:$0xff] %v1113_v16   ;;  %v1153_v22 = vpack.c.bf16 %v726_v19, %v725_v18  ;;  %v708_v34 = vsel %vm548_vm13, %v1645_v35, %v990_v17  ;;  %v1353_v23 = vpop.eup %1352 }
 0x130   : > { %v1108_v52 = vpack.c.bf16 %v708_v34, %v707_v10  ;;  %v1006_v26 = vadd.f32 -1.0, %v1353_v23 }
 0x131   : > { %1169 = vst [vmem:[%s1544_s13 + $0x78] sm:$0xff] %v1153_v22  }
 0x132   : > { %1160 = vst [vmem:[%s1544_s13 + $0x30] sm:$0xff] %v1108_v52   ;;  %v724_v53 = vsel %vm564_vm15, %v1653_v56, %v1006_v26 }
 0x133   : > { %v1148_v29 = vpack.c.bf16 %v724_v53, %v723_v11 }
 0x135   : > { %1168 = vst [vmem:[%s1544_s13 + $0x70] sm:$0xff] %v1148_v29  }
 0x136 PF: > { %s13_s12 = sadd.s32 1, %s1360_s12  }
 0x137   : > { %p10_p4 = scmp.ge.s32.totalorder %s13_s12, 4  }
 0x139   :  { %12 = sbr.rel (!%p10_p4) target bundleno = 1 (0x1), region = 62 }

// kernel: attentive_encoder_decoder.8
= control target key start
LH: loop header
LB: loop body
LE: loop exit
PB: predicated region body
PF: predicated region fallthrough
CT: control target
= control target key end

     0   :  { %s995_s12 = smov 0   ;;  %s1126_s0 = inlined_call_operand.vmem [shape: bf16[128,384], index: 0, kind: input, shape index: {}]   ;;  %s1127_s1 = inlined_call_operand.vmem [shape: bf16[384,128], index: 1, kind: input, shape index: {}]   ;;  %s1128_s2 = inlined_call_operand.vmem [shape: f32[1,128], index: 2, kind: input, shape index: {}]   ;;  %s1129_s3 = inlined_call_operand.vmem [shape: bf16[128,128], index: 3, kind: output, shape index: {}]  }
   0x1 LB: > { %s731_s13 = sadd.s32 4294967295, %s973_s12   ;;  %p735_p0 = scmp.ge.s32.totalorder %s973_s12, 1  ;;  %s973_s12 = sphi %s995_s12, %s13_s12  }
   0x2   : > { %p139_p1 = scmp.lt.s32.totalorder %s973_s12, 3 }
   0x4   : > { %p140_p2 = pnand %p735_p0, %p139_p1 }
   0x5   : > { %s736_s28 = sshll.u32 (!%p140_p2), %s731_s13, 3 }
   0x6   : > { %143 = sbr.rel (%p140_p2) target bundleno = 297 (0x129), region = 32  ;;  %p165_p3 = scmp.lt.s32.totalorder (!%p140_p2), %s736_s28, 15 }
   0xb   : > { %v911_v0 = vld [vmem:[%s1127_s1 + $0x78] sm:$0xff]   ;;  %v913_v2 = vld [vmem:[%s1127_s1 + $0x70] sm:$0xff]   ;;  %v916_v5 = vld [vmem:[%s1127_s1 + $0x68] sm:$0xff]   ;;  %s1131_s28 = smov (!%p165_p3, %s736_s28), 15 }
   0xc   : > { %v912_v1 = vld [vmem:[%s1127_s1 + $0x38] sm:$0xff]   ;;  %826 = vmatprep.subr.bf16.mxu0 %v911_v0  ;;  %v915_v4 = vld [vmem:[%s1127_s1 + $0x30] sm:$0xff]   ;;  %v918_v7 = vld [vmem:[%s1127_s1 + $0x28] sm:$0xff]   ;;  %s902_s21 = smul.u32 12, %s1131_s28  ;;  %s739_s18 = sshll.u32 %s1131_s28, 2 }
   0xd   : > { %827 = vmatpush3.bf16.msra.mxu0 %v912_v1  ;;  %v914_v3 = vld [vmem:[%s1127_s1 + $0xb8] sm:$0xff]   ;;  %v917_v6 = vld [vmem:[%s1127_s1 + $0xb0] sm:$0xff]   ;;  %v919_v8 = vld [vmem:[%s1127_s1 + $0x60] sm:$0xff]  }
   0xe   : > { %828 = vmatprep.subr.bf16.mxu0 %v913_v2  ;;  %878 = vmatprep.subr.bf16.mxu1 %v914_v3  ;;  %v920_v9 = vld [vmem:[%s1127_s1 + $0xa8] sm:$0xff]   ;;  %v921_v10 = vld [vmem:[%s1127_s1 + $0x20] sm:$0xff]   ;;  %v922_v11 = vld [vmem:[%s1127_s1 + $0x58] sm:$0xff]   ;;  %s1069_s6 = scalar_lea.vmem %s1126_s0, %s902_s21  ;;  %s1114_s21 = scalar_lea.vmem %s1129_s3, %s739_s18 }
   0xf   : > { %879 = vmatpush3.bf16.msra.mxu1 %v914_v3  ;;  %v923_v12 = vld [vmem:[%s1127_s1 + $0xa0] sm:$0xff]   ;;  %v924_v13 = vld [vmem:[%s1127_s1 + $0x18] sm:$0xff]   ;;  %v925_v15 = vld [vmem:[%s1127_s1 + $0x50] sm:$0xff]  }
  0x10   : > { %880 = vmatprep.subr.bf16.mxu1 %v917_v6  ;;  %v926_v14 = vld [vmem:[%s1127_s1 + $0x98] sm:$0xff]   ;;  %v927_v16 = vld [vmem:[%s1127_s1 + $0x10] sm:$0xff]   ;;  %v928_v18 = vld [vmem:[%s1127_s1 + $0x48] sm:$0xff]  }
  0x11   : > { %829 = vmatpush3.bf16.msra.mxu0 %v915_v4  ;;  %v929_v17 = vld [vmem:[%s1127_s1 + $0x90] sm:$0xff]   ;;  %v930_v19 = vld [vmem:[%s1127_s1 + $0x8] sm:$0xff]   ;;  %v931_v20 = vld [vmem:[%s1127_s1 + $0x40] sm:$0xff]  }
  0x12   : > { %830 = vmatprep.subr.bf16.mxu0 %v916_v5  ;;  %v932_v21 = vld [vmem:[%s1127_s1 + $0x88] sm:$0xff]   ;;  %v936_v22 = vld [vmem:[%s1069_s6 + $0x4] ss:$12 sps:$4 sm:$0xff]   ;;  %v943_v31 = vld [vmem:[%s1069_s6 + $0x34] ss:$12 sps:$4 sm:$0xff]  }
  0x13   : > { %881 = vmatpush3.bf16.msra.mxu1 %v917_v6  ;;  %v933_v23 = vld [vmem:[%s1127_s1] sm:$0xff]   ;;  %489 = vmatprep.mubr.bf16.mxu0 %v936_v22  ;;  %v938_v24 = vld [vmem:[%s1069_s6 + $0x8] ss:$12 sps:$4 sm:$0xff]   ;;  %v947_v32 = vld [vmem:[%s1069_s6 + $0x50] ss:$12 sps:$4 sm:$0xff]  }
  0x14   : > { %882 = vmatprep.subr.bf16.mxu1 %v920_v9  ;;  %v937_v25 = vld [vmem:[%s1127_s1 + $0x80] sm:$0xff]   ;;  %894 = vmatprep.mubr.bf16.mxu1 %v938_v24  ;;  %v940_v27 = vld [vmem:[%s1069_s6 + $0x1c] ss:$12 sps:$4 sm:$0xff]   ;;  %v948_v34 = vld [vmem:[%s1069_s6 + $0x4c] ss:$12 sps:$4 sm:$0xff]  }
  0x15   : > { %831 = vmatpush3.bf16.msra.mxu0 %v918_v7  ;;  %v934_v26 = vld [vmem:[%s1069_s6] ss:$12 sps:$4 sm:$0xff]   ;;  %v946_v29 = vld [vmem:[%s1069_s6 + $0x38] ss:$12 sps:$4 sm:$0xff]   ;;  %v945_v33 = vld [vmem:[%s1069_s6 + $0x30] ss:$12 sps:$4 sm:$0xff]  }
  0x16   : > { %832 = vmatprep.subr.bf16.mxu0 %v919_v8  ;;  %v939_v28 = vld [vmem:[%s1069_s6 + $0x20] ss:$12 sps:$4 sm:$0xff]   ;;  %v942_v30 = vld [vmem:[%s1069_s6 + $0x18] ss:$12 sps:$4 sm:$0xff]   ;;  %v950_v35 = vld [vmem:[%s1069_s6 + $0x48] ss:$12 sps:$4 sm:$0xff]  }
  0x17   : > { %883 = vmatpush3.bf16.msra.mxu1 %v920_v9  ;;  %v1098_v38 = vld [vmem:[%s1128_s2] ss:$0 sm:$0xff] }
  0x18   : > { %884 = vmatprep.subr.bf16.mxu1 %v923_v12 }
  0x19   : > { %833 = vmatpush3.bf16.msra.mxu0 %v921_v10 }
  0x1a   : > { %834 = vmatprep.subr.bf16.mxu0 %v922_v11 }
  0x1b   : > { %885 = vmatpush3.bf16.msra.mxu1 %v923_v12 }
  0x1c   : > { %886 = vmatprep.subr.bf16.mxu1 %v926_v14 }
  0x1d   : > { %835 = vmatpush3.bf16.msra.mxu0 %v924_v13 }
  0x1e   : > { %836 = vmatprep.subr.bf16.mxu0 %v925_v15 }
  0x1f   : > { %887 = vmatpush3.bf16.msra.mxu1 %v926_v14 }
  0x20   : > { %888 = vmatprep.subr.bf16.mxu1 %v929_v17 }
  0x21   : > { %837 = vmatpush3.bf16.msra.mxu0 %v927_v16 }
  0x22   : > { %838 = vmatprep.subr.bf16.mxu0 %v928_v18 }
  0x23   : > { %889 = vmatpush3.bf16.msra.mxu1 %v929_v17 }
  0x24   : > { %890 = vmatprep.subr.bf16.mxu1 %v932_v21 }
  0x25   : > { %839 = vmatpush3.bf16.msra.mxu0 %v930_v19 }
  0x26   : > { %840 = vmatprep.subr.bf16.mxu0 %v931_v20 }
  0x27   : > { %891 = vmatpush3.bf16.msra.mxu1 %v932_v21 }
  0x28   : > { %892 = vmatprep.subr.bf16.mxu1 %v937_v25 }
  0x29   : > { %841 = vmatpush3.bf16.msra.mxu0 %v933_v23 }
  0x2b   : > { %893 = vmatpush3.bf16.msra.mxu1 %v937_v25 }
  0x2c   : > { %490 = vmatmul.mubr.bf16.vlgmr.msra.gmra.mxu0 %v934_v26 }
  0x2d   : > { %497 = vmatprep.mubr.bf16.mxu0 %v940_v27 }
  0x2e   : > { %895 = vmatmul.mubr.bf16.vlgmr.msra.gmra.mxu1 %v939_v28 }
  0x2f   : > { %898 = vmatprep.mubr.bf16.mxu1 %v946_v29 }
  0x34   : > { %498 = vmatmul.mubr.bf16.gmra.mxu0 %v942_v30 }
  0x35   : > { %505 = vmatprep.mubr.bf16.mxu0 %v943_v31 }
  0x36   : > { %899 = vmatmul.mubr.bf16.gmra.mxu1 %v947_v32 }
  0x3c   : > { %506 = vmatmul.mubr.bf16.gmra.mxu0 %v945_v33 }
  0x3d   : > { %513 = vmatprep.mubr.bf16.mxu0 %v948_v34 }
  0x44   : > { %514 = vmatmul.mubr.bf16.gmra.mxu0 %v950_v35 }
  0xec   : > { %v842_v36 = vpop.f32.mrf.mxu0 }
  0xee   : > { %v843_v37 = vpop.f32.mrf.mxu0  ;;  %v896_v40 = vpop.f32.mrf.mxu1 }
  0xef   : > { %v844_v39 = vadd.f32 %v843_v37, %v842_v36 }
  0xf0   : > { %v845_v41 = vpop.f32.mrf.mxu0  ;;  %v556_v43 = vpop.f32.mrf.mxu1 }
  0xf1   : > { %v492_v42 = vadd.f32 %v844_v39, %v1098_v38 }
  0xf2   : > { %v846_v44 = vpop.f32.mrf.mxu0  ;;  %v897_v47 = vpop.f32.mrf.mxu1 }
  0xf3   : > { %v847_v45 = vadd.f32 %v846_v44, %v845_v41  ;;  %v557_v46 = vadd.f32 %v556_v43, %v492_v42 }
  0xf4   : > { %v848_v48 = vpop.f32.mrf.mxu0  ;;  %v559_v51 = vpop.f32.mrf.mxu1 }
  0xf5   : > { %v595_v49 = vmin.f32 %v557_v46, 0.0  ;;  %v495_v50 = vadd.f32 %v847_v45, %v1098_v38  ;;  %vm587_vm0 = vcmp.gt.f32.partialorder %v557_v46, 0.0 }
  0xf6   : > { %v849_v52 = vpop.f32.mrf.mxu0  ;;  %v900_v57 = vpop.f32.mrf.mxu1 }
  0xf7   : > { %v603_v53 = vmul.f32 1.442695, %v595_v49  ;;  %v850_v54 = vadd.f32 %v849_v52, %v848_v48  ;;  %v560_v55 = vadd.f32 %v559_v51, %v495_v50 }
  0xf8   : > { %v851_v56 = vpop.f32.mrf.mxu0  ;;  %v572_v1 = vpop.f32.mrf.mxu1 }
  0xf9   : > { %951 = vpow2.f32 %v603_v53  ;;  %v500_v58 = vadd.f32 %v850_v54, %v1098_v38  ;;  %v596_v59 = vmin.f32 %v560_v55, 0.0  ;;  %vm588_vm1 = vcmp.gt.f32.partialorder %v560_v55, 0.0 }
  0xfa   : > { %v852_v60 = vpop.f32.mrf.mxu0  ;;  %v901_v9 = vpop.f32.mrf.mxu1 }
  0xfb   : > { %v1103_v61 = vadd.f32 %v896_v40, %v500_v58  ;;  %v605_v62 = vmul.f32 1.442695, %v596_v59  ;;  %v853_v63 = vadd.f32 %v852_v60, %v851_v56 }
  0xfc   : > { %v854_v0 = vpop.f32.mrf.mxu0  ;;  %v575_v17 = vpop.f32.mrf.mxu1 }
  0xfd   : > { %v597_v2 = vmin.f32 %v1103_v61, 0.0  ;;  %953 = vpow2.f32 %v605_v62  ;;  %v503_v3 = vadd.f32 %v853_v63, %v1098_v38  ;;  %vm589_vm2 = vcmp.gt.f32.partialorder %v1103_v61, 0.0 }
  0xfe   : > { %v855_v4 = vpop.f32.mrf.mxu0 }
  0xff   : > { %v607_v5 = vmul.f32 1.442695, %v597_v2  ;;  %v568_v6 = vadd.f32 %v897_v47, %v503_v3  ;;  %v856_v7 = vadd.f32 %v855_v4, %v854_v0 }
 0x100   : > { %v857_v8 = vpop.f32.mrf.mxu0 }
 0x101   : > { %955 = vpow2.f32 %v607_v5  ;;  %v598_v10 = vmin.f32 %v568_v6, 0.0  ;;  %v508_v11 = vadd.f32 %v856_v7, %v1098_v38  ;;  %vm590_vm3 = vcmp.gt.f32.partialorder %v568_v6, 0.0 }
 0x102   : > { %v858_v12 = vpop.f32.mrf.mxu0 }
 0x103   : > { %v609_v13 = vmul.f32 1.442695, %v598_v10  ;;  %v859_v14 = vadd.f32 %v858_v12, %v857_v8  ;;  %v573_v15 = vadd.f32 %v572_v1, %v508_v11 }
 0x104   : > { %v860_v16 = vpop.f32.mrf.mxu0 }
 0x105   : > { %957 = vpow2.f32 %v609_v13  ;;  %v599_v18 = vmin.f32 %v573_v15, 0.0  ;;  %v511_v19 = vadd.f32 %v859_v14, %v1098_v38  ;;  %vm591_vm4 = vcmp.gt.f32.partialorder %v573_v15, 0.0 }
 0x106   : > { %v952_v20 = vpop.eup %951  ;;  %v861_v21 = vpop.f32.mrf.mxu0 }
 0x107   : > { %v611_v22 = vmul.f32 1.442695, %v599_v18  ;;  %v862_v23 = vadd.f32 %v861_v21, %v860_v16  ;;  %v576_v24 = vadd.f32 %v575_v17, %v511_v19  ;;  %v777_v26 = vadd.f32 -1.0, %v952_v20 }
 0x108   : > { %v863_v25 = vpop.f32.mrf.mxu0 }
 0x109   : > { %v516_v27 = vadd.f32 %v862_v23, %v1098_v38  ;;  %959 = vpow2.f32 %v611_v22  ;;  %v600_v29 = vmin.f32 %v576_v24, 0.0  ;;  %v627_v35 = vsel %vm587_vm0, %v557_v46, %v777_v26 }
 0x10a   : > { %v954_v28 = vpop.eup %953  ;;  %v864_v30 = vpop.f32.mrf.mxu0  ;;  %vm592_vm5 = vcmp.gt.f32.partialorder %v576_v24, 0.0 }
 0x10b   : > { %v778_v31 = vadd.f32 -1.0, %v954_v28  ;;  %v581_v32 = vadd.f32 %v900_v57, %v516_v27  ;;  %v865_v33 = vadd.f32 %v864_v30, %v863_v25  ;;  %v613_v34 = vmul.f32 1.442695, %v600_v29 }
 0x10d   : > { %v628_v36 = vsel %vm588_vm1, %v560_v55, %v778_v31  ;;  %v601_v37 = vmin.f32 %v581_v32, 0.0  ;;  %v519_v39 = vadd.f32 %v865_v33, %v1098_v38  ;;  %961 = vpow2.f32 %v613_v34 }
 0x10e   : > { %v956_v40 = vpop.eup %955  ;;  %v806_v41 = vpack.c.bf16 %v628_v36, %v627_v35  ;;  %vm593_vm6 = vcmp.gt.f32.partialorder %v581_v32, 0.0 }
 0x10f   : > { %v615_v42 = vmul.f32 1.442695, %v601_v37  ;;  %v584_v43 = vadd.f32 %v901_v9, %v519_v39  ;;  %v779_v44 = vadd.f32 -1.0, %v956_v40 }
 0x110   : > { %807 = vst [vmem:[%s1114_s21] sm:$0xff] %v806_v41  }
 0x111   : > { %963 = vpow2.f32 %v615_v42  ;;  %v602_v45 = vmin.f32 %v584_v43, 0.0  ;;  %v629_v49 = vsel %vm589_vm2, %v1103_v61, %v779_v44  ;;  %vm594_vm7 = vcmp.gt.f32.partialorder %v584_v43, 0.0 }
 0x112   : > { %v958_v46 = vpop.eup %957 }
 0x113   : > { %v780_v47 = vadd.f32 -1.0, %v958_v46  ;;  %v617_v48 = vmul.f32 1.442695, %v602_v45 }
 0x115   : > { %v630_v38 = vsel %vm590_vm3, %v568_v6, %v780_v47  ;;  %965 = vpow2.f32 %v617_v48 }
 0x116   : > { %v811_v50 = vpack.c.bf16 %v630_v38, %v629_v49  ;;  %v960_v51 = vpop.eup %959 }
 0x117   : > { %v781_v52 = vadd.f32 -1.0, %v960_v51 }
 0x118   : > { %823 = vst [vmem:[%s1114_s21 + $0x8] sm:$0xff] %v811_v50  }
 0x119   : > { %v631_v56 = vsel %vm591_vm4, %v573_v15, %v781_v52 }
 0x11a   : > { %v962_v53 = vpop.eup %961 }
 0x11b   : > { %v782_v54 = vadd.f32 -1.0, %v962_v53 }
 0x11d   : > { %v632_v57 = vsel %vm592_vm5, %v576_v24, %v782_v54 }
 0x11e   : > { %v964_v55 = vpop.eup %963  ;;  %v816_v58 = vpack.c.bf16 %v632_v57, %v631_v56 }
 0x11f   : > { %v783_v59 = vadd.f32 -1.0, %v964_v55 }
 0x120   : > { %824 = vst [vmem:[%s1114_s21 + $0x10] sm:$0xff] %v816_v58  }
 0x121   : > { %v633_v62 = vsel %vm593_vm6, %v581_v32, %v783_v59 }
 0x122   : > { %v966_v60 = vpop.eup %965 }
 0x123   : > { %v784_v61 = vadd.f32 -1.0, %v966_v60 }
 0x125   : > { %v634_v63 = vsel %vm594_vm7, %v584_v43, %v784_v61 }
 0x126   : > { %v821_v0 = vpack.c.bf16 %v634_v63, %v633_v62 }
 0x128   : > { %825 = vst [vmem:[%s1114_s21 + $0x18] sm:$0xff] %v821_v0  }
 0x129 PF: > { %s13_s12 = sadd.s32 1, %s973_s12  }
 0x12a   : > { %p10_p4 = scmp.ge.s32.totalorder %s13_s12, 4  }
 0x12c   :  { %12 = sbr.rel (!%p10_p4) target bundleno = 1 (0x1), region = 62 }

// kernel: attentive_encoder_decoder.10
= control target key start
LH: loop header
LB: loop body
LE: loop exit
PB: predicated region body
PF: predicated region fallthrough
CT: control target
= control target key end

     0   :  { %s1002_s1 = inlined_call_operand.vmem [shape: bf16[640,128], index: 1, kind: input, shape index: {}]   ;;  %s1003_s0 = inlined_call_operand.vmem [shape: bf16[32,640], index: 0, kind: input, shape index: {}]   ;;  %s1004_s2 = inlined_call_operand.vmem [shape: f32[1,128], index: 2, kind: input, shape index: {}]   ;;  %s1005_s3 = inlined_call_operand.vmem [shape: bf16[32,128], index: 3, kind: output, shape index: {}]  }
   0x1   :  { %v761_v0 = vld [vmem:[%s1002_s1 + $0x78] sm:$0xff]   ;;  %v765_v4 = vld [vmem:[%s1002_s1 + $0x70] sm:$0xff]   ;;  %v769_v8 = vld [vmem:[%s1002_s1 + $0x68] sm:$0xff]  }
   0x2   :  { %v762_v1 = vld [vmem:[%s1002_s1 + $0x38] sm:$0xff]   ;;  %675 = vmatprep.subr.bf16.mxu0 %v761_v0  ;;  %v766_v5 = vld [vmem:[%s1002_s1 + $0x30] sm:$0xff]   ;;  %v770_v9 = vld [vmem:[%s1002_s1 + $0x28] sm:$0xff]  }
   0x3   :  { %v763_v2 = vld [vmem:[%s1002_s1 + $0xf8] sm:$0xff]   ;;  %676 = vmatpush3.bf16.msra.mxu0 %v762_v1  ;;  %v767_v6 = vld [vmem:[%s1002_s1 + $0xf0] sm:$0xff]   ;;  %v771_v10 = vld [vmem:[%s1002_s1 + $0xe8] sm:$0xff]  }
   0x4   :  { %v764_v3 = vld [vmem:[%s1002_s1 + $0xb8] sm:$0xff]   ;;  %703 = vmatprep.subr.bf16.mxu1 %v763_v2  ;;  %677 = vmatprep.subr.bf16.mxu0 %v765_v4  ;;  %v768_v7 = vld [vmem:[%s1002_s1 + $0xb0] sm:$0xff]   ;;  %v772_v11 = vld [vmem:[%s1002_s1 + $0xa8] sm:$0xff]  }
   0x5   :  { %704 = vmatpush3.bf16.msra.mxu1 %v764_v3  ;;  %v773_v12 = vld [vmem:[%s1002_s1 + $0x60] sm:$0xff]   ;;  %v777_v16 = vld [vmem:[%s1002_s1 + $0x58] sm:$0xff]   ;;  %v781_v20 = vld [vmem:[%s1002_s1 + $0x50] sm:$0xff]  }
   0x6   :  { %705 = vmatprep.subr.bf16.mxu1 %v767_v6  ;;  %v774_v13 = vld [vmem:[%s1002_s1 + $0x20] sm:$0xff]   ;;  %v778_v17 = vld [vmem:[%s1002_s1 + $0x18] sm:$0xff]   ;;  %v782_v21 = vld [vmem:[%s1002_s1 + $0x10] sm:$0xff]  }
   0x7   :  { %678 = vmatpush3.bf16.msra.mxu0 %v766_v5  ;;  %v775_v14 = vld [vmem:[%s1002_s1 + $0xe0] sm:$0xff]   ;;  %v779_v18 = vld [vmem:[%s1002_s1 + $0xd8] sm:$0xff]   ;;  %v783_v22 = vld [vmem:[%s1002_s1 + $0xd0] sm:$0xff]  }
   0x8   :  { %679 = vmatprep.subr.bf16.mxu0 %v769_v8  ;;  %v776_v15 = vld [vmem:[%s1002_s1 + $0xa0] sm:$0xff]   ;;  %v780_v19 = vld [vmem:[%s1002_s1 + $0x98] sm:$0xff]   ;;  %v784_v23 = vld [vmem:[%s1002_s1 + $0x90] sm:$0xff]  }
   0x9   :  { %706 = vmatpush3.bf16.msra.mxu1 %v768_v7  ;;  %v785_v24 = vld [vmem:[%s1002_s1 + $0x48] sm:$0xff]   ;;  %v789_v28 = vld [vmem:[%s1002_s1 + $0x40] sm:$0xff]   ;;  %v796_v34 = vld [vmem:[%s1002_s1 + $0x138] sm:$0xff]  }
   0xa   :  { %707 = vmatprep.subr.bf16.mxu1 %v771_v10  ;;  %v786_v25 = vld [vmem:[%s1002_s1 + $0x8] sm:$0xff]   ;;  %v790_v29 = vld [vmem:[%s1002_s1] sm:$0xff]   ;;  %v800_v37 = vld [vmem:[%s1002_s1 + $0x130] sm:$0xff]  }
   0xb   :  { %680 = vmatpush3.bf16.msra.mxu0 %v770_v9  ;;  %v787_v26 = vld [vmem:[%s1002_s1 + $0xc8] sm:$0xff]   ;;  %v791_v30 = vld [vmem:[%s1002_s1 + $0xc0] sm:$0xff]   ;;  %v803_v44 = vld [vmem:[%s1002_s1 + $0x118] sm:$0xff]  }
   0xc   :  { %681 = vmatprep.subr.bf16.mxu0 %v773_v12  ;;  %v788_v27 = vld [vmem:[%s1002_s1 + $0x88] sm:$0xff]   ;;  %v792_v31 = vld [vmem:[%s1003_s0] ss:$20 sps:$4 sm:$0xff]   ;;  %v794_v32 = vld [vmem:[%s1003_s0 + $0x4] ss:$20 sps:$4 sm:$0xff]  }
   0xd   :  { %708 = vmatpush3.bf16.msra.mxu1 %v772_v11  ;;  %v795_v33 = vld [vmem:[%s1002_s1 + $0x80] sm:$0xff]   ;;  %438 = vmatprep.mubr.bf16.mxu0 %v794_v32  ;;  %v797_v35 = vld [vmem:[%s1003_s0 + $0x8] ss:$20 sps:$4 sm:$0xff]   ;;  %v810_v46 = vld [vmem:[%s1002_s1 + $0x110] sm:$0xff]  }
   0xe   :  { %709 = vmatprep.subr.bf16.mxu1 %v775_v14  ;;  %v799_v36 = vld [vmem:[%s1003_s0 + $0xc] ss:$20 sps:$4 sm:$0xff]   ;;  %v806_v41 = vld [vmem:[%s1003_s0 + $0x28] ss:$20 sps:$4 sm:$0xff]   ;;  %v809_v43 = vld [vmem:[%s1003_s0 + $0x30] ss:$20 sps:$4 sm:$0xff]  }
   0xf   :  { %682 = vmatpush3.bf16.msra.mxu0 %v774_v13  ;;  %487 = vmatprep.mubr.bf16.mxu1 %v799_v36  ;;  %v801_v38 = vld [vmem:[%s1002_s1 + $0x128] sm:$0xff]   ;;  %v802_v39 = vld [vmem:[%s1002_s1 + $0x120] sm:$0xff]  }
  0x10   :  { %683 = vmatprep.subr.bf16.mxu0 %v777_v16  ;;  %v804_v40 = vld [vmem:[%s1003_s0 + $0x2c] ss:$20 sps:$4 sm:$0xff]   ;;  %v807_v42 = vld [vmem:[%s1003_s0 + $0x34] ss:$20 sps:$4 sm:$0xff]   ;;  %v813_v45 = vld [vmem:[%s1003_s0 + $0x10] ss:$20 sps:$4 sm:$0xff]  }
  0x11   :  { %710 = vmatpush3.bf16.msra.mxu1 %v776_v15  ;;  %v811_v47 = vld [vmem:[%s1002_s1 + $0x108] sm:$0xff]   ;;  %v812_v48 = vld [vmem:[%s1002_s1 + $0x100] sm:$0xff]  }
  0x12   :  { %711 = vmatprep.subr.bf16.mxu1 %v779_v18  ;;  %v814_v49 = vld [vmem:[%s1003_s0 + $0x38] ss:$20 sps:$4 sm:$0xff]   ;;  %v601_v3 = vld [vmem:[%s1004_s2] ss:$0 sm:$0xff] }
  0x13   :  { %684 = vmatpush3.bf16.msra.mxu0 %v778_v17 }
  0x14   :  { %685 = vmatprep.subr.bf16.mxu0 %v781_v20 }
  0x15   :  { %712 = vmatpush3.bf16.msra.mxu1 %v780_v19 }
  0x16   :  { %713 = vmatprep.subr.bf16.mxu1 %v783_v22 }
  0x17   :  { %686 = vmatpush3.bf16.msra.mxu0 %v782_v21 }
  0x18   :  { %687 = vmatprep.subr.bf16.mxu0 %v785_v24 }
  0x19   :  { %714 = vmatpush3.bf16.msra.mxu1 %v784_v23 }
  0x1a   :  { %715 = vmatprep.subr.bf16.mxu1 %v787_v26 }
  0x1b   :  { %688 = vmatpush3.bf16.msra.mxu0 %v786_v25 }
  0x1c   :  { %689 = vmatprep.subr.bf16.mxu0 %v789_v28 }
  0x1d   :  { %716 = vmatpush3.bf16.msra.mxu1 %v788_v27 }
  0x1e   :  { %717 = vmatprep.subr.bf16.mxu1 %v791_v30 }
  0x1f   :  { %690 = vmatpush3.bf16.msra.mxu0 %v790_v29 }
  0x20   :  { %741 = vmatprep.subr.bf16.mxu0 %v796_v34 }
  0x21   :  { %718 = vmatpush3.bf16.msra.mxu1 %v795_v33 }
  0x22   :  { %439 = vmatmul.mubr.bf16.vlgmr.msra.gmra.mxu0 %v792_v31 }
  0x23   :  { %742 = vmatpush3.bf16.msra.mxu0 %v796_v34  ;;  %446 = vmatprep.mubr.bf16.mxu0 %v804_v40 }
  0x24   :  { %488 = vmatmul.mubr.bf16.vlgmr.msra.gmra.mxu1 %v797_v35  ;;  %743 = vmatprep.subr.bf16.mxu0 %v800_v37 }
  0x25   :  { %495 = vmatprep.mubr.bf16.mxu1 %v807_v42 }
  0x27   :  { %744 = vmatpush3.bf16.msra.mxu0 %v800_v37 }
  0x28   :  { %745 = vmatprep.subr.bf16.mxu0 %v801_v38 }
  0x2a   :  { %447 = vmatmul.mubr.bf16.gmra.mxu0 %v806_v41 }
  0x2b   :  { %746 = vmatpush3.bf16.msra.mxu0 %v801_v38  ;;  %757 = vmatprep.mubr.bf16.mxu0 %v813_v45 }
  0x2c   :  { %747 = vmatprep.subr.bf16.mxu0 %v802_v39  ;;  %496 = vmatmul.mubr.bf16.gmra.mxu1 %v809_v43 }
  0x2f   :  { %748 = vmatpush3.bf16.msra.mxu0 %v802_v39 }
  0x30   :  { %749 = vmatprep.subr.bf16.mxu0 %v803_v44 }
  0x33   :  { %750 = vmatpush3.bf16.msra.mxu0 %v803_v44 }
  0x34   :  { %751 = vmatprep.subr.bf16.mxu0 %v810_v46 }
  0x37   :  { %752 = vmatpush3.bf16.msra.mxu0 %v810_v46 }
  0x38   :  { %753 = vmatprep.subr.bf16.mxu0 %v811_v47 }
  0x3b   :  { %754 = vmatpush3.bf16.msra.mxu0 %v811_v47 }
  0x3c   :  { %755 = vmatprep.subr.bf16.mxu0 %v812_v48 }
  0x3f   :  { %756 = vmatpush3.bf16.msra.mxu0 %v812_v48 }
  0x42   :  { %758 = vmatmul.mubr.bf16.vlgmr.msra.gmra.mxu0 %v814_v49 }
  0xe2   :  { %v691_v50 = vpop.f32.mrf.mxu0 }
  0xe4   :  { %v692_v51 = vpop.f32.mrf.mxu0  ;;  %v719_v52 = vpop.f32.mrf.mxu1 }
  0xe5   :  { %v693_v2 = vadd.f32 %v692_v51, %v691_v50 }
  0xe6   :  { %v694_v53 = vpop.f32.mrf.mxu0  ;;  %v720_v54 = vpop.f32.mrf.mxu1 }
  0xe7   :  { %v441_v8 = vadd.f32 %v693_v2, %v601_v3  ;;  %v721_v9 = vadd.f32 %v720_v54, %v719_v52 }
  0xe8   :  { %v695_v55 = vpop.f32.mrf.mxu0  ;;  %v722_v56 = vpop.f32.mrf.mxu1 }
  0xe9   :  { %v696_v10 = vadd.f32 %v695_v55, %v694_v53  ;;  %v490_v16 = vadd.f32 %v721_v9, %v441_v8 }
  0xea   :  { %v697_v57 = vpop.f32.mrf.mxu0  ;;  %v723_v58 = vpop.f32.mrf.mxu1 }
  0xeb   :  { %v444_v17 = vadd.f32 %v696_v10, %v601_v3  ;;  %v724_v18 = vadd.f32 %v723_v58, %v722_v56 }
  0xec   :  { %v698_v59 = vpop.f32.mrf.mxu0  ;;  %v725_v60 = vpop.f32.mrf.mxu1 }
  0xed   :  { %v699_v63 = vadd.f32 %v698_v59, %v697_v57  ;;  %v493_v27 = vadd.f32 %v724_v18, %v444_v17 }
  0xee   :  { %v700_v61 = vpop.f32.mrf.mxu0  ;;  %v726_v62 = vpop.f32.mrf.mxu1 }
  0xef   :  { %v449_v4 = vadd.f32 %v699_v63, %v601_v3  ;;  %v727_v5 = vadd.f32 %v726_v62, %v725_v60 }
  0xf0   :  { %v701_v0 = vpop.f32.mrf.mxu0  ;;  %v728_v1 = vpop.f32.mrf.mxu1 }
  0xf1   :  { %v702_v6 = vadd.f32 %v701_v0, %v700_v61  ;;  %v498_v13 = vadd.f32 %v727_v5, %v449_v4 }
  0xf2   :  { %v729_v7 = vpop.f32.mrf.mxu1 }
  0xf3   :  { %v452_v11 = vadd.f32 %v702_v6, %v601_v3  ;;  %v730_v12 = vadd.f32 %v729_v7, %v728_v1 }
  0xf5   :  { %v501_v22 = vadd.f32 %v730_v12, %v452_v11 }
 0x102   :  { %v759_v14 = vpop.f32.mrf.mxu0 }
 0x103   :  { %v547_v15 = vadd.f32 %v759_v14, %v498_v13 }
 0x104   :  { %v538_v19 = vpop.f32.mrf.mxu0 }
 0x105   :  { %v559_v20 = vmin.f32 %v547_v15, 0.0  ;;  %v539_v21 = vadd.f32 %v538_v19, %v490_v16  ;;  %vm555_vm0 = vcmp.gt.f32.partialorder %v547_v15, 0.0 }
 0x106   :  { %v760_v23 = vpop.f32.mrf.mxu0 }
 0x107   :  { %v565_v24 = vmul.f32 1.442695, %v559_v20  ;;  %v557_v25 = vmin.f32 %v539_v21, 0.0  ;;  %v550_v26 = vadd.f32 %v760_v23, %v501_v22  ;;  %vm553_vm2 = vcmp.gt.f32.partialorder %v539_v21, 0.0 }
 0x108   :  { %v541_v28 = vpop.f32.mrf.mxu0 }
 0x109   :  { %815 = vpow2.f32 %v565_v24  ;;  %v561_v29 = vmul.f32 1.442695, %v557_v25  ;;  %v560_v30 = vmin.f32 %v550_v26, 0.0  ;;  %v542_v31 = vadd.f32 %v541_v28, %v493_v27 }
 0x10a   :  { %vm556_vm1 = vcmp.gt.f32.partialorder %v550_v26, 0.0 }
 0x10b   :  { %v567_v32 = vmul.f32 1.442695, %v560_v30  ;;  %817 = vpow2.f32 %v561_v29  ;;  %v558_v33 = vmin.f32 %v542_v31, 0.0  ;;  %vm554_vm3 = vcmp.gt.f32.partialorder %v542_v31, 0.0 }
 0x10d   :  { %819 = vpow2.f32 %v567_v32  ;;  %v563_v34 = vmul.f32 1.442695, %v558_v33 }
 0x10f   :  { %821 = vpow2.f32 %v563_v34 }
 0x116   :  { %v816_v35 = vpop.eup %815 }
 0x117   :  { %v654_v37 = vadd.f32 -1.0, %v816_v35 }
 0x118   :  { %v818_v36 = vpop.eup %817 }
 0x119   :  { %v652_v40 = vadd.f32 -1.0, %v818_v36  ;;  %v575_v42 = vsel %vm555_vm0, %v547_v15, %v654_v37 }
 0x11a   :  { %v820_v38 = vpop.eup %819 }
 0x11b   :  { %v655_v39 = vadd.f32 -1.0, %v820_v38  ;;  %v573_v46 = vsel %vm553_vm2, %v539_v21, %v652_v40 }
 0x11c   :  { %v822_v41 = vpop.eup %821 }
 0x11d   :  { %v576_v43 = vsel %vm556_vm1, %v550_v26, %v655_v39  ;;  %v653_v45 = vadd.f32 -1.0, %v822_v41 }
 0x11e   :  { %v672_v44 = vpack.c.bf16 %v576_v43, %v575_v42 }
 0x11f   :  { %v574_v47 = vsel %vm554_vm3, %v542_v31, %v653_v45 }
 0x120   :  { %674 = vst [vmem:[%s1005_s3 + $0x8] sm:$0xff] %v672_v44   ;;  %v667_v48 = vpack.c.bf16 %v574_v47, %v573_v46 }
 0x122   :  { %668 = vst [vmem:[%s1005_s3] sm:$0xff] %v667_v48  }

// kernel: mul.7
= control target key start
LH: loop header
LB: loop body
LE: loop exit
PB: predicated region body
PF: predicated region fallthrough
CT: control target
= control target key end

     0   :  { %s30_s10 = smov 3  ;;  %s11_s11 = smov 3  ;;  %vm13_vm0 = vcmask 31744   ;;  %vm20_vm1 = vcmask 130144   ;;  %vm27_vm2 = vcmask 97344   ;;  %vm34_vm3 = vcmask 64544   ;;  %s70_s0 = inlined_call_operand.vmem [shape: f32[2,4,4], index: 0, kind: input, shape index: {}]   ;;  %s71_s1 = inlined_call_operand.vmem [shape: f32[2,16], index: 1, kind: output, shape index: {}]  }
   0x1   :  { %v44_v0 = vld [vmem:[%s70_s0 + $0x4] sm:$0xf]  ;;  %v9_v1 = vld [vmem:[%s70_s0] sm:$0xf]  ;;  %s16_s0 = smov 3  ;;  %s23_s12 = smov 3 }
   0x2   :  { %8 = vst [vmem:[#allocation1 + $0x8] sm:$0xf] %v44_v0  ;;  %10 = vst [vmem:[#allocation1] sm:$0xf] %v9_v1  ;;  %s48_s13 = smov 12   ;;  %s49_s14 = smov 4  }
   0x3   :  { %s50_s15 = smov 8  }
   0x9   :  { %v17_v2 = vld [vmem:[#allocation1 + $0x3] ss:$8 sm:%s16_s0]   ;;  %v31_v3 = vld [vmem:[#allocation1 + $0x1] ss:$8 sm:%s30_s10]   ;;  %v12_v4 = vld [vmem:[#allocation1] ss:$8 sm:%s11_s11]  }
   0xa   :  { %18 = vrot.lane.b32.xlu0 %v17_v2, %s48_s13  ;;  %32 = vrot.lane.b32.xlu1 %v31_v3, %s49_s14  ;;  %v24_v5 = vld [vmem:[#allocation1 + $0x2] ss:$8 sm:%s23_s12]   ;;  %14 = vst.msk [vmem:[#allocation0] sm:$0x3] %vm13_vm0, %v12_v4  }
   0xe   :  { %25 = vrot.lane.b32.xlu0 %v24_v5, %s50_s15 }
  0x7c   :  { %v19_v6 = vpop.permute.xlu0 %18   ;;  %v33_v7 = vpop.permute.xlu1 %32  }
  0x7d   :  { %21 = vst.msk [vmem:[#allocation0] sm:$0x3] %vm20_vm1, %v19_v6  }
  0x80   :  { %v26_v8 = vpop.permute.xlu0 %25  }
  0x81   :  { %28 = vst.msk [vmem:[#allocation0] sm:$0x3] %vm27_vm2, %v26_v8  }
  0x82   :  { %35 = vst.msk [vmem:[#allocation0] sm:$0x3] %vm34_vm3, %v33_v7  }
  0x89   :  { %v40_v9 = vld [vmem:[#allocation0] sm:$0x3] }
  0x8a   :  { %43 = vst [vmem:[%s71_s1] sm:$0x3] %v40_v9 }

// kernel: attentive_encoder_decoder.12
= control target key start
LH: loop header
LB: loop body
LE: loop exit
PB: predicated region body
PF: predicated region fallthrough
CT: control target
= control target key end

     0   :  { %s2021_s12 = smov 0   ;;  %s2023_s13 = smov 0   ;;  %s2494_s0 = inlined_call_operand.vmem [shape: bf16[2,16,1152], index: 0, kind: input, shape index: {}]   ;;  %s2495_s1 = inlined_call_operand.vmem [shape: bf16[2,128,1152], index: 1, kind: input, shape index: {}]   ;;  %s2496_s2 = inlined_call_operand.vmem [shape: f32[2,1,128], index: 2, kind: input, shape index: {}]   ;;  %s2497_s3 = inlined_call_operand.vmem [shape: bf16[2,16,1152], index: 3, kind: output, shape index: {}]  }
   0x1   :  { %s2025_s14 = smov 0  }
   0x2 LB: > { %s32_s15 = sadd.s32 1, %s1991_s13  ;;  %p1647_p0 = scmp.ge.s32.totalorder %s1995_s14, 1  ;;  %s1995_s14 = sphi %s2025_s14, %s13_s14   ;;  %s1991_s13 = sphi %s2023_s13, %s2511_s13   ;;  %s1987_s12 = sphi %s2021_s12, %s2510_s12  }
   0x3   : > { %p34_p1 = scmp.ge.s32.totalorder %s32_s15, 2  ;;  %p197_p2 = scmp.lt.s32.totalorder %s1995_s14, 3 }
   0x5   : > { %s2513_s15 = smov (%p34_p1, %s32_s15), 0  ;;  %p198_p3 = pnand %p1647_p0, %p197_p2 }
   0x7   : > { %201 = sbr.rel (%p198_p3) target bundleno = 989 (0x3dd), region = 32 }
   0xc   : > { %p248_p4 = scmp.lt.s32.totalorder %s1987_s12, 1  ;;  %vm1998_vm0 = vmmov 0   ;;  %vm291_vm1 = vcmask 7168  }
   0xe   : > { %s2515_s12 = smov (!%p248_p4, %s1987_s12), 1 }
   0xf   : > { %s1813_s16 = smul.u32 576, %s2515_s12  ;;  %s274_s26 = scalar_lea.vmem %s2496_s2, %s2515_s12 }
  0x10   : > { %s1812_s20 = smul.u32 72, %s2515_s12 }
  0x11   : > { %s2045_s19 = scalar_lea.vmem %s2495_s1, %s1813_s16 }
  0x12   : > { %v2048_v0 = vld [vmem:[%s2045_s19 + $0x1fc] ss:$36 sps:$4 sm:$0xff]   ;;  %v2051_v1 = vld [vmem:[%s2045_s19 + $0x204] ss:$36 sps:$4 sm:$0xff]   ;;  %v2062_v4 = vld [vmem:[%s2045_s19 + $0x1b4] ss:$36 sps:$4 sm:$0xff]   ;;  %s2105_s23 = scalar_lea.vmem %s2494_s0, %s1812_s20  ;;  %s2473_s29 = scalar_lea.vmem %s2497_s3, %s1812_s20 }
  0x13   : > { %819 = vmatprep.subr.bf16.mxu0 %v2048_v0  ;;  %v2055_v2 = vld [vmem:[%s2045_s19 + $0x1f8] ss:$36 sps:$4 sm:$0xff]   ;;  %v2058_v3 = vld [vmem:[%s2045_s19 + $0x200] ss:$36 sps:$4 sm:$0xff]   ;;  %860 = vmatprep.subr.bf16.mxu1 %v2051_v1  ;;  %v2072_v6 = vld [vmem:[%s2045_s19 + $0x1b0] ss:$36 sps:$4 sm:$0xff]  }
  0x14   : > { %820 = vmatpush1.bf16.xpose.msra.mxu0 %v2055_v2  ;;  %861 = vmatpush1.bf16.xpose.msra.mxu1 %v2058_v3  ;;  %v2067_v5 = vld [vmem:[%s2045_s19 + $0x1bc] ss:$36 sps:$4 sm:$0xff]   ;;  %v2078_v8 = vld [vmem:[%s2045_s19 + $0x16c] ss:$36 sps:$4 sm:$0xff]   ;;  %v2081_v9 = vld [vmem:[%s2045_s19 + $0x174] ss:$36 sps:$4 sm:$0xff]  }
  0x15   : > { %821 = vmatprep.subr.bf16.mxu0 %v2062_v4  ;;  %862 = vmatprep.subr.bf16.mxu1 %v2067_v5  ;;  %v2075_v7 = vld [vmem:[%s2045_s19 + $0x1b8] ss:$36 sps:$4 sm:$0xff]   ;;  %v2088_v10 = vld [vmem:[%s2045_s19 + $0x168] ss:$36 sps:$4 sm:$0xff]   ;;  %v2091_v11 = vld [vmem:[%s2045_s19 + $0x170] ss:$36 sps:$4 sm:$0xff]  }
  0x16   : > { %v2095_v12 = vld [vmem:[%s2045_s19 + $0x124] ss:$36 sps:$4 sm:$0xff]   ;;  %v2098_v13 = vld [vmem:[%s2045_s19 + $0x12c] ss:$36 sps:$4 sm:$0xff]   ;;  %v2120_v18 = vld [vmem:[%s2045_s19 + $0xdc] ss:$36 sps:$4 sm:$0xff]  }
  0x17   : > { %v2112_v14 = vld [vmem:[%s2045_s19 + $0x120] ss:$36 sps:$4 sm:$0xff]   ;;  %v2116_v16 = vld [vmem:[%s2045_s19 + $0x128] ss:$36 sps:$4 sm:$0xff]   ;;  %v2130_v20 = vld [vmem:[%s2045_s19 + $0xd8] ss:$36 sps:$4 sm:$0xff]  }
  0x18   : > { %v1894_v15 = vld [vmem:[%s2105_s23 + $0x4] ss:$36 sps:$4 sm:$0xff]   ;;  %v1897_v17 = vld [vmem:[%s2105_s23 + $0xc] ss:$36 sps:$4 sm:$0xff]   ;;  %v2136_v22 = vld [vmem:[%s2045_s19 + $0x94] ss:$36 sps:$4 sm:$0xff]  }
  0x19   : > { %851 = vmatprep.mubr.bf16.mxu0 %v1894_v15  ;;  %v2123_v19 = vld [vmem:[%s2045_s19 + $0xe4] ss:$36 sps:$4 sm:$0xff]   ;;  %892 = vmatprep.mubr.bf16.mxu1 %v1897_v17  ;;  %v2139_v23 = vld [vmem:[%s2045_s19 + $0x9c] ss:$36 sps:$4 sm:$0xff]   ;;  %v2146_v24 = vld [vmem:[%s2045_s19 + $0x90] ss:$36 sps:$4 sm:$0xff]  }
  0x1a   : > { %v2133_v21 = vld [vmem:[%s2045_s19 + $0xe0] ss:$36 sps:$4 sm:$0xff]   ;;  %v2149_v25 = vld [vmem:[%s2045_s19 + $0x98] ss:$36 sps:$4 sm:$0xff]   ;;  %v2152_v26 = vld [vmem:[%s2045_s19 + $0x4c] ss:$36 sps:$4 sm:$0xff]  }
  0x1b   : > { %v2155_v27 = vld [vmem:[%s2045_s19 + $0x54] ss:$36 sps:$4 sm:$0xff]   ;;  %v2162_v28 = vld [vmem:[%s2045_s19 + $0x48] ss:$36 sps:$4 sm:$0xff]   ;;  %v2178_v32 = vld [vmem:[%s2045_s19] ss:$36 sps:$4 sm:$0xff]  }
  0x1c   : > { %822 = vmatpush1.bf16.xpose.msra.mxu0 %v2072_v6  ;;  %863 = vmatpush1.bf16.xpose.msra.mxu1 %v2075_v7  ;;  %v2165_v29 = vld [vmem:[%s2045_s19 + $0x50] ss:$36 sps:$4 sm:$0xff]   ;;  %v2168_v30 = vld [vmem:[%s2045_s19 + $0x4] ss:$36 sps:$4 sm:$0xff]   ;;  %v1951_v43 = vld [vmem:[%s2105_s23 + $0x1c] ss:$36 sps:$4 sm:$0xff]  }
  0x1d   : > { %823 = vmatprep.subr.bf16.mxu0 %v2078_v8  ;;  %864 = vmatprep.subr.bf16.mxu1 %v2081_v9  ;;  %v2171_v31 = vld [vmem:[%s2045_s19 + $0xc] ss:$36 sps:$4 sm:$0xff]   ;;  %v2187_v35 = vld [vmem:[%s2045_s19 + $0x214] ss:$36 sps:$4 sm:$0xff]   ;;  %v1892_v36 = vld [vmem:[%s2105_s23] ss:$36 sps:$4 sm:$0xff]  }
  0x1e   : > { %v2181_v33 = vld [vmem:[%s2045_s19 + $0x8] ss:$36 sps:$4 sm:$0xff]   ;;  %v2199_v39 = vld [vmem:[%s2045_s19 + $0x210] ss:$36 sps:$4 sm:$0xff]   ;;  %v2214_v44 = vld [vmem:[%s2045_s19 + $0x1c0] ss:$36 sps:$4 sm:$0xff]  }
  0x1f   : > { %v2184_v34 = vld [vmem:[%s2045_s19 + $0x20c] ss:$36 sps:$4 sm:$0xff]   ;;  %v2202_v40 = vld [vmem:[%s2045_s19 + $0x1c4] ss:$36 sps:$4 sm:$0xff]   ;;  %v1948_v42 = vld [vmem:[%s2105_s23 + $0x14] ss:$36 sps:$4 sm:$0xff]  }
  0x20   : > { %v1895_v37 = vld [vmem:[%s2105_s23 + $0x8] ss:$36 sps:$4 sm:$0xff]   ;;  %v2220_v46 = vld [vmem:[%s2045_s19 + $0x17c] ss:$36 sps:$4 sm:$0xff]   ;;  %v2236_v50 = vld [vmem:[%s2045_s19 + $0x134] ss:$36 sps:$4 sm:$0xff]  }
  0x21   : > { %v2196_v38 = vld [vmem:[%s2045_s19 + $0x208] ss:$36 sps:$4 sm:$0xff]   ;;  %v2230_v48 = vld [vmem:[%s2045_s19 + $0x178] ss:$36 sps:$4 sm:$0xff]   ;;  %v2233_v49 = vld [vmem:[%s2045_s19 + $0x180] ss:$36 sps:$4 sm:$0xff]  }
  0x22   : > { %v2205_v41 = vld [vmem:[%s2045_s19 + $0x1cc] ss:$36 sps:$4 sm:$0xff]   ;;  %v2223_v47 = vld [vmem:[%s2045_s19 + $0x184] ss:$36 sps:$4 sm:$0xff]   ;;  %v2239_v51 = vld [vmem:[%s2045_s19 + $0x13c] ss:$36 sps:$4 sm:$0xff]  }
  0x23   : > { %v2217_v45 = vld [vmem:[%s2045_s19 + $0x1c8] ss:$36 sps:$4 sm:$0xff]   ;;  %v2246_v52 = vld [vmem:[%s2045_s19 + $0x130] ss:$36 sps:$4 sm:$0xff]   ;;  %v2249_v53 = vld [vmem:[%s2045_s19 + $0x138] ss:$36 sps:$4 sm:$0xff]  }
  0x24   : > { %824 = vmatpush1.bf16.xpose.msra.mxu0 %v2088_v10  ;;  %865 = vmatpush1.bf16.xpose.msra.mxu1 %v2091_v11  ;;  %v2252_v54 = vld [vmem:[%s2045_s19 + $0xec] ss:$36 sps:$4 sm:$0xff]   ;;  %v2255_v55 = vld [vmem:[%s2045_s19 + $0xf4] ss:$36 sps:$4 sm:$0xff]   ;;  %v2268_v58 = vld [vmem:[%s2045_s19 + $0xa4] ss:$36 sps:$4 sm:$0xff]  }
  0x25   : > { %825 = vmatprep.subr.bf16.mxu0 %v2095_v12  ;;  %866 = vmatprep.subr.bf16.mxu1 %v2098_v13  ;;  %v2262_v56 = vld [vmem:[%s2045_s19 + $0xe8] ss:$36 sps:$4 sm:$0xff]   ;;  %v2265_v57 = vld [vmem:[%s2045_s19 + $0xf0] ss:$36 sps:$4 sm:$0xff]   ;;  %v2278_v60 = vld [vmem:[%s2045_s19 + $0xa0] ss:$36 sps:$4 sm:$0xff]  }
  0x26   : > { %v2271_v59 = vld [vmem:[%s2045_s19 + $0xac] ss:$36 sps:$4 sm:$0xff]   ;;  %v2284_v62 = vld [vmem:[%s2045_s19 + $0x5c] ss:$36 sps:$4 sm:$0xff]   ;;  %v2287_v63 = vld [vmem:[%s2045_s19 + $0x64] ss:$36 sps:$4 sm:$0xff]  }
  0x27   : > { %2502 = vst [vmem:[#allocation5_spill] sm:$0xff] %v2271_v59  ;;  %v2281_v61 = vld [vmem:[%s2045_s19 + $0xa8] ss:$36 sps:$4 sm:$0xff]   ;;  %2504 = vst [vmem:[#allocation7_spill] sm:$0xff] %v2287_v63  ;;  %v2294_v15 = vld [vmem:[%s2045_s19 + $0x58] ss:$36 sps:$4 sm:$0xff]  }
  0x28   : > { %2503 = vst [vmem:[#allocation6_spill] sm:$0xff] %v2281_v61  ;;  %v2297_v17 = vld [vmem:[%s2045_s19 + $0x60] ss:$36 sps:$4 sm:$0xff]  }
  0x29   : > { %2505 = vst [vmem:[#allocation8_spill] sm:$0xff] %v2297_v17 }
  0x2c   : > { %826 = vmatpush1.bf16.xpose.msra.mxu0 %v2112_v14  ;;  %867 = vmatpush1.bf16.xpose.msra.mxu1 %v2116_v16 }
  0x2d   : > { %827 = vmatprep.subr.bf16.mxu0 %v2120_v18  ;;  %868 = vmatprep.subr.bf16.mxu1 %v2123_v19 }
  0x34   : > { %828 = vmatpush1.bf16.xpose.msra.mxu0 %v2130_v20  ;;  %869 = vmatpush1.bf16.xpose.msra.mxu1 %v2133_v21 }
  0x35   : > { %829 = vmatprep.subr.bf16.mxu0 %v2136_v22  ;;  %870 = vmatprep.subr.bf16.mxu1 %v2139_v23 }
  0x3c   : > { %830 = vmatpush1.bf16.xpose.msra.mxu0 %v2146_v24  ;;  %871 = vmatpush1.bf16.xpose.msra.mxu1 %v2149_v25 }
  0x3d   : > { %831 = vmatprep.subr.bf16.mxu0 %v2152_v26  ;;  %872 = vmatprep.subr.bf16.mxu1 %v2155_v27 }
  0x44   : > { %832 = vmatpush1.bf16.xpose.msra.mxu0 %v2162_v28  ;;  %873 = vmatpush1.bf16.xpose.msra.mxu1 %v2165_v29 }
  0x45   : > { %833 = vmatprep.subr.bf16.mxu0 %v2168_v30  ;;  %874 = vmatprep.subr.bf16.mxu1 %v2171_v31 }
  0x4c   : > { %834 = vmatpush1.bf16.xpose.msra.mxu0 %v2178_v32  ;;  %875 = vmatpush1.bf16.xpose.msra.mxu1 %v2181_v33 }
  0x4d   : > { %901 = vmatprep.subr.bf16.mxu0 %v2184_v34  ;;  %942 = vmatprep.subr.bf16.mxu1 %v2187_v35 }
  0x53   : > { %852 = vmatmul.mubr.bf16.vlgmr.msra.gmra.mxu0 %v1892_v36  ;;  %893 = vmatmul.mubr.bf16.vlgmr.msra.gmra.mxu1 %v1895_v37  ;;  %v2300_v36 = vld [vmem:[%s2045_s19 + $0x14] ss:$36 sps:$4 sm:$0xff]   ;;  %v2303_v37 = vld [vmem:[%s2045_s19 + $0x1c] ss:$36 sps:$4 sm:$0xff]  }
  0x54   : > { %902 = vmatpush1.bf16.xpose.msra.mxu0 %v2196_v38  ;;  %943 = vmatpush1.bf16.xpose.msra.mxu1 %v2199_v39 }
  0x55   : > { %903 = vmatprep.subr.bf16.mxu0 %v2202_v40  ;;  %944 = vmatprep.subr.bf16.mxu1 %v2205_v41 }
  0x56   : > { %933 = vmatprep.mubr.bf16.mxu0 %v1948_v42  ;;  %974 = vmatprep.mubr.bf16.mxu1 %v1951_v43  ;;  %v2310_v42 = vld [vmem:[%s2045_s19 + $0x10] ss:$36 sps:$4 sm:$0xff]   ;;  %v2313_v43 = vld [vmem:[%s2045_s19 + $0x18] ss:$36 sps:$4 sm:$0xff]  }
  0x5c   : > { %904 = vmatpush1.bf16.xpose.msra.mxu0 %v2214_v44  ;;  %945 = vmatpush1.bf16.xpose.msra.mxu1 %v2217_v45 }
  0x5d   : > { %905 = vmatprep.subr.bf16.mxu0 %v2220_v46  ;;  %946 = vmatprep.subr.bf16.mxu1 %v2223_v47 }
  0x64   : > { %906 = vmatpush1.bf16.xpose.msra.mxu0 %v2230_v48  ;;  %947 = vmatpush1.bf16.xpose.msra.mxu1 %v2233_v49 }
  0x65   : > { %907 = vmatprep.subr.bf16.mxu0 %v2236_v50  ;;  %948 = vmatprep.subr.bf16.mxu1 %v2239_v51 }
  0x6c   : > { %908 = vmatpush1.bf16.xpose.msra.mxu0 %v2246_v52  ;;  %949 = vmatpush1.bf16.xpose.msra.mxu1 %v2249_v53 }
  0x6d   : > { %909 = vmatprep.subr.bf16.mxu0 %v2252_v54  ;;  %950 = vmatprep.subr.bf16.mxu1 %v2255_v55 }
  0x74   : > { %910 = vmatpush1.bf16.xpose.msra.mxu0 %v2262_v56  ;;  %951 = vmatpush1.bf16.xpose.msra.mxu1 %v2265_v57 }
  0x75   : > { %911 = vmatprep.subr.bf16.mxu0 %v2268_v58  ;;  %952 = vmatprep.subr.bf16.mxu1 %v2271_v59  ;;  %v2322_v59 = vld [vmem:[%s2045_s19 + $0x218] ss:$36 sps:$4 sm:$0xff]  }
  0x7c   : > { %912 = vmatpush1.bf16.xpose.msra.mxu0 %v2278_v60  ;;  %953 = vmatpush1.bf16.xpose.msra.mxu1 %v2281_v61  ;;  %v1946_v61 = vld [vmem:[%s2105_s23 + $0x10] ss:$36 sps:$4 sm:$0xff]  }
  0x7d   : > { %913 = vmatprep.subr.bf16.mxu0 %v2284_v62  ;;  %954 = vmatprep.subr.bf16.mxu1 %v2287_v63  ;;  %v1997_v63 = vmov 0.0  }
  0x7e   : > { %294 = vst.msk [vmem:[#allocation3] sm:$0xff] %vm291_vm1, %v1997_v63  ;;  %295 = vst.msk [vmem:[#allocation3 + $0x8] sm:$0xff] %vm291_vm1, %v1997_v63 }
  0x84   : > { %914 = vmatpush1.bf16.xpose.msra.mxu0 %v2294_v15  ;;  %955 = vmatpush1.bf16.xpose.msra.mxu1 %v2297_v17  ;;  %v1949_v17 = vld [vmem:[%s2105_s23 + $0x18] ss:$36 sps:$4 sm:$0xff]  }
  0x85   : > { %915 = vmatprep.subr.bf16.mxu0 %v2300_v36  ;;  %956 = vmatprep.subr.bf16.mxu1 %v2303_v37 }
  0x8c   : > { %916 = vmatpush1.bf16.xpose.msra.mxu0 %v2310_v42  ;;  %957 = vmatpush1.bf16.xpose.msra.mxu1 %v2313_v43 }
  0x8d   : > { %1772 = vmatprep.subr.bf16.mxu0 %v1997_v63  ;;  %1141 = vmatprep.subr.bf16.mxu1 %v2048_v0  ;;  %v2331_v0 = vld [vmem:[%s2045_s19 + $0x1d0] ss:$36 sps:$4 sm:$0xff]  }
  0x93   : > { %934 = vmatmul.mubr.bf16.vlgmr.msra.gmra.mxu0 %v1946_v61  ;;  %975 = vmatmul.mubr.bf16.vlgmr.msra.gmra.mxu1 %v1949_v17  ;;  %v2340_v61 = vld [vmem:[%s2045_s19 + $0x188] ss:$36 sps:$4 sm:$0xff]  }
  0x94   : > { %1773 = vmatpush3.bf16.xpose.msra.mxu0 %v2322_v59  ;;  %1788 = vmatprep.mubr.msk.bf16.mxu0 %vm1998_vm0, %v1997_v63 }
  0x95   : > { %1774 = vmatprep.subr.bf16.mxu0 %v1997_v63  ;;  %1142 = vmatpush1.bf16.msra.mxu1 %v2055_v2  ;;  %v2349_v2 = vld [vmem:[%s2045_s19 + $0x140] ss:$36 sps:$4 sm:$0xff]  }
  0x96   : > { %1143 = vmatprep.subr.bf16.mxu1 %v2062_v4  ;;  %v2358_v4 = vld [vmem:[%s2045_s19 + $0xf8] ss:$36 sps:$4 sm:$0xff]  }
  0x99   : > { %1144 = vmatpush1.bf16.msra.mxu1 %v2072_v6  ;;  %v2365_v6 = vld [vmem:[%s2045_s19 + $0xb0] ss:$36 sps:$4 sm:$0xff]  }
  0x9a   : > { %1145 = vmatprep.subr.bf16.mxu1 %v2078_v8  ;;  %v2370_v8 = vld [vmem:[%s2045_s19 + $0x68] ss:$36 sps:$4 sm:$0xff]  }
  0x9c   : > { %1775 = vmatpush3.bf16.xpose.msra.mxu0 %v2331_v0 }
  0x9d   : > { %1776 = vmatprep.subr.bf16.mxu0 %v1997_v63  ;;  %1146 = vmatpush1.bf16.msra.mxu1 %v2088_v10  ;;  %v2375_v10 = vld [vmem:[%s2045_s19 + $0x20] ss:$36 sps:$4 sm:$0xff]  }
  0x9e   : > { %1147 = vmatprep.subr.bf16.mxu1 %v2095_v12  ;;  %v1026_v12 = vlaneseq }
  0xa1   : > { %1148 = vmatpush1.bf16.msra.mxu1 %v2112_v14 }
  0xa2   : > { %1149 = vmatprep.subr.bf16.mxu1 %v2120_v18 }
  0xa4   : > { %1777 = vmatpush3.bf16.xpose.msra.mxu0 %v2340_v61 }
  0xa5   : > { %1778 = vmatprep.subr.bf16.mxu0 %v1997_v63  ;;  %1150 = vmatpush1.bf16.msra.mxu1 %v2130_v20  ;;  %v1027_v20 = vshrl.u32 %v1026_v12, 7 }
  0xa6   : > { %1151 = vmatprep.subr.bf16.mxu1 %v2136_v22 }
  0xa9   : > { %1152 = vmatpush1.bf16.msra.mxu1 %v2146_v24 }
  0xaa   : > { %1153 = vmatprep.subr.bf16.mxu1 %v2152_v26 }
  0xac   : > { %1779 = vmatpush3.bf16.xpose.msra.mxu0 %v2349_v2 }
  0xad   : > { %1780 = vmatprep.subr.bf16.mxu0 %v1997_v63  ;;  %1154 = vmatpush1.bf16.msra.mxu1 %v2162_v28 }
  0xae   : > { %1155 = vmatprep.subr.bf16.mxu1 %v2168_v30 }
  0xb1   : > { %1156 = vmatpush1.bf16.msra.mxu1 %v2178_v32  ;;  %v1028_v32 = vsub.s32 0, %v1027_v20 }
  0xb2   : > { %1184 = vmatprep.subr.bf16.mxu1 %v2051_v1  ;;  %v1960_v1 = vld [vmem:[%s2105_s23 + $0x20] ss:$36 sps:$4 sm:$0xff]  }
  0xb4   : > { %1781 = vmatpush3.bf16.xpose.msra.mxu0 %v2358_v4 }
  0xb5   : > { %1782 = vmatprep.subr.bf16.mxu0 %v1997_v63 }
  0xbc   : > { %1783 = vmatpush3.bf16.xpose.msra.mxu0 %v2365_v6 }
  0xbd   : > { %1784 = vmatprep.subr.bf16.mxu0 %v1997_v63 }
  0xc4   : > { %1785 = vmatpush3.bf16.xpose.msra.mxu0 %v2370_v8 }
  0xc5   : > { %1786 = vmatprep.subr.bf16.mxu0 %v1997_v63 }
  0xcc   : > { %1787 = vmatpush3.bf16.xpose.msra.mxu0 %v2375_v10 }
  0xcd   : > { %1227 = vmatprep.subr.bf16.mxu0 %v2184_v34 }
  0xd3   : > { %1789 = vmatmul.mubr.bf16.vlgmr.msra.gmra.mxu0 %v1960_v1 }
  0xd4   : > { %1228 = vmatpush1.bf16.msra.mxu0 %v2196_v38  ;;  %v404_v38 = vld [vmem:[%s274_s26] sm:$0x1] }
  0xd5   : > { %1229 = vmatprep.subr.bf16.mxu0 %v2202_v40 }
  0xd8   : > { %1230 = vmatpush1.bf16.msra.mxu0 %v2214_v44 }
  0xd9   : > { %1231 = vmatprep.subr.bf16.mxu0 %v2220_v46  ;;  %v2400_v46 = vrot.slane %v404_v38, %v1028_v32 }
  0xdc   : > { %1232 = vmatpush1.bf16.msra.mxu0 %v2230_v48  ;;  %v1999_v48 = vmov -1e+30  }
  0xdd   : > { %1233 = vmatprep.subr.bf16.mxu0 %v2236_v50  ;;  %292 = vst.msk [vmem:[#allocation2] sm:$0xff] %vm291_vm1, %v1999_v48  ;;  %293 = vst.msk [vmem:[#allocation2 + $0x8] sm:$0xff] %vm291_vm1, %v1999_v48 }
  0xe0   : > { %1234 = vmatpush1.bf16.msra.mxu0 %v2246_v52 }
  0xe1   : > { %1235 = vmatprep.subr.bf16.mxu0 %v2252_v54 }
  0xe4   : > { %1236 = vmatpush1.bf16.msra.mxu0 %v2262_v56 }
  0xe5   : > { %1237 = vmatprep.subr.bf16.mxu0 %v2268_v58 }
  0xe8   : > { %1238 = vmatpush1.bf16.msra.mxu0 %v2278_v60 }
  0xe9   : > { %1239 = vmatprep.subr.bf16.mxu0 %v2284_v62 }
  0xec   : > { %1240 = vmatpush1.bf16.msra.mxu0 %v2294_v15 }
  0xed   : > { %1241 = vmatprep.subr.bf16.mxu0 %v2300_v36  ;;  %v1024_v36 = vmul.f32 10.0, %v404_v38  ;;  %v1044_v38 = vld [vmem:[#allocation2 + $0x8] sm:$0xff] }
  0xf0   : > { %1242 = vmatpush1.bf16.msra.mxu0 %v2310_v42  ;;  %v1035_v42 = vand.u32 127, %v1026_v12  ;;  %v1043_v12 = vld [vmem:[#allocation2] sm:$0xff] }
  0xf1   : > { %1792 = vmatprep.subr.bf16.mxu0 %v1997_v63 }
  0xf2   : > { %vm1038_vm2 = vcmp.lt.s32.totalorder %v1035_v42, 16 }
 0x113   : > { %v853_v14 = vpop.f32.mrf.mxu0  ;;  %v894_v18 = vpop.f32.mrf.mxu1 }
 0x114   : > { %v895_v22 = vadd.f32 %v894_v18, %v853_v14  ;;  %v1029_v18 = vrot.slane %v1024_v36, %v1028_v32 }
 0x115   : > { %v855_v24 = vpop.f32.mrf.mxu0  ;;  %v896_v26 = vpop.f32.mrf.mxu1 }
 0x117   : > { %v856_v28 = vpop.f32.mrf.mxu0  ;;  %v897_v30 = vpop.f32.mrf.mxu1 }
 0x118   : > { %v898_v34 = vadd.f32 %v897_v30, %v856_v28 }
 0x119   : > { %v858_v40 = vpop.f32.mrf.mxu0  ;;  %v899_v44 = vpop.f32.mrf.mxu1 }
 0x153   : > { %v935_v50 = vpop.f32.mrf.mxu0  ;;  %v976_v52 = vpop.f32.mrf.mxu1 }
 0x154   : > { %v936_v17 = vadd.f32 %v935_v50, %v895_v22  ;;  %v2000_v22 = vmov 0  }
 0x155   : > { %v937_v54 = vpop.f32.mrf.mxu0  ;;  %v978_v56 = vpop.f32.mrf.mxu1  ;;  %1842 = vset.pattern.permute.xlu1 %v2000_v22  ;;  %1173 = vmatprep.mubr.bf16.mxu1 %v2000_v22 }
 0x156   : > { %v977_v1 = vadd.f32 %v976_v52, %v936_v17  ;;  %1259 = vmatprep.mubr.bf16.mxu0 %v2000_v22  ;;  %1843 = vset.pattern.permute.xlu0 %v2000_v22 }
 0x157   : > { %v938_v58 = vpop.f32.mrf.mxu0  ;;  %v979_v60 = vpop.f32.mrf.mxu1 }
 0x158   : > { %v939_v14 = vadd.f32 %v938_v58, %v898_v34 }
 0x159   : > { %v940_v62 = vpop.f32.mrf.mxu0  ;;  %v981_v15 = vpop.f32.mrf.mxu1 }
 0x15a   : > { %v980_v28 = vadd.f32 %v979_v60, %v939_v14 }
 0x193   : > { %v1017_v20 = vpop.f32.mrf.mxu0 }
 0x194   : > { %v1018_v24 = vadd.f32 %v1017_v20, %v977_v1 }
 0x195   : > { %v1790_v26 = vpop.f32.mrf.mxu0 }
 0x196   : > { %v1031_v30 = vmul.f32 %v1029_v18, %v1018_v24 }
 0x197   : > { %v1020_v40 = vpop.f32.mrf.mxu0 }
 0x198   : > { %v1021_v44 = vadd.f32 %v1020_v40, %v980_v28  ;;  %v1041_v48 = vsel %vm1038_vm2, %v1031_v30, -1e+30 }
 0x199   : > { %v1791_v54 = vpop.f32.mrf.mxu0  ;;  %1045 = vmax.xlane.f32.xlu0 %v1041_v48 }
 0x19a   : > { %v1032_v56 = vmul.f32 %v1029_v18, %v1021_v44 }
 0x19c   : > { %v1042_v62 = vsel %vm1038_vm2, %v1032_v56, -1e+30 }
 0x19d   : > { %1047 = vmax.xlane.f32.xlu0 %v1042_v62 }
 0x222   : > { %v1046_v32 = vpop.xlane.xlu0 %1045 }
 0x223   : > { %v1049_v34 = vmax.f32 %v1043_v12, %v1046_v32 }
 0x225   : > { %v1051_v50 = vsub.f32 %v1043_v12, %v1049_v34  ;;  %1390 = vst.msk [vmem:[#allocation2] sm:$0xff] %vm291_vm1, %v1049_v34  ;;  %1059 = vperm.xlu1 %1842, %v1049_v34  }
 0x226   : > { %v1048_v52 = vpop.xlane.xlu0 %1047 }
 0x227   : > { %v1050_v58 = vmax.f32 %v1044_v38, %v1048_v52  ;;  %v1053_v24 = vmul.f32 1.442695, %v1051_v50 }
 0x229   : > { %v1052_v60 = vsub.f32 %v1044_v38, %v1050_v58  ;;  %1391 = vst.msk [vmem:[#allocation2 + $0x8] sm:$0xff] %vm291_vm1, %v1050_v58  ;;  %1064 = vperm.xlu1 %1842, %v1050_v58  }
 0x22b   : > { %v1055_v26 = vmul.f32 1.442695, %v1052_v60 }
 0x2a0   : > { %v1060_v15 = vpop.permute.xlu1 %1059 }
 0x2a1   : > { %v1067_v17 = vsub.f32 %v1041_v48, %v1060_v15 }
 0x2a3   : > { %v1069_v36 = vmul.f32 1.442695, %v1067_v17 }
 0x2a4   : > { %v1065_v42 = vpop.permute.xlu1 %1064 }
 0x2a5   : > { %1961 = vpow2.f32 %v1069_v36  ;;  %v1068_v1 = vsub.f32 %v1042_v62, %v1065_v42 }
 0x2a7   : > { %v1071_v14 = vmul.f32 1.442695, %v1068_v1 }
 0x2a9   : > { %1963 = vpow2.f32 %v1071_v14 }
 0x2aa   : > { %1965 = vpow2.f32 %v1053_v24 }
 0x2ab   : > { %1967 = vpow2.f32 %v1055_v26 }
 0x2b2   : > { %v1962_v18 = vpop.eup %1961 }
 0x2b3   : > { %1077 = vadd.xlane.f32.xlu0 %v1962_v18  ;;  %v1092_v28 = vmul.f32 %v1962_v18, %v2400_v46 }
 0x2b6   : > { %v1964_v20 = vpop.eup %1963 }
 0x2b7   : > { %1079 = vadd.xlane.f32.xlu1 %v1964_v20  ;;  %v1093_v30 = vmul.f32 %v1964_v20, %v2400_v46 }
 0x2b9   : > { %v1094_v40 = vpack.c.bf16 %v1093_v30, %v1092_v28 }
 0x2bb   : > { %1174 = vmatmul.mubr.bf16.vlgmr.msra.gmra.mxu1 %v1094_v40  ;;  %1260 = vmatmul.mubr.bf16.vlgmr.msra.gmra.mxu0 %v1094_v40 }
 0x2bc   : > { %1185 = vmatpush1.bf16.msra.mxu1 %v2058_v3  ;;  %1793 = vmatpush3.bf16.msra.mxu0 %v2322_v59  ;;  %v1966_v3 = vpop.eup %1965 }
 0x2bd   : > { %1186 = vmatprep.subr.bf16.mxu1 %v2067_v5  ;;  %1794 = vmatprep.subr.bf16.mxu0 %v1997_v63  ;;  %v1968_v5 = vpop.eup %1967 }
 0x2be   : > { %1216 = vmatprep.mubr.bf16.mxu1 %v2000_v22  ;;  %1808 = vmatprep.mubr.msk.bf16.mxu0 %vm1998_vm0, %v1997_v63 }
 0x2c0   : > { %1187 = vmatpush1.bf16.msra.mxu1 %v2075_v7  ;;  %1795 = vmatpush3.bf16.msra.mxu0 %v2331_v0  ;;  %v2506_v7 = vld [vmem:[#allocation5_spill] sm:$0xff] }
 0x2c1   : > { %1188 = vmatprep.subr.bf16.mxu1 %v2081_v9  ;;  %1796 = vmatprep.subr.bf16.mxu0 %v1997_v63  ;;  %v2507_v9 = vld [vmem:[#allocation6_spill] sm:$0xff] }
 0x2c4   : > { %1189 = vmatpush1.bf16.msra.mxu1 %v2091_v11  ;;  %1797 = vmatpush3.bf16.msra.mxu0 %v2340_v61  ;;  %v2508_v11 = vld [vmem:[#allocation7_spill] sm:$0xff] }
 0x2c5   : > { %1190 = vmatprep.subr.bf16.mxu1 %v2098_v13  ;;  %1798 = vmatprep.subr.bf16.mxu0 %v1997_v63  ;;  %v2509_v13 = vld [vmem:[#allocation8_spill] sm:$0xff] }
 0x2c8   : > { %1191 = vmatpush1.bf16.msra.mxu1 %v2116_v16  ;;  %1799 = vmatpush3.bf16.msra.mxu0 %v2349_v2  ;;  %v1073_v16 = vld [vmem:[#allocation3] sm:$0xff] }
 0x2c9   : > { %1120 = vperm.xlu1 %1842, %v1968_v5   ;;  %1115 = vperm.xlu0 %1843, %v1966_v3  }
 0x2ca   : > { %1192 = vmatprep.subr.bf16.mxu1 %v2123_v19  ;;  %1800 = vmatprep.subr.bf16.mxu0 %v1997_v63  ;;  %v1075_v19 = vmul.f32 %v1966_v3, %v1073_v16 }
 0x2cc   : > { %1193 = vmatpush1.bf16.msra.mxu1 %v2133_v21  ;;  %1801 = vmatpush3.bf16.msra.mxu0 %v2358_v4 }
 0x2cd   : > { %1194 = vmatprep.subr.bf16.mxu1 %v2139_v23  ;;  %1802 = vmatprep.subr.bf16.mxu0 %v1997_v63  ;;  %v1074_v23 = vld [vmem:[#allocation3 + $0x8] sm:$0xff] }
 0x2d0   : > { %1195 = vmatpush1.bf16.msra.mxu1 %v2149_v25  ;;  %1803 = vmatpush3.bf16.msra.mxu0 %v2365_v6 }
 0x2d1   : > { %1196 = vmatprep.subr.bf16.mxu1 %v2155_v27  ;;  %1804 = vmatprep.subr.bf16.mxu0 %v1997_v63  ;;  %v1076_v27 = vmul.f32 %v1968_v5, %v1074_v23 }
 0x2d4   : > { %1197 = vmatpush1.bf16.msra.mxu1 %v2165_v29  ;;  %1805 = vmatpush3.bf16.msra.mxu0 %v2370_v8 }
 0x2d5   : > { %1198 = vmatprep.subr.bf16.mxu1 %v2171_v31  ;;  %1806 = vmatprep.subr.bf16.mxu0 %v1997_v63 }
 0x2d8   : > { %1199 = vmatpush1.bf16.msra.mxu1 %v2181_v33  ;;  %1807 = vmatpush3.bf16.msra.mxu0 %v2375_v10 }
 0x2d9   : > { %1270 = vmatprep.subr.bf16.mxu1 %v2187_v35 }
 0x2db   : > { %1217 = vmatmul.mubr.bf16.vlgmr.msra.gmra.mxu1 %v1094_v40  ;;  %1809 = vmatmul.mubr.bf16.vlgmr.msra.gmra.mxu0 %v1094_v40 }
 0x2dc   : > { %1271 = vmatpush1.bf16.msra.mxu1 %v2199_v39  ;;  %1302 = vmatprep.mubr.bf16.mxu1 %v2000_v22 }
 0x2dd   : > { %1272 = vmatprep.subr.bf16.mxu1 %v2205_v41 }
 0x2e0   : > { %1273 = vmatpush1.bf16.msra.mxu1 %v2217_v45 }
 0x2e1   : > { %1274 = vmatprep.subr.bf16.mxu1 %v2223_v47 }
 0x2e4   : > { %1275 = vmatpush1.bf16.msra.mxu1 %v2233_v49 }
 0x2e5   : > { %1276 = vmatprep.subr.bf16.mxu1 %v2239_v51 }
 0x2e8   : > { %1277 = vmatpush1.bf16.msra.mxu1 %v2249_v53 }
 0x2e9   : > { %1278 = vmatprep.subr.bf16.mxu1 %v2255_v55 }
 0x2ec   : > { %1279 = vmatpush1.bf16.msra.mxu1 %v2265_v57 }
 0x2ed   : > { %1280 = vmatprep.subr.bf16.mxu1 %v2506_v7 }
 0x2f0   : > { %1281 = vmatpush1.bf16.msra.mxu1 %v2507_v9 }
 0x2f1   : > { %1282 = vmatprep.subr.bf16.mxu1 %v2508_v11 }
 0x2f4   : > { %1283 = vmatpush1.bf16.msra.mxu1 %v2509_v13 }
 0x2f5   : > { %1284 = vmatprep.subr.bf16.mxu1 %v2303_v37 }
 0x2f8   : > { %1285 = vmatpush1.bf16.msra.mxu1 %v2313_v43 }
 0x2fb   : > { %1303 = vmatmul.mubr.bf16.vlgmr.msra.gmra.mxu1 %v1094_v40 }
 0x33c   : > { %v1078_v21 = vpop.xlane.xlu0 %1077 }
 0x33d   : > { %v1081_v25 = vadd.f32 %v1078_v21, %v1075_v19 }
 0x33f   : > { %1084 = vst.msk [vmem:[#allocation3] sm:$0xff] %vm291_vm1, %v1081_v25 }
 0x340   : > { %v1080_v29 = vpop.xlane.xlu1 %1079 }
 0x341   : > { %v1082_v31 = vadd.f32 %v1080_v29, %v1076_v27 }
 0x343   : > { %1085 = vst.msk [vmem:[#allocation3 + $0x8] sm:$0xff] %vm291_vm1, %v1082_v31 }
 0x344   : > { %v1116_v10 = vpop.permute.xlu0 %1115  ;;  %v1121_v46 = vpop.permute.xlu1 %1120 }
 0x345   : > { %v1123_v48 = vmul.f32 0.0, %v1116_v10  ;;  %v1132_v54 = vmul.f32 0.0, %v1121_v46 }
 0x346   : > { %v1413_v33 = vld [vmem:[#allocation3] sm:$0xff] }
 0x347   : > { %1969 = vrcp.f32 %v1413_v33 }
 0x34a   : > { %v1414_v35 = vld [vmem:[#allocation3 + $0x8] sm:$0xff] }
 0x34b   : > { %1971 = vrcp.f32 %v1414_v35 }
 0x354   : > { %v1970_v39 = vpop.eup %1969 }
 0x355   : > { %1419 = vperm.xlu0 %1843, %v1970_v39  }
 0x358   : > { %v1972_v41 = vpop.eup %1971 }
 0x359   : > { %1424 = vperm.xlu0 %1843, %v1972_v41  }
 0x37b   : > { %v1261_v45 = vpop.f32.mrf.mxu0  ;;  %v1175_v63 = vpop.f32.mrf.mxu1 }
 0x37c   : > { %v1354_v56 = vadd.f32 %v1175_v63, %v1123_v48  ;;  %v1358_v62 = vadd.f32 %v1261_v45, %v1123_v48 }
 0x37d   : > { %v1263_v47 = vpop.f32.mrf.mxu0  ;;  %v1177_v37 = vpop.f32.mrf.mxu1 }
 0x37e   : > { %v1355_v22 = vadd.f32 %v1177_v37, %v1123_v48  ;;  %v1359_v32 = vadd.f32 %v1263_v47, %v1123_v48 }
 0x37f   : > { %v1265_v49 = vpop.f32.mrf.mxu0  ;;  %v1179_v43 = vpop.f32.mrf.mxu1 }
 0x380   : > { %v1363_v34 = vadd.f32 %v1179_v43, %v1132_v54  ;;  %v1367_v38 = vadd.f32 %v1265_v49, %v1132_v54 }
 0x381   : > { %v1267_v51 = vpop.f32.mrf.mxu0  ;;  %v1181_v0 = vpop.f32.mrf.mxu1 }
 0x382   : > { %v1364_v50 = vadd.f32 %v1181_v0, %v1132_v54  ;;  %v1368_v52 = vadd.f32 %v1267_v51, %v1132_v54 }
 0x39b   : > { %v1347_v53 = vpop.f32.mrf.mxu0  ;;  %v1218_v61 = vpop.f32.mrf.mxu1 }
 0x39c   : > { %v1356_v58 = vadd.f32 %v1218_v61, %v1123_v48  ;;  %v1362_v60 = vadd.f32 %v1347_v53, %v1123_v48 }
 0x39d   : > { %v1810_v55 = vpop.f32.mrf.mxu0  ;;  %v1220_v2 = vpop.f32.mrf.mxu1 }
 0x39e   : > { %v1357_v15 = vadd.f32 %v1220_v2, %v1123_v48 }
 0x39f   : > { %v1350_v57 = vpop.f32.mrf.mxu0  ;;  %v1222_v4 = vpop.f32.mrf.mxu1 }
 0x3a0   : > { %v1365_v17 = vadd.f32 %v1222_v4, %v1132_v54  ;;  %v1371_v36 = vadd.f32 %v1350_v57, %v1132_v54 }
 0x3a1   : > { %v1811_v59 = vpop.f32.mrf.mxu0  ;;  %v1224_v6 = vpop.f32.mrf.mxu1 }
 0x3a2   : > { %v1366_v7 = vadd.f32 %v1224_v6, %v1132_v54 }
 0x3bb   : > { %v1304_v8 = vpop.f32.mrf.mxu1 }
 0x3bc   : > { %v1360_v42 = vadd.f32 %v1304_v8, %v1123_v48 }
 0x3bd   : > { %v1306_v44 = vpop.f32.mrf.mxu1 }
 0x3be   : > { %v1361_v1 = vadd.f32 %v1306_v44, %v1123_v48 }
 0x3bf   : > { %v1308_v12 = vpop.f32.mrf.mxu1 }
 0x3c0   : > { %v1369_v16 = vadd.f32 %v1308_v12, %v1132_v54 }
 0x3c1   : > { %v1310_v18 = vpop.f32.mrf.mxu1 }
 0x3c2   : > { %v1370_v19 = vadd.f32 %v1310_v18, %v1132_v54 }
 0x3d0   : > { %v1420_v14 = vpop.permute.xlu0 %1419 }
 0x3d1   : > { %v1427_v20 = vmul.f32 %v1420_v14, %v1354_v56  ;;  %v1428_v24 = vmul.f32 %v1420_v14, %v1355_v22  ;;  %v1429_v26 = vmul.f32 %v1420_v14, %v1356_v58  ;;  %v1430_v28 = vmul.f32 %v1420_v14, %v1357_v15 }
 0x3d2   : > { %v1431_v30 = vmul.f32 %v1420_v14, %v1358_v62  ;;  %v1432_v40 = vmul.f32 %v1420_v14, %v1359_v32  ;;  %v1433_v3 = vmul.f32 %v1420_v14, %v1360_v42  ;;  %v1434_v5 = vmul.f32 %v1420_v14, %v1361_v1 }
 0x3d3   : > { %v1435_v9 = vmul.f32 %v1420_v14, %v1362_v60  ;;  %v1744_v11 = vpack.c.bf16 %v1428_v24, %v1427_v20  ;;  %v1745_v13 = vpack.c.bf16 %v1430_v28, %v1429_v26 }
 0x3d4   : > { %v1746_v21 = vpack.c.bf16 %v1432_v40, %v1431_v30  ;;  %v1747_v23 = vpack.c.bf16 %v1434_v5, %v1433_v3  ;;  %v1425_v25 = vpop.permute.xlu0 %1424 }
 0x3d5   : > { %v1748_v27 = vpack.c.bf16 %v1435_v9, %v1435_v9  ;;  %1501 = vst [vmem:[%s2473_s29] sm:$0xff] %v1744_v11  ;;  %1502 = vst [vmem:[%s2473_s29 + $0x8] sm:$0xff] %v1745_v13  ;;  %v1436_v29 = vmul.f32 %v1425_v25, %v1363_v34  ;;  %v1437_v31 = vmul.f32 %v1425_v25, %v1364_v50 }
 0x3d6   : > { %v1438_v33 = vmul.f32 %v1425_v25, %v1365_v17  ;;  %1503 = vst [vmem:[%s2473_s29 + $0x10] sm:$0xff] %v1746_v21  ;;  %1504 = vst [vmem:[%s2473_s29 + $0x18] sm:$0xff] %v1747_v23  ;;  %v1439_v35 = vmul.f32 %v1425_v25, %v1366_v7  ;;  %v1440_v39 = vmul.f32 %v1425_v25, %v1367_v38 }
 0x3d7   : > { %v1441_v41 = vmul.f32 %v1425_v25, %v1368_v52  ;;  %v1442_v45 = vmul.f32 %v1425_v25, %v1369_v16  ;;  %1505 = vst [vmem:[%s2473_s29 + $0x20] sm:$0xf] %v1748_v27  ;;  %v1443_v47 = vmul.f32 %v1425_v25, %v1370_v19  ;;  %v1444_v49 = vmul.f32 %v1425_v25, %v1371_v36 }
 0x3d8   : > { %v1749_v51 = vpack.c.bf16 %v1437_v31, %v1436_v29  ;;  %v1750_v53 = vpack.c.bf16 %v1439_v35, %v1438_v33 }
 0x3d9   : > { %v1751_v55 = vpack.c.bf16 %v1441_v41, %v1440_v39  ;;  %v1752_v57 = vpack.c.bf16 %v1443_v47, %v1442_v45  ;;  %v1753_v59 = vpack.c.bf16 %v1444_v49, %v1444_v49 }
 0x3da   : > { %1506 = vst [vmem:[%s2473_s29 + $0x24] sm:$0xff] %v1749_v51  ;;  %1507 = vst [vmem:[%s2473_s29 + $0x2c] sm:$0xff] %v1750_v53 }
 0x3db   : > { %1508 = vst [vmem:[%s2473_s29 + $0x34] sm:$0xff] %v1751_v55  ;;  %1509 = vst [vmem:[%s2473_s29 + $0x3c] sm:$0xff] %v1752_v57 }
 0x3dc   : > { %1510 = vst [vmem:[%s2473_s29 + $0x44] sm:$0xf] %v1753_v59 }
 0x3dd PF: > { %s13_s14 = sadd.s32 1, %s1995_s14   ;;  %s2510_s12 = smov %s1991_s13 }
 0x3de   : > { %p10_p5 = scmp.ge.s32.totalorder %s13_s14, 4   ;;  %s2511_s13 = smov %s2513_s15 }
 0x3e0   :  { %12 = sbr.rel (!%p10_p5) target bundleno = 2 (0x2), region = 76 }

// kernel: attentive_encoder_decoder.11
= control target key start
LH: loop header
LB: loop body
LE: loop exit
PB: predicated region body
PF: predicated region fallthrough
CT: control target
= control target key end

     0   :  { %s3180_s18 = smov 0   ;;  %s3666_s0 = inlined_call_operand.vmem [shape: bf16[2,16,128], index: 0, kind: input, shape index: {}]   ;;  %s3667_s1 = inlined_call_operand.vmem [shape: bf16[1152,128], index: 1, kind: input, shape index: {}]   ;;  %s3668_s2 = inlined_call_operand.vmem [shape: f32[1,128], index: 2, kind: input, shape index: {}]   ;;  %s3669_s3 = inlined_call_operand.vmem [shape: bf16[1152,128], index: 3, kind: input, shape index: {}]   ;;  %s3670_s4 = inlined_call_operand.vmem [shape: f32[1,128], index: 4, kind: input, shape index: {}]   ;;  %s3671_s5 = inlined_call_operand.vmem [shape: bf16[2,16,128], index: 5, kind: output, shape index: {}]  }
   0x1 LB: > { %s2458_s19 = sadd.s32 4294967295, %s3146_s18   ;;  %p2462_p0 = scmp.ge.s32.totalorder %s3146_s18, 1  ;;  %s3146_s18 = sphi %s3180_s18, %s15_s18  }
   0x2   : > { %p187_p1 = scmp.lt.s32.totalorder %s3146_s18, 3 }
   0x4   : > { %p188_p2 = pnand %p2462_p0, %p187_p1 }
   0x5   : > { %p215_p3 = scmp.lt.s32.totalorder (!%p188_p2), %s2458_s19, 1 }
   0x6   : > { %191 = sbr.rel (%p188_p2) target bundleno = 649 (0x289), region = 40 }
   0xb   : > { %v2966_v0 = vld [vmem:[%s3667_s1 + $0x78] sm:$0xff]   ;;  %v2970_v4 = vld [vmem:[%s3667_s1 + $0x70] sm:$0xff]   ;;  %v2974_v8 = vld [vmem:[%s3667_s1 + $0x68] sm:$0xff]   ;;  %s3673_s19 = smov (!%p215_p3, %s2458_s19), 1  ;;  %vm3149_vm0 = vmmov 0  }
   0xc   : > { %v2967_v1 = vld [vmem:[%s3667_s1 + $0x38] sm:$0xff]   ;;  %2722 = vmatprep.subr.bf16.mxu0 %v2966_v0  ;;  %v2971_v5 = vld [vmem:[%s3667_s1 + $0x30] sm:$0xff]   ;;  %v2975_v9 = vld [vmem:[%s3667_s1 + $0x28] sm:$0xff]   ;;  %s2673_s28 = sshll.u32 %s3673_s19, 3 }
   0xd   : > { %v2968_v2 = vld [vmem:[%s3667_s1 + $0xf8] sm:$0xff]   ;;  %2723 = vmatpush3.bf16.msra.mxu0 %v2967_v1  ;;  %v2972_v6 = vld [vmem:[%s3667_s1 + $0xf0] sm:$0xff]   ;;  %v2976_v10 = vld [vmem:[%s3667_s1 + $0xe8] sm:$0xff]   ;;  %s219_s12 = scalar_lea.vmem %s3666_s0, %s2673_s28  ;;  %s224_s30 = scalar_lea.vmem %s3671_s5, %s2673_s28 }
   0xe   : > { %v2969_v3 = vld [vmem:[%s3667_s1 + $0xb8] sm:$0xff]   ;;  %2744 = vmatprep.subr.bf16.mxu1 %v2968_v2  ;;  %2724 = vmatprep.subr.bf16.mxu0 %v2970_v4  ;;  %v2973_v7 = vld [vmem:[%s3667_s1 + $0xb0] sm:$0xff]   ;;  %v2977_v11 = vld [vmem:[%s3667_s1 + $0xa8] sm:$0xff]  }
   0xf   : > { %2745 = vmatpush3.bf16.msra.mxu1 %v2969_v3  ;;  %v2978_v12 = vld [vmem:[%s3667_s1 + $0x60] sm:$0xff]   ;;  %v2982_v16 = vld [vmem:[%s3667_s1 + $0x58] sm:$0xff]   ;;  %v2986_v20 = vld [vmem:[%s3667_s1 + $0x50] sm:$0xff]  }
  0x10   : > { %2746 = vmatprep.subr.bf16.mxu1 %v2972_v6  ;;  %v2979_v13 = vld [vmem:[%s3667_s1 + $0x20] sm:$0xff]   ;;  %v2983_v17 = vld [vmem:[%s3667_s1 + $0x18] sm:$0xff]   ;;  %v2987_v21 = vld [vmem:[%s3667_s1 + $0x10] sm:$0xff]  }
  0x11   : > { %2725 = vmatpush3.bf16.msra.mxu0 %v2971_v5  ;;  %v2980_v14 = vld [vmem:[%s3667_s1 + $0xe0] sm:$0xff]   ;;  %v2984_v18 = vld [vmem:[%s3667_s1 + $0xd8] sm:$0xff]   ;;  %v2988_v22 = vld [vmem:[%s3667_s1 + $0xd0] sm:$0xff]  }
  0x12   : > { %2726 = vmatprep.subr.bf16.mxu0 %v2974_v8  ;;  %v2981_v15 = vld [vmem:[%s3667_s1 + $0xa0] sm:$0xff]   ;;  %v2985_v19 = vld [vmem:[%s3667_s1 + $0x98] sm:$0xff]   ;;  %v2989_v23 = vld [vmem:[%s3667_s1 + $0x90] sm:$0xff]  }
  0x13   : > { %2747 = vmatpush3.bf16.msra.mxu1 %v2973_v7  ;;  %v2990_v24 = vld [vmem:[%s3667_s1 + $0x48] sm:$0xff]   ;;  %v2994_v28 = vld [vmem:[%s3667_s1 + $0x40] sm:$0xff]   ;;  %v3000_v35 = vld [vmem:[%s3667_s1 + $0x178] sm:$0xff]  }
  0x14   : > { %2748 = vmatprep.subr.bf16.mxu1 %v2976_v10  ;;  %v2991_v25 = vld [vmem:[%s3667_s1 + $0x8] sm:$0xff]   ;;  %v2995_v29 = vld [vmem:[%s3667_s1] sm:$0xff]   ;;  %v3005_v36 = vld [vmem:[%s3667_s1 + $0x1f8] sm:$0xff]  }
  0x15   : > { %2727 = vmatpush3.bf16.msra.mxu0 %v2975_v9  ;;  %v2992_v26 = vld [vmem:[%s3667_s1 + $0xc8] sm:$0xff]   ;;  %v2996_v30 = vld [vmem:[%s3667_s1 + $0xc0] sm:$0xff]  }
  0x16   : > { %2728 = vmatprep.subr.bf16.mxu0 %v2978_v12  ;;  %v2993_v27 = vld [vmem:[%s3667_s1 + $0x88] sm:$0xff]   ;;  %v2997_v31 = vld [vmem:[%s3667_s1 + $0x80] sm:$0xff]  }
  0x17   : > { %2749 = vmatpush3.bf16.msra.mxu1 %v2977_v11  ;;  %v2714_v32 = vld [vmem:[%s219_s12] sm:$0xff]  }
  0x18   : > { %2750 = vmatprep.subr.bf16.mxu1 %v2980_v14  ;;  %v2715_v33 = vunpack.c.l.bf16 %v2714_v32  ;;  %v2716_v34 = vunpack.c.h.bf16 %v2714_v32  ;;  %v3011_v32 = vld [vmem:[%s3667_s1 + $0x1b0] sm:$0xff]  }
  0x19   : > { %2729 = vmatpush3.bf16.msra.mxu0 %v2979_v13 }
  0x1a   : > { %2730 = vmatprep.subr.bf16.mxu0 %v2982_v16  ;;  %231 = vst [vmem:[#allocation2 + $0x9] ss:$8 sps:$4 sm:$0xff] %v2715_v33   ;;  %235 = vst [vmem:[#allocation2 + $0x19] ss:$8 sps:$4 sm:$0xff] %v2716_v34  }
  0x1b   : > { %2751 = vmatpush3.bf16.msra.mxu1 %v2981_v15  ;;  %238 = vst [vmem:[#allocation2 - $0x3] sm:$0xf0] %v2715_v33  ;;  %240 = vst [vmem:[#allocation2 + $0x29] sm:$0xf] %v2716_v34  ;;  %v3013_v33 = vld [vmem:[%s3667_s1 + $0x128] sm:$0xff]  }
  0x1c   : > { %2752 = vmatprep.subr.bf16.mxu1 %v2984_v18  ;;  %v3014_v34 = vld [vmem:[%s3667_s1 + $0x1e8] sm:$0xff]  }
  0x1d   : > { %2731 = vmatpush3.bf16.msra.mxu0 %v2983_v17 }
  0x1e   : > { %2732 = vmatprep.subr.bf16.mxu0 %v2986_v20 }
  0x1f   : > { %2753 = vmatpush3.bf16.msra.mxu1 %v2985_v19 }
  0x20   : > { %2754 = vmatprep.subr.bf16.mxu1 %v2988_v22  ;;  %v3002_v22 = vld [vmem:[%s3667_s1 + $0x138] sm:$0xff]  }
  0x21   : > { %2733 = vmatpush3.bf16.msra.mxu0 %v2987_v21  ;;  %v242_v38 = vld [vmem:[#allocation2 + $0xa] sm:$0x1]  ;;  %v243_v39 = vld [vmem:[#allocation2 + $0x12] sm:$0x1]  ;;  %v244_v40 = vld [vmem:[#allocation2 + $0x1a] sm:$0x1] }
  0x22   : > { %2734 = vmatprep.subr.bf16.mxu0 %v2990_v24  ;;  %v241_v37 = vld [vmem:[#allocation2 + $0x2] sm:$0x1]  ;;  %248 = vst [vmem:[#allocation2 + $0x8] sm:$0x1] %v242_v38  ;;  %249 = vst [vmem:[#allocation2 + $0x10] sm:$0x1] %v243_v39 }
  0x23   : > { %2755 = vmatpush3.bf16.msra.mxu1 %v2989_v23  ;;  %247 = vst [vmem:[#allocation2] sm:$0x1] %v241_v37  ;;  %v287_v41 = vld [vmem:[#allocation2 + $0x1] sm:$0xf]  ;;  %v290_v42 = vld [vmem:[#allocation2 + $0x9] sm:$0xf] }
  0x24   : > { %2756 = vmatprep.subr.bf16.mxu1 %v2992_v26  ;;  %250 = vst [vmem:[#allocation2 + $0x18] sm:$0x1] %v244_v40  ;;  %v288_v43 = vpack.c.bf16 %v287_v41, %v287_v41  ;;  %v2677_v44 = vpack.c.bf16 %v290_v42, %v290_v42  ;;  %v298_v45 = vld [vmem:[#allocation2 + $0x11] sm:$0xf]  ;;  %v301_v46 = vld [vmem:[#allocation2 + $0x19] sm:$0xf] }
  0x25   : > { %2735 = vmatpush3.bf16.msra.mxu0 %v2991_v25  ;;  %v245_v47 = vld [vmem:[#allocation2 + $0x22] sm:$0x1]  ;;  %v299_v48 = vpack.c.bf16 %v298_v45, %v298_v45  ;;  %v2678_v49 = vpack.c.bf16 %v301_v46, %v301_v46  ;;  %v253_v50 = vld [vmem:[#allocation2 + $0x3] sm:$0x1]  ;;  %v254_v51 = vld [vmem:[#allocation2 + $0xb] sm:$0x1] }
  0x26   : > { %2736 = vmatprep.subr.bf16.mxu0 %v2994_v28  ;;  %251 = vst [vmem:[#allocation2 + $0x20] sm:$0x1] %v245_v47  ;;  %v255_v52 = vld [vmem:[#allocation2 + $0x13] sm:$0x1]  ;;  %289 = vst [vmem:[#allocation3 + $0x4] sm:$0x3] %v288_v43 }
  0x27   : > { %2757 = vmatpush3.bf16.msra.mxu1 %v2993_v27  ;;  %v295_v53 = vrot.slane %v2677_v44, 6  ;;  %v256_v54 = vld [vmem:[#allocation2 + $0x1b] sm:$0x1]  ;;  %259 = vst [vmem:[#allocation2 + $0x5] sm:$0x1] %v253_v50  ;;  %v306_v55 = vrot.slane %v2678_v49, 6 }
  0x28   : > { %2758 = vmatprep.subr.bf16.mxu1 %v2996_v30  ;;  %260 = vst [vmem:[#allocation2 + $0xd] sm:$0x1] %v254_v51  ;;  %261 = vst [vmem:[#allocation2 + $0x15] sm:$0x1] %v255_v52  ;;  %v3007_v25 = vld [vmem:[%s3667_s1 + $0x1b8] sm:$0xff]   ;;  %v3008_v26 = vld [vmem:[%s3667_s1 + $0x170] sm:$0xff]  }
  0x29   : > { %2737 = vmatpush3.bf16.msra.mxu0 %v2995_v29  ;;  %300 = vst [vmem:[#allocation3 + $0x28] sm:$0x3] %v299_v48  ;;  %262 = vst [vmem:[#allocation2 + $0x1d] sm:$0x1] %v256_v54  ;;  %v268_v57 = vld [vmem:[#allocation2 + $0x8] sm:$0xf] }
  0x2a   : > { %2766 = vmatprep.subr.bf16.mxu0 %v3000_v35  ;;  %297 = vst [vmem:[#allocation3 + $0x4] sm:$0xc] %v295_v53  ;;  %308 = vst [vmem:[#allocation3 + $0x28] sm:$0xc] %v306_v55  ;;  %v265_v56 = vld [vmem:[#allocation2] sm:$0xf]  ;;  %v2675_v60 = vpack.c.bf16 %v268_v57, %v268_v57 }
  0x2b   : > { %2759 = vmatpush3.bf16.msra.mxu1 %v2997_v31  ;;  %v276_v58 = vld [vmem:[#allocation2 + $0x10] sm:$0xf]  ;;  %v266_v59 = vpack.c.bf16 %v265_v56, %v265_v56  ;;  %v279_v62 = vld [vmem:[#allocation2 + $0x18] sm:$0xf]  ;;  %v331_v63 = vld [vmem:[#allocation2 + $0x8] sm:$0xf] }
  0x2c   : > { %2788 = vmatprep.subr.bf16.mxu1 %v3005_v36  ;;  %v277_v61 = vpack.c.bf16 %v276_v58, %v276_v58  ;;  %v334_v0 = vld [vmem:[#allocation2 + $0x10] sm:$0xf]  ;;  %v2676_v1 = vpack.c.bf16 %v279_v62, %v279_v62  ;;  %v332_v2 = vpack.c.bf16 %v331_v63, %v331_v63  ;;  %v342_v4 = vld [vmem:[#allocation2 + $0x18] sm:$0xf]  ;;  %v273_v6 = vrot.slane %v2675_v60, 6  ;;  %v3012_v31 = vld [vmem:[%s3667_s1 + $0x168] sm:$0xff]  }
  0x2d   : > { %v2681_v3 = vpack.c.bf16 %v334_v0, %v334_v0  ;;  %v345_v5 = vld [vmem:[#allocation2 + $0x20] sm:$0xf]  ;;  %267 = vst [vmem:[#allocation3] sm:$0x3] %v266_v59  ;;  %v343_v9 = vpack.c.bf16 %v342_v4, %v342_v4  ;;  %v3009_v27 = vld [vmem:[%s3667_s1 + $0x130] sm:$0xff]   ;;  %v3015_v35 = vld [vmem:[%s3667_s1 + $0x1a8] sm:$0xff]  }
  0x2e   : > { %278 = vst [vmem:[#allocation3 + $0x24] sm:$0x3] %v277_v61  ;;  %v309_v7 = vld [vmem:[#allocation2 + $0x2] sm:$0xf]  ;;  %v2682_v10 = vpack.c.bf16 %v345_v5, %v345_v5  ;;  %v284_v11 = vrot.slane %v2676_v1, 6  ;;  %v3010_v30 = vld [vmem:[%s3667_s1 + $0x1f0] sm:$0xff]  }
  0x2f   : > { %v312_v8 = vld [vmem:[#allocation2 + $0xa] sm:$0xf]  ;;  %v310_v12 = vpack.c.bf16 %v309_v7, %v309_v7  ;;  %v320_v14 = vld [vmem:[#allocation2 + $0x12] sm:$0xf]  ;;  %333 = vst [vmem:[#allocation3 + $0xc] sm:$0x3] %v332_v2 }
  0x30   : > { %v2679_v13 = vpack.c.bf16 %v312_v8, %v312_v8  ;;  %v323_v15 = vld [vmem:[#allocation2 + $0x1a] sm:$0xf]  ;;  %v339_v16 = vrot.slane %v2681_v3, 6  ;;  %275 = vst [vmem:[#allocation3] sm:$0xc] %v273_v6  ;;  %v321_v17 = vpack.c.bf16 %v320_v14, %v320_v14  ;;  %v350_v19 = vrot.slane %v2682_v10, 6 }
  0x31   : > { %v2680_v18 = vpack.c.bf16 %v323_v15, %v323_v15  ;;  %344 = vst [vmem:[#allocation3 + $0x30] sm:$0x3] %v343_v9  ;;  %286 = vst [vmem:[#allocation3 + $0x24] sm:$0xc] %v284_v11  ;;  %v2998_v23 = vld [vmem:[#allocation3 + $0x4] ss:$36 sps:$4 sm:$0xff]  }
  0x32   : > { %311 = vst [vmem:[#allocation3 + $0x8] sm:$0x3] %v310_v12  ;;  %v317_v20 = vrot.slane %v2679_v13, 6  ;;  %341 = vst [vmem:[#allocation3 + $0xc] sm:$0xc] %v339_v16  ;;  %1134 = vmatprep.mubr.bf16.mxu0 %v2998_v23  ;;  %v3016_v36 = vld [vmem:[%s3667_s1 + $0x160] sm:$0xff]  }
  0x33   : > { %322 = vst [vmem:[#allocation3 + $0x2c] sm:$0x3] %v321_v17  ;;  %v328_v21 = vrot.slane %v2680_v18, 6  ;;  %352 = vst [vmem:[#allocation3 + $0x30] sm:$0xc] %v350_v19  ;;  %v3017_v37 = vld [vmem:[%s3667_s1 + $0x120] sm:$0xff]  }
  0x34   : > { %319 = vst [vmem:[#allocation3 + $0x8] sm:$0xc] %v317_v20  ;;  %v3018_v38 = vld [vmem:[%s3667_s1 + $0x1e0] sm:$0xff]   ;;  %v3020_v39 = vld [vmem:[%s3667_s1 + $0x158] sm:$0xff]   ;;  %v353_v41 = vld [vmem:[#allocation2 + $0x9] sm:$0xf] }
  0x35   : > { %330 = vst [vmem:[#allocation3 + $0x2c] sm:$0xc] %v328_v21  ;;  %v257_v40 = vld [vmem:[#allocation2 + $0x23] sm:$0x1]  ;;  %v356_v42 = vld [vmem:[#allocation2 + $0x11] sm:$0xf]  ;;  %v354_v45 = vpack.c.bf16 %v353_v41, %v353_v41 }
  0x36   : > { %263 = vst [vmem:[#allocation2 + $0x25] sm:$0x1] %v257_v40  ;;  %v364_v43 = vld [vmem:[#allocation2 + $0x19] sm:$0xf]  ;;  %v3019_v44 = vld [vmem:[%s3667_s1 + $0x1a0] sm:$0xff]   ;;  %v2683_v46 = vpack.c.bf16 %v356_v42, %v356_v42  ;;  %v3024_v57 = vld [vmem:[%s3667_s1 + $0x150] sm:$0xff]  }
  0x37   : > { %v365_v47 = vpack.c.bf16 %v364_v43, %v364_v43  ;;  %v367_v48 = vld [vmem:[#allocation2 + $0x21] sm:$0xf]  ;;  %v375_v49 = vld [vmem:[#allocation2 + $0xa] sm:$0xf]  ;;  %v378_v50 = vld [vmem:[#allocation2 + $0x12] sm:$0xf] }
  0x38   : > { %v3001_v24 = vld [vmem:[#allocation3] ss:$36 sps:$4 sm:$0xff]   ;;  %v3021_v51 = vld [vmem:[%s3667_s1 + $0x118] sm:$0xff]   ;;  %v2684_v53 = vpack.c.bf16 %v367_v48, %v367_v48  ;;  %v376_v54 = vpack.c.bf16 %v375_v49, %v375_v49  ;;  %v2685_v55 = vpack.c.bf16 %v378_v50, %v378_v50  ;;  %355 = vst [vmem:[#allocation3 + $0x10] sm:$0x3] %v354_v45  ;;  %v361_v58 = vrot.slane %v2683_v46, 6 }
  0x39   : > { %1135 = vmatmul.mubr.bf16.vlgmr.msra.gmra.mxu0 %v3001_v24  ;;  %v3022_v52 = vld [vmem:[%s3667_s1 + $0x1d8] sm:$0xff]   ;;  %366 = vst [vmem:[#allocation3 + $0x34] sm:$0x3] %v365_v47  ;;  %v246_v60 = vld [vmem:[#allocation2 + $0x2a] sm:$0x1]  ;;  %v3025_v13 = vld [vmem:[%s3667_s1 + $0x110] sm:$0xff]  }
  0x3a   : > { %v3003_v28 = vld [vmem:[#allocation3 + $0xc] ss:$36 sps:$4 sm:$0xff]   ;;  %2767 = vmatpush3.bf16.msra.mxu0 %v3002_v22  ;;  %v397_v61 = vld [vmem:[#allocation2 + $0x10] sm:$0xf]  ;;  %v372_v62 = vrot.slane %v2684_v53, 6  ;;  %v383_v63 = vrot.slane %v2685_v55, 6 }
  0x3b   : > { %1175 = vmatprep.mubr.bf16.mxu1 %v3003_v28  ;;  %2768 = vmatprep.subr.bf16.mxu0 %v3008_v26  ;;  %v386_v56 = vld [vmem:[#allocation2 + $0x1a] sm:$0xf]  ;;  %377 = vst [vmem:[#allocation3 + $0x14] sm:$0x3] %v376_v54  ;;  %252 = vst [vmem:[#allocation2 + $0x28] sm:$0x1] %v246_v60  ;;  %v398_v0 = vpack.c.bf16 %v397_v61, %v397_v61 }
  0x3c   : > { %v3006_v29 = vld [vmem:[#allocation3 + $0x8] ss:$36 sps:$4 sm:$0xff]   ;;  %v387_v59 = vpack.c.bf16 %v386_v56, %v386_v56  ;;  %v408_v2 = vld [vmem:[#allocation2 + $0x20] sm:$0xf]  ;;  %363 = vst [vmem:[#allocation3 + $0x10] sm:$0xc] %v361_v58 }
  0x3d   : > { %1176 = vmatmul.mubr.bf16.vlgmr.msra.gmra.mxu1 %v3006_v29  ;;  %v400_v1 = vld [vmem:[#allocation2 + $0x18] sm:$0xf]  ;;  %v409_v5 = vpack.c.bf16 %v408_v2, %v408_v2  ;;  %v419_v6 = vld [vmem:[#allocation2 + $0x11] sm:$0xf]  ;;  %v430_v8 = vld [vmem:[#allocation2 + $0x21] sm:$0xf] }
  0x3e   : > { %2789 = vmatpush3.bf16.msra.mxu1 %v3007_v25  ;;  %2769 = vmatpush3.bf16.msra.mxu0 %v3009_v27  ;;  %v3023_v3 = vld [vmem:[%s3667_s1 + $0x198] sm:$0xff]   ;;  %388 = vst [vmem:[#allocation3 + $0x38] sm:$0x3] %v387_v59  ;;  %v2687_v4 = vpack.c.bf16 %v400_v1, %v400_v1  ;;  %374 = vst [vmem:[#allocation3 + $0x34] sm:$0xc] %v372_v62  ;;  %v420_v9 = vpack.c.bf16 %v419_v6, %v419_v6  ;;  %v3026_v17 = vld [vmem:[%s3667_s1 + $0x1d0] sm:$0xff]  }
  0x3f   : > { %2790 = vmatprep.subr.bf16.mxu1 %v3010_v30  ;;  %2770 = vmatprep.subr.bf16.mxu0 %v3012_v31  ;;  %v422_v7 = vld [vmem:[#allocation2 + $0x19] sm:$0xf]  ;;  %385 = vst [vmem:[#allocation3 + $0x14] sm:$0xc] %v383_v63  ;;  %399 = vst [vmem:[#allocation3 + $0x18] sm:$0x3] %v398_v0  ;;  %v431_v11 = vpack.c.bf16 %v430_v8, %v430_v8 }
  0x40   : > { %v2689_v10 = vpack.c.bf16 %v422_v7, %v422_v7  ;;  %v433_v12 = vld [vmem:[#allocation2 + $0x29] sm:$0xf]  ;;  %v389_v14 = vld [vmem:[#allocation2 + $0x22] sm:$0xf]  ;;  %v405_v15 = vrot.slane %v2687_v4, 6  ;;  %v3027_v20 = vld [vmem:[%s3667_s1 + $0x190] sm:$0xff]  }
  0x41   : > { %410 = vst [vmem:[#allocation3 + $0x3c] sm:$0x3] %v409_v5  ;;  %v2690_v16 = vpack.c.bf16 %v433_v12, %v433_v12  ;;  %v2686_v18 = vpack.c.bf16 %v389_v14, %v389_v14  ;;  %421 = vst [vmem:[#allocation3 + $0x1c] sm:$0x3] %v420_v9  ;;  %v3028_v21 = vld [vmem:[%s3667_s1 + $0x148] sm:$0xff]   ;;  %v3032_v27 = vld [vmem:[%s3667_s1 + $0x140] sm:$0xff]  }
  0x42   : > { %2791 = vmatpush3.bf16.msra.mxu1 %v3011_v32  ;;  %2771 = vmatpush3.bf16.msra.mxu0 %v3013_v33  ;;  %v427_v19 = vrot.slane %v2689_v10, 6  ;;  %432 = vst [vmem:[#allocation3 + $0x40] sm:$0x3] %v431_v11  ;;  %407 = vst [vmem:[#allocation3 + $0x18] sm:$0xc] %v405_v15  ;;  %v3029_v23 = vld [vmem:[%s3667_s1 + $0x108] sm:$0xff]  }
  0x43   : > { %2792 = vmatprep.subr.bf16.mxu1 %v3014_v34  ;;  %2772 = vmatprep.subr.bf16.mxu0 %v3016_v36  ;;  %v438_v22 = vrot.slane %v2690_v16, 6  ;;  %v394_v24 = vrot.slane %v2686_v18, 6  ;;  %v3030_v25 = vld [vmem:[%s3667_s1 + $0x1c8] sm:$0xff]   ;;  %v3033_v30 = vld [vmem:[%s3667_s1 + $0x100] sm:$0xff]   ;;  %v441_v34 = vld [vmem:[#allocation2 + $0x12] sm:$0xf] }
  0x44   : > { %429 = vst [vmem:[#allocation3 + $0x1c] sm:$0xc] %v427_v19  ;;  %v411_v26 = vld [vmem:[#allocation2 + $0x28] sm:$0xf]  ;;  %v3034_v32 = vld [vmem:[%s3667_s1 + $0x1c0] sm:$0xff]   ;;  %v3041_v41 = vld [vmem:[%s3667_s1 + $0x238] sm:$0xff]  }
  0x45   : > { %440 = vst [vmem:[#allocation3 + $0x40] sm:$0xc] %v438_v22  ;;  %396 = vst [vmem:[#allocation3 + $0x38] sm:$0xc] %v394_v24  ;;  %v2688_v28 = vpack.c.bf16 %v411_v26, %v411_v26  ;;  %v3031_v29 = vld [vmem:[%s3667_s1 + $0x188] sm:$0xff]   ;;  %v3148_v45 = vmov 0.0  }
  0x46   : > { %2793 = vmatpush3.bf16.msra.mxu1 %v3015_v35  ;;  %2773 = vmatpush3.bf16.msra.mxu0 %v3017_v37  ;;  %v258_v33 = vld [vmem:[#allocation2 + $0x2b] sm:$0x1]  ;;  %v442_v35 = vpack.c.bf16 %v441_v34, %v441_v34  ;;  %v444_v36 = vld [vmem:[#allocation2 + $0x1a] sm:$0xf]  ;;  %v452_v37 = vld [vmem:[#allocation2 + $0x22] sm:$0xf] }
  0x47   : > { %2794 = vmatprep.subr.bf16.mxu1 %v3018_v38  ;;  %2774 = vmatprep.subr.bf16.mxu0 %v3020_v39  ;;  %v416_v31 = vrot.slane %v2688_v28, 6  ;;  %264 = vst [vmem:[#allocation2 + $0x2d] sm:$0x1] %v258_v33  ;;  %v3037_v38 = vld [vmem:[%s3667_s1 + $0x180] sm:$0xff]   ;;  %v2691_v39 = vpack.c.bf16 %v444_v36, %v444_v36  ;;  %v453_v40 = vpack.c.bf16 %v452_v37, %v452_v37  ;;  %v3043_v46 = vld [vmem:[%s3667_s1 + $0x230] sm:$0xff]   ;;  %v3046_v54 = vld [vmem:[%s3667_s1 + $0x218] sm:$0xff]  }
  0x48   : > { %443 = vst [vmem:[#allocation3 + $0x20] sm:$0x3] %v442_v35  ;;  %v3038_v43 = vld [vmem:[#allocation3 + $0x10] ss:$36 sps:$4 sm:$0xff]   ;;  %v3047_v55 = vld [vmem:[%s3667_s1 + $0x210] sm:$0xff]   ;;  %v3048_v56 = vld [vmem:[%s3667_s1 + $0x208] sm:$0xff]  }
  0x49   : > { %418 = vst [vmem:[#allocation3 + $0x3c] sm:$0xc] %v416_v31  ;;  %454 = vst [vmem:[#allocation3 + $0x44] sm:$0x3] %v453_v40  ;;  %v3045_v53 = vld [vmem:[%s3667_s1 + $0x220] sm:$0xff]   ;;  %v3051_v59 = vld [vmem:[%s3669_s3 + $0x78] sm:$0xff]  }
  0x4a   : > { %2795 = vmatpush3.bf16.msra.mxu1 %v3019_v44  ;;  %2775 = vmatpush3.bf16.msra.mxu0 %v3021_v51  ;;  %v449_v44 = vrot.slane %v2691_v39, 6  ;;  %v3044_v51 = vld [vmem:[%s3667_s1 + $0x228] sm:$0xff]   ;;  %v3052_v60 = vld [vmem:[%s3669_s3 + $0xf8] sm:$0xff]   ;;  %v3055_v63 = vld [vmem:[%s3669_s3 + $0x70] sm:$0xff]  }
  0x4b   : > { %2796 = vmatprep.subr.bf16.mxu1 %v3022_v52  ;;  %2776 = vmatprep.subr.bf16.mxu0 %v3024_v57  ;;  %v3049_v57 = vld [vmem:[%s3667_s1 + $0x200] sm:$0xff]   ;;  %v3053_v61 = vld [vmem:[%s3669_s3 + $0x38] sm:$0xff]   ;;  %v3056_v0 = vld [vmem:[%s3669_s3 + $0xf0] sm:$0xff]  }
  0x4c   : > { %v3035_v42 = vld [vmem:[#allocation3 + $0x14] ss:$36 sps:$4 sm:$0xff]   ;;  %451 = vst [vmem:[#allocation3 + $0x20] sm:$0xc] %v449_v44  ;;  %v3039_v47 = vld [vmem:[#allocation3 + $0x1c] ss:$36 sps:$4 sm:$0xff]  }
  0x4d   : > { %1216 = vmatprep.mubr.bf16.mxu0 %v3035_v42  ;;  %1257 = vmatprep.mubr.bf16.mxu1 %v3039_v47  ;;  %v3054_v62 = vld [vmem:[%s3669_s3 + $0xb8] sm:$0xff]   ;;  %v3057_v1 = vld [vmem:[%s3669_s3 + $0x30] sm:$0xff]   ;;  %v3060_v4 = vld [vmem:[%s3669_s3 + $0xe8] sm:$0xff]  }
  0x4e   : > { %2797 = vmatpush3.bf16.msra.mxu1 %v3023_v3  ;;  %2777 = vmatpush3.bf16.msra.mxu0 %v3025_v13  ;;  %v455_v49 = vld [vmem:[#allocation2 + $0x2a] sm:$0xf]  ;;  %v3058_v2 = vld [vmem:[%s3669_s3 + $0xb0] sm:$0xff]   ;;  %v3063_v7 = vld [vmem:[%s3669_s3 + $0x60] sm:$0xff]  }
  0x4f   : > { %2798 = vmatprep.subr.bf16.mxu1 %v3026_v17  ;;  %2778 = vmatprep.subr.bf16.mxu0 %v3028_v21  ;;  %v2692_v50 = vpack.c.bf16 %v455_v49, %v455_v49  ;;  %v3059_v3 = vld [vmem:[%s3669_s3 + $0x68] sm:$0xff]   ;;  %v3064_v8 = vld [vmem:[%s3669_s3 + $0xe0] sm:$0xff]   ;;  %v3067_v11 = vld [vmem:[%s3669_s3 + $0x58] sm:$0xff]  }
  0x50   : > { %v3042_v48 = vld [vmem:[#allocation3 + $0x18] ss:$36 sps:$4 sm:$0xff]   ;;  %v3065_v9 = vld [vmem:[%s3669_s3 + $0x20] sm:$0xff]   ;;  %v3068_v12 = vld [vmem:[%s3669_s3 + $0xd8] sm:$0xff]  }
  0x51   : > { %v460_v52 = vrot.slane %v2692_v50, 6  ;;  %v3061_v5 = vld [vmem:[%s3669_s3 + $0x28] sm:$0xff]   ;;  %v3066_v10 = vld [vmem:[%s3669_s3 + $0xa0] sm:$0xff]   ;;  %v3069_v13 = vld [vmem:[%s3669_s3 + $0x18] sm:$0xff]  }
  0x52   : > { %2799 = vmatpush3.bf16.msra.mxu1 %v3027_v20  ;;  %2779 = vmatpush3.bf16.msra.mxu0 %v3029_v23  ;;  %v3062_v6 = vld [vmem:[%s3669_s3 + $0xa8] sm:$0xff]   ;;  %v3070_v14 = vld [vmem:[%s3669_s3 + $0x98] sm:$0xff]   ;;  %v3071_v15 = vld [vmem:[%s3669_s3 + $0x50] sm:$0xff]  }
  0x53   : > { %2800 = vmatprep.subr.bf16.mxu1 %v3030_v25  ;;  %2780 = vmatprep.subr.bf16.mxu0 %v3032_v27  ;;  %462 = vst [vmem:[#allocation3 + $0x44] sm:$0xc] %v460_v52  ;;  %v3072_v16 = vld [vmem:[%s3669_s3 + $0xd0] sm:$0xff]   ;;  %v3075_v19 = vld [vmem:[%s3669_s3 + $0x48] sm:$0xff]   ;;  %v3079_v23 = vld [vmem:[%s3669_s3 + $0x40] sm:$0xff]  }
  0x54   : > { %v3073_v17 = vld [vmem:[%s3669_s3 + $0x10] sm:$0xff]   ;;  %v3076_v20 = vld [vmem:[%s3669_s3 + $0xc8] sm:$0xff]   ;;  %v3080_v24 = vld [vmem:[%s3669_s3 + $0xc0] sm:$0xff]  }
  0x55   : > { %v3074_v18 = vld [vmem:[%s3669_s3 + $0x90] sm:$0xff]   ;;  %v3077_v21 = vld [vmem:[%s3669_s3 + $0x8] sm:$0xff]   ;;  %v3081_v25 = vld [vmem:[%s3669_s3] sm:$0xff]  }
  0x56   : > { %2801 = vmatpush3.bf16.msra.mxu1 %v3031_v29  ;;  %2781 = vmatpush3.bf16.msra.mxu0 %v3033_v30  ;;  %v3078_v22 = vld [vmem:[%s3669_s3 + $0x88] sm:$0xff]   ;;  %v3082_v26 = vld [vmem:[%s3669_s3 + $0x80] sm:$0xff]   ;;  %v3089_v27 = vld [vmem:[%s3669_s3 + $0x178] sm:$0xff]  }
  0x57   : > { %2802 = vmatprep.subr.bf16.mxu1 %v3034_v32  ;;  %2916 = vmatprep.subr.bf16.mxu0 %v3148_v45  ;;  %v3090_v28 = vld [vmem:[%s3669_s3 + $0x1f8] sm:$0xff]  }
  0x59   : > { %1217 = vmatmul.mubr.bf16.vlgmr.msra.gmra.mxu0 %v3038_v43 }
  0x5a   : > { %2803 = vmatpush3.bf16.msra.mxu1 %v3037_v38  ;;  %2917 = vmatpush3.bf16.msra.mxu0 %v3041_v41  ;;  %v3050_v58 = vld [vmem:[#allocation3 + $0x20] ss:$36 sps:$4 sm:$0xff]   ;;  %v2485_v41 = vld [vmem:[%s3668_s2] ss:$0 sm:$0xff] }
  0x5b   : > { %2932 = vmatprep.mubr.msk.bf16.mxu0 %vm3149_vm0, %v3148_v45  ;;  %2918 = vmatprep.subr.bf16.mxu0 %v3148_v45 }
  0x5c   : > { %2819 = vmatprep.subr.bf16.mxu1 %v3051_v59 }
  0x5d   : > { %1258 = vmatmul.mubr.bf16.vlgmr.msra.gmra.mxu1 %v3042_v48 }
  0x5e   : > { %2919 = vmatpush3.bf16.msra.mxu0 %v3043_v46  ;;  %2820 = vmatpush3.bf16.msra.mxu1 %v3053_v61 }
  0x5f   : > { %2920 = vmatprep.subr.bf16.mxu0 %v3148_v45  ;;  %2821 = vmatprep.subr.bf16.mxu1 %v3055_v63 }
  0x62   : > { %2921 = vmatpush3.bf16.msra.mxu0 %v3044_v51  ;;  %2822 = vmatpush3.bf16.msra.mxu1 %v3057_v1 }
  0x63   : > { %2922 = vmatprep.subr.bf16.mxu0 %v3148_v45  ;;  %2823 = vmatprep.subr.bf16.mxu1 %v3059_v3 }
  0x66   : > { %2923 = vmatpush3.bf16.msra.mxu0 %v3045_v53  ;;  %2824 = vmatpush3.bf16.msra.mxu1 %v3061_v5 }
  0x67   : > { %2924 = vmatprep.subr.bf16.mxu0 %v3148_v45  ;;  %2825 = vmatprep.subr.bf16.mxu1 %v3063_v7 }
  0x6a   : > { %2925 = vmatpush3.bf16.msra.mxu0 %v3046_v54  ;;  %2826 = vmatpush3.bf16.msra.mxu1 %v3065_v9 }
  0x6b   : > { %2926 = vmatprep.subr.bf16.mxu0 %v3148_v45  ;;  %2827 = vmatprep.subr.bf16.mxu1 %v3067_v11 }
  0x6e   : > { %2927 = vmatpush3.bf16.msra.mxu0 %v3047_v55  ;;  %2828 = vmatpush3.bf16.msra.mxu1 %v3069_v13 }
  0x6f   : > { %2928 = vmatprep.subr.bf16.mxu0 %v3148_v45  ;;  %2829 = vmatprep.subr.bf16.mxu1 %v3071_v15 }
  0x72   : > { %2929 = vmatpush3.bf16.msra.mxu0 %v3048_v56  ;;  %2830 = vmatpush3.bf16.msra.mxu1 %v3073_v17 }
  0x73   : > { %2930 = vmatprep.subr.bf16.mxu0 %v3148_v45  ;;  %2831 = vmatprep.subr.bf16.mxu1 %v3075_v19 }
  0x76   : > { %2931 = vmatpush3.bf16.msra.mxu0 %v3049_v57  ;;  %2832 = vmatpush3.bf16.msra.mxu1 %v3077_v21 }
  0x77   : > { %2841 = vmatprep.subr.bf16.mxu0 %v3052_v60  ;;  %2833 = vmatprep.subr.bf16.mxu1 %v3079_v23 }
  0x79   : > { %2933 = vmatmul.mubr.bf16.vlgmr.msra.gmra.mxu0 %v3050_v58 }
  0x7a   : > { %2842 = vmatpush3.bf16.msra.mxu0 %v3054_v62  ;;  %2834 = vmatpush3.bf16.msra.mxu1 %v3081_v25 }
  0x7b   : > { %2843 = vmatprep.subr.bf16.mxu0 %v3056_v0  ;;  %2863 = vmatprep.subr.bf16.mxu1 %v3089_v27 }
  0x7e   : > { %2844 = vmatpush3.bf16.msra.mxu0 %v3058_v2 }
  0x7f   : > { %2845 = vmatprep.subr.bf16.mxu0 %v3060_v4 }
  0x82   : > { %2846 = vmatpush3.bf16.msra.mxu0 %v3062_v6 }
  0x83   : > { %2847 = vmatprep.subr.bf16.mxu0 %v3064_v8 }
  0x86   : > { %2848 = vmatpush3.bf16.msra.mxu0 %v3066_v10 }
  0x87   : > { %2849 = vmatprep.subr.bf16.mxu0 %v3068_v12 }
  0x8a   : > { %2850 = vmatpush3.bf16.msra.mxu0 %v3070_v14 }
  0x8b   : > { %2851 = vmatprep.subr.bf16.mxu0 %v3072_v16 }
  0x8e   : > { %2852 = vmatpush3.bf16.msra.mxu0 %v3074_v18 }
  0x8f   : > { %2853 = vmatprep.subr.bf16.mxu0 %v3076_v20 }
  0x92   : > { %2854 = vmatpush3.bf16.msra.mxu0 %v3078_v22 }
  0x93   : > { %2855 = vmatprep.subr.bf16.mxu0 %v3080_v24 }
  0x96   : > { %2856 = vmatpush3.bf16.msra.mxu0 %v3082_v26 }
  0x97   : > { %2885 = vmatprep.subr.bf16.mxu0 %v3090_v28 }
  0xf9   : > { %v2738_v29 = vpop.f32.mrf.mxu0 }
  0xfb   : > { %v2739_v30 = vpop.f32.mrf.mxu0 }
  0xfc   : > { %v2740_v40 = vadd.f32 %v2739_v30, %v2738_v29 }
  0xfd   : > { %v2760_v31 = vpop.f32.mrf.mxu1  ;;  %v2741_v32 = vpop.f32.mrf.mxu0 }
  0xfe   : > { %v1137_v44 = vadd.f32 %v2740_v40, %v2485_v41 }
  0xff   : > { %v2761_v33 = vpop.f32.mrf.mxu1  ;;  %v2742_v34 = vpop.f32.mrf.mxu0 }
 0x100   : > { %v2762_v46 = vadd.f32 %v2761_v33, %v2760_v31  ;;  %v2743_v47 = vadd.f32 %v2742_v34, %v2741_v32 }
 0x101   : > { %v2763_v35 = vpop.f32.mrf.mxu1 }
 0x102   : > { %v1178_v51 = vadd.f32 %v2762_v46, %v1137_v44  ;;  %v1140_v52 = vadd.f32 %v2743_v47, %v2485_v41 }
 0x103   : > { %v2764_v37 = vpop.f32.mrf.mxu1 }
 0x104   : > { %v2765_v53 = vadd.f32 %v2764_v37, %v2763_v35 }
 0x106   : > { %v1181_v58 = vadd.f32 %v2765_v53, %v1140_v52 }
 0x119   : > { %v2782_v36 = vpop.f32.mrf.mxu0 }
 0x11b   : > { %v2783_v38 = vpop.f32.mrf.mxu0 }
 0x11c   : > { %v2784_v48 = vadd.f32 %v2783_v38, %v2782_v36 }
 0x11d   : > { %v2804_v39 = vpop.f32.mrf.mxu1  ;;  %v2785_v42 = vpop.f32.mrf.mxu0 }
 0x11e   : > { %v1219_v54 = vadd.f32 %v2784_v48, %v1178_v51 }
 0x11f   : > { %v2805_v43 = vpop.f32.mrf.mxu1  ;;  %v2786_v49 = vpop.f32.mrf.mxu0 }
 0x120   : > { %v2806_v55 = vadd.f32 %v2805_v43, %v2804_v39  ;;  %v2787_v56 = vadd.f32 %v2786_v49, %v2785_v42 }
 0x121   : > { %v2807_v50 = vpop.f32.mrf.mxu1 }
 0x122   : > { %v1222_v59 = vadd.f32 %v2787_v56, %v1181_v58  ;;  %v1260_v61 = vadd.f32 %v2806_v55, %v1219_v54 }
 0x123   : > { %v2808_v57 = vpop.f32.mrf.mxu1 }
 0x124   : > { %v2809_v60 = vadd.f32 %v2808_v57, %v2807_v50 }
 0x126   : > { %v1263_v2 = vadd.f32 %v2809_v60, %v1222_v59 }
 0x139   : > { %v1300_v62 = vpop.f32.mrf.mxu0 }
 0x13a   : > { %v1301_v63 = vadd.f32 %v1300_v62, %v1260_v61 }
 0x13b   : > { %v2934_v0 = vpop.f32.mrf.mxu0 }
 0x13c   : > { %v1309_v1 = vmin.f32 %v1301_v63, 0.0  ;;  %vm1307_vm1 = vcmp.gt.f32.partialorder %v1301_v63, 0.0 }
 0x13d   : > { %v1303_v3 = vpop.f32.mrf.mxu0 }
 0x13e   : > { %v1311_v4 = vmul.f32 1.442695, %v1309_v1  ;;  %v1304_v5 = vadd.f32 %v1303_v3, %v1263_v2 }
 0x13f   : > { %v2935_v6 = vpop.f32.mrf.mxu0 }
 0x140   : > { %3136 = vpow2.f32 %v1311_v4  ;;  %v1310_v7 = vmin.f32 %v1304_v5, 0.0  ;;  %vm1308_vm2 = vcmp.gt.f32.partialorder %v1304_v5, 0.0 }
 0x142   : > { %v1313_v8 = vmul.f32 1.442695, %v1310_v7 }
 0x144   : > { %3138 = vpow2.f32 %v1313_v8 }
 0x14d   : > { %v3137_v9 = vpop.eup %3136 }
 0x14e   : > { %v2567_v10 = vadd.f32 -1.0, %v3137_v9 }
 0x150   : > { %v1317_v11 = vsel %vm1307_vm1, %v1301_v63, %v2567_v10 }
 0x151   : > { %v3139_v12 = vpop.eup %3138  ;;  %1319 = vst [vmem:[#allocation2 + $0x9] ss:$8 sps:$4 sm:$0xff] %v1317_v11   ;;  %1323 = vst [vmem:[#allocation2 - $0x3] sm:$0xf0] %v1317_v11 }
 0x152   : > { %v2568_v13 = vadd.f32 -1.0, %v3139_v12 }
 0x154   : > { %v1318_v14 = vsel %vm1308_vm2, %v1304_v5, %v2568_v13 }
 0x155   : > { %1321 = vst [vmem:[#allocation2 + $0x19] ss:$8 sps:$4 sm:$0xff] %v1318_v14   ;;  %1324 = vst [vmem:[#allocation2 + $0x29] sm:$0xf] %v1318_v14 }
 0x158   : > { %v1325_v15 = vld [vmem:[#allocation2 + $0x2] sm:$0x1]  ;;  %v1326_v16 = vld [vmem:[#allocation2 + $0xa] sm:$0x1]  ;;  %v1327_v17 = vld [vmem:[#allocation2 + $0x12] sm:$0x1] }
 0x159   : > { %1331 = vst [vmem:[#allocation2] sm:$0x1] %v1325_v15  ;;  %1332 = vst [vmem:[#allocation2 + $0x8] sm:$0x1] %v1326_v16  ;;  %v1337_v18 = vld [vmem:[#allocation2 + $0x3] sm:$0x1] }
 0x15a   : > { %v1338_v19 = vld [vmem:[#allocation2 + $0xb] sm:$0x1]  ;;  %v1339_v20 = vld [vmem:[#allocation2 + $0x13] sm:$0x1]  ;;  %1333 = vst [vmem:[#allocation2 + $0x10] sm:$0x1] %v1327_v17 }
 0x15b   : > { %1343 = vst [vmem:[#allocation2 + $0x5] sm:$0x1] %v1337_v18  ;;  %1344 = vst [vmem:[#allocation2 + $0xd] sm:$0x1] %v1338_v19  ;;  %v1371_v21 = vld [vmem:[#allocation2 + $0x1] sm:$0xf] }
 0x15c   : > { %1345 = vst [vmem:[#allocation2 + $0x15] sm:$0x1] %v1339_v20  ;;  %v1374_v22 = vld [vmem:[#allocation2 + $0x9] sm:$0xf]  ;;  %v1382_v23 = vld [vmem:[#allocation2 + $0x11] sm:$0xf]  ;;  %v1372_v24 = vpack.c.bf16 %v1371_v21, %v1371_v21 }
 0x15d   : > { %v2695_v25 = vpack.c.bf16 %v1374_v22, %v1374_v22  ;;  %v1383_v26 = vpack.c.bf16 %v1382_v23, %v1382_v23  ;;  %v1437_v27 = vld [vmem:[#allocation2 + $0x9] sm:$0xf]  ;;  %v1440_v28 = vld [vmem:[#allocation2 + $0x11] sm:$0xf]  ;;  %v1328_v30 = vld [vmem:[#allocation2 + $0x1a] sm:$0x1] }
 0x15e   : > { %v1503_v29 = vld [vmem:[#allocation2 + $0x11] sm:$0xf]  ;;  %v1329_v31 = vld [vmem:[#allocation2 + $0x22] sm:$0x1]  ;;  %v1330_v32 = vld [vmem:[#allocation2 + $0x2a] sm:$0x1]  ;;  %v1438_v33 = vpack.c.bf16 %v1437_v27, %v1437_v27  ;;  %v2701_v34 = vpack.c.bf16 %v1440_v28, %v1440_v28 }
 0x15f   : > { %v1504_v35 = vpack.c.bf16 %v1503_v29, %v1503_v29  ;;  %1335 = vst [vmem:[#allocation2 + $0x20] sm:$0x1] %v1329_v31  ;;  %1336 = vst [vmem:[#allocation2 + $0x28] sm:$0x1] %v1330_v32  ;;  %v1340_v36 = vld [vmem:[#allocation2 + $0x1b] sm:$0x1] }
 0x160   : > { %v1341_v37 = vld [vmem:[#allocation2 + $0x23] sm:$0x1]  ;;  %v1342_v38 = vld [vmem:[#allocation2 + $0x2b] sm:$0x1]  ;;  %1334 = vst [vmem:[#allocation2 + $0x18] sm:$0x1] %v1328_v30 }
 0x161   : > { %1373 = vst [vmem:[#allocation3 + $0x4] sm:$0x3] %v1372_v24  ;;  %1384 = vst [vmem:[#allocation3 + $0x28] sm:$0x3] %v1383_v26  ;;  %v1379_v39 = vrot.slane %v2695_v25, 6  ;;  %v1445_v41 = vrot.slane %v2701_v34, 6 }
 0x162   : > { %1347 = vst [vmem:[#allocation2 + $0x25] sm:$0x1] %v1341_v37  ;;  %1348 = vst [vmem:[#allocation2 + $0x2d] sm:$0x1] %v1342_v38  ;;  %v1385_v40 = vld [vmem:[#allocation2 + $0x19] sm:$0xf] }
 0x163   : > { %1346 = vst [vmem:[#allocation2 + $0x1d] sm:$0x1] %v1340_v36  ;;  %1439 = vst [vmem:[#allocation3 + $0x10] sm:$0x3] %v1438_v33  ;;  %v1448_v42 = vld [vmem:[#allocation2 + $0x19] sm:$0xf]  ;;  %v2696_v43 = vpack.c.bf16 %v1385_v40, %v1385_v40 }
 0x164   : > { %1505 = vst [vmem:[#allocation3 + $0x1c] sm:$0x3] %v1504_v35  ;;  %v1449_v44 = vpack.c.bf16 %v1448_v42, %v1448_v42  ;;  %v1451_v46 = vld [vmem:[#allocation2 + $0x21] sm:$0xf]  ;;  %v1506_v47 = vld [vmem:[#allocation2 + $0x19] sm:$0xf] }
 0x165   : > { %v1514_v48 = vld [vmem:[#allocation2 + $0x21] sm:$0xf]  ;;  %v1352_v50 = vld [vmem:[#allocation2 + $0x8] sm:$0xf]  ;;  %v1360_v51 = vld [vmem:[#allocation2 + $0x10] sm:$0xf]  ;;  %v2702_v52 = vpack.c.bf16 %v1451_v46, %v1451_v46  ;;  %v2707_v53 = vpack.c.bf16 %v1506_v47, %v1506_v47 }
 0x166   : > { %v1349_v49 = vld [vmem:[#allocation2] sm:$0xf]  ;;  %1381 = vst [vmem:[#allocation3 + $0x4] sm:$0xc] %v1379_v39  ;;  %1447 = vst [vmem:[#allocation3 + $0x10] sm:$0xc] %v1445_v41  ;;  %v1515_v54 = vpack.c.bf16 %v1514_v48, %v1514_v48  ;;  %v2693_v56 = vpack.c.bf16 %v1352_v50, %v1352_v50  ;;  %v1361_v57 = vpack.c.bf16 %v1360_v51, %v1360_v51 }
 0x167   : > { %v1350_v55 = vpack.c.bf16 %v1349_v49, %v1349_v49  ;;  %v1390_v58 = vrot.slane %v2696_v43, 6  ;;  %v1393_v59 = vld [vmem:[#allocation2 + $0x2] sm:$0xf]  ;;  %v1396_v60 = vld [vmem:[#allocation2 + $0xa] sm:$0xf]  ;;  %v1456_v11 = vrot.slane %v2702_v52, 6 }
 0x168   : > { %1450 = vst [vmem:[#allocation3 + $0x34] sm:$0x3] %v1449_v44  ;;  %v1394_v61 = vpack.c.bf16 %v1393_v59, %v1393_v59  ;;  %v2697_v62 = vpack.c.bf16 %v1396_v60, %v1396_v60  ;;  %v1404_v63 = vld [vmem:[#allocation2 + $0x12] sm:$0xf]  ;;  %v1415_v0 = vld [vmem:[#allocation2 + $0x8] sm:$0xf] }
 0x169   : > { %v1418_v1 = vld [vmem:[#allocation2 + $0x10] sm:$0xf]  ;;  %1516 = vst [vmem:[#allocation3 + $0x40] sm:$0x3] %v1515_v54  ;;  %1351 = vst [vmem:[#allocation3] sm:$0x3] %v1350_v55  ;;  %v1405_v3 = vpack.c.bf16 %v1404_v63, %v1404_v63  ;;  %v1416_v4 = vpack.c.bf16 %v1415_v0, %v1415_v0 }
 0x16a   : > { %v1357_v2 = vrot.slane %v2693_v56, 6  ;;  %1362 = vst [vmem:[#allocation3 + $0x24] sm:$0x3] %v1361_v57  ;;  %1392 = vst [vmem:[#allocation3 + $0x28] sm:$0xc] %v1390_v58  ;;  %v2699_v5 = vpack.c.bf16 %v1418_v1, %v1418_v1  ;;  %v1401_v9 = vrot.slane %v2697_v62, 6 }
 0x16b   : > { %v1459_v6 = vld [vmem:[#allocation2 + $0xa] sm:$0xf]  ;;  %v1462_v7 = vld [vmem:[#allocation2 + $0x12] sm:$0xf]  ;;  %v1363_v8 = vld [vmem:[#allocation2 + $0x18] sm:$0xf] }
 0x16c   : > { %1395 = vst [vmem:[#allocation3 + $0x8] sm:$0x3] %v1394_v61  ;;  %v1426_v10 = vld [vmem:[#allocation2 + $0x18] sm:$0xf]  ;;  %v1460_v12 = vpack.c.bf16 %v1459_v6, %v1459_v6  ;;  %v2703_v13 = vpack.c.bf16 %v1462_v7, %v1462_v7  ;;  %1359 = vst [vmem:[#allocation3] sm:$0xc] %v1357_v2  ;;  %v2694_v14 = vpack.c.bf16 %v1363_v8, %v1363_v8 }
 0x16d   : > { %1406 = vst [vmem:[#allocation3 + $0x2c] sm:$0x3] %v1405_v3  ;;  %v1407_v15 = vld [vmem:[#allocation2 + $0x1a] sm:$0xf]  ;;  %1417 = vst [vmem:[#allocation3 + $0xc] sm:$0x3] %v1416_v4  ;;  %v1427_v17 = vpack.c.bf16 %v1426_v10, %v1426_v10 }
 0x16e   : > { %v1423_v16 = vrot.slane %v2699_v5, 6  ;;  %v1429_v18 = vld [vmem:[#allocation2 + $0x20] sm:$0xf]  ;;  %v1511_v19 = vrot.slane %v2707_v53, 6  ;;  %1403 = vst [vmem:[#allocation3 + $0x8] sm:$0xc] %v1401_v9  ;;  %v2698_v20 = vpack.c.bf16 %v1407_v15, %v1407_v15 }
 0x16f   : > { %v2700_v21 = vpack.c.bf16 %v1429_v18, %v1429_v18  ;;  %1458 = vst [vmem:[#allocation3 + $0x34] sm:$0xc] %v1456_v11  ;;  %1461 = vst [vmem:[#allocation3 + $0x14] sm:$0x3] %v1460_v12  ;;  %v1467_v22 = vrot.slane %v2703_v13, 6  ;;  %v1368_v25 = vrot.slane %v2694_v14, 6 }
 0x170   : > { %v1470_v23 = vld [vmem:[#allocation2 + $0x1a] sm:$0xf]  ;;  %v1473_v24 = vld [vmem:[#allocation2 + $0x22] sm:$0xf]  ;;  %1425 = vst [vmem:[#allocation3 + $0xc] sm:$0xc] %v1423_v16 }
 0x171   : > { %1428 = vst [vmem:[#allocation3 + $0x30] sm:$0x3] %v1427_v17  ;;  %v1471_v26 = vpack.c.bf16 %v1470_v23, %v1470_v23  ;;  %v2704_v27 = vpack.c.bf16 %v1473_v24, %v1473_v24  ;;  %v1481_v28 = vld [vmem:[#allocation2 + $0x10] sm:$0xf]  ;;  %v1484_v29 = vld [vmem:[#allocation2 + $0x18] sm:$0xf] }
 0x172   : > { %1513 = vst [vmem:[#allocation3 + $0x1c] sm:$0xc] %v1511_v19  ;;  %v1412_v30 = vrot.slane %v2698_v20, 6  ;;  %v1434_v31 = vrot.slane %v2700_v21, 6  ;;  %1469 = vst [vmem:[#allocation3 + $0x14] sm:$0xc] %v1467_v22  ;;  %v1482_v32 = vpack.c.bf16 %v1481_v28, %v1481_v28  ;;  %v2705_v33 = vpack.c.bf16 %v1484_v29, %v1484_v29 }
 0x173   : > { %v1492_v34 = vld [vmem:[#allocation2 + $0x20] sm:$0xf]  ;;  %v1495_v35 = vld [vmem:[#allocation2 + $0x28] sm:$0xf]  ;;  %1370 = vst [vmem:[#allocation3 + $0x24] sm:$0xc] %v1368_v25 }
 0x174   : > { %1472 = vst [vmem:[#allocation3 + $0x38] sm:$0x3] %v1471_v26  ;;  %v1478_v36 = vrot.slane %v2704_v27, 6  ;;  %v1493_v37 = vpack.c.bf16 %v1492_v34, %v1492_v34  ;;  %v2706_v38 = vpack.c.bf16 %v1495_v35, %v1495_v35  ;;  %v1517_v39 = vld [vmem:[#allocation2 + $0x29] sm:$0xf]  ;;  %v1489_v41 = vrot.slane %v2705_v33, 6 }
 0x175   : > { %v1525_v40 = vld [vmem:[#allocation2 + $0x12] sm:$0xf]  ;;  %1414 = vst [vmem:[#allocation3 + $0x2c] sm:$0xc] %v1412_v30  ;;  %1436 = vst [vmem:[#allocation3 + $0x30] sm:$0xc] %v1434_v31  ;;  %v2708_v42 = vpack.c.bf16 %v1517_v39, %v1517_v39 }
 0x176   : > { %1483 = vst [vmem:[#allocation3 + $0x18] sm:$0x3] %v1482_v32  ;;  %v1526_v43 = vpack.c.bf16 %v1525_v40, %v1525_v40  ;;  %v1528_v44 = vld [vmem:[#allocation2 + $0x1a] sm:$0xf]  ;;  %v1536_v46 = vld [vmem:[#allocation2 + $0x22] sm:$0xf] }
 0x177   : > { %1480 = vst [vmem:[#allocation3 + $0x38] sm:$0xc] %v1478_v36  ;;  %1494 = vst [vmem:[#allocation3 + $0x3c] sm:$0x3] %v1493_v37  ;;  %v1500_v47 = vrot.slane %v2706_v38, 6  ;;  %v2709_v48 = vpack.c.bf16 %v1528_v44, %v1528_v44  ;;  %v1537_v49 = vpack.c.bf16 %v1536_v46, %v1536_v46  ;;  %v1522_v51 = vrot.slane %v2708_v42, 6 }
 0x178   : > { %v1539_v50 = vld [vmem:[#allocation2 + $0x2a] sm:$0xf]  ;;  %1491 = vst [vmem:[#allocation3 + $0x18] sm:$0xc] %v1489_v41  ;;  %1527 = vst [vmem:[#allocation3 + $0x20] sm:$0x3] %v1526_v43 }
 0x179   : > { %v2710_v52 = vpack.c.bf16 %v1539_v50, %v1539_v50  ;;  %1502 = vst [vmem:[#allocation3 + $0x3c] sm:$0xc] %v1500_v47  ;;  %v1533_v53 = vrot.slane %v2709_v48, 6  ;;  %1538 = vst [vmem:[#allocation3 + $0x44] sm:$0x3] %v1537_v49  ;;  %v3091_v55 = vld [vmem:[%s3669_s3 + $0x138] sm:$0xff]  }
 0x17a   : > { %1524 = vst [vmem:[#allocation3 + $0x40] sm:$0xc] %v1522_v51  ;;  %v3092_v56 = vld [vmem:[%s3669_s3 + $0x1b8] sm:$0xff]   ;;  %v3083_v57 = vld [vmem:[#allocation3] ss:$36 sps:$4 sm:$0xff]   ;;  %v3103_v3 = vld [vmem:[%s3669_s3 + $0x168] sm:$0xff]  }
 0x17b   : > { %v1544_v54 = vrot.slane %v2710_v52, 6  ;;  %1535 = vst [vmem:[#allocation3 + $0x20] sm:$0xc] %v1533_v53  ;;  %v3085_v58 = vld [vmem:[#allocation3 + $0x4] ss:$36 sps:$4 sm:$0xff]   ;;  %v3104_v4 = vld [vmem:[%s3669_s3 + $0x1e8] sm:$0xff]  }
 0x17c   : > { %v3086_v59 = vld [vmem:[#allocation3 + $0x8] ss:$36 sps:$4 sm:$0xff]   ;;  %2218 = vmatprep.mubr.bf16.mxu1 %v3085_v58  ;;  %v3099_v61 = vld [vmem:[%s3669_s3 + $0x170] sm:$0xff]   ;;  %v3105_v5 = vld [vmem:[%s3669_s3 + $0x128] sm:$0xff]  }
 0x17d   : > { %1546 = vst [vmem:[#allocation3 + $0x44] sm:$0xc] %v1544_v54  ;;  %v3088_v60 = vld [vmem:[#allocation3 + $0xc] ss:$36 sps:$4 sm:$0xff]   ;;  %v3100_v62 = vld [vmem:[%s3669_s3 + $0x1f0] sm:$0xff]   ;;  %2219 = vmatmul.mubr.bf16.vlgmr.msra.gmra.mxu1 %v3083_v57  ;;  %v3106_v6 = vld [vmem:[%s3669_s3 + $0x1a8] sm:$0xff]  }
 0x17e   : > { %2259 = vmatprep.mubr.bf16.mxu0 %v3088_v60  ;;  %v3095_v63 = vld [vmem:[#allocation3 + $0x14] ss:$36 sps:$4 sm:$0xff]   ;;  %2864 = vmatpush3.bf16.msra.mxu1 %v3091_v55  ;;  %v3101_v0 = vld [vmem:[%s3669_s3 + $0x130] sm:$0xff]   ;;  %v3111_v11 = vld [vmem:[%s3669_s3 + $0x158] sm:$0xff]  }
 0x17f   : > { %2260 = vmatmul.mubr.bf16.vlgmr.msra.gmra.mxu0 %v3086_v59  ;;  %v3102_v1 = vld [vmem:[%s3669_s3 + $0x1b0] sm:$0xff]   ;;  %2300 = vmatprep.mubr.bf16.mxu1 %v3095_v63  ;;  %v3107_v7 = vld [vmem:[%s3669_s3 + $0x160] sm:$0xff]   ;;  %v3112_v12 = vld [vmem:[%s3669_s3 + $0x1d8] sm:$0xff]  }
 0x180   : > { %2886 = vmatpush3.bf16.msra.mxu0 %v3092_v56  ;;  %2865 = vmatprep.subr.bf16.mxu1 %v3099_v61  ;;  %v3108_v8 = vld [vmem:[%s3669_s3 + $0x1e0] sm:$0xff]   ;;  %v3113_v13 = vld [vmem:[%s3669_s3 + $0x118] sm:$0xff]   ;;  %v3115_v15 = vld [vmem:[%s3669_s3 + $0x150] sm:$0xff]  }
 0x181   : > { %v3098_v2 = vld [vmem:[#allocation3 + $0x1c] ss:$36 sps:$4 sm:$0xff]   ;;  %2887 = vmatprep.subr.bf16.mxu0 %v3100_v62  ;;  %v3109_v9 = vld [vmem:[%s3669_s3 + $0x120] sm:$0xff]   ;;  %v3114_v14 = vld [vmem:[%s3669_s3 + $0x198] sm:$0xff]  }
 0x182   : > { %2341 = vmatprep.mubr.bf16.mxu0 %v3098_v2  ;;  %2866 = vmatpush3.bf16.msra.mxu1 %v3101_v0  ;;  %v3110_v10 = vld [vmem:[%s3669_s3 + $0x1a0] sm:$0xff]   ;;  %v3116_v16 = vld [vmem:[%s3669_s3 + $0x1d0] sm:$0xff]   ;;  %v3119_v19 = vld [vmem:[%s3669_s3 + $0x148] sm:$0xff]  }
 0x183   : > { %2867 = vmatprep.subr.bf16.mxu1 %v3103_v3  ;;  %v3117_v17 = vld [vmem:[%s3669_s3 + $0x110] sm:$0xff]   ;;  %v3120_v20 = vld [vmem:[%s3669_s3 + $0x1c8] sm:$0xff]   ;;  %v3123_v23 = vld [vmem:[%s3669_s3 + $0x140] sm:$0xff]  }
 0x184   : > { %2888 = vmatpush3.bf16.msra.mxu0 %v3102_v1  ;;  %v3118_v18 = vld [vmem:[%s3669_s3 + $0x190] sm:$0xff]   ;;  %v3121_v21 = vld [vmem:[%s3669_s3 + $0x108] sm:$0xff]   ;;  %v3124_v24 = vld [vmem:[%s3669_s3 + $0x1c0] sm:$0xff]  }
 0x185   : > { %2889 = vmatprep.subr.bf16.mxu0 %v3104_v4  ;;  %v3122_v22 = vld [vmem:[%s3669_s3 + $0x188] sm:$0xff]   ;;  %v3125_v25 = vld [vmem:[%s3669_s3 + $0x100] sm:$0xff]   ;;  %v3127_v27 = vld [vmem:[%s3669_s3 + $0x238] sm:$0xff]  }
 0x186   : > { %2868 = vmatpush3.bf16.msra.mxu1 %v3105_v5  ;;  %v3126_v26 = vld [vmem:[%s3669_s3 + $0x180] sm:$0xff]   ;;  %v3096_v29 = vld [vmem:[#allocation3 + $0x18] ss:$36 sps:$4 sm:$0xff]   ;;  %v3128_v30 = vld [vmem:[%s3669_s3 + $0x230] sm:$0xff]  }
 0x187   : > { %2869 = vmatprep.subr.bf16.mxu1 %v3107_v7  ;;  %v3093_v28 = vld [vmem:[#allocation3 + $0x10] ss:$36 sps:$4 sm:$0xff]   ;;  %v3129_v31 = vld [vmem:[%s3669_s3 + $0x228] sm:$0xff]   ;;  %v3131_v33 = vld [vmem:[%s3669_s3 + $0x218] sm:$0xff]  }
 0x188   : > { %2890 = vmatpush3.bf16.msra.mxu0 %v3106_v6  ;;  %v3130_v32 = vld [vmem:[%s3669_s3 + $0x220] sm:$0xff]   ;;  %v3132_v34 = vld [vmem:[%s3669_s3 + $0x210] sm:$0xff]   ;;  %v3133_v35 = vld [vmem:[%s3669_s3 + $0x208] sm:$0xff]  }
 0x189   : > { %2891 = vmatprep.subr.bf16.mxu0 %v3108_v8  ;;  %v3134_v36 = vld [vmem:[%s3669_s3 + $0x200] sm:$0xff]   ;;  %v3135_v37 = vld [vmem:[#allocation3 + $0x20] ss:$36 sps:$4 sm:$0xff]  }
 0x18a   : > { %2870 = vmatpush3.bf16.msra.mxu1 %v3109_v9  ;;  %v2587_v51 = vld [vmem:[%s3670_s4] ss:$0 sm:$0xff] }
 0x18b   : > { %2871 = vmatprep.subr.bf16.mxu1 %v3111_v11 }
 0x18c   : > { %2892 = vmatpush3.bf16.msra.mxu0 %v3110_v10 }
 0x18d   : > { %2893 = vmatprep.subr.bf16.mxu0 %v3112_v12 }
 0x18e   : > { %2872 = vmatpush3.bf16.msra.mxu1 %v3113_v13 }
 0x18f   : > { %2873 = vmatprep.subr.bf16.mxu1 %v3115_v15 }
 0x190   : > { %2894 = vmatpush3.bf16.msra.mxu0 %v3114_v14 }
 0x191   : > { %2895 = vmatprep.subr.bf16.mxu0 %v3116_v16 }
 0x192   : > { %2874 = vmatpush3.bf16.msra.mxu1 %v3117_v17 }
 0x193   : > { %2875 = vmatprep.subr.bf16.mxu1 %v3119_v19 }
 0x194   : > { %2896 = vmatpush3.bf16.msra.mxu0 %v3118_v18 }
 0x195   : > { %2897 = vmatprep.subr.bf16.mxu0 %v3120_v20 }
 0x196   : > { %2876 = vmatpush3.bf16.msra.mxu1 %v3121_v21 }
 0x197   : > { %2877 = vmatprep.subr.bf16.mxu1 %v3123_v23 }
 0x198   : > { %2898 = vmatpush3.bf16.msra.mxu0 %v3122_v22 }
 0x199   : > { %2899 = vmatprep.subr.bf16.mxu0 %v3124_v24 }
 0x19a   : > { %2878 = vmatpush3.bf16.msra.mxu1 %v3125_v25 }
 0x19b   : > { %2936 = vmatprep.subr.bf16.mxu1 %v3148_v45 }
 0x19c   : > { %2900 = vmatpush3.bf16.msra.mxu0 %v3126_v26 }
 0x19d   : > { %2301 = vmatmul.mubr.bf16.vlgmr.msra.gmra.mxu1 %v3093_v28 }
 0x19e   : > { %2937 = vmatpush3.bf16.msra.mxu1 %v3127_v27  ;;  %2952 = vmatprep.mubr.msk.bf16.mxu1 %vm3149_vm0, %v3148_v45 }
 0x19f   : > { %2342 = vmatmul.mubr.bf16.vlgmr.msra.gmra.mxu0 %v3096_v29  ;;  %2938 = vmatprep.subr.bf16.mxu1 %v3148_v45 }
 0x1a2   : > { %2939 = vmatpush3.bf16.msra.mxu1 %v3128_v30 }
 0x1a3   : > { %2940 = vmatprep.subr.bf16.mxu1 %v3148_v45 }
 0x1a6   : > { %2941 = vmatpush3.bf16.msra.mxu1 %v3129_v31 }
 0x1a7   : > { %2942 = vmatprep.subr.bf16.mxu1 %v3148_v45 }
 0x1aa   : > { %2943 = vmatpush3.bf16.msra.mxu1 %v3130_v32 }
 0x1ab   : > { %2944 = vmatprep.subr.bf16.mxu1 %v3148_v45 }
 0x1ae   : > { %2945 = vmatpush3.bf16.msra.mxu1 %v3131_v33 }
 0x1af   : > { %2946 = vmatprep.subr.bf16.mxu1 %v3148_v45 }
 0x1b2   : > { %2947 = vmatpush3.bf16.msra.mxu1 %v3132_v34 }
 0x1b3   : > { %2948 = vmatprep.subr.bf16.mxu1 %v3148_v45 }
 0x1b6   : > { %2949 = vmatpush3.bf16.msra.mxu1 %v3133_v35 }
 0x1b7   : > { %2950 = vmatprep.subr.bf16.mxu1 %v3148_v45 }
 0x1ba   : > { %2951 = vmatpush3.bf16.msra.mxu1 %v3134_v36 }
 0x1bd   : > { %2953 = vmatmul.mubr.bf16.vlgmr.msra.gmra.mxu1 %v3135_v37 }
 0x23d   : > { %v2835_v38 = vpop.f32.mrf.mxu1 }
 0x23f   : > { %v2836_v39 = vpop.f32.mrf.mxu1  ;;  %v2857_v40 = vpop.f32.mrf.mxu0 }
 0x240   : > { %v2837_v50 = vadd.f32 %v2836_v39, %v2835_v38 }
 0x241   : > { %v2838_v41 = vpop.f32.mrf.mxu1  ;;  %v2858_v42 = vpop.f32.mrf.mxu0 }
 0x242   : > { %v2221_v54 = vadd.f32 %v2837_v50, %v2587_v51  ;;  %v2859_v56 = vadd.f32 %v2858_v42, %v2857_v40 }
 0x243   : > { %v2839_v43 = vpop.f32.mrf.mxu1  ;;  %v2860_v44 = vpop.f32.mrf.mxu0 }
 0x244   : > { %v2840_v52 = vadd.f32 %v2839_v43, %v2838_v41  ;;  %v2262_v60 = vadd.f32 %v2859_v56, %v2221_v54 }
 0x245   : > { %v2861_v47 = vpop.f32.mrf.mxu0 }
 0x246   : > { %v2224_v57 = vadd.f32 %v2840_v52, %v2587_v51  ;;  %v2862_v61 = vadd.f32 %v2861_v47, %v2860_v44 }
 0x248   : > { %v2265_v63 = vadd.f32 %v2862_v61, %v2224_v57 }
 0x25d   : > { %v2879_v46 = vpop.f32.mrf.mxu1 }
 0x25f   : > { %v2880_v48 = vpop.f32.mrf.mxu1  ;;  %v2901_v49 = vpop.f32.mrf.mxu0 }
 0x260   : > { %v2881_v58 = vadd.f32 %v2880_v48, %v2879_v46 }
 0x261   : > { %v2882_v45 = vpop.f32.mrf.mxu1  ;;  %v2902_v53 = vpop.f32.mrf.mxu0 }
 0x262   : > { %v2303_v0 = vadd.f32 %v2881_v58, %v2262_v60  ;;  %v2903_v2 = vadd.f32 %v2902_v53, %v2901_v49 }
 0x263   : > { %v2883_v55 = vpop.f32.mrf.mxu1  ;;  %v2904_v59 = vpop.f32.mrf.mxu0 }
 0x264   : > { %v2884_v62 = vadd.f32 %v2883_v55, %v2882_v45  ;;  %v2344_v6 = vadd.f32 %v2903_v2, %v2303_v0 }
 0x265   : > { %v2905_v1 = vpop.f32.mrf.mxu0 }
 0x266   : > { %v2306_v3 = vadd.f32 %v2884_v62, %v2265_v63  ;;  %v2906_v5 = vadd.f32 %v2905_v1, %v2904_v59 }
 0x268   : > { %v2347_v9 = vadd.f32 %v2906_v5, %v2306_v3 }
 0x27d   : > { %v2384_v4 = vpop.f32.mrf.mxu1 }
 0x27e   : > { %v2385_v8 = vadd.f32 %v2384_v4, %v2344_v6 }
 0x27f   : > { %v2954_v7 = vpop.f32.mrf.mxu1 }
 0x280   : > { %v2391_v13 = vmax.f32 %v2385_v8, 0.0 }
 0x281   : > { %v2387_v10 = vpop.f32.mrf.mxu1 }
 0x282   : > { %v2388_v11 = vadd.f32 %v2387_v10, %v2347_v9 }
 0x283   : > { %v2955_v12 = vpop.f32.mrf.mxu1 }
 0x284   : > { %v2392_v14 = vmax.f32 %v2388_v11, 0.0 }
 0x286   : > { %v2720_v15 = vpack.c.bf16 %v2392_v14, %v2391_v13 }
 0x288   : > { %2721 = vst [vmem:[%s224_s30] sm:$0xff] %v2720_v15  }
 0x289 PF: > { %s15_s18 = sadd.s32 1, %s3146_s18  }
 0x28a   : > { %p12_p4 = scmp.ge.s32.totalorder %s15_s18, 4  }
 0x28c   :  { %14 = sbr.rel (!%p12_p4) target bundleno = 1 (0x1), region = 75 }

// kernel: attentive_encoder_decoder.13
= control target key start
LH: loop header
LB: loop body
LE: loop exit
PB: predicated region body
PF: predicated region fallthrough
CT: control target
= control target key end

     0   :  { %s3196_s18 = smov 0   ;;  %s3682_s0 = inlined_call_operand.vmem [shape: bf16[2,16,128], index: 0, kind: input, shape index: {}]   ;;  %s3683_s1 = inlined_call_operand.vmem [shape: bf16[1152,128], index: 1, kind: input, shape index: {}]   ;;  %s3684_s2 = inlined_call_operand.vmem [shape: f32[1,128], index: 2, kind: input, shape index: {}]   ;;  %s3685_s3 = inlined_call_operand.vmem [shape: bf16[1152,128], index: 3, kind: input, shape index: {}]   ;;  %s3686_s4 = inlined_call_operand.vmem [shape: f32[1,128], index: 4, kind: input, shape index: {}]   ;;  %s3687_s5 = inlined_call_operand.vmem [shape: bf16[2,16,128], index: 5, kind: output, shape index: {}]  }
   0x1 LB: > { %s2468_s19 = sadd.s32 4294967295, %s3162_s18   ;;  %p2472_p0 = scmp.ge.s32.totalorder %s3162_s18, 1  ;;  %s3162_s18 = sphi %s3196_s18, %s15_s18  }
   0x2   : > { %p187_p1 = scmp.lt.s32.totalorder %s3162_s18, 3 }
   0x4   : > { %p188_p2 = pnand %p2472_p0, %p187_p1 }
   0x5   : > { %p215_p3 = scmp.lt.s32.totalorder (!%p188_p2), %s2468_s19, 1 }
   0x6   : > { %191 = sbr.rel (%p188_p2) target bundleno = 668 (0x29c), region = 40 }
   0xb   : > { %v2978_v0 = vld [vmem:[%s3683_s1 + $0x78] sm:$0xff]   ;;  %v2982_v4 = vld [vmem:[%s3683_s1 + $0x70] sm:$0xff]   ;;  %v2986_v8 = vld [vmem:[%s3683_s1 + $0x68] sm:$0xff]   ;;  %s3689_s19 = smov (!%p215_p3, %s2468_s19), 1  ;;  %vm3165_vm0 = vmmov 0  }
   0xc   : > { %v2979_v1 = vld [vmem:[%s3683_s1 + $0x38] sm:$0xff]   ;;  %2734 = vmatprep.subr.bf16.mxu0 %v2978_v0  ;;  %v2983_v5 = vld [vmem:[%s3683_s1 + $0x30] sm:$0xff]   ;;  %v2987_v9 = vld [vmem:[%s3683_s1 + $0x28] sm:$0xff]   ;;  %s2685_s28 = sshll.u32 %s3689_s19, 3 }
   0xd   : > { %v2980_v2 = vld [vmem:[%s3683_s1 + $0xf8] sm:$0xff]   ;;  %2735 = vmatpush3.bf16.msra.mxu0 %v2979_v1  ;;  %v2984_v6 = vld [vmem:[%s3683_s1 + $0xf0] sm:$0xff]   ;;  %v2988_v10 = vld [vmem:[%s3683_s1 + $0xe8] sm:$0xff]   ;;  %s219_s12 = scalar_lea.vmem %s3682_s0, %s2685_s28  ;;  %s224_s30 = scalar_lea.vmem %s3687_s5, %s2685_s28 }
   0xe   : > { %v2981_v3 = vld [vmem:[%s3683_s1 + $0xb8] sm:$0xff]   ;;  %2756 = vmatprep.subr.bf16.mxu1 %v2980_v2  ;;  %2736 = vmatprep.subr.bf16.mxu0 %v2982_v4  ;;  %v2985_v7 = vld [vmem:[%s3683_s1 + $0xb0] sm:$0xff]   ;;  %v2989_v11 = vld [vmem:[%s3683_s1 + $0xa8] sm:$0xff]  }
   0xf   : > { %2757 = vmatpush3.bf16.msra.mxu1 %v2981_v3  ;;  %v2990_v12 = vld [vmem:[%s3683_s1 + $0x60] sm:$0xff]   ;;  %v2994_v16 = vld [vmem:[%s3683_s1 + $0x58] sm:$0xff]   ;;  %v2998_v20 = vld [vmem:[%s3683_s1 + $0x50] sm:$0xff]  }
  0x10   : > { %2758 = vmatprep.subr.bf16.mxu1 %v2984_v6  ;;  %v2991_v13 = vld [vmem:[%s3683_s1 + $0x20] sm:$0xff]   ;;  %v2995_v17 = vld [vmem:[%s3683_s1 + $0x18] sm:$0xff]   ;;  %v2999_v21 = vld [vmem:[%s3683_s1 + $0x10] sm:$0xff]  }
  0x11   : > { %2737 = vmatpush3.bf16.msra.mxu0 %v2983_v5  ;;  %v2992_v14 = vld [vmem:[%s3683_s1 + $0xe0] sm:$0xff]   ;;  %v2996_v18 = vld [vmem:[%s3683_s1 + $0xd8] sm:$0xff]   ;;  %v3000_v22 = vld [vmem:[%s3683_s1 + $0xd0] sm:$0xff]  }
  0x12   : > { %2738 = vmatprep.subr.bf16.mxu0 %v2986_v8  ;;  %v2993_v15 = vld [vmem:[%s3683_s1 + $0xa0] sm:$0xff]   ;;  %v2997_v19 = vld [vmem:[%s3683_s1 + $0x98] sm:$0xff]   ;;  %v3001_v23 = vld [vmem:[%s3683_s1 + $0x90] sm:$0xff]  }
  0x13   : > { %2759 = vmatpush3.bf16.msra.mxu1 %v2985_v7  ;;  %v3002_v24 = vld [vmem:[%s3683_s1 + $0x48] sm:$0xff]   ;;  %v3006_v28 = vld [vmem:[%s3683_s1 + $0x40] sm:$0xff]   ;;  %v3012_v35 = vld [vmem:[%s3683_s1 + $0x178] sm:$0xff]  }
  0x14   : > { %2760 = vmatprep.subr.bf16.mxu1 %v2988_v10  ;;  %v3003_v25 = vld [vmem:[%s3683_s1 + $0x8] sm:$0xff]   ;;  %v3007_v29 = vld [vmem:[%s3683_s1] sm:$0xff]   ;;  %v3017_v36 = vld [vmem:[%s3683_s1 + $0x1f8] sm:$0xff]  }
  0x15   : > { %2739 = vmatpush3.bf16.msra.mxu0 %v2987_v9  ;;  %v3004_v26 = vld [vmem:[%s3683_s1 + $0xc8] sm:$0xff]   ;;  %v3008_v30 = vld [vmem:[%s3683_s1 + $0xc0] sm:$0xff]  }
  0x16   : > { %2740 = vmatprep.subr.bf16.mxu0 %v2990_v12  ;;  %v3005_v27 = vld [vmem:[%s3683_s1 + $0x88] sm:$0xff]   ;;  %v3009_v31 = vld [vmem:[%s3683_s1 + $0x80] sm:$0xff]  }
  0x17   : > { %2761 = vmatpush3.bf16.msra.mxu1 %v2989_v11  ;;  %v2726_v32 = vld [vmem:[%s219_s12] sm:$0xff]  }
  0x18   : > { %2762 = vmatprep.subr.bf16.mxu1 %v2992_v14  ;;  %v2727_v33 = vunpack.c.l.bf16 %v2726_v32  ;;  %v2728_v34 = vunpack.c.h.bf16 %v2726_v32  ;;  %v3023_v32 = vld [vmem:[%s3683_s1 + $0x1b0] sm:$0xff]  }
  0x19   : > { %2741 = vmatpush3.bf16.msra.mxu0 %v2991_v13 }
  0x1a   : > { %2742 = vmatprep.subr.bf16.mxu0 %v2994_v16  ;;  %231 = vst [vmem:[#allocation2 + $0x9] ss:$8 sps:$4 sm:$0xff] %v2727_v33   ;;  %235 = vst [vmem:[#allocation2 + $0x19] ss:$8 sps:$4 sm:$0xff] %v2728_v34  }
  0x1b   : > { %2763 = vmatpush3.bf16.msra.mxu1 %v2993_v15  ;;  %238 = vst [vmem:[#allocation2 - $0x3] sm:$0xf0] %v2727_v33  ;;  %240 = vst [vmem:[#allocation2 + $0x29] sm:$0xf] %v2728_v34  ;;  %v3025_v33 = vld [vmem:[%s3683_s1 + $0x128] sm:$0xff]  }
  0x1c   : > { %2764 = vmatprep.subr.bf16.mxu1 %v2996_v18  ;;  %v3026_v34 = vld [vmem:[%s3683_s1 + $0x1e8] sm:$0xff]  }
  0x1d   : > { %2743 = vmatpush3.bf16.msra.mxu0 %v2995_v17 }
  0x1e   : > { %2744 = vmatprep.subr.bf16.mxu0 %v2998_v20 }
  0x1f   : > { %2765 = vmatpush3.bf16.msra.mxu1 %v2997_v19 }
  0x20   : > { %2766 = vmatprep.subr.bf16.mxu1 %v3000_v22  ;;  %v3014_v22 = vld [vmem:[%s3683_s1 + $0x138] sm:$0xff]  }
  0x21   : > { %2745 = vmatpush3.bf16.msra.mxu0 %v2999_v21  ;;  %v242_v38 = vld [vmem:[#allocation2 + $0xa] sm:$0x1]  ;;  %v243_v39 = vld [vmem:[#allocation2 + $0x12] sm:$0x1]  ;;  %v244_v40 = vld [vmem:[#allocation2 + $0x1a] sm:$0x1] }
  0x22   : > { %2746 = vmatprep.subr.bf16.mxu0 %v3002_v24  ;;  %v241_v37 = vld [vmem:[#allocation2 + $0x2] sm:$0x1]  ;;  %248 = vst [vmem:[#allocation2 + $0x8] sm:$0x1] %v242_v38  ;;  %249 = vst [vmem:[#allocation2 + $0x10] sm:$0x1] %v243_v39 }
  0x23   : > { %2767 = vmatpush3.bf16.msra.mxu1 %v3001_v23  ;;  %247 = vst [vmem:[#allocation2] sm:$0x1] %v241_v37  ;;  %v287_v41 = vld [vmem:[#allocation2 + $0x1] sm:$0xf]  ;;  %v290_v42 = vld [vmem:[#allocation2 + $0x9] sm:$0xf] }
  0x24   : > { %2768 = vmatprep.subr.bf16.mxu1 %v3004_v26  ;;  %250 = vst [vmem:[#allocation2 + $0x18] sm:$0x1] %v244_v40  ;;  %v288_v43 = vpack.c.bf16 %v287_v41, %v287_v41  ;;  %v2689_v44 = vpack.c.bf16 %v290_v42, %v290_v42  ;;  %v298_v45 = vld [vmem:[#allocation2 + $0x11] sm:$0xf]  ;;  %v301_v46 = vld [vmem:[#allocation2 + $0x19] sm:$0xf] }
  0x25   : > { %2747 = vmatpush3.bf16.msra.mxu0 %v3003_v25  ;;  %v245_v47 = vld [vmem:[#allocation2 + $0x22] sm:$0x1]  ;;  %v299_v48 = vpack.c.bf16 %v298_v45, %v298_v45  ;;  %v2690_v49 = vpack.c.bf16 %v301_v46, %v301_v46  ;;  %v253_v50 = vld [vmem:[#allocation2 + $0x3] sm:$0x1]  ;;  %v254_v51 = vld [vmem:[#allocation2 + $0xb] sm:$0x1] }
  0x26   : > { %2748 = vmatprep.subr.bf16.mxu0 %v3006_v28  ;;  %251 = vst [vmem:[#allocation2 + $0x20] sm:$0x1] %v245_v47  ;;  %v255_v52 = vld [vmem:[#allocation2 + $0x13] sm:$0x1]  ;;  %289 = vst [vmem:[#allocation3 + $0x4] sm:$0x3] %v288_v43 }
  0x27   : > { %2769 = vmatpush3.bf16.msra.mxu1 %v3005_v27  ;;  %v295_v53 = vrot.slane %v2689_v44, 6  ;;  %v256_v54 = vld [vmem:[#allocation2 + $0x1b] sm:$0x1]  ;;  %259 = vst [vmem:[#allocation2 + $0x5] sm:$0x1] %v253_v50  ;;  %v306_v55 = vrot.slane %v2690_v49, 6 }
  0x28   : > { %2770 = vmatprep.subr.bf16.mxu1 %v3008_v30  ;;  %260 = vst [vmem:[#allocation2 + $0xd] sm:$0x1] %v254_v51  ;;  %261 = vst [vmem:[#allocation2 + $0x15] sm:$0x1] %v255_v52  ;;  %v3019_v25 = vld [vmem:[%s3683_s1 + $0x1b8] sm:$0xff]   ;;  %v3020_v26 = vld [vmem:[%s3683_s1 + $0x170] sm:$0xff]  }
  0x29   : > { %2749 = vmatpush3.bf16.msra.mxu0 %v3007_v29  ;;  %300 = vst [vmem:[#allocation3 + $0x28] sm:$0x3] %v299_v48  ;;  %262 = vst [vmem:[#allocation2 + $0x1d] sm:$0x1] %v256_v54  ;;  %v268_v57 = vld [vmem:[#allocation2 + $0x8] sm:$0xf] }
  0x2a   : > { %2778 = vmatprep.subr.bf16.mxu0 %v3012_v35  ;;  %297 = vst [vmem:[#allocation3 + $0x4] sm:$0xc] %v295_v53  ;;  %308 = vst [vmem:[#allocation3 + $0x28] sm:$0xc] %v306_v55  ;;  %v265_v56 = vld [vmem:[#allocation2] sm:$0xf]  ;;  %v2687_v60 = vpack.c.bf16 %v268_v57, %v268_v57 }
  0x2b   : > { %2771 = vmatpush3.bf16.msra.mxu1 %v3009_v31  ;;  %v276_v58 = vld [vmem:[#allocation2 + $0x10] sm:$0xf]  ;;  %v266_v59 = vpack.c.bf16 %v265_v56, %v265_v56  ;;  %v279_v62 = vld [vmem:[#allocation2 + $0x18] sm:$0xf]  ;;  %v331_v63 = vld [vmem:[#allocation2 + $0x8] sm:$0xf] }
  0x2c   : > { %2800 = vmatprep.subr.bf16.mxu1 %v3017_v36  ;;  %v277_v61 = vpack.c.bf16 %v276_v58, %v276_v58  ;;  %v334_v0 = vld [vmem:[#allocation2 + $0x10] sm:$0xf]  ;;  %v2688_v1 = vpack.c.bf16 %v279_v62, %v279_v62  ;;  %v332_v2 = vpack.c.bf16 %v331_v63, %v331_v63  ;;  %v342_v4 = vld [vmem:[#allocation2 + $0x18] sm:$0xf]  ;;  %v273_v6 = vrot.slane %v2687_v60, 6  ;;  %v3024_v31 = vld [vmem:[%s3683_s1 + $0x168] sm:$0xff]  }
  0x2d   : > { %v2693_v3 = vpack.c.bf16 %v334_v0, %v334_v0  ;;  %v345_v5 = vld [vmem:[#allocation2 + $0x20] sm:$0xf]  ;;  %267 = vst [vmem:[#allocation3] sm:$0x3] %v266_v59  ;;  %v343_v9 = vpack.c.bf16 %v342_v4, %v342_v4  ;;  %v3021_v27 = vld [vmem:[%s3683_s1 + $0x130] sm:$0xff]   ;;  %v3027_v35 = vld [vmem:[%s3683_s1 + $0x1a8] sm:$0xff]  }
  0x2e   : > { %278 = vst [vmem:[#allocation3 + $0x24] sm:$0x3] %v277_v61  ;;  %v309_v7 = vld [vmem:[#allocation2 + $0x2] sm:$0xf]  ;;  %v2694_v10 = vpack.c.bf16 %v345_v5, %v345_v5  ;;  %v284_v11 = vrot.slane %v2688_v1, 6  ;;  %v3022_v30 = vld [vmem:[%s3683_s1 + $0x1f0] sm:$0xff]  }
  0x2f   : > { %v312_v8 = vld [vmem:[#allocation2 + $0xa] sm:$0xf]  ;;  %v310_v12 = vpack.c.bf16 %v309_v7, %v309_v7  ;;  %v320_v14 = vld [vmem:[#allocation2 + $0x12] sm:$0xf]  ;;  %333 = vst [vmem:[#allocation3 + $0xc] sm:$0x3] %v332_v2 }
  0x30   : > { %v2691_v13 = vpack.c.bf16 %v312_v8, %v312_v8  ;;  %v323_v15 = vld [vmem:[#allocation2 + $0x1a] sm:$0xf]  ;;  %v339_v16 = vrot.slane %v2693_v3, 6  ;;  %275 = vst [vmem:[#allocation3] sm:$0xc] %v273_v6  ;;  %v321_v17 = vpack.c.bf16 %v320_v14, %v320_v14  ;;  %v350_v19 = vrot.slane %v2694_v10, 6 }
  0x31   : > { %v2692_v18 = vpack.c.bf16 %v323_v15, %v323_v15  ;;  %344 = vst [vmem:[#allocation3 + $0x30] sm:$0x3] %v343_v9  ;;  %286 = vst [vmem:[#allocation3 + $0x24] sm:$0xc] %v284_v11  ;;  %v3010_v23 = vld [vmem:[#allocation3 + $0x4] ss:$36 sps:$4 sm:$0xff]  }
  0x32   : > { %311 = vst [vmem:[#allocation3 + $0x8] sm:$0x3] %v310_v12  ;;  %v317_v20 = vrot.slane %v2691_v13, 6  ;;  %341 = vst [vmem:[#allocation3 + $0xc] sm:$0xc] %v339_v16  ;;  %1134 = vmatprep.mubr.bf16.mxu0 %v3010_v23  ;;  %v3028_v36 = vld [vmem:[%s3683_s1 + $0x160] sm:$0xff]  }
  0x33   : > { %322 = vst [vmem:[#allocation3 + $0x2c] sm:$0x3] %v321_v17  ;;  %v328_v21 = vrot.slane %v2692_v18, 6  ;;  %352 = vst [vmem:[#allocation3 + $0x30] sm:$0xc] %v350_v19  ;;  %v3029_v37 = vld [vmem:[%s3683_s1 + $0x120] sm:$0xff]  }
  0x34   : > { %319 = vst [vmem:[#allocation3 + $0x8] sm:$0xc] %v317_v20  ;;  %v3030_v38 = vld [vmem:[%s3683_s1 + $0x1e0] sm:$0xff]   ;;  %v3032_v39 = vld [vmem:[%s3683_s1 + $0x158] sm:$0xff]   ;;  %v353_v41 = vld [vmem:[#allocation2 + $0x9] sm:$0xf] }
  0x35   : > { %330 = vst [vmem:[#allocation3 + $0x2c] sm:$0xc] %v328_v21  ;;  %v257_v40 = vld [vmem:[#allocation2 + $0x23] sm:$0x1]  ;;  %v356_v42 = vld [vmem:[#allocation2 + $0x11] sm:$0xf]  ;;  %v354_v45 = vpack.c.bf16 %v353_v41, %v353_v41 }
  0x36   : > { %263 = vst [vmem:[#allocation2 + $0x25] sm:$0x1] %v257_v40  ;;  %v364_v43 = vld [vmem:[#allocation2 + $0x19] sm:$0xf]  ;;  %v3031_v44 = vld [vmem:[%s3683_s1 + $0x1a0] sm:$0xff]   ;;  %v2695_v46 = vpack.c.bf16 %v356_v42, %v356_v42  ;;  %v3036_v57 = vld [vmem:[%s3683_s1 + $0x150] sm:$0xff]  }
  0x37   : > { %v365_v47 = vpack.c.bf16 %v364_v43, %v364_v43  ;;  %v367_v48 = vld [vmem:[#allocation2 + $0x21] sm:$0xf]  ;;  %v375_v49 = vld [vmem:[#allocation2 + $0xa] sm:$0xf]  ;;  %v378_v50 = vld [vmem:[#allocation2 + $0x12] sm:$0xf] }
  0x38   : > { %v3013_v24 = vld [vmem:[#allocation3] ss:$36 sps:$4 sm:$0xff]   ;;  %v3033_v51 = vld [vmem:[%s3683_s1 + $0x118] sm:$0xff]   ;;  %v2696_v53 = vpack.c.bf16 %v367_v48, %v367_v48  ;;  %v376_v54 = vpack.c.bf16 %v375_v49, %v375_v49  ;;  %v2697_v55 = vpack.c.bf16 %v378_v50, %v378_v50  ;;  %355 = vst [vmem:[#allocation3 + $0x10] sm:$0x3] %v354_v45  ;;  %v361_v58 = vrot.slane %v2695_v46, 6 }
  0x39   : > { %1135 = vmatmul.mubr.bf16.vlgmr.msra.gmra.mxu0 %v3013_v24  ;;  %v3034_v52 = vld [vmem:[%s3683_s1 + $0x1d8] sm:$0xff]   ;;  %366 = vst [vmem:[#allocation3 + $0x34] sm:$0x3] %v365_v47  ;;  %v246_v60 = vld [vmem:[#allocation2 + $0x2a] sm:$0x1]  ;;  %v3037_v13 = vld [vmem:[%s3683_s1 + $0x110] sm:$0xff]  }
  0x3a   : > { %v3015_v28 = vld [vmem:[#allocation3 + $0xc] ss:$36 sps:$4 sm:$0xff]   ;;  %2779 = vmatpush3.bf16.msra.mxu0 %v3014_v22  ;;  %v397_v61 = vld [vmem:[#allocation2 + $0x10] sm:$0xf]  ;;  %v372_v62 = vrot.slane %v2696_v53, 6  ;;  %v383_v63 = vrot.slane %v2697_v55, 6 }
  0x3b   : > { %1175 = vmatprep.mubr.bf16.mxu1 %v3015_v28  ;;  %2780 = vmatprep.subr.bf16.mxu0 %v3020_v26  ;;  %v386_v56 = vld [vmem:[#allocation2 + $0x1a] sm:$0xf]  ;;  %377 = vst [vmem:[#allocation3 + $0x14] sm:$0x3] %v376_v54  ;;  %252 = vst [vmem:[#allocation2 + $0x28] sm:$0x1] %v246_v60  ;;  %v398_v0 = vpack.c.bf16 %v397_v61, %v397_v61 }
  0x3c   : > { %v3018_v29 = vld [vmem:[#allocation3 + $0x8] ss:$36 sps:$4 sm:$0xff]   ;;  %v387_v59 = vpack.c.bf16 %v386_v56, %v386_v56  ;;  %v408_v2 = vld [vmem:[#allocation2 + $0x20] sm:$0xf]  ;;  %363 = vst [vmem:[#allocation3 + $0x10] sm:$0xc] %v361_v58 }
  0x3d   : > { %1176 = vmatmul.mubr.bf16.vlgmr.msra.gmra.mxu1 %v3018_v29  ;;  %v400_v1 = vld [vmem:[#allocation2 + $0x18] sm:$0xf]  ;;  %v409_v5 = vpack.c.bf16 %v408_v2, %v408_v2  ;;  %v419_v6 = vld [vmem:[#allocation2 + $0x11] sm:$0xf]  ;;  %v430_v8 = vld [vmem:[#allocation2 + $0x21] sm:$0xf] }
  0x3e   : > { %2801 = vmatpush3.bf16.msra.mxu1 %v3019_v25  ;;  %2781 = vmatpush3.bf16.msra.mxu0 %v3021_v27  ;;  %v3035_v3 = vld [vmem:[%s3683_s1 + $0x198] sm:$0xff]   ;;  %388 = vst [vmem:[#allocation3 + $0x38] sm:$0x3] %v387_v59  ;;  %v2699_v4 = vpack.c.bf16 %v400_v1, %v400_v1  ;;  %374 = vst [vmem:[#allocation3 + $0x34] sm:$0xc] %v372_v62  ;;  %v420_v9 = vpack.c.bf16 %v419_v6, %v419_v6  ;;  %v3038_v17 = vld [vmem:[%s3683_s1 + $0x1d0] sm:$0xff]  }
  0x3f   : > { %2802 = vmatprep.subr.bf16.mxu1 %v3022_v30  ;;  %2782 = vmatprep.subr.bf16.mxu0 %v3024_v31  ;;  %v422_v7 = vld [vmem:[#allocation2 + $0x19] sm:$0xf]  ;;  %385 = vst [vmem:[#allocation3 + $0x14] sm:$0xc] %v383_v63  ;;  %399 = vst [vmem:[#allocation3 + $0x18] sm:$0x3] %v398_v0  ;;  %v431_v11 = vpack.c.bf16 %v430_v8, %v430_v8 }
  0x40   : > { %v2701_v10 = vpack.c.bf16 %v422_v7, %v422_v7  ;;  %v433_v12 = vld [vmem:[#allocation2 + $0x29] sm:$0xf]  ;;  %v389_v14 = vld [vmem:[#allocation2 + $0x22] sm:$0xf]  ;;  %v405_v15 = vrot.slane %v2699_v4, 6  ;;  %v3039_v20 = vld [vmem:[%s3683_s1 + $0x190] sm:$0xff]  }
  0x41   : > { %410 = vst [vmem:[#allocation3 + $0x3c] sm:$0x3] %v409_v5  ;;  %v2702_v16 = vpack.c.bf16 %v433_v12, %v433_v12  ;;  %v2698_v18 = vpack.c.bf16 %v389_v14, %v389_v14  ;;  %421 = vst [vmem:[#allocation3 + $0x1c] sm:$0x3] %v420_v9  ;;  %v3040_v21 = vld [vmem:[%s3683_s1 + $0x148] sm:$0xff]   ;;  %v3044_v27 = vld [vmem:[%s3683_s1 + $0x140] sm:$0xff]  }
  0x42   : > { %2803 = vmatpush3.bf16.msra.mxu1 %v3023_v32  ;;  %2783 = vmatpush3.bf16.msra.mxu0 %v3025_v33  ;;  %v427_v19 = vrot.slane %v2701_v10, 6  ;;  %432 = vst [vmem:[#allocation3 + $0x40] sm:$0x3] %v431_v11  ;;  %407 = vst [vmem:[#allocation3 + $0x18] sm:$0xc] %v405_v15  ;;  %v3041_v23 = vld [vmem:[%s3683_s1 + $0x108] sm:$0xff]  }
  0x43   : > { %2804 = vmatprep.subr.bf16.mxu1 %v3026_v34  ;;  %2784 = vmatprep.subr.bf16.mxu0 %v3028_v36  ;;  %v438_v22 = vrot.slane %v2702_v16, 6  ;;  %v394_v24 = vrot.slane %v2698_v18, 6  ;;  %v3042_v25 = vld [vmem:[%s3683_s1 + $0x1c8] sm:$0xff]   ;;  %v3045_v30 = vld [vmem:[%s3683_s1 + $0x100] sm:$0xff]   ;;  %v441_v34 = vld [vmem:[#allocation2 + $0x12] sm:$0xf] }
  0x44   : > { %429 = vst [vmem:[#allocation3 + $0x1c] sm:$0xc] %v427_v19  ;;  %v411_v26 = vld [vmem:[#allocation2 + $0x28] sm:$0xf]  ;;  %v3046_v32 = vld [vmem:[%s3683_s1 + $0x1c0] sm:$0xff]   ;;  %v3053_v41 = vld [vmem:[%s3683_s1 + $0x238] sm:$0xff]  }
  0x45   : > { %440 = vst [vmem:[#allocation3 + $0x40] sm:$0xc] %v438_v22  ;;  %396 = vst [vmem:[#allocation3 + $0x38] sm:$0xc] %v394_v24  ;;  %v2700_v28 = vpack.c.bf16 %v411_v26, %v411_v26  ;;  %v3043_v29 = vld [vmem:[%s3683_s1 + $0x188] sm:$0xff]   ;;  %v3164_v45 = vmov 0.0  }
  0x46   : > { %2805 = vmatpush3.bf16.msra.mxu1 %v3027_v35  ;;  %2785 = vmatpush3.bf16.msra.mxu0 %v3029_v37  ;;  %v258_v33 = vld [vmem:[#allocation2 + $0x2b] sm:$0x1]  ;;  %v442_v35 = vpack.c.bf16 %v441_v34, %v441_v34  ;;  %v444_v36 = vld [vmem:[#allocation2 + $0x1a] sm:$0xf]  ;;  %v452_v37 = vld [vmem:[#allocation2 + $0x22] sm:$0xf] }
  0x47   : > { %2806 = vmatprep.subr.bf16.mxu1 %v3030_v38  ;;  %2786 = vmatprep.subr.bf16.mxu0 %v3032_v39  ;;  %v416_v31 = vrot.slane %v2700_v28, 6  ;;  %264 = vst [vmem:[#allocation2 + $0x2d] sm:$0x1] %v258_v33  ;;  %v3049_v38 = vld [vmem:[%s3683_s1 + $0x180] sm:$0xff]   ;;  %v2703_v39 = vpack.c.bf16 %v444_v36, %v444_v36  ;;  %v453_v40 = vpack.c.bf16 %v452_v37, %v452_v37  ;;  %v3055_v46 = vld [vmem:[%s3683_s1 + $0x230] sm:$0xff]   ;;  %v3058_v54 = vld [vmem:[%s3683_s1 + $0x218] sm:$0xff]  }
  0x48   : > { %443 = vst [vmem:[#allocation3 + $0x20] sm:$0x3] %v442_v35  ;;  %v3050_v43 = vld [vmem:[#allocation3 + $0x10] ss:$36 sps:$4 sm:$0xff]   ;;  %v3059_v55 = vld [vmem:[%s3683_s1 + $0x210] sm:$0xff]   ;;  %v3060_v56 = vld [vmem:[%s3683_s1 + $0x208] sm:$0xff]  }
  0x49   : > { %418 = vst [vmem:[#allocation3 + $0x3c] sm:$0xc] %v416_v31  ;;  %454 = vst [vmem:[#allocation3 + $0x44] sm:$0x3] %v453_v40  ;;  %v3057_v53 = vld [vmem:[%s3683_s1 + $0x220] sm:$0xff]   ;;  %v3063_v59 = vld [vmem:[%s3685_s3 + $0x78] sm:$0xff]  }
  0x4a   : > { %2807 = vmatpush3.bf16.msra.mxu1 %v3031_v44  ;;  %2787 = vmatpush3.bf16.msra.mxu0 %v3033_v51  ;;  %v449_v44 = vrot.slane %v2703_v39, 6  ;;  %v3056_v51 = vld [vmem:[%s3683_s1 + $0x228] sm:$0xff]   ;;  %v3064_v60 = vld [vmem:[%s3685_s3 + $0xf8] sm:$0xff]   ;;  %v3067_v63 = vld [vmem:[%s3685_s3 + $0x70] sm:$0xff]  }
  0x4b   : > { %2808 = vmatprep.subr.bf16.mxu1 %v3034_v52  ;;  %2788 = vmatprep.subr.bf16.mxu0 %v3036_v57  ;;  %v3061_v57 = vld [vmem:[%s3683_s1 + $0x200] sm:$0xff]   ;;  %v3065_v61 = vld [vmem:[%s3685_s3 + $0x38] sm:$0xff]   ;;  %v3068_v0 = vld [vmem:[%s3685_s3 + $0xf0] sm:$0xff]  }
  0x4c   : > { %v3047_v42 = vld [vmem:[#allocation3 + $0x14] ss:$36 sps:$4 sm:$0xff]   ;;  %451 = vst [vmem:[#allocation3 + $0x20] sm:$0xc] %v449_v44  ;;  %v3051_v47 = vld [vmem:[#allocation3 + $0x1c] ss:$36 sps:$4 sm:$0xff]  }
  0x4d   : > { %1216 = vmatprep.mubr.bf16.mxu0 %v3047_v42  ;;  %1257 = vmatprep.mubr.bf16.mxu1 %v3051_v47  ;;  %v3066_v62 = vld [vmem:[%s3685_s3 + $0xb8] sm:$0xff]   ;;  %v3069_v1 = vld [vmem:[%s3685_s3 + $0x30] sm:$0xff]   ;;  %v3072_v4 = vld [vmem:[%s3685_s3 + $0xe8] sm:$0xff]  }
  0x4e   : > { %2809 = vmatpush3.bf16.msra.mxu1 %v3035_v3  ;;  %2789 = vmatpush3.bf16.msra.mxu0 %v3037_v13  ;;  %v455_v49 = vld [vmem:[#allocation2 + $0x2a] sm:$0xf]  ;;  %v3070_v2 = vld [vmem:[%s3685_s3 + $0xb0] sm:$0xff]   ;;  %v3075_v7 = vld [vmem:[%s3685_s3 + $0x60] sm:$0xff]  }
  0x4f   : > { %2810 = vmatprep.subr.bf16.mxu1 %v3038_v17  ;;  %2790 = vmatprep.subr.bf16.mxu0 %v3040_v21  ;;  %v2704_v50 = vpack.c.bf16 %v455_v49, %v455_v49  ;;  %v3071_v3 = vld [vmem:[%s3685_s3 + $0x68] sm:$0xff]   ;;  %v3076_v8 = vld [vmem:[%s3685_s3 + $0xe0] sm:$0xff]   ;;  %v3079_v11 = vld [vmem:[%s3685_s3 + $0x58] sm:$0xff]  }
  0x50   : > { %v3054_v48 = vld [vmem:[#allocation3 + $0x18] ss:$36 sps:$4 sm:$0xff]   ;;  %v3077_v9 = vld [vmem:[%s3685_s3 + $0x20] sm:$0xff]   ;;  %v3080_v12 = vld [vmem:[%s3685_s3 + $0xd8] sm:$0xff]  }
  0x51   : > { %v460_v52 = vrot.slane %v2704_v50, 6  ;;  %v3073_v5 = vld [vmem:[%s3685_s3 + $0x28] sm:$0xff]   ;;  %v3078_v10 = vld [vmem:[%s3685_s3 + $0xa0] sm:$0xff]   ;;  %v3081_v13 = vld [vmem:[%s3685_s3 + $0x18] sm:$0xff]  }
  0x52   : > { %2811 = vmatpush3.bf16.msra.mxu1 %v3039_v20  ;;  %2791 = vmatpush3.bf16.msra.mxu0 %v3041_v23  ;;  %v3074_v6 = vld [vmem:[%s3685_s3 + $0xa8] sm:$0xff]   ;;  %v3082_v14 = vld [vmem:[%s3685_s3 + $0x98] sm:$0xff]   ;;  %v3083_v15 = vld [vmem:[%s3685_s3 + $0x50] sm:$0xff]  }
  0x53   : > { %2812 = vmatprep.subr.bf16.mxu1 %v3042_v25  ;;  %2792 = vmatprep.subr.bf16.mxu0 %v3044_v27  ;;  %462 = vst [vmem:[#allocation3 + $0x44] sm:$0xc] %v460_v52  ;;  %v3084_v16 = vld [vmem:[%s3685_s3 + $0xd0] sm:$0xff]   ;;  %v3087_v19 = vld [vmem:[%s3685_s3 + $0x48] sm:$0xff]   ;;  %v3091_v23 = vld [vmem:[%s3685_s3 + $0x40] sm:$0xff]  }
  0x54   : > { %v3085_v17 = vld [vmem:[%s3685_s3 + $0x10] sm:$0xff]   ;;  %v3088_v20 = vld [vmem:[%s3685_s3 + $0xc8] sm:$0xff]   ;;  %v3092_v24 = vld [vmem:[%s3685_s3 + $0xc0] sm:$0xff]  }
  0x55   : > { %v3086_v18 = vld [vmem:[%s3685_s3 + $0x90] sm:$0xff]   ;;  %v3089_v21 = vld [vmem:[%s3685_s3 + $0x8] sm:$0xff]   ;;  %v3093_v25 = vld [vmem:[%s3685_s3] sm:$0xff]  }
  0x56   : > { %2813 = vmatpush3.bf16.msra.mxu1 %v3043_v29  ;;  %2793 = vmatpush3.bf16.msra.mxu0 %v3045_v30  ;;  %v3090_v22 = vld [vmem:[%s3685_s3 + $0x88] sm:$0xff]   ;;  %v3094_v26 = vld [vmem:[%s3685_s3 + $0x80] sm:$0xff]   ;;  %v3101_v27 = vld [vmem:[%s3685_s3 + $0x178] sm:$0xff]  }
  0x57   : > { %2814 = vmatprep.subr.bf16.mxu1 %v3046_v32  ;;  %2928 = vmatprep.subr.bf16.mxu0 %v3164_v45  ;;  %v3102_v28 = vld [vmem:[%s3685_s3 + $0x1f8] sm:$0xff]  }
  0x59   : > { %1217 = vmatmul.mubr.bf16.vlgmr.msra.gmra.mxu0 %v3050_v43 }
  0x5a   : > { %2815 = vmatpush3.bf16.msra.mxu1 %v3049_v38  ;;  %2929 = vmatpush3.bf16.msra.mxu0 %v3053_v41  ;;  %v3062_v58 = vld [vmem:[#allocation3 + $0x20] ss:$36 sps:$4 sm:$0xff]   ;;  %v2495_v41 = vld [vmem:[%s3684_s2] ss:$0 sm:$0xff] }
  0x5b   : > { %2944 = vmatprep.mubr.msk.bf16.mxu0 %vm3165_vm0, %v3164_v45  ;;  %2930 = vmatprep.subr.bf16.mxu0 %v3164_v45 }
  0x5c   : > { %2831 = vmatprep.subr.bf16.mxu1 %v3063_v59 }
  0x5d   : > { %1258 = vmatmul.mubr.bf16.vlgmr.msra.gmra.mxu1 %v3054_v48 }
  0x5e   : > { %2931 = vmatpush3.bf16.msra.mxu0 %v3055_v46  ;;  %2832 = vmatpush3.bf16.msra.mxu1 %v3065_v61 }
  0x5f   : > { %2932 = vmatprep.subr.bf16.mxu0 %v3164_v45  ;;  %2833 = vmatprep.subr.bf16.mxu1 %v3067_v63 }
  0x62   : > { %2933 = vmatpush3.bf16.msra.mxu0 %v3056_v51  ;;  %2834 = vmatpush3.bf16.msra.mxu1 %v3069_v1 }
  0x63   : > { %2934 = vmatprep.subr.bf16.mxu0 %v3164_v45  ;;  %2835 = vmatprep.subr.bf16.mxu1 %v3071_v3 }
  0x66   : > { %2935 = vmatpush3.bf16.msra.mxu0 %v3057_v53  ;;  %2836 = vmatpush3.bf16.msra.mxu1 %v3073_v5 }
  0x67   : > { %2936 = vmatprep.subr.bf16.mxu0 %v3164_v45  ;;  %2837 = vmatprep.subr.bf16.mxu1 %v3075_v7 }
  0x6a   : > { %2937 = vmatpush3.bf16.msra.mxu0 %v3058_v54  ;;  %2838 = vmatpush3.bf16.msra.mxu1 %v3077_v9 }
  0x6b   : > { %2938 = vmatprep.subr.bf16.mxu0 %v3164_v45  ;;  %2839 = vmatprep.subr.bf16.mxu1 %v3079_v11 }
  0x6e   : > { %2939 = vmatpush3.bf16.msra.mxu0 %v3059_v55  ;;  %2840 = vmatpush3.bf16.msra.mxu1 %v3081_v13 }
  0x6f   : > { %2940 = vmatprep.subr.bf16.mxu0 %v3164_v45  ;;  %2841 = vmatprep.subr.bf16.mxu1 %v3083_v15 }
  0x72   : > { %2941 = vmatpush3.bf16.msra.mxu0 %v3060_v56  ;;  %2842 = vmatpush3.bf16.msra.mxu1 %v3085_v17 }
  0x73   : > { %2942 = vmatprep.subr.bf16.mxu0 %v3164_v45  ;;  %2843 = vmatprep.subr.bf16.mxu1 %v3087_v19 }
  0x76   : > { %2943 = vmatpush3.bf16.msra.mxu0 %v3061_v57  ;;  %2844 = vmatpush3.bf16.msra.mxu1 %v3089_v21 }
  0x77   : > { %2853 = vmatprep.subr.bf16.mxu0 %v3064_v60  ;;  %2845 = vmatprep.subr.bf16.mxu1 %v3091_v23 }
  0x79   : > { %2945 = vmatmul.mubr.bf16.vlgmr.msra.gmra.mxu0 %v3062_v58 }
  0x7a   : > { %2854 = vmatpush3.bf16.msra.mxu0 %v3066_v62  ;;  %2846 = vmatpush3.bf16.msra.mxu1 %v3093_v25 }
  0x7b   : > { %2855 = vmatprep.subr.bf16.mxu0 %v3068_v0  ;;  %2875 = vmatprep.subr.bf16.mxu1 %v3101_v27 }
  0x7e   : > { %2856 = vmatpush3.bf16.msra.mxu0 %v3070_v2 }
  0x7f   : > { %2857 = vmatprep.subr.bf16.mxu0 %v3072_v4 }
  0x82   : > { %2858 = vmatpush3.bf16.msra.mxu0 %v3074_v6 }
  0x83   : > { %2859 = vmatprep.subr.bf16.mxu0 %v3076_v8 }
  0x86   : > { %2860 = vmatpush3.bf16.msra.mxu0 %v3078_v10 }
  0x87   : > { %2861 = vmatprep.subr.bf16.mxu0 %v3080_v12 }
  0x8a   : > { %2862 = vmatpush3.bf16.msra.mxu0 %v3082_v14 }
  0x8b   : > { %2863 = vmatprep.subr.bf16.mxu0 %v3084_v16 }
  0x8e   : > { %2864 = vmatpush3.bf16.msra.mxu0 %v3086_v18 }
  0x8f   : > { %2865 = vmatprep.subr.bf16.mxu0 %v3088_v20 }
  0x92   : > { %2866 = vmatpush3.bf16.msra.mxu0 %v3090_v22 }
  0x93   : > { %2867 = vmatprep.subr.bf16.mxu0 %v3092_v24 }
  0x96   : > { %2868 = vmatpush3.bf16.msra.mxu0 %v3094_v26 }
  0x97   : > { %2897 = vmatprep.subr.bf16.mxu0 %v3102_v28 }
  0xf9   : > { %v2750_v29 = vpop.f32.mrf.mxu0 }
  0xfb   : > { %v2751_v30 = vpop.f32.mrf.mxu0 }
  0xfc   : > { %v2752_v40 = vadd.f32 %v2751_v30, %v2750_v29 }
  0xfd   : > { %v2772_v31 = vpop.f32.mrf.mxu1  ;;  %v2753_v32 = vpop.f32.mrf.mxu0 }
  0xfe   : > { %v1137_v44 = vadd.f32 %v2752_v40, %v2495_v41 }
  0xff   : > { %v2773_v33 = vpop.f32.mrf.mxu1  ;;  %v2754_v34 = vpop.f32.mrf.mxu0 }
 0x100   : > { %v2774_v46 = vadd.f32 %v2773_v33, %v2772_v31  ;;  %v2755_v47 = vadd.f32 %v2754_v34, %v2753_v32 }
 0x101   : > { %v2775_v35 = vpop.f32.mrf.mxu1 }
 0x102   : > { %v1178_v51 = vadd.f32 %v2774_v46, %v1137_v44  ;;  %v1140_v52 = vadd.f32 %v2755_v47, %v2495_v41 }
 0x103   : > { %v2776_v37 = vpop.f32.mrf.mxu1 }
 0x104   : > { %v2777_v53 = vadd.f32 %v2776_v37, %v2775_v35 }
 0x106   : > { %v1181_v58 = vadd.f32 %v2777_v53, %v1140_v52 }
 0x119   : > { %v2794_v36 = vpop.f32.mrf.mxu0 }
 0x11b   : > { %v2795_v38 = vpop.f32.mrf.mxu0 }
 0x11c   : > { %v2796_v48 = vadd.f32 %v2795_v38, %v2794_v36 }
 0x11d   : > { %v2816_v39 = vpop.f32.mrf.mxu1  ;;  %v2797_v42 = vpop.f32.mrf.mxu0 }
 0x11e   : > { %v1219_v54 = vadd.f32 %v2796_v48, %v1178_v51 }
 0x11f   : > { %v2817_v43 = vpop.f32.mrf.mxu1  ;;  %v2798_v49 = vpop.f32.mrf.mxu0 }
 0x120   : > { %v2818_v55 = vadd.f32 %v2817_v43, %v2816_v39  ;;  %v2799_v56 = vadd.f32 %v2798_v49, %v2797_v42 }
 0x121   : > { %v2819_v50 = vpop.f32.mrf.mxu1 }
 0x122   : > { %v1222_v59 = vadd.f32 %v2799_v56, %v1181_v58  ;;  %v1260_v61 = vadd.f32 %v2818_v55, %v1219_v54 }
 0x123   : > { %v2820_v57 = vpop.f32.mrf.mxu1 }
 0x124   : > { %v2821_v60 = vadd.f32 %v2820_v57, %v2819_v50 }
 0x126   : > { %v1263_v2 = vadd.f32 %v2821_v60, %v1222_v59 }
 0x139   : > { %v1300_v62 = vpop.f32.mrf.mxu0 }
 0x13a   : > { %v1301_v63 = vadd.f32 %v1300_v62, %v1260_v61 }
 0x13b   : > { %v2946_v0 = vpop.f32.mrf.mxu0 }
 0x13c   : > { %v1309_v1 = vmin.f32 %v1301_v63, 0.0  ;;  %vm1307_vm1 = vcmp.gt.f32.partialorder %v1301_v63, 0.0 }
 0x13d   : > { %v1303_v3 = vpop.f32.mrf.mxu0 }
 0x13e   : > { %v1311_v4 = vmul.f32 1.442695, %v1309_v1  ;;  %v1304_v5 = vadd.f32 %v1303_v3, %v1263_v2 }
 0x13f   : > { %v2947_v6 = vpop.f32.mrf.mxu0 }
 0x140   : > { %3148 = vpow2.f32 %v1311_v4  ;;  %v1310_v7 = vmin.f32 %v1304_v5, 0.0  ;;  %vm1308_vm2 = vcmp.gt.f32.partialorder %v1304_v5, 0.0 }
 0x142   : > { %v1313_v8 = vmul.f32 1.442695, %v1310_v7 }
 0x144   : > { %3150 = vpow2.f32 %v1313_v8 }
 0x14d   : > { %v3149_v9 = vpop.eup %3148 }
 0x14e   : > { %v2577_v10 = vadd.f32 -1.0, %v3149_v9 }
 0x150   : > { %v1317_v11 = vsel %vm1307_vm1, %v1301_v63, %v2577_v10 }
 0x151   : > { %v3151_v12 = vpop.eup %3150  ;;  %1319 = vst [vmem:[#allocation2 + $0x9] ss:$8 sps:$4 sm:$0xff] %v1317_v11   ;;  %1323 = vst [vmem:[#allocation2 - $0x3] sm:$0xf0] %v1317_v11 }
 0x152   : > { %v2578_v13 = vadd.f32 -1.0, %v3151_v12 }
 0x154   : > { %v1318_v14 = vsel %vm1308_vm2, %v1304_v5, %v2578_v13 }
 0x155   : > { %1321 = vst [vmem:[#allocation2 + $0x19] ss:$8 sps:$4 sm:$0xff] %v1318_v14   ;;  %1324 = vst [vmem:[#allocation2 + $0x29] sm:$0xf] %v1318_v14 }
 0x158   : > { %v1325_v15 = vld [vmem:[#allocation2 + $0x2] sm:$0x1]  ;;  %v1326_v16 = vld [vmem:[#allocation2 + $0xa] sm:$0x1]  ;;  %v1327_v17 = vld [vmem:[#allocation2 + $0x12] sm:$0x1] }
 0x159   : > { %1331 = vst [vmem:[#allocation2] sm:$0x1] %v1325_v15  ;;  %1332 = vst [vmem:[#allocation2 + $0x8] sm:$0x1] %v1326_v16  ;;  %v1337_v18 = vld [vmem:[#allocation2 + $0x3] sm:$0x1] }
 0x15a   : > { %v1338_v19 = vld [vmem:[#allocation2 + $0xb] sm:$0x1]  ;;  %v1339_v20 = vld [vmem:[#allocation2 + $0x13] sm:$0x1]  ;;  %1333 = vst [vmem:[#allocation2 + $0x10] sm:$0x1] %v1327_v17 }
 0x15b   : > { %1343 = vst [vmem:[#allocation2 + $0x5] sm:$0x1] %v1337_v18  ;;  %1344 = vst [vmem:[#allocation2 + $0xd] sm:$0x1] %v1338_v19  ;;  %v1371_v21 = vld [vmem:[#allocation2 + $0x1] sm:$0xf] }
 0x15c   : > { %1345 = vst [vmem:[#allocation2 + $0x15] sm:$0x1] %v1339_v20  ;;  %v1374_v22 = vld [vmem:[#allocation2 + $0x9] sm:$0xf]  ;;  %v1382_v23 = vld [vmem:[#allocation2 + $0x11] sm:$0xf]  ;;  %v1372_v24 = vpack.c.bf16 %v1371_v21, %v1371_v21 }
 0x15d   : > { %v2707_v25 = vpack.c.bf16 %v1374_v22, %v1374_v22  ;;  %v1383_v26 = vpack.c.bf16 %v1382_v23, %v1382_v23  ;;  %v1437_v27 = vld [vmem:[#allocation2 + $0x9] sm:$0xf]  ;;  %v1440_v28 = vld [vmem:[#allocation2 + $0x11] sm:$0xf]  ;;  %v1328_v30 = vld [vmem:[#allocation2 + $0x1a] sm:$0x1] }
 0x15e   : > { %v1503_v29 = vld [vmem:[#allocation2 + $0x11] sm:$0xf]  ;;  %v1329_v31 = vld [vmem:[#allocation2 + $0x22] sm:$0x1]  ;;  %v1330_v32 = vld [vmem:[#allocation2 + $0x2a] sm:$0x1]  ;;  %v1438_v33 = vpack.c.bf16 %v1437_v27, %v1437_v27  ;;  %v2713_v34 = vpack.c.bf16 %v1440_v28, %v1440_v28 }
 0x15f   : > { %v1504_v35 = vpack.c.bf16 %v1503_v29, %v1503_v29  ;;  %1335 = vst [vmem:[#allocation2 + $0x20] sm:$0x1] %v1329_v31  ;;  %1336 = vst [vmem:[#allocation2 + $0x28] sm:$0x1] %v1330_v32  ;;  %v1340_v36 = vld [vmem:[#allocation2 + $0x1b] sm:$0x1] }
 0x160   : > { %v1341_v37 = vld [vmem:[#allocation2 + $0x23] sm:$0x1]  ;;  %v1342_v38 = vld [vmem:[#allocation2 + $0x2b] sm:$0x1]  ;;  %1334 = vst [vmem:[#allocation2 + $0x18] sm:$0x1] %v1328_v30 }
 0x161   : > { %1373 = vst [vmem:[#allocation3 + $0x4] sm:$0x3] %v1372_v24  ;;  %1384 = vst [vmem:[#allocation3 + $0x28] sm:$0x3] %v1383_v26  ;;  %v1379_v39 = vrot.slane %v2707_v25, 6  ;;  %v1445_v41 = vrot.slane %v2713_v34, 6 }
 0x162   : > { %1347 = vst [vmem:[#allocation2 + $0x25] sm:$0x1] %v1341_v37  ;;  %1348 = vst [vmem:[#allocation2 + $0x2d] sm:$0x1] %v1342_v38  ;;  %v1385_v40 = vld [vmem:[#allocation2 + $0x19] sm:$0xf] }
 0x163   : > { %1346 = vst [vmem:[#allocation2 + $0x1d] sm:$0x1] %v1340_v36  ;;  %1439 = vst [vmem:[#allocation3 + $0x10] sm:$0x3] %v1438_v33  ;;  %v1448_v42 = vld [vmem:[#allocation2 + $0x19] sm:$0xf]  ;;  %v2708_v43 = vpack.c.bf16 %v1385_v40, %v1385_v40 }
 0x164   : > { %1505 = vst [vmem:[#allocation3 + $0x1c] sm:$0x3] %v1504_v35  ;;  %v1449_v44 = vpack.c.bf16 %v1448_v42, %v1448_v42  ;;  %v1451_v46 = vld [vmem:[#allocation2 + $0x21] sm:$0xf]  ;;  %v1506_v47 = vld [vmem:[#allocation2 + $0x19] sm:$0xf] }
 0x165   : > { %v1514_v48 = vld [vmem:[#allocation2 + $0x21] sm:$0xf]  ;;  %v1352_v50 = vld [vmem:[#allocation2 + $0x8] sm:$0xf]  ;;  %v1360_v51 = vld [vmem:[#allocation2 + $0x10] sm:$0xf]  ;;  %v2714_v52 = vpack.c.bf16 %v1451_v46, %v1451_v46  ;;  %v2719_v53 = vpack.c.bf16 %v1506_v47, %v1506_v47 }
 0x166   : > { %v1349_v49 = vld [vmem:[#allocation2] sm:$0xf]  ;;  %1381 = vst [vmem:[#allocation3 + $0x4] sm:$0xc] %v1379_v39  ;;  %1447 = vst [vmem:[#allocation3 + $0x10] sm:$0xc] %v1445_v41  ;;  %v1515_v54 = vpack.c.bf16 %v1514_v48, %v1514_v48  ;;  %v2705_v56 = vpack.c.bf16 %v1352_v50, %v1352_v50  ;;  %v1361_v57 = vpack.c.bf16 %v1360_v51, %v1360_v51 }
 0x167   : > { %v1350_v55 = vpack.c.bf16 %v1349_v49, %v1349_v49  ;;  %v1390_v58 = vrot.slane %v2708_v43, 6  ;;  %v1393_v59 = vld [vmem:[#allocation2 + $0x2] sm:$0xf]  ;;  %v1396_v60 = vld [vmem:[#allocation2 + $0xa] sm:$0xf]  ;;  %v1456_v11 = vrot.slane %v2714_v52, 6 }
 0x168   : > { %1450 = vst [vmem:[#allocation3 + $0x34] sm:$0x3] %v1449_v44  ;;  %v1394_v61 = vpack.c.bf16 %v1393_v59, %v1393_v59  ;;  %v2709_v62 = vpack.c.bf16 %v1396_v60, %v1396_v60  ;;  %v1404_v63 = vld [vmem:[#allocation2 + $0x12] sm:$0xf]  ;;  %v1415_v0 = vld [vmem:[#allocation2 + $0x8] sm:$0xf] }
 0x169   : > { %v1418_v1 = vld [vmem:[#allocation2 + $0x10] sm:$0xf]  ;;  %1516 = vst [vmem:[#allocation3 + $0x40] sm:$0x3] %v1515_v54  ;;  %1351 = vst [vmem:[#allocation3] sm:$0x3] %v1350_v55  ;;  %v1405_v3 = vpack.c.bf16 %v1404_v63, %v1404_v63  ;;  %v1416_v4 = vpack.c.bf16 %v1415_v0, %v1415_v0 }
 0x16a   : > { %v1357_v2 = vrot.slane %v2705_v56, 6  ;;  %1362 = vst [vmem:[#allocation3 + $0x24] sm:$0x3] %v1361_v57  ;;  %1392 = vst [vmem:[#allocation3 + $0x28] sm:$0xc] %v1390_v58  ;;  %v2711_v5 = vpack.c.bf16 %v1418_v1, %v1418_v1  ;;  %v1401_v9 = vrot.slane %v2709_v62, 6 }
 0x16b   : > { %v1459_v6 = vld [vmem:[#allocation2 + $0xa] sm:$0xf]  ;;  %v1462_v7 = vld [vmem:[#allocation2 + $0x12] sm:$0xf]  ;;  %v1363_v8 = vld [vmem:[#allocation2 + $0x18] sm:$0xf] }
 0x16c   : > { %1395 = vst [vmem:[#allocation3 + $0x8] sm:$0x3] %v1394_v61  ;;  %v1426_v10 = vld [vmem:[#allocation2 + $0x18] sm:$0xf]  ;;  %v1460_v12 = vpack.c.bf16 %v1459_v6, %v1459_v6  ;;  %v2715_v13 = vpack.c.bf16 %v1462_v7, %v1462_v7  ;;  %1359 = vst [vmem:[#allocation3] sm:$0xc] %v1357_v2  ;;  %v2706_v14 = vpack.c.bf16 %v1363_v8, %v1363_v8 }
 0x16d   : > { %1406 = vst [vmem:[#allocation3 + $0x2c] sm:$0x3] %v1405_v3  ;;  %v1407_v15 = vld [vmem:[#allocation2 + $0x1a] sm:$0xf]  ;;  %1417 = vst [vmem:[#allocation3 + $0xc] sm:$0x3] %v1416_v4  ;;  %v1427_v17 = vpack.c.bf16 %v1426_v10, %v1426_v10 }
 0x16e   : > { %v1423_v16 = vrot.slane %v2711_v5, 6  ;;  %v1429_v18 = vld [vmem:[#allocation2 + $0x20] sm:$0xf]  ;;  %v1511_v19 = vrot.slane %v2719_v53, 6  ;;  %1403 = vst [vmem:[#allocation3 + $0x8] sm:$0xc] %v1401_v9  ;;  %v2710_v20 = vpack.c.bf16 %v1407_v15, %v1407_v15 }
 0x16f   : > { %v2712_v21 = vpack.c.bf16 %v1429_v18, %v1429_v18  ;;  %1458 = vst [vmem:[#allocation3 + $0x34] sm:$0xc] %v1456_v11  ;;  %1461 = vst [vmem:[#allocation3 + $0x14] sm:$0x3] %v1460_v12  ;;  %v1467_v22 = vrot.slane %v2715_v13, 6  ;;  %v1368_v25 = vrot.slane %v2706_v14, 6 }
 0x170   : > { %v1470_v23 = vld [vmem:[#allocation2 + $0x1a] sm:$0xf]  ;;  %v1473_v24 = vld [vmem:[#allocation2 + $0x22] sm:$0xf]  ;;  %1425 = vst [vmem:[#allocation3 + $0xc] sm:$0xc] %v1423_v16 }
 0x171   : > { %1428 = vst [vmem:[#allocation3 + $0x30] sm:$0x3] %v1427_v17  ;;  %v1471_v26 = vpack.c.bf16 %v1470_v23, %v1470_v23  ;;  %v2716_v27 = vpack.c.bf16 %v1473_v24, %v1473_v24  ;;  %v1481_v28 = vld [vmem:[#allocation2 + $0x10] sm:$0xf]  ;;  %v1484_v29 = vld [vmem:[#allocation2 + $0x18] sm:$0xf] }
 0x172   : > { %1513 = vst [vmem:[#allocation3 + $0x1c] sm:$0xc] %v1511_v19  ;;  %v1412_v30 = vrot.slane %v2710_v20, 6  ;;  %v1434_v31 = vrot.slane %v2712_v21, 6  ;;  %1469 = vst [vmem:[#allocation3 + $0x14] sm:$0xc] %v1467_v22  ;;  %v1482_v32 = vpack.c.bf16 %v1481_v28, %v1481_v28  ;;  %v2717_v33 = vpack.c.bf16 %v1484_v29, %v1484_v29 }
 0x173   : > { %v1492_v34 = vld [vmem:[#allocation2 + $0x20] sm:$0xf]  ;;  %v1495_v35 = vld [vmem:[#allocation2 + $0x28] sm:$0xf]  ;;  %1370 = vst [vmem:[#allocation3 + $0x24] sm:$0xc] %v1368_v25 }
 0x174   : > { %1472 = vst [vmem:[#allocation3 + $0x38] sm:$0x3] %v1471_v26  ;;  %v1478_v36 = vrot.slane %v2716_v27, 6  ;;  %v1493_v37 = vpack.c.bf16 %v1492_v34, %v1492_v34  ;;  %v2718_v38 = vpack.c.bf16 %v1495_v35, %v1495_v35  ;;  %v1517_v39 = vld [vmem:[#allocation2 + $0x29] sm:$0xf]  ;;  %v1489_v41 = vrot.slane %v2717_v33, 6 }
 0x175   : > { %v1525_v40 = vld [vmem:[#allocation2 + $0x12] sm:$0xf]  ;;  %1414 = vst [vmem:[#allocation3 + $0x2c] sm:$0xc] %v1412_v30  ;;  %1436 = vst [vmem:[#allocation3 + $0x30] sm:$0xc] %v1434_v31  ;;  %v2720_v42 = vpack.c.bf16 %v1517_v39, %v1517_v39 }
 0x176   : > { %1483 = vst [vmem:[#allocation3 + $0x18] sm:$0x3] %v1482_v32  ;;  %v1526_v43 = vpack.c.bf16 %v1525_v40, %v1525_v40  ;;  %v1528_v44 = vld [vmem:[#allocation2 + $0x1a] sm:$0xf]  ;;  %v1536_v46 = vld [vmem:[#allocation2 + $0x22] sm:$0xf] }
 0x177   : > { %1480 = vst [vmem:[#allocation3 + $0x38] sm:$0xc] %v1478_v36  ;;  %1494 = vst [vmem:[#allocation3 + $0x3c] sm:$0x3] %v1493_v37  ;;  %v1500_v47 = vrot.slane %v2718_v38, 6  ;;  %v2721_v48 = vpack.c.bf16 %v1528_v44, %v1528_v44  ;;  %v1537_v49 = vpack.c.bf16 %v1536_v46, %v1536_v46  ;;  %v1522_v51 = vrot.slane %v2720_v42, 6 }
 0x178   : > { %v1539_v50 = vld [vmem:[#allocation2 + $0x2a] sm:$0xf]  ;;  %1491 = vst [vmem:[#allocation3 + $0x18] sm:$0xc] %v1489_v41  ;;  %1527 = vst [vmem:[#allocation3 + $0x20] sm:$0x3] %v1526_v43 }
 0x179   : > { %v2722_v52 = vpack.c.bf16 %v1539_v50, %v1539_v50  ;;  %1502 = vst [vmem:[#allocation3 + $0x3c] sm:$0xc] %v1500_v47  ;;  %v1533_v53 = vrot.slane %v2721_v48, 6  ;;  %1538 = vst [vmem:[#allocation3 + $0x44] sm:$0x3] %v1537_v49  ;;  %v3103_v55 = vld [vmem:[%s3685_s3 + $0x138] sm:$0xff]  }
 0x17a   : > { %1524 = vst [vmem:[#allocation3 + $0x40] sm:$0xc] %v1522_v51  ;;  %v3104_v56 = vld [vmem:[%s3685_s3 + $0x1b8] sm:$0xff]   ;;  %v3095_v57 = vld [vmem:[#allocation3] ss:$36 sps:$4 sm:$0xff]   ;;  %v3115_v3 = vld [vmem:[%s3685_s3 + $0x168] sm:$0xff]  }
 0x17b   : > { %v1544_v54 = vrot.slane %v2722_v52, 6  ;;  %1535 = vst [vmem:[#allocation3 + $0x20] sm:$0xc] %v1533_v53  ;;  %v3097_v58 = vld [vmem:[#allocation3 + $0x4] ss:$36 sps:$4 sm:$0xff]   ;;  %v3116_v4 = vld [vmem:[%s3685_s3 + $0x1e8] sm:$0xff]  }
 0x17c   : > { %v3098_v59 = vld [vmem:[#allocation3 + $0x8] ss:$36 sps:$4 sm:$0xff]   ;;  %2218 = vmatprep.mubr.bf16.mxu1 %v3097_v58  ;;  %v3111_v61 = vld [vmem:[%s3685_s3 + $0x170] sm:$0xff]   ;;  %v3117_v5 = vld [vmem:[%s3685_s3 + $0x128] sm:$0xff]  }
 0x17d   : > { %1546 = vst [vmem:[#allocation3 + $0x44] sm:$0xc] %v1544_v54  ;;  %v3100_v60 = vld [vmem:[#allocation3 + $0xc] ss:$36 sps:$4 sm:$0xff]   ;;  %v3112_v62 = vld [vmem:[%s3685_s3 + $0x1f0] sm:$0xff]   ;;  %2219 = vmatmul.mubr.bf16.vlgmr.msra.gmra.mxu1 %v3095_v57  ;;  %v3118_v6 = vld [vmem:[%s3685_s3 + $0x1a8] sm:$0xff]  }
 0x17e   : > { %2259 = vmatprep.mubr.bf16.mxu0 %v3100_v60  ;;  %v3107_v63 = vld [vmem:[#allocation3 + $0x14] ss:$36 sps:$4 sm:$0xff]   ;;  %2876 = vmatpush3.bf16.msra.mxu1 %v3103_v55  ;;  %v3113_v0 = vld [vmem:[%s3685_s3 + $0x130] sm:$0xff]   ;;  %v3123_v11 = vld [vmem:[%s3685_s3 + $0x158] sm:$0xff]  }
 0x17f   : > { %2260 = vmatmul.mubr.bf16.vlgmr.msra.gmra.mxu0 %v3098_v59  ;;  %v3114_v1 = vld [vmem:[%s3685_s3 + $0x1b0] sm:$0xff]   ;;  %2300 = vmatprep.mubr.bf16.mxu1 %v3107_v63  ;;  %v3119_v7 = vld [vmem:[%s3685_s3 + $0x160] sm:$0xff]   ;;  %v3124_v12 = vld [vmem:[%s3685_s3 + $0x1d8] sm:$0xff]  }
 0x180   : > { %2898 = vmatpush3.bf16.msra.mxu0 %v3104_v56  ;;  %2877 = vmatprep.subr.bf16.mxu1 %v3111_v61  ;;  %v3120_v8 = vld [vmem:[%s3685_s3 + $0x1e0] sm:$0xff]   ;;  %v3125_v13 = vld [vmem:[%s3685_s3 + $0x118] sm:$0xff]   ;;  %v3127_v15 = vld [vmem:[%s3685_s3 + $0x150] sm:$0xff]  }
 0x181   : > { %v3110_v2 = vld [vmem:[#allocation3 + $0x1c] ss:$36 sps:$4 sm:$0xff]   ;;  %2899 = vmatprep.subr.bf16.mxu0 %v3112_v62  ;;  %v3121_v9 = vld [vmem:[%s3685_s3 + $0x120] sm:$0xff]   ;;  %v3126_v14 = vld [vmem:[%s3685_s3 + $0x198] sm:$0xff]  }
 0x182   : > { %2341 = vmatprep.mubr.bf16.mxu0 %v3110_v2  ;;  %2878 = vmatpush3.bf16.msra.mxu1 %v3113_v0  ;;  %v3122_v10 = vld [vmem:[%s3685_s3 + $0x1a0] sm:$0xff]   ;;  %v3128_v16 = vld [vmem:[%s3685_s3 + $0x1d0] sm:$0xff]   ;;  %v3131_v19 = vld [vmem:[%s3685_s3 + $0x148] sm:$0xff]  }
 0x183   : > { %2879 = vmatprep.subr.bf16.mxu1 %v3115_v3  ;;  %v3129_v17 = vld [vmem:[%s3685_s3 + $0x110] sm:$0xff]   ;;  %v3132_v20 = vld [vmem:[%s3685_s3 + $0x1c8] sm:$0xff]   ;;  %v3135_v23 = vld [vmem:[%s3685_s3 + $0x140] sm:$0xff]  }
 0x184   : > { %2900 = vmatpush3.bf16.msra.mxu0 %v3114_v1  ;;  %v3130_v18 = vld [vmem:[%s3685_s3 + $0x190] sm:$0xff]   ;;  %v3133_v21 = vld [vmem:[%s3685_s3 + $0x108] sm:$0xff]   ;;  %v3136_v24 = vld [vmem:[%s3685_s3 + $0x1c0] sm:$0xff]  }
 0x185   : > { %2901 = vmatprep.subr.bf16.mxu0 %v3116_v4  ;;  %v3134_v22 = vld [vmem:[%s3685_s3 + $0x188] sm:$0xff]   ;;  %v3137_v25 = vld [vmem:[%s3685_s3 + $0x100] sm:$0xff]   ;;  %v3139_v27 = vld [vmem:[%s3685_s3 + $0x238] sm:$0xff]  }
 0x186   : > { %2880 = vmatpush3.bf16.msra.mxu1 %v3117_v5  ;;  %v3138_v26 = vld [vmem:[%s3685_s3 + $0x180] sm:$0xff]   ;;  %v3108_v29 = vld [vmem:[#allocation3 + $0x18] ss:$36 sps:$4 sm:$0xff]   ;;  %v3140_v30 = vld [vmem:[%s3685_s3 + $0x230] sm:$0xff]  }
 0x187   : > { %2881 = vmatprep.subr.bf16.mxu1 %v3119_v7  ;;  %v3105_v28 = vld [vmem:[#allocation3 + $0x10] ss:$36 sps:$4 sm:$0xff]   ;;  %v3141_v31 = vld [vmem:[%s3685_s3 + $0x228] sm:$0xff]   ;;  %v3143_v33 = vld [vmem:[%s3685_s3 + $0x218] sm:$0xff]  }
 0x188   : > { %2902 = vmatpush3.bf16.msra.mxu0 %v3118_v6  ;;  %v3142_v32 = vld [vmem:[%s3685_s3 + $0x220] sm:$0xff]   ;;  %v3144_v34 = vld [vmem:[%s3685_s3 + $0x210] sm:$0xff]   ;;  %v3145_v35 = vld [vmem:[%s3685_s3 + $0x208] sm:$0xff]  }
 0x189   : > { %2903 = vmatprep.subr.bf16.mxu0 %v3120_v8  ;;  %v3146_v36 = vld [vmem:[%s3685_s3 + $0x200] sm:$0xff]   ;;  %v3147_v37 = vld [vmem:[#allocation3 + $0x20] ss:$36 sps:$4 sm:$0xff]  }
 0x18a   : > { %2882 = vmatpush3.bf16.msra.mxu1 %v3121_v9  ;;  %v2597_v50 = vld [vmem:[%s3686_s4] ss:$0 sm:$0xff] }
 0x18b   : > { %2883 = vmatprep.subr.bf16.mxu1 %v3123_v11 }
 0x18c   : > { %2904 = vmatpush3.bf16.msra.mxu0 %v3122_v10 }
 0x18d   : > { %2905 = vmatprep.subr.bf16.mxu0 %v3124_v12 }
 0x18e   : > { %2884 = vmatpush3.bf16.msra.mxu1 %v3125_v13 }
 0x18f   : > { %2885 = vmatprep.subr.bf16.mxu1 %v3127_v15 }
 0x190   : > { %2906 = vmatpush3.bf16.msra.mxu0 %v3126_v14 }
 0x191   : > { %2907 = vmatprep.subr.bf16.mxu0 %v3128_v16 }
 0x192   : > { %2886 = vmatpush3.bf16.msra.mxu1 %v3129_v17 }
 0x193   : > { %2887 = vmatprep.subr.bf16.mxu1 %v3131_v19 }
 0x194   : > { %2908 = vmatpush3.bf16.msra.mxu0 %v3130_v18 }
 0x195   : > { %2909 = vmatprep.subr.bf16.mxu0 %v3132_v20 }
 0x196   : > { %2888 = vmatpush3.bf16.msra.mxu1 %v3133_v21 }
 0x197   : > { %2889 = vmatprep.subr.bf16.mxu1 %v3135_v23 }
 0x198   : > { %2910 = vmatpush3.bf16.msra.mxu0 %v3134_v22 }
 0x199   : > { %2911 = vmatprep.subr.bf16.mxu0 %v3136_v24 }
 0x19a   : > { %2890 = vmatpush3.bf16.msra.mxu1 %v3137_v25 }
 0x19b   : > { %2948 = vmatprep.subr.bf16.mxu1 %v3164_v45 }
 0x19c   : > { %2912 = vmatpush3.bf16.msra.mxu0 %v3138_v26 }
 0x19d   : > { %2301 = vmatmul.mubr.bf16.vlgmr.msra.gmra.mxu1 %v3105_v28 }
 0x19e   : > { %2949 = vmatpush3.bf16.msra.mxu1 %v3139_v27  ;;  %2964 = vmatprep.mubr.msk.bf16.mxu1 %vm3165_vm0, %v3164_v45 }
 0x19f   : > { %2342 = vmatmul.mubr.bf16.vlgmr.msra.gmra.mxu0 %v3108_v29  ;;  %2950 = vmatprep.subr.bf16.mxu1 %v3164_v45 }
 0x1a2   : > { %2951 = vmatpush3.bf16.msra.mxu1 %v3140_v30 }
 0x1a3   : > { %2952 = vmatprep.subr.bf16.mxu1 %v3164_v45 }
 0x1a6   : > { %2953 = vmatpush3.bf16.msra.mxu1 %v3141_v31 }
 0x1a7   : > { %2954 = vmatprep.subr.bf16.mxu1 %v3164_v45 }
 0x1aa   : > { %2955 = vmatpush3.bf16.msra.mxu1 %v3142_v32 }
 0x1ab   : > { %2956 = vmatprep.subr.bf16.mxu1 %v3164_v45 }
 0x1ae   : > { %2957 = vmatpush3.bf16.msra.mxu1 %v3143_v33 }
 0x1af   : > { %2958 = vmatprep.subr.bf16.mxu1 %v3164_v45 }
 0x1b2   : > { %2959 = vmatpush3.bf16.msra.mxu1 %v3144_v34 }
 0x1b3   : > { %2960 = vmatprep.subr.bf16.mxu1 %v3164_v45 }
 0x1b6   : > { %2961 = vmatpush3.bf16.msra.mxu1 %v3145_v35 }
 0x1b7   : > { %2962 = vmatprep.subr.bf16.mxu1 %v3164_v45 }
 0x1ba   : > { %2963 = vmatpush3.bf16.msra.mxu1 %v3146_v36 }
 0x1bd   : > { %2965 = vmatmul.mubr.bf16.vlgmr.msra.gmra.mxu1 %v3147_v37 }
 0x23d   : > { %v2847_v38 = vpop.f32.mrf.mxu1 }
 0x23f   : > { %v2848_v39 = vpop.f32.mrf.mxu1  ;;  %v2869_v40 = vpop.f32.mrf.mxu0 }
 0x240   : > { %v2849_v49 = vadd.f32 %v2848_v39, %v2847_v38 }
 0x241   : > { %v2850_v41 = vpop.f32.mrf.mxu1  ;;  %v2870_v42 = vpop.f32.mrf.mxu0 }
 0x242   : > { %v2221_v52 = vadd.f32 %v2849_v49, %v2597_v50  ;;  %v2871_v55 = vadd.f32 %v2870_v42, %v2869_v40 }
 0x243   : > { %v2851_v43 = vpop.f32.mrf.mxu1  ;;  %v2872_v44 = vpop.f32.mrf.mxu0 }
 0x244   : > { %v2852_v53 = vadd.f32 %v2851_v43, %v2850_v41  ;;  %v2262_v58 = vadd.f32 %v2871_v55, %v2221_v52 }
 0x245   : > { %v2873_v47 = vpop.f32.mrf.mxu0 }
 0x246   : > { %v2224_v59 = vadd.f32 %v2852_v53, %v2597_v50  ;;  %v2874_v61 = vadd.f32 %v2873_v47, %v2872_v44 }
 0x248   : > { %v2265_v0 = vadd.f32 %v2874_v61, %v2224_v59 }
 0x25d   : > { %v2891_v46 = vpop.f32.mrf.mxu1 }
 0x25f   : > { %v2892_v48 = vpop.f32.mrf.mxu1  ;;  %v2913_v51 = vpop.f32.mrf.mxu0 }
 0x260   : > { %v2893_v56 = vadd.f32 %v2892_v48, %v2891_v46 }
 0x261   : > { %v2894_v45 = vpop.f32.mrf.mxu1  ;;  %v2914_v54 = vpop.f32.mrf.mxu0 }
 0x262   : > { %v2303_v62 = vadd.f32 %v2893_v56, %v2262_v58  ;;  %v2915_v1 = vadd.f32 %v2914_v54, %v2913_v51 }
 0x263   : > { %v2895_v57 = vpop.f32.mrf.mxu1  ;;  %v2916_v60 = vpop.f32.mrf.mxu0 }
 0x264   : > { %v2896_v63 = vadd.f32 %v2895_v57, %v2894_v45  ;;  %v2344_v4 = vadd.f32 %v2915_v1, %v2303_v62 }
 0x265   : > { %v2917_v2 = vpop.f32.mrf.mxu0 }
 0x266   : > { %v2306_v3 = vadd.f32 %v2896_v63, %v2265_v0  ;;  %v2918_v6 = vadd.f32 %v2917_v2, %v2916_v60 }
 0x268   : > { %v2347_v10 = vadd.f32 %v2918_v6, %v2306_v3 }
 0x27d   : > { %v2384_v5 = vpop.f32.mrf.mxu1 }
 0x27e   : > { %v2385_v7 = vadd.f32 %v2384_v5, %v2344_v4 }
 0x27f   : > { %v2966_v8 = vpop.f32.mrf.mxu1 }
 0x280   : > { %v2393_v9 = vmin.f32 %v2385_v7, 0.0  ;;  %vm2391_vm3 = vcmp.gt.f32.partialorder %v2385_v7, 0.0 }
 0x281   : > { %v2387_v11 = vpop.f32.mrf.mxu1 }
 0x282   : > { %v2395_v12 = vmul.f32 1.442695, %v2393_v9  ;;  %v2388_v13 = vadd.f32 %v2387_v11, %v2347_v10 }
 0x283   : > { %v2967_v14 = vpop.f32.mrf.mxu1 }
 0x284   : > { %3152 = vpow2.f32 %v2395_v12  ;;  %v2394_v15 = vmin.f32 %v2388_v13, 0.0  ;;  %vm2392_vm4 = vcmp.gt.f32.partialorder %v2388_v13, 0.0 }
 0x286   : > { %v2397_v16 = vmul.f32 1.442695, %v2394_v15 }
 0x288   : > { %3154 = vpow2.f32 %v2397_v16 }
 0x291   : > { %v3153_v17 = vpop.eup %3152 }
 0x292   : > { %v2679_v18 = vadd.f32 -1.0, %v3153_v17 }
 0x294   : > { %v2401_v21 = vsel %vm2391_vm3, %v2385_v7, %v2679_v18 }
 0x295   : > { %v3155_v19 = vpop.eup %3154 }
 0x296   : > { %v2680_v20 = vadd.f32 -1.0, %v3155_v19 }
 0x298   : > { %v2402_v22 = vsel %vm2392_vm4, %v2388_v13, %v2680_v20 }
 0x299   : > { %v2732_v23 = vpack.c.bf16 %v2402_v22, %v2401_v21 }
 0x29b   : > { %2733 = vst [vmem:[%s224_s30] sm:$0xff] %v2732_v23  }
 0x29c PF: > { %s15_s18 = sadd.s32 1, %s3162_s18  }
 0x29d   : > { %p12_p4 = scmp.ge.s32.totalorder %s15_s18, 4  }
 0x29f   :  { %14 = sbr.rel (!%p12_p4) target bundleno = 1 (0x1), region = 75 }

</bundles_post_ra>
